<compile_context>
chip_gen: v6e
topology: v6e:2x2x1
jax: 0.10.0
libtpu: 0.0.40
codegen_flags: <defaults>
</compile_context>

<pallas_src>
import functools
import math

import jax
import jax.numpy as jnp
from jax.experimental import pallas as pl
from jax.experimental.pallas import tpu as pltpu

LANES = 128                      # channel padding target (TPU lane width)
N_CLASSES = 4
_VMEM_LIMIT = 32 * 1024 * 1024   # explicit scoped-VMEM budget (fits v5e/v6e/v7x)
_VMEM_SPEC = pl.BlockSpec(memory_space=pltpu.MemorySpace.VMEM)


def _cost(flops, transcendentals, operands, out_shape, out_dtype):
    bytes_accessed = int(sum(a.size * a.dtype.itemsize for a in operands)
                         + math.prod(out_shape) * jnp.dtype(out_dtype).itemsize)
    return pl.CostEstimate(flops=int(flops), transcendentals=int(transcendentals),
                           bytes_accessed=bytes_accessed)


# ----------------------------------------------------------------------------
# Kernel 1: matmul + bias + activation (stem conv via im2col), M-tiled grid
# ----------------------------------------------------------------------------
def _matmul_bias_act_kernel(x_ref, w_ref, b_ref, o_ref, *, act):
    y = jnp.dot(x_ref[...], w_ref[...], preferred_element_type=jnp.float32)
    y = y + b_ref[...]
    if act == "swish":
        y = y * jax.nn.sigmoid(y)
    elif act == "sigmoid":
        y = jax.nn.sigmoid(y)
    o_ref[...] = y.astype(o_ref.dtype)


def matmul_bias_act(x, w, b, act="linear", block_m=512):
    m, k = x.shape
    n = w.shape[1]
    bm = min(block_m, m)
    mp = pl.cdiv(m, bm) * bm               # pad M to a tile multiple (no hard assert)
    if mp != m:
        x = jnp.pad(x, ((0, mp - m), (0, 0)))
    b2d = b.reshape(1, n)
    out = pl.pallas_call(
        functools.partial(_matmul_bias_act_kernel, act=act),
        grid=(mp // bm,),
        in_specs=[pl.BlockSpec((bm, k), lambda i: (i, 0)),
                  pl.BlockSpec((k, n), lambda i: (0, 0)),
                  pl.BlockSpec((1, n), lambda i: (0, 0))],
        out_specs=pl.BlockSpec((bm, n), lambda i: (i, 0)),
        out_shape=jax.ShapeDtypeStruct((mp, n), jnp.bfloat16),
        compiler_params=pltpu.CompilerParams(
            dimension_semantics=("parallel",), vmem_limit_bytes=_VMEM_LIMIT),
        cost_estimate=_cost(2 * mp * k * n, mp * n if act != "linear" else 0,
                            (x, w, b2d), (mp, n), jnp.bfloat16),
    )(x, w, b2d)
    return out if mp == m else out[:m]


# ----------------------------------------------------------------------------
# Shared in-kernel SE + project helper (per-image GAP, SE FCs batched over images)
# ----------------------------------------------------------------------------
def _se_project_core(hdn, s1w, s1b, s2w, s2b, pw, pb):
    """hdn: (n, h, w, ce) f32 -> (n, h, w, cout) f32 (project is linear)."""
    n, h, w, ce = hdn.shape
    flat = hdn.reshape(n, h * w, ce)
    sq = jnp.mean(flat, axis=1)                                     # (n, ce) per-image GAP
    se = jnp.dot(sq.astype(jnp.bfloat16), s1w,
                 preferred_element_type=jnp.float32) + s1b          # SE FC1, M = n
    se = se * jax.nn.sigmoid(se)                                    # swish
    se = jnp.dot(se.astype(jnp.bfloat16), s2w,
                 preferred_element_type=jnp.float32) + s2b          # SE FC2, M = n
    se = jax.nn.sigmoid(se)                                         # (n, ce)
    scaled = (flat * se.reshape(n, 1, ce)).astype(jnp.bfloat16)     # excite
    y = jnp.dot(scaled.reshape(n * h * w, ce), pw,
                preferred_element_type=jnp.float32) + pb            # project 1x1
    return y.reshape(n, h, w, pw.shape[-1])


# ----------------------------------------------------------------------------
# Kernel 2: fully fused MBConv, stride 1
#   [expand 1x1 + swish + dw3x3 + swish + SE + project + residual], whole batch at once
# ----------------------------------------------------------------------------
def _mbconv_s1_kernel(*refs, has_expand, has_residual):
    if has_expand:
        (x_ref, ew_ref, eb_ref, dw_ref, db_ref, s1w_ref, s1b_ref,
         s2w_ref, s2b_ref, pw_ref, pb_ref, o_ref, pad_sc) = refs
    else:
        (x_ref, dw_ref, db_ref, s1w_ref, s1b_ref,
         s2w_ref, s2b_ref, pw_ref, pb_ref, o_ref, pad_sc) = refs
    n, h, w, cin = x_ref.shape
    ce = dw_ref.shape[-1]

    # ---- expand 1x1 + bias + swish (one batched matmul, M = n*h*w) ----
    if has_expand:
        e = jnp.dot(x_ref[...].reshape(n * h * w, cin), ew_ref[...],
                    preferred_element_type=jnp.float32) + eb_ref[...]
        e = e * jax.nn.sigmoid(e)
        hid_store = e.astype(pad_sc.dtype).reshape(n, h, w, ce)
    else:
        hid_store = x_ref[...]                                      # already bf16

    # ---- zero only the 1-wide border strips; interior fully overwritten ----
    pad_sc[:, 0:1, :, :] = jnp.zeros((n, 1, w + 2, ce), pad_sc.dtype)
    pad_sc[:, h + 1:h + 2, :, :] = jnp.zeros((n, 1, w + 2, ce), pad_sc.dtype)
    pad_sc[:, 1:h + 1, 0:1, :] = jnp.zeros((n, h, 1, ce), pad_sc.dtype)
    pad_sc[:, 1:h + 1, w + 1:w + 2, :] = jnp.zeros((n, h, 1, ce), pad_sc.dtype)
    pad_sc[:, 1:h + 1, 1:w + 1, :] = hid_store

    # ---- depthwise 3x3 stride 1 (bf16 taps, f32 accumulation) + bias + swish ----
    dw = dw_ref[...]                                                # (3, 3, ce) f32
    acc = jnp.zeros((n, h, w, ce), jnp.float32)
    for dy in range(3):
        for dx in range(3):
            acc = acc + pad_sc[:, dy:dy + h, dx:dx + w, :].astype(jnp.float32) * dw[dy, dx, :]
    hdn = acc + db_ref[...].reshape(1, 1, 1, ce)
    hdn = hdn * jax.nn.sigmoid(hdn)

    # ---- SE + project + residual ----
    y = _se_project_core(hdn, s1w_ref[...], s1b_ref[...], s2w_ref[...],
                         s2b_ref[...], pw_ref[...], pb_ref[...])
    if has_residual:
        y = y + x_ref[...].astype(jnp.float32)
    o_ref[...] = y.astype(o_ref.dtype)


def mbconv_s1(x, p, has_residual):
    n, h, w, cin = x.shape
    ce = p["dw_w"].shape[-1]
    cout = p["proj_w"].shape[-1]
    has_expand = p["exp_w"] is not None

    args = [x]
    flops = 18 * n * h * w * ce + 2 * n * h * w * ce * cout
    if has_expand:
        args += [p["exp_w"], p["exp_b"].reshape(1, ce)]
        flops += 2 * n * h * w * cin * ce
    args += [p["dw_w"], p["dw_b"].reshape(1, ce),
             p["se1_w"], p["se1_b"].reshape(1, -1),
             p["se2_w"], p["se2_b"].reshape(1, ce),
             p["proj_w"], p["proj_b"].reshape(1, cout)]
    flops += 2 * n * (p["se1_w"].size + p["se2_w"].size)
    trans = 3 * n * h * w * ce + 2 * n * ce

    return pl.pallas_call(
        functools.partial(_mbconv_s1_kernel, has_expand=has_expand,
                          has_residual=has_residual),
        out_shape=jax.ShapeDtypeStruct((n, h, w, cout), jnp.bfloat16),
        in_specs=[_VMEM_SPEC] * len(args),
        out_specs=_VMEM_SPEC,
        scratch_shapes=[pltpu.VMEM((n, h + 2, w + 2, ce), jnp.bfloat16)],
        compiler_params=pltpu.CompilerParams(vmem_limit_bytes=_VMEM_LIMIT),
        cost_estimate=_cost(flops, trans, tuple(args), (n, h, w, cout), jnp.bfloat16),
    )(*args)


# ----------------------------------------------------------------------------
# Kernel 2': fully fused MBConv, stride 2 (parity-phase depthwise, no residual)
#   All four parity expands are one matmul (M = 4*n*ho*wo); contiguous taps only.
# ----------------------------------------------------------------------------
def _mbconv_s2_kernel(xp_ref, ew_ref, eb_ref, dw_ref, db_ref,
                      s1w_ref, s1b_ref, s2w_ref, s2b_ref, pw_ref, pb_ref,
                      o_ref, ee_sc, eo_sc, oe_sc):
    n4, ho, wo, cin = xp_ref.shape
    n = n4 // 4
    ce = dw_ref.shape[-1]

    # ---- ONE expand matmul over all four stacked parity phases ----
    e = jnp.dot(xp_ref[...].reshape(n4 * ho * wo, cin), ew_ref[...],
                preferred_element_type=jnp.float32) + eb_ref[...]
    e = e * jax.nn.sigmoid(e)
    e = e.astype(jnp.bfloat16).reshape(n4, ho, wo, ce)
    e_oo = e[0:n]          # expand(x[1::2, 1::2])
    e_oe = e[n:2 * n]      # expand(x[1::2, 0::2])
    e_eo = e[2 * n:3 * n]  # expand(x[0::2, 1::2])
    e_ee = e[3 * n:4 * n]  # expand(x[0::2, 0::2])

    # Parity phases of the zero-padded expanded activation Epad (pad = 1):
    #   EE[r,c]=Epad[2r,2c]  EO[r,c]=Epad[2r,2c+1]  OE[r,c]=Epad[2r+1,2c]  OO[r,c]=Epad[2r+1,2c+1]
    # Only the border strips that are actually read get zeroed; OO needs no scratch.
    ee_sc[:, 0:1, :, :] = jnp.zeros((n, 1, wo + 1, ce), ee_sc.dtype)
    ee_sc[:, 1:ho + 1, 0:1, :] = jnp.zeros((n, ho, 1, ce), ee_sc.dtype)
    ee_sc[:, 1:ho + 1, 1:wo + 1, :] = e_oo
    eo_sc[:, 0:1, :, :] = jnp.zeros((n, 1, wo, ce), eo_sc.dtype)
    eo_sc[:, 1:ho + 1, :, :] = e_oe
    oe_sc[:, :, 0:1, :] = jnp.zeros((n, ho, 1, ce), oe_sc.dtype)
    oe_sc[:, :, 1:wo + 1, :] = e_eo

    # out(i,j) = sum_{dy,dx} Epad[2i+dy, 2j+dx] * w[dy,dx]   (contiguous slices only)
    dw = dw_ref[...]                                                # (3, 3, ce) f32
    f32 = jnp.float32
    acc = ee_sc[:, 0:ho, 0:wo, :].astype(f32) * dw[0, 0, :]
    acc = acc + eo_sc[:, 0:ho, :, :].astype(f32) * dw[0, 1, :]
    acc = acc + ee_sc[:, 0:ho, 1:wo + 1, :].astype(f32) * dw[0, 2, :]
    acc = acc + oe_sc[:, :, 0:wo, :].astype(f32) * dw[1, 0, :]
    acc = acc + e_ee.astype(f32) * dw[1, 1, :]
    acc = acc + oe_sc[:, :, 1:wo + 1, :].astype(f32) * dw[1, 2, :]
    acc = acc + ee_sc[:, 1:ho + 1, 0:wo, :].astype(f32) * dw[2, 0, :]
    acc = acc + eo_sc[:, 1:ho + 1, :, :].astype(f32) * dw[2, 1, :]
    acc = acc + ee_sc[:, 1:ho + 1, 1:wo + 1, :].astype(f32) * dw[2, 2, :]
    hdn = acc + db_ref[...].reshape(1, 1, 1, ce)
    hdn = hdn * jax.nn.sigmoid(hdn)

    # ---- SE + project (no residual for the stride-2 block) ----
    y = _se_project_core(hdn, s1w_ref[...], s1b_ref[...], s2w_ref[...],
                         s2b_ref[...], pw_ref[...], pb_ref[...])
    o_ref[...] = y.astype(o_ref.dtype)


def mbconv_s2(x, p):
    n, h, w, cin = x.shape
    ho, wo = h // 2, w // 2
    ce = p["dw_w"].shape[-1]
    cout = p["proj_w"].shape[-1]

    # spatial parity split of the (pre-expand) block input -- cheap JAX glue
    xp = jnp.concatenate([x[:, 1::2, 1::2, :], x[:, 1::2, 0::2, :],
                          x[:, 0::2, 1::2, :], x[:, 0::2, 0::2, :]], axis=0)

    args = (xp, p["exp_w"], p["exp_b"].reshape(1, ce),
            p["dw_w"], p["dw_b"].reshape(1, ce),
            p["se1_w"], p["se1_b"].reshape(1, -1),
            p["se2_w"], p["se2_b"].reshape(1, ce),
            p["proj_w"], p["proj_b"].reshape(1, cout))
    flops = (2 * n * h * w * cin * ce + 18 * n * ho * wo * ce
             + 2 * n * (p["se1_w"].size + p["se2_w"].size)
             + 2 * n * ho * wo * ce * cout)
    trans = n * h * w * ce + 2 * n * ho * wo * ce + 2 * n * ce

    return pl.pallas_call(
        _mbconv_s2_kernel,
        out_shape=jax.ShapeDtypeStruct((n, ho, wo, cout), jnp.bfloat16),
        in_specs=[_VMEM_SPEC] * len(args),
        out_specs=_VMEM_SPEC,
        scratch_shapes=[pltpu.VMEM((n, ho + 1, wo + 1, ce), jnp.bfloat16),
                        pltpu.VMEM((n, ho + 1, wo, ce), jnp.bfloat16),
                        pltpu.VMEM((n, ho, wo + 1, ce), jnp.bfloat16)],
        compiler_params=pltpu.CompilerParams(vmem_limit_bytes=_VMEM_LIMIT),
        cost_estimate=_cost(flops, trans, args, (n, ho, wo, cout), jnp.bfloat16),
    )(*args)


# ----------------------------------------------------------------------------
# Kernel 3: fused [head 1x1 + swish + global-avg-pool + classifier + sigmoid(4)]
# ----------------------------------------------------------------------------
def _head_pool_fc_kernel(x_ref, hw_ref, hb_ref, fw_ref, fb_ref, o_ref):
    n, hh, wh, c = x_ref.shape
    ch = hw_ref.shape[-1]
    ncls = o_ref.shape[-1]
    y = jnp.dot(x_ref[...].reshape(n * hh * wh, c), hw_ref[...],
                preferred_element_type=jnp.float32) + hb_ref[...]
    y = y * jax.nn.sigmoid(y)                                     # head swish
    pooled = jnp.mean(y.reshape(n, hh * wh, ch), axis=1)          # global avg pool
    logits = jnp.dot(pooled.astype(jnp.bfloat16), fw_ref[...],
                     preferred_element_type=jnp.float32) + fb_ref[...]
    # sigmoid + store only the real classes (padded columns never leave the kernel)
    o_ref[...] = jax.nn.sigmoid(logits[:, :ncls]).astype(o_ref.dtype)


def head_pool_classify(h, head_w, head_b, fc_w, fc_b):
    n, hh, wh, c = h.shape
    ch = head_w.shape[-1]
    args = (h, head_w, head_b.reshape(1, ch), fc_w, fc_b.reshape(1, -1))
    flops = 2 * n * hh * wh * c * ch + 2 * n * ch * fc_w.shape[-1]
    return pl.pallas_call(
        _head_pool_fc_kernel,
        out_shape=jax.ShapeDtypeStruct((n, N_CLASSES), jnp.float32),
        in_specs=[_VMEM_SPEC] * 5,
        out_specs=_VMEM_SPEC,
        compiler_params=pltpu.CompilerParams(vmem_limit_bytes=_VMEM_LIMIT),
        cost_estimate=_cost(flops, n * hh * wh * ch + n * N_CLASSES, args,
                            (n, N_CLASSES), jnp.float32),
    )(*args)


# ----------------------------------------------------------------------------
# Plain-JAX glue
# ----------------------------------------------------------------------------
def im2col(x, kh, kw, stride, pad):
    """x: (N, H, W, C) NHWC (bf16) -> (N*Ho*Wo, kh*kw*C) patches."""
    n, h, w, c = x.shape
    xp = jnp.pad(x, ((0, 0), (pad, pad), (pad, pad), (0, 0)))
    ho = (h + 2 * pad - kh) // stride + 1
    wo = (w + 2 * pad - kw) // stride + 1
    cols = []
    for dy in range(kh):
        for dx in range(kw):
            cols.append(xp[:, dy:dy + stride * ho:stride, dx:dx + stride * wo:stride, :])
    patches = jnp.stack(cols, axis=3)                  # (N, Ho, Wo, kh*kw, C)
    return patches.reshape(n * ho * wo, kh * kw * c), (n, ho, wo)


def effnet_forward(x_nchw, params):
    # NCHW -> NHWC, cast to bf16 up front so the stem glue never materializes f32 copies
    x = jnp.transpose(x_nchw, (0, 2, 3, 1)).astype(jnp.bfloat16)

    # stem: 3x3 conv stride 2 (bf16 im2col glue + fused matmul/bias/swish kernel)
    cols, (n, ho, wo) = im2col(x, 3, 3, stride=2, pad=1)
    cols = jnp.pad(cols, ((0, 0), (0, LANES - cols.shape[1])))
    h = matmul_bias_act(cols, params["stem_w"], params["stem_b"], "swish")
    h = h.reshape(n, ho, wo, LANES)

    # three fused MBConv blocks (one pallas_call each, whole batch per call)
    h = mbconv_s1(h, params["b1"], has_residual=True)     # expand 1, stride 1, skip
    h = mbconv_s2(h, params["b2"])                        # expand 4, stride 2
    h = mbconv_s1(h, params["b3"], has_residual=True)     # expand 4, stride 1, skip

    # head 1x1 + swish + global average pool + classifier + sigmoid (one kernel)
    return head_pool_classify(h, params["head_w"], params["head_b"],
                              params["fc_w"], params["fc_b"])


# ----------------------------------------------------------------------------
# Deterministic synthetic parameters (BN folded into conv bias), zero-padded to
# 128 lanes so every kernel sees lane-dense channel axes.
# ----------------------------------------------------------------------------
def init_params(key):
    keys = iter(jax.random.split(key, 64))

    def rnd(shape, scale=0.1):
        return (scale * jax.random.normal(next(keys), shape)).astype(jnp.float32)

    def pad_mat(m):        # zero-pad both dims to LANES, bf16 for MXU operands
        out = jnp.zeros((LANES, LANES), jnp.float32)
        out = out.at[:m.shape[0], :m.shape[1]].set(m)
        return out.astype(jnp.bfloat16)

    def pad_vec(v):        # biases stay f32 (added after f32 accumulation)
        return jnp.zeros((LANES,), jnp.float32).at[:v.shape[0]].set(v)

    def pad_dw(w):         # depthwise weights stay f32 (VPU math)
        return jnp.zeros((3, 3, LANES), jnp.float32).at[:, :, :w.shape[2]].set(w)

    def mb(c_in, c_exp, c_out, c_se):
        p = {}
        if c_exp != c_in:
            p["exp_w"], p["exp_b"] = pad_mat(rnd((c_in, c_exp))), pad_vec(rnd((c_exp,)))
        else:
            p["exp_w"], p["exp_b"] = None, None
        p["dw_w"], p["dw_b"] = pad_dw(rnd((3, 3, c_exp))), pad_vec(rnd((c_exp,)))
        p["se1_w"], p["se1_b"] = pad_mat(rnd((c_exp, c_se))), pad_vec(rnd((c_se,)))
        p["se2_w"], p["se2_b"] = pad_mat(rnd((c_se, c_exp))), pad_vec(rnd((c_exp,)))
        p["proj_w"], p["proj_b"] = pad_mat(rnd((c_exp, c_out))), pad_vec(rnd((c_out,)))
        return p

    return {
        "stem_w": pad_mat(rnd((3 * 3 * 3, 16))), "stem_b": pad_vec(rnd((16,))),
        "b1": mb(16, 16, 16, 4),       # expand 1, stride 1, skip
        "b2": mb(16, 64, 24, 4),       # expand 4, stride 2
        "b3": mb(24, 96, 24, 6),       # expand 4, stride 1, skip
        "head_w": pad_mat(rnd((24, 128))), "head_b": pad_vec(rnd((128,))),
        "fc_w": pad_mat(rnd((128, N_CLASSES))), "fc_b": pad_vec(rnd((N_CLASSES,))),
    }


# ----------------------------------------------------------------------------
if __name__ == "__main__":
    key = jax.random.PRNGKey(0)
    pkey, xkey = jax.random.split(key)
    params = init_params(pkey)

    # PyTorch-style NCHW input: batch=2, channels=3 (RGB), 16x16 spatial
    x = jax.random.normal(xkey, (2, 3, 16, 16), jnp.float32)

    fwd = jax.jit(effnet_forward)
    out = jax.block_until_ready(fwd(x, params))

    assert out.shape == (2, N_CLASSES), out.shape
    assert bool(jnp.all((out >= 0.0) & (out <= 1.0)))   # sigmoid output range
    print("KERNEL_OK")
</pallas_src>

<mosaic_0001>
module attributes {stable_mosaic.version = 11 : i64} {
  func.func @_matmul_bias_act_kernel(%arg0: i32, %arg1: memref<128x128xbf16, #tpu.memory_space<vmem>>, %arg2: memref<128x128xbf16, #tpu.memory_space<vmem>>, %arg3: memref<1x128xf32, #tpu.memory_space<vmem>>, %arg4: memref<128x128xbf16, #tpu.memory_space<vmem>>) attributes {dimension_semantics = [#tpu.dimension_semantics<parallel>], iteration_bounds = array<i64: 1>, scalar_prefetch = 0 : i64, scratch_operands = 0 : i64, tpu.core_type = #tpu.core_type<tc>, window_params = [{transform_indices = @transform_0, window_bounds = array<i64: 128, 128>}, {pipeline_mode = #tpu.pipeline_mode<synchronous>, transform_indices = @transform_1, window_bounds = array<i64: 128, 128>}, {pipeline_mode = #tpu.pipeline_mode<synchronous>, transform_indices = @transform_2, window_bounds = array<i64: 1, 128>}, {transform_indices = @transform_3, window_bounds = array<i64: 128, 128>}]} {
    %c0 = arith.constant 0 : index
    %c0_0 = arith.constant 0 : index
    %0 = vector.load %arg1[%c0, %c0_0] : memref<128x128xbf16, #tpu.memory_space<vmem>>, vector<128x128xbf16>
    %c0_1 = arith.constant 0 : index
    %c0_2 = arith.constant 0 : index
    %1 = vector.load %arg2[%c0_1, %c0_2] : memref<128x128xbf16, #tpu.memory_space<vmem>>, vector<128x128xbf16>
    %cst = arith.constant dense<0.000000e+00> : vector<128x128xf32>
    %2 = tpu.matmul %0, %1, %cst {dimension_numbers = #tpu.dot_dimension_numbers<[1], [0], [0], [1], [0, 0, 1, 1], [], []>} : vector<128x128xbf16>, vector<128x128xbf16>, vector<128x128xf32> -> vector<128x128xf32>
    %c0_3 = arith.constant 0 : index
    %c0_4 = arith.constant 0 : index
    %3 = vector.load %arg3[%c0_3, %c0_4] : memref<1x128xf32, #tpu.memory_space<vmem>>, vector<1x128xf32>
    %4 = vector.broadcast %3 : vector<1x128xf32> to vector<128x128xf32>
    %5 = arith.addf %2, %4 : vector<128x128xf32>
    %6 = arith.negf %5 : vector<128x128xf32>
    %7 = math.exp %6 : vector<128x128xf32>
    %cst_5 = arith.constant 1.000000e+00 : f32
    %8 = vector.broadcast %cst_5 : f32 to vector<128x128xf32>
    %9 = arith.addf %8, %7 : vector<128x128xf32>
    %10 = arith.divf %8, %9 : vector<128x128xf32>
    %11 = arith.mulf %5, %10 : vector<128x128xf32>
    %12 = arith.truncf %11 : vector<128x128xf32> to vector<128x128xbf16>
    %c0_6 = arith.constant 0 : index
    %c0_7 = arith.constant 0 : index
    %13 = vector.load %arg4[%c0_6, %c0_7] : memref<128x128xbf16, #tpu.memory_space<vmem>>, vector<128x128xbf16>
    tpu.vector_store %arg4[%c0_6, %c0_7], %12 {strides = array<i32>} : memref<128x128xbf16, #tpu.memory_space<vmem>>, vector<128x128xbf16>,
    return
  }
  func.func @transform_0(%arg0: i32) -> (i32, i32) {
    %c0_i32 = arith.constant 0 : i32
    %c0_i32_0 = arith.constant 0 : i32
    return %arg0, %c0_i32 : i32, i32
  }
  func.func @transform_1(%arg0: i32) -> (i32, i32) {
    %c0_i32 = arith.constant 0 : i32
    %c0_i32_0 = arith.constant 0 : i32
    %c0_i32_1 = arith.constant 0 : i32
    return %c0_i32, %c0_i32_0 : i32, i32
  }
  func.func @transform_2(%arg0: i32) -> (i32, i32) {
    %c0_i32 = arith.constant 0 : i32
    %c0_i32_0 = arith.constant 0 : i32
    %c0_i32_1 = arith.constant 0 : i32
    return %c0_i32, %c0_i32_0 : i32, i32
  }
  func.func @transform_3(%arg0: i32) -> (i32, i32) {
    %c0_i32 = arith.constant 0 : i32
    %c0_i32_0 = arith.constant 0 : i32
    return %arg0, %c0_i32 : i32, i32
  }
}

module attributes {stable_mosaic.version = 11 : i64} {
  func.func @_mbconv_s1_kernel(%arg0: memref<2x8x8x128xbf16, #tpu.memory_space<vmem>>, %arg1: memref<3x3x128xf32, #tpu.memory_space<vmem>>, %arg2: memref<1x128xf32, #tpu.memory_space<vmem>>, %arg3: memref<128x128xbf16, #tpu.memory_space<vmem>>, %arg4: memref<1x128xf32, #tpu.memory_space<vmem>>, %arg5: memref<128x128xbf16, #tpu.memory_space<vmem>>, %arg6: memref<1x128xf32, #tpu.memory_space<vmem>>, %arg7: memref<128x128xbf16, #tpu.memory_space<vmem>>, %arg8: memref<1x128xf32, #tpu.memory_space<vmem>>, %arg9: memref<2x8x8x128xbf16, #tpu.memory_space<vmem>>, %arg10: memref<2x10x10x128xbf16, #tpu.memory_space<vmem>>) attributes {dimension_semantics = [], scalar_prefetch = 0 : i64, scratch_operands = 1 : i64, tpu.core_type = #tpu.core_type<tc>} {
    %c0 = arith.constant 0 : index
    %c0_0 = arith.constant 0 : index
    %c0_1 = arith.constant 0 : index
    %c0_2 = arith.constant 0 : index
    %0 = vector.load %arg0[%c0, %c0_0, %c0_1, %c0_2] : memref<2x8x8x128xbf16, #tpu.memory_space<vmem>>, vector<2x8x8x128xbf16>
    %cst = arith.constant 0.000000e+00 : bf16
    %1 = vector.broadcast %cst : bf16 to vector<2x1x10x128xbf16>
    %c0_3 = arith.constant 0 : index
    %c0_4 = arith.constant 0 : index
    %c0_5 = arith.constant 0 : index
    %c0_6 = arith.constant 0 : index
    %2 = vector.load %arg10[%c0_3, %c0_4, %c0_5, %c0_6] : memref<2x10x10x128xbf16, #tpu.memory_space<vmem>>, vector<2x1x10x128xbf16>
    tpu.vector_store %arg10[%c0_3, %c0_4, %c0_5, %c0_6], %1 {strides = array<i32>} : memref<2x10x10x128xbf16, #tpu.memory_space<vmem>>, vector<2x1x10x128xbf16>,
    %cst_7 = arith.constant 0.000000e+00 : bf16
    %3 = vector.broadcast %cst_7 : bf16 to vector<2x1x10x128xbf16>
    %c0_8 = arith.constant 0 : index
    %c9 = arith.constant 9 : index
    %c0_9 = arith.constant 0 : index
    %c0_10 = arith.constant 0 : index
    %4 = vector.load %arg10[%c0_8, %c9, %c0_9, %c0_10] : memref<2x10x10x128xbf16, #tpu.memory_space<vmem>>, vector<2x1x10x128xbf16>
    tpu.vector_store %arg10[%c0_8, %c9, %c0_9, %c0_10], %3 {strides = array<i32>} : memref<2x10x10x128xbf16, #tpu.memory_space<vmem>>, vector<2x1x10x128xbf16>,
    %cst_11 = arith.constant 0.000000e+00 : bf16
    %5 = vector.broadcast %cst_11 : bf16 to vector<2x8x1x128xbf16>
    %c0_12 = arith.constant 0 : index
    %c1 = arith.constant 1 : index
    %c0_13 = arith.constant 0 : index
    %c0_14 = arith.constant 0 : index
    %6 = vector.load %arg10[%c0_12, %c1, %c0_13, %c0_14] : memref<2x10x10x128xbf16, #tpu.memory_space<vmem>>, vector<2x8x1x128xbf16>
    tpu.vector_store %arg10[%c0_12, %c1, %c0_13, %c0_14], %5 {strides = array<i32>} : memref<2x10x10x128xbf16, #tpu.memory_space<vmem>>, vector<2x8x1x128xbf16>,
    %cst_15 = arith.constant 0.000000e+00 : bf16
    %7 = vector.broadcast %cst_15 : bf16 to vector<2x8x1x128xbf16>
    %c0_16 = arith.constant 0 : index
    %c1_17 = arith.constant 1 : index
    %c9_18 = arith.constant 9 : index
    %c0_19 = arith.constant 0 : index
    %8 = vector.load %arg10[%c0_16, %c1_17, %c9_18, %c0_19] : memref<2x10x10x128xbf16, #tpu.memory_space<vmem>>, vector<2x8x1x128xbf16>
    tpu.vector_store %arg10[%c0_16, %c1_17, %c9_18, %c0_19], %7 {strides = array<i32>} : memref<2x10x10x128xbf16, #tpu.memory_space<vmem>>, vector<2x8x1x128xbf16>,
    %c0_20 = arith.constant 0 : index
    %c1_21 = arith.constant 1 : index
    %c1_22 = arith.constant 1 : index
    %c0_23 = arith.constant 0 : index
    %9 = vector.load %arg10[%c0_20, %c1_21, %c1_22, %c0_23] : memref<2x10x10x128xbf16, #tpu.memory_space<vmem>>, vector<2x8x8x128xbf16>
    tpu.vector_store %arg10[%c0_20, %c1_21, %c1_22, %c0_23], %0 {strides = array<i32>} : memref<2x10x10x128xbf16, #tpu.memory_space<vmem>>, vector<2x8x8x128xbf16>,
    %c0_24 = arith.constant 0 : index
    %c0_25 = arith.constant 0 : index
    %c0_26 = arith.constant 0 : index
    %10 = vector.load %arg1[%c0_24, %c0_25, %c0_26] : memref<3x3x128xf32, #tpu.memory_space<vmem>>, vector<3x3x128xf32>
    %cst_27 = arith.constant 0.000000e+00 : f32
    %11 = vector.broadcast %cst_27 : f32 to vector<2x8x8x128xf32>
    %c0_28 = arith.constant 0 : index
    %c0_29 = arith.constant 0 : index
    %c0_30 = arith.constant 0 : index
    %c0_31 = arith.constant 0 : index
    %12 = vector.load %arg10[%c0_28, %c0_29, %c0_30, %c0_31] : memref<2x10x10x128xbf16, #tpu.memory_space<vmem>>, vector<2x8x8x128xbf16>
    %13 = arith.extf %12 : vector<2x8x8x128xbf16> to vector<2x8x8x128xf32>
    %14 = vector.extract_strided_slice %10 {offsets = [0, 0, 0], sizes = [1, 1, 128], strides = [1, 1, 1]} : vector<3x3x128xf32> to vector<1x1x128xf32>
    %15 = vector.shape_cast %14 : vector<1x1x128xf32> to vector<128xf32>
    %16 = vector.shape_cast %15 : vector<128xf32> to vector<1x1x1x128xf32>
    %17 = vector.broadcast %16 : vector<1x1x1x128xf32> to vector<2x8x8x128xf32>
    %18 = arith.mulf %13, %17 : vector<2x8x8x128xf32>
    %19 = arith.addf %11, %18 : vector<2x8x8x128xf32>
    %c0_32 = arith.constant 0 : index
    %c0_33 = arith.constant 0 : index
    %c1_34 = arith.constant 1 : index
    %c0_35 = arith.constant 0 : index
    %20 = vector.load %arg10[%c0_32, %c0_33, %c1_34, %c0_35] : memref<2x10x10x128xbf16, #tpu.memory_space<vmem>>, vector<2x8x8x128xbf16>
    %21 = arith.extf %20 : vector<2x8x8x128xbf16> to vector<2x8x8x128xf32>
    %22 = vector.extract_strided_slice %10 {offsets = [0, 1, 0], sizes = [1, 1, 128], strides = [1, 1, 1]} : vector<3x3x128xf32> to vector<1x1x128xf32>
    %23 = vector.shape_cast %22 : vector<1x1x128xf32> to vector<128xf32>
    %24 = vector.shape_cast %23 : vector<128xf32> to vector<1x1x1x128xf32>
    %25 = vector.broadcast %24 : vector<1x1x1x128xf32> to vector<2x8x8x128xf32>
    %26 = arith.mulf %21, %25 : vector<2x8x8x128xf32>
    %27 = arith.addf %19, %26 : vector<2x8x8x128xf32>
    %c0_36 = arith.constant 0 : index
    %c0_37 = arith.constant 0 : index
    %c2 = arith.constant 2 : index
    %c0_38 = arith.constant 0 : index
    %28 = vector.load %arg10[%c0_36, %c0_37, %c2, %c0_38] : memref<2x10x10x128xbf16, #tpu.memory_space<vmem>>, vector<2x8x8x128xbf16>
    %29 = arith.extf %28 : vector<2x8x8x128xbf16> to vector<2x8x8x128xf32>
    %30 = vector.extract_strided_slice %10 {offsets = [0, 2, 0], sizes = [1, 1, 128], strides = [1, 1, 1]} : vector<3x3x128xf32> to vector<1x1x128xf32>
    %31 = vector.shape_cast %30 : vector<1x1x128xf32> to vector<128xf32>
    %32 = vector.shape_cast %31 : vector<128xf32> to vector<1x1x1x128xf32>
    %33 = vector.broadcast %32 : vector<1x1x1x128xf32> to vector<2x8x8x128xf32>
    %34 = arith.mulf %29, %33 : vector<2x8x8x128xf32>
    %35 = arith.addf %27, %34 : vector<2x8x8x128xf32>
    %c0_39 = arith.constant 0 : index
    %c1_40 = arith.constant 1 : index
    %c0_41 = arith.constant 0 : index
    %c0_42 = arith.constant 0 : index
    %36 = vector.load %arg10[%c0_39, %c1_40, %c0_41, %c0_42] : memref<2x10x10x128xbf16, #tpu.memory_space<vmem>>, vector<2x8x8x128xbf16>
    %37 = arith.extf %36 : vector<2x8x8x128xbf16> to vector<2x8x8x128xf32>
    %38 = vector.extract_strided_slice %10 {offsets = [1, 0, 0], sizes = [1, 1, 128], strides = [1, 1, 1]} : vector<3x3x128xf32> to vector<1x1x128xf32>
    %39 = vector.shape_cast %38 : vector<1x1x128xf32> to vector<128xf32>
    %40 = vector.shape_cast %39 : vector<128xf32> to vector<1x1x1x128xf32>
    %41 = vector.broadcast %40 : vector<1x1x1x128xf32> to vector<2x8x8x128xf32>
    %42 = arith.mulf %37, %41 : vector<2x8x8x128xf32>
    %43 = arith.addf %35, %42 : vector<2x8x8x128xf32>
    %c0_43 = arith.constant 0 : index
    %c1_44 = arith.constant 1 : index
    %c1_45 = arith.constant 1 : index
    %c0_46 = arith.constant 0 : index
    %44 = vector.load %arg10[%c0_43, %c1_44, %c1_45, %c0_46] : memref<2x10x10x128xbf16, #tpu.memory_space<vmem>>, vector<2x8x8x128xbf16>
    %45 = arith.extf %44 : vector<2x8x8x128xbf16> to vector<2x8x8x128xf32>
    %46 = vector.extract_strided_slice %10 {offsets = [1, 1, 0], sizes = [1, 1, 128], strides = [1, 1, 1]} : vector<3x3x128xf32> to vector<1x1x128xf32>
    %47 = vector.shape_cast %46 : vector<1x1x128xf32> to vector<128xf32>
    %48 = vector.shape_cast %47 : vector<128xf32> to vector<1x1x1x128xf32>
    %49 = vector.broadcast %48 : vector<1x1x1x128xf32> to vector<2x8x8x128xf32>
    %50 = arith.mulf %45, %49 : vector<2x8x8x128xf32>
    %51 = arith.addf %43, %50 : vector<2x8x8x128xf32>
    %c0_47 = arith.constant 0 : index
    %c1_48 = arith.constant 1 : index
    %c2_49 = arith.constant 2 : index
    %c0_50 = arith.constant 0 : index
    %52 = vector.load %arg10[%c0_47, %c1_48, %c2_49, %c0_50] : memref<2x10x10x128xbf16, #tpu.memory_space<vmem>>, vector<2x8x8x128xbf16>
    %53 = arith.extf %52 : vector<2x8x8x128xbf16> to vector<2x8x8x128xf32>
    %54 = vector.extract_strided_slice %10 {offsets = [1, 2, 0], sizes = [1, 1, 128], strides = [1, 1, 1]} : vector<3x3x128xf32> to vector<1x1x128xf32>
    %55 = vector.shape_cast %54 : vector<1x1x128xf32> to vector<128xf32>
    %56 = vector.shape_cast %55 : vector<128xf32> to vector<1x1x1x128xf32>
    %57 = vector.broadcast %56 : vector<1x1x1x128xf32> to vector<2x8x8x128xf32>
    %58 = arith.mulf %53, %57 : vector<2x8x8x128xf32>
    %59 = arith.addf %51, %58 : vector<2x8x8x128xf32>
    %c0_51 = arith.constant 0 : index
    %c2_52 = arith.constant 2 : index
    %c0_53 = arith.constant 0 : index
    %c0_54 = arith.constant 0 : index
    %60 = vector.load %arg10[%c0_51, %c2_52, %c0_53, %c0_54] : memref<2x10x10x128xbf16, #tpu.memory_space<vmem>>, vector<2x8x8x128xbf16>
    %61 = arith.extf %60 : vector<2x8x8x128xbf16> to vector<2x8x8x128xf32>
    %62 = vector.extract_strided_slice %10 {offsets = [2, 0, 0], sizes = [1, 1, 128], strides = [1, 1, 1]} : vector<3x3x128xf32> to vector<1x1x128xf32>
    %63 = vector.shape_cast %62 : vector<1x1x128xf32> to vector<128xf32>
    %64 = vector.shape_cast %63 : vector<128xf32> to vector<1x1x1x128xf32>
    %65 = vector.broadcast %64 : vector<1x1x1x128xf32> to vector<2x8x8x128xf32>
    %66 = arith.mulf %61, %65 : vector<2x8x8x128xf32>
    %67 = arith.addf %59, %66 : vector<2x8x8x128xf32>
    %c0_55 = arith.constant 0 : index
    %c2_56 = arith.constant 2 : index
    %c1_57 = arith.constant 1 : index
    %c0_58 = arith.constant 0 : index
    %68 = vector.load %arg10[%c0_55, %c2_56, %c1_57, %c0_58] : memref<2x10x10x128xbf16, #tpu.memory_space<vmem>>, vector<2x8x8x128xbf16>
    %69 = arith.extf %68 : vector<2x8x8x128xbf16> to vector<2x8x8x128xf32>
    %70 = vector.extract_strided_slice %10 {offsets = [2, 1, 0], sizes = [1, 1, 128], strides = [1, 1, 1]} : vector<3x3x128xf32> to vector<1x1x128xf32>
    %71 = vector.shape_cast %70 : vector<1x1x128xf32> to vector<128xf32>
    %72 = vector.shape_cast %71 : vector<128xf32> to vector<1x1x1x128xf32>
    %73 = vector.broadcast %72 : vector<1x1x1x128xf32> to vector<2x8x8x128xf32>
    %74 = arith.mulf %69, %73 : vector<2x8x8x128xf32>
    %75 = arith.addf %67, %74 : vector<2x8x8x128xf32>
    %c0_59 = arith.constant 0 : index
    %c2_60 = arith.constant 2 : index
    %c2_61 = arith.constant 2 : index
    %c0_62 = arith.constant 0 : index
    %76 = vector.load %arg10[%c0_59, %c2_60, %c2_61, %c0_62] : memref<2x10x10x128xbf16, #tpu.memory_space<vmem>>, vector<2x8x8x128xbf16>
    %77 = arith.extf %76 : vector<2x8x8x128xbf16> to vector<2x8x8x128xf32>
    %78 = vector.extract_strided_slice %10 {offsets = [2, 2, 0], sizes = [1, 1, 128], strides = [1, 1, 1]} : vector<3x3x128xf32> to vector<1x1x128xf32>
    %79 = vector.shape_cast %78 : vector<1x1x128xf32> to vector<128xf32>
    %80 = vector.shape_cast %79 : vector<128xf32> to vector<1x1x1x128xf32>
    %81 = vector.broadcast %80 : vector<1x1x1x128xf32> to vector<2x8x8x128xf32>
    %82 = arith.mulf %77, %81 : vector<2x8x8x128xf32>
    %83 = arith.addf %75, %82 : vector<2x8x8x128xf32>
    %c0_63 = arith.constant 0 : index
    %c0_64 = arith.constant 0 : index
    %84 = vector.load %arg2[%c0_63, %c0_64] : memref<1x128xf32, #tpu.memory_space<vmem>>, vector<1x128xf32>
    %85 = vector.shape_cast %84 : vector<1x128xf32> to vector<1x1x1x128xf32>
    %86 = vector.broadcast %85 : vector<1x1x1x128xf32> to vector<2x8x8x128xf32>
    %87 = arith.addf %83, %86 : vector<2x8x8x128xf32>
    %88 = arith.negf %87 : vector<2x8x8x128xf32>
    %89 = math.exp %88 : vector<2x8x8x128xf32>
    %cst_65 = arith.constant 1.000000e+00 : f32
    %90 = vector.broadcast %cst_65 : f32 to vector<2x8x8x128xf32>
    %91 = arith.addf %90, %89 : vector<2x8x8x128xf32>
    %92 = arith.divf %90, %91 : vector<2x8x8x128xf32>
    %93 = arith.mulf %87, %92 : vector<2x8x8x128xf32>
    %c0_66 = arith.constant 0 : index
    %c0_67 = arith.constant 0 : index
    %94 = vector.load %arg3[%c0_66, %c0_67] : memref<128x128xbf16, #tpu.memory_space<vmem>>, vector<128x128xbf16>
    %c0_68 = arith.constant 0 : index
    %c0_69 = arith.constant 0 : index
    %95 = vector.load %arg4[%c0_68, %c0_69] : memref<1x128xf32, #tpu.memory_space<vmem>>, vector<1x128xf32>
    %c0_70 = arith.constant 0 : index
    %c0_71 = arith.constant 0 : index
    %96 = vector.load %arg5[%c0_70, %c0_71] : memref<128x128xbf16, #tpu.memory_space<vmem>>, vector<128x128xbf16>
    %c0_72 = arith.constant 0 : index
    %c0_73 = arith.constant 0 : index
    %97 = vector.load %arg6[%c0_72, %c0_73] : memref<1x128xf32, #tpu.memory_space<vmem>>, vector<1x128xf32>
    %c0_74 = arith.constant 0 : index
    %c0_75 = arith.constant 0 : index
    %98 = vector.load %arg7[%c0_74, %c0_75] : memref<128x128xbf16, #tpu.memory_space<vmem>>, vector<128x128xbf16>
    %c0_76 = arith.constant 0 : index
    %c0_77 = arith.constant 0 : index
    %99 = vector.load %arg8[%c0_76, %c0_77] : memref<1x128xf32, #tpu.memory_space<vmem>>, vector<1x128xf32>
    %100 = vector.shape_cast %93 : vector<2x8x8x128xf32> to vector<2x64x128xf32>
    %cst_78 = arith.constant dense<0.000000e+00> : vector<2x128xf32>
    %101 = vector.multi_reduction <add>, %100, %cst_78 [1] : vector<2x64x128xf32> to vector<2x128xf32>
    %cst_79 = arith.constant 6.400000e+01 : f32
    %102 = vector.broadcast %cst_79 : f32 to vector<2x128xf32>
    %103 = arith.divf %101, %102 : vector<2x128xf32>
    %104 = arith.truncf %103 : vector<2x128xf32> to vector<2x128xbf16>
    %cst_80 = arith.constant dense<0.000000e+00> : vector<2x128xf32>
    %105 = tpu.matmul %104, %94, %cst_80 {dimension_numbers = #tpu.dot_dimension_numbers<[1], [0], [0], [1], [0, 0, 1, 1], [], []>} : vector<2x128xbf16>, vector<128x128xbf16>, vector<2x128xf32> -> vector<2x128xf32>
    %106 = vector.broadcast %95 : vector<1x128xf32> to vector<2x128xf32>
    %107 = arith.addf %105, %106 : vector<2x128xf32>
    %108 = arith.negf %107 : vector<2x128xf32>
    %109 = math.exp %108 : vector<2x128xf32>
    %cst_81 = arith.constant 1.000000e+00 : f32
    %110 = vector.broadcast %cst_81 : f32 to vector<2x128xf32>
    %111 = arith.addf %110, %109 : vector<2x128xf32>
    %112 = arith.divf %110, %111 : vector<2x128xf32>
    %113 = arith.mulf %107, %112 : vector<2x128xf32>
    %114 = arith.truncf %113 : vector<2x128xf32> to vector<2x128xbf16>
    %cst_82 = arith.constant dense<0.000000e+00> : vector<2x128xf32>
    %115 = tpu.matmul %114, %96, %cst_82 {dimension_numbers = #tpu.dot_dimension_numbers<[1], [0], [0], [1], [0, 0, 1, 1], [], []>} : vector<2x128xbf16>, vector<128x128xbf16>, vector<2x128xf32> -> vector<2x128xf32>
    %116 = vector.broadcast %97 : vector<1x128xf32> to vector<2x128xf32>
    %117 = arith.addf %115, %116 : vector<2x128xf32>
    %118 = arith.negf %117 : vector<2x128xf32>
    %119 = math.exp %118 : vector<2x128xf32>
    %cst_83 = arith.constant 1.000000e+00 : f32
    %120 = vector.broadcast %cst_83 : f32 to vector<2x128xf32>
    %121 = arith.addf %120, %119 : vector<2x128xf32>
    %122 = arith.divf %120, %121 : vector<2x128xf32>
    %123 = vector.shape_cast %122 : vector<2x128xf32> to vector<2x1x128xf32>
    %124 = vector.broadcast %123 : vector<2x1x128xf32> to vector<2x64x128xf32>
    %125 = arith.mulf %100, %124 : vector<2x64x128xf32>
    %126 = arith.truncf %125 : vector<2x64x128xf32> to vector<2x64x128xbf16>
    %127 = vector.shape_cast %126 : vector<2x64x128xbf16> to vector<128x128xbf16>
    %cst_84 = arith.constant dense<0.000000e+00> : vector<128x128xf32>
    %128 = tpu.matmul %127, %98, %cst_84 {dimension_numbers = #tpu.dot_dimension_numbers<[1], [0], [0], [1], [0, 0, 1, 1], [], []>} : vector<128x128xbf16>, vector<128x128xbf16>, vector<128x128xf32> -> vector<128x128xf32>
    %129 = vector.broadcast %99 : vector<1x128xf32> to vector<128x128xf32>
    %130 = arith.addf %128, %129 : vector<128x128xf32>
    %131 = vector.shape_cast %130 : vector<128x128xf32> to vector<2x8x8x128xf32>
    %c0_85 = arith.constant 0 : index
    %c0_86 = arith.constant 0 : index
    %c0_87 = arith.constant 0 : index
    %c0_88 = arith.constant 0 : index
    %132 = vector.load %arg0[%c0_85, %c0_86, %c0_87, %c0_88] : memref<2x8x8x128xbf16, #tpu.memory_space<vmem>>, vector<2x8x8x128xbf16>
    %133 = arith.extf %132 : vector<2x8x8x128xbf16> to vector<2x8x8x128xf32>
    %134 = arith.addf %131, %133 : vector<2x8x8x128xf32>
    %135 = arith.truncf %134 : vector<2x8x8x128xf32> to vector<2x8x8x128xbf16>
    %c0_89 = arith.constant 0 : index
    %c0_90 = arith.constant 0 : index
    %c0_91 = arith.constant 0 : index
    %c0_92 = arith.constant 0 : index
    %136 = vector.load %arg9[%c0_89, %c0_90, %c0_91, %c0_92] : memref<2x8x8x128xbf16, #tpu.memory_space<vmem>>, vector<2x8x8x128xbf16>
    tpu.vector_store %arg9[%c0_89, %c0_90, %c0_91, %c0_92], %135 {strides = array<i32>} : memref<2x8x8x128xbf16, #tpu.memory_space<vmem>>, vector<2x8x8x128xbf16>,
    return
  }
}

module attributes {stable_mosaic.version = 11 : i64} {
  func.func @_mbconv_s2_kernel(%arg0: memref<8x4x4x128xbf16, #tpu.memory_space<vmem>>, %arg1: memref<128x128xbf16, #tpu.memory_space<vmem>>, %arg2: memref<1x128xf32, #tpu.memory_space<vmem>>, %arg3: memref<3x3x128xf32, #tpu.memory_space<vmem>>, %arg4: memref<1x128xf32, #tpu.memory_space<vmem>>, %arg5: memref<128x128xbf16, #tpu.memory_space<vmem>>, %arg6: memref<1x128xf32, #tpu.memory_space<vmem>>, %arg7: memref<128x128xbf16, #tpu.memory_space<vmem>>, %arg8: memref<1x128xf32, #tpu.memory_space<vmem>>, %arg9: memref<128x128xbf16, #tpu.memory_space<vmem>>, %arg10: memref<1x128xf32, #tpu.memory_space<vmem>>, %arg11: memref<2x4x4x128xbf16, #tpu.memory_space<vmem>>, %arg12: memref<2x5x5x128xbf16, #tpu.memory_space<vmem>>, %arg13: memref<2x5x4x128xbf16, #tpu.memory_space<vmem>>, %arg14: memref<2x4x5x128xbf16, #tpu.memory_space<vmem>>) attributes {dimension_semantics = [], scalar_prefetch = 0 : i64, scratch_operands = 3 : i64, tpu.core_type = #tpu.core_type<tc>} {
    %c0 = arith.constant 0 : index
    %c0_0 = arith.constant 0 : index
    %c0_1 = arith.constant 0 : index
    %c0_2 = arith.constant 0 : index
    %0 = vector.load %arg0[%c0, %c0_0, %c0_1, %c0_2] : memref<8x4x4x128xbf16, #tpu.memory_space<vmem>>, vector<8x4x4x128xbf16>
    %1 = vector.shape_cast %0 : vector<8x4x4x128xbf16> to vector<128x128xbf16>
    %c0_3 = arith.constant 0 : index
    %c0_4 = arith.constant 0 : index
    %2 = vector.load %arg1[%c0_3, %c0_4] : memref<128x128xbf16, #tpu.memory_space<vmem>>, vector<128x128xbf16>
    %cst = arith.constant dense<0.000000e+00> : vector<128x128xf32>
    %3 = tpu.matmul %1, %2, %cst {dimension_numbers = #tpu.dot_dimension_numbers<[1], [0], [0], [1], [0, 0, 1, 1], [], []>} : vector<128x128xbf16>, vector<128x128xbf16>, vector<128x128xf32> -> vector<128x128xf32>
    %c0_5 = arith.constant 0 : index
    %c0_6 = arith.constant 0 : index
    %4 = vector.load %arg2[%c0_5, %c0_6] : memref<1x128xf32, #tpu.memory_space<vmem>>, vector<1x128xf32>
    %5 = vector.broadcast %4 : vector<1x128xf32> to vector<128x128xf32>
    %6 = arith.addf %3, %5 : vector<128x128xf32>
    %7 = arith.negf %6 : vector<128x128xf32>
    %8 = math.exp %7 : vector<128x128xf32>
    %cst_7 = arith.constant 1.000000e+00 : f32
    %9 = vector.broadcast %cst_7 : f32 to vector<128x128xf32>
    %10 = arith.addf %9, %8 : vector<128x128xf32>
    %11 = arith.divf %9, %10 : vector<128x128xf32>
    %12 = arith.mulf %6, %11 : vector<128x128xf32>
    %13 = arith.truncf %12 : vector<128x128xf32> to vector<128x128xbf16>
    %14 = vector.shape_cast %13 : vector<128x128xbf16> to vector<8x4x4x128xbf16>
    %15 = vector.extract_strided_slice %14 {offsets = [0, 0, 0, 0], sizes = [2, 4, 4, 128], strides = [1, 1, 1, 1]} : vector<8x4x4x128xbf16> to vector<2x4x4x128xbf16>
    %16 = vector.extract_strided_slice %14 {offsets = [2, 0, 0, 0], sizes = [2, 4, 4, 128], strides = [1, 1, 1, 1]} : vector<8x4x4x128xbf16> to vector<2x4x4x128xbf16>
    %17 = vector.extract_strided_slice %14 {offsets = [4, 0, 0, 0], sizes = [2, 4, 4, 128], strides = [1, 1, 1, 1]} : vector<8x4x4x128xbf16> to vector<2x4x4x128xbf16>
    %18 = vector.extract_strided_slice %14 {offsets = [6, 0, 0, 0], sizes = [2, 4, 4, 128], strides = [1, 1, 1, 1]} : vector<8x4x4x128xbf16> to vector<2x4x4x128xbf16>
    %cst_8 = arith.constant 0.000000e+00 : bf16
    %19 = vector.broadcast %cst_8 : bf16 to vector<2x1x5x128xbf16>
    %c0_9 = arith.constant 0 : index
    %c0_10 = arith.constant 0 : index
    %c0_11 = arith.constant 0 : index
    %c0_12 = arith.constant 0 : index
    %20 = vector.load %arg12[%c0_9, %c0_10, %c0_11, %c0_12] : memref<2x5x5x128xbf16, #tpu.memory_space<vmem>>, vector<2x1x5x128xbf16>
    tpu.vector_store %arg12[%c0_9, %c0_10, %c0_11, %c0_12], %19 {strides = array<i32>} : memref<2x5x5x128xbf16, #tpu.memory_space<vmem>>, vector<2x1x5x128xbf16>,
    %cst_13 = arith.constant 0.000000e+00 : bf16
    %21 = vector.broadcast %cst_13 : bf16 to vector<2x4x1x128xbf16>
    %c0_14 = arith.constant 0 : index
    %c1 = arith.constant 1 : index
    %c0_15 = arith.constant 0 : index
    %c0_16 = arith.constant 0 : index
    %22 = vector.load %arg12[%c0_14, %c1, %c0_15, %c0_16] : memref<2x5x5x128xbf16, #tpu.memory_space<vmem>>, vector<2x4x1x128xbf16>
    tpu.vector_store %arg12[%c0_14, %c1, %c0_15, %c0_16], %21 {strides = array<i32>} : memref<2x5x5x128xbf16, #tpu.memory_space<vmem>>, vector<2x4x1x128xbf16>,
    %c0_17 = arith.constant 0 : index
    %c1_18 = arith.constant 1 : index
    %c1_19 = arith.constant 1 : index
    %c0_20 = arith.constant 0 : index
    %23 = vector.load %arg12[%c0_17, %c1_18, %c1_19, %c0_20] : memref<2x5x5x128xbf16, #tpu.memory_space<vmem>>, vector<2x4x4x128xbf16>
    tpu.vector_store %arg12[%c0_17, %c1_18, %c1_19, %c0_20], %15 {strides = array<i32>} : memref<2x5x5x128xbf16, #tpu.memory_space<vmem>>, vector<2x4x4x128xbf16>,
    %cst_21 = arith.constant 0.000000e+00 : bf16
    %24 = vector.broadcast %cst_21 : bf16 to vector<2x1x4x128xbf16>
    %c0_22 = arith.constant 0 : index
    %c0_23 = arith.constant 0 : index
    %c0_24 = arith.constant 0 : index
    %c0_25 = arith.constant 0 : index
    %25 = vector.load %arg13[%c0_22, %c0_23, %c0_24, %c0_25] : memref<2x5x4x128xbf16, #tpu.memory_space<vmem>>, vector<2x1x4x128xbf16>
    tpu.vector_store %arg13[%c0_22, %c0_23, %c0_24, %c0_25], %24 {strides = array<i32>} : memref<2x5x4x128xbf16, #tpu.memory_space<vmem>>, vector<2x1x4x128xbf16>,
    %c0_26 = arith.constant 0 : index
    %c1_27 = arith.constant 1 : index
    %c0_28 = arith.constant 0 : index
    %c0_29 = arith.constant 0 : index
    %26 = vector.load %arg13[%c0_26, %c1_27, %c0_28, %c0_29] : memref<2x5x4x128xbf16, #tpu.memory_space<vmem>>, vector<2x4x4x128xbf16>
    tpu.vector_store %arg13[%c0_26, %c1_27, %c0_28, %c0_29], %16 {strides = array<i32>} : memref<2x5x4x128xbf16, #tpu.memory_space<vmem>>, vector<2x4x4x128xbf16>,
    %cst_30 = arith.constant 0.000000e+00 : bf16
    %27 = vector.broadcast %cst_30 : bf16 to vector<2x4x1x128xbf16>
    %c0_31 = arith.constant 0 : index
    %c0_32 = arith.constant 0 : index
    %c0_33 = arith.constant 0 : index
    %c0_34 = arith.constant 0 : index
    %28 = vector.load %arg14[%c0_31, %c0_32, %c0_33, %c0_34] : memref<2x4x5x128xbf16, #tpu.memory_space<vmem>>, vector<2x4x1x128xbf16>
    tpu.vector_store %arg14[%c0_31, %c0_32, %c0_33, %c0_34], %27 {strides = array<i32>} : memref<2x4x5x128xbf16, #tpu.memory_space<vmem>>, vector<2x4x1x128xbf16>,
    %c0_35 = arith.constant 0 : index
    %c0_36 = arith.constant 0 : index
    %c1_37 = arith.constant 1 : index
    %c0_38 = arith.constant 0 : index
    %29 = vector.load %arg14[%c0_35, %c0_36, %c1_37, %c0_38] : memref<2x4x5x128xbf16, #tpu.memory_space<vmem>>, vector<2x4x4x128xbf16>
    tpu.vector_store %arg14[%c0_35, %c0_36, %c1_37, %c0_38], %17 {strides = array<i32>} : memref<2x4x5x128xbf16, #tpu.memory_space<vmem>>, vector<2x4x4x128xbf16>,
    %c0_39 = arith.constant 0 : index
    %c0_40 = arith.constant 0 : index
    %c0_41 = arith.constant 0 : index
    %30 = vector.load %arg3[%c0_39, %c0_40, %c0_41] : memref<3x3x128xf32, #tpu.memory_space<vmem>>, vector<3x3x128xf32>
    %c0_42 = arith.constant 0 : index
    %c0_43 = arith.constant 0 : index
    %c0_44 = arith.constant 0 : index
    %c0_45 = arith.constant 0 : index
    %31 = vector.load %arg12[%c0_42, %c0_43, %c0_44, %c0_45] : memref<2x5x5x128xbf16, #tpu.memory_space<vmem>>, vector<2x4x4x128xbf16>
    %32 = arith.extf %31 : vector<2x4x4x128xbf16> to vector<2x4x4x128xf32>
    %33 = vector.extract_strided_slice %30 {offsets = [0, 0, 0], sizes = [1, 1, 128], strides = [1, 1, 1]} : vector<3x3x128xf32> to vector<1x1x128xf32>
    %34 = vector.shape_cast %33 : vector<1x1x128xf32> to vector<128xf32>
    %35 = vector.shape_cast %34 : vector<128xf32> to vector<1x1x1x128xf32>
    %36 = vector.broadcast %35 : vector<1x1x1x128xf32> to vector<2x4x4x128xf32>
    %37 = arith.mulf %32, %36 : vector<2x4x4x128xf32>
    %c0_46 = arith.constant 0 : index
    %c0_47 = arith.constant 0 : index
    %c0_48 = arith.constant 0 : index
    %c0_49 = arith.constant 0 : index
    %38 = vector.load %arg13[%c0_46, %c0_47, %c0_48, %c0_49] : memref<2x5x4x128xbf16, #tpu.memory_space<vmem>>, vector<2x4x4x128xbf16>
    %39 = arith.extf %38 : vector<2x4x4x128xbf16> to vector<2x4x4x128xf32>
    %40 = vector.extract_strided_slice %30 {offsets = [0, 1, 0], sizes = [1, 1, 128], strides = [1, 1, 1]} : vector<3x3x128xf32> to vector<1x1x128xf32>
    %41 = vector.shape_cast %40 : vector<1x1x128xf32> to vector<128xf32>
    %42 = vector.shape_cast %41 : vector<128xf32> to vector<1x1x1x128xf32>
    %43 = vector.broadcast %42 : vector<1x1x1x128xf32> to vector<2x4x4x128xf32>
    %44 = arith.mulf %39, %43 : vector<2x4x4x128xf32>
    %45 = arith.addf %37, %44 : vector<2x4x4x128xf32>
    %c0_50 = arith.constant 0 : index
    %c0_51 = arith.constant 0 : index
    %c1_52 = arith.constant 1 : index
    %c0_53 = arith.constant 0 : index
    %46 = vector.load %arg12[%c0_50, %c0_51, %c1_52, %c0_53] : memref<2x5x5x128xbf16, #tpu.memory_space<vmem>>, vector<2x4x4x128xbf16>
    %47 = arith.extf %46 : vector<2x4x4x128xbf16> to vector<2x4x4x128xf32>
    %48 = vector.extract_strided_slice %30 {offsets = [0, 2, 0], sizes = [1, 1, 128], strides = [1, 1, 1]} : vector<3x3x128xf32> to vector<1x1x128xf32>
    %49 = vector.shape_cast %48 : vector<1x1x128xf32> to vector<128xf32>
    %50 = vector.shape_cast %49 : vector<128xf32> to vector<1x1x1x128xf32>
    %51 = vector.broadcast %50 : vector<1x1x1x128xf32> to vector<2x4x4x128xf32>
    %52 = arith.mulf %47, %51 : vector<2x4x4x128xf32>
    %53 = arith.addf %45, %52 : vector<2x4x4x128xf32>
    %c0_54 = arith.constant 0 : index
    %c0_55 = arith.constant 0 : index
    %c0_56 = arith.constant 0 : index
    %c0_57 = arith.constant 0 : index
    %54 = vector.load %arg14[%c0_54, %c0_55, %c0_56, %c0_57] : memref<2x4x5x128xbf16, #tpu.memory_space<vmem>>, vector<2x4x4x128xbf16>
    %55 = arith.extf %54 : vector<2x4x4x128xbf16> to vector<2x4x4x128xf32>
    %56 = vector.extract_strided_slice %30 {offsets = [1, 0, 0], sizes = [1, 1, 128], strides = [1, 1, 1]} : vector<3x3x128xf32> to vector<1x1x128xf32>
    %57 = vector.shape_cast %56 : vector<1x1x128xf32> to vector<128xf32>
    %58 = vector.shape_cast %57 : vector<128xf32> to vector<1x1x1x128xf32>
    %59 = vector.broadcast %58 : vector<1x1x1x128xf32> to vector<2x4x4x128xf32>
    %60 = arith.mulf %55, %59 : vector<2x4x4x128xf32>
    %61 = arith.addf %53, %60 : vector<2x4x4x128xf32>
    %62 = arith.extf %18 : vector<2x4x4x128xbf16> to vector<2x4x4x128xf32>
    %63 = vector.extract_strided_slice %30 {offsets = [1, 1, 0], sizes = [1, 1, 128], strides = [1, 1, 1]} : vector<3x3x128xf32> to vector<1x1x128xf32>
    %64 = vector.shape_cast %63 : vector<1x1x128xf32> to vector<128xf32>
    %65 = vector.shape_cast %64 : vector<128xf32> to vector<1x1x1x128xf32>
    %66 = vector.broadcast %65 : vector<1x1x1x128xf32> to vector<2x4x4x128xf32>
    %67 = arith.mulf %62, %66 : vector<2x4x4x128xf32>
    %68 = arith.addf %61, %67 : vector<2x4x4x128xf32>
    %c0_58 = arith.constant 0 : index
    %c0_59 = arith.constant 0 : index
    %c1_60 = arith.constant 1 : index
    %c0_61 = arith.constant 0 : index
    %69 = vector.load %arg14[%c0_58, %c0_59, %c1_60, %c0_61] : memref<2x4x5x128xbf16, #tpu.memory_space<vmem>>, vector<2x4x4x128xbf16>
    %70 = arith.extf %69 : vector<2x4x4x128xbf16> to vector<2x4x4x128xf32>
    %71 = vector.extract_strided_slice %30 {offsets = [1, 2, 0], sizes = [1, 1, 128], strides = [1, 1, 1]} : vector<3x3x128xf32> to vector<1x1x128xf32>
    %72 = vector.shape_cast %71 : vector<1x1x128xf32> to vector<128xf32>
    %73 = vector.shape_cast %72 : vector<128xf32> to vector<1x1x1x128xf32>
    %74 = vector.broadcast %73 : vector<1x1x1x128xf32> to vector<2x4x4x128xf32>
    %75 = arith.mulf %70, %74 : vector<2x4x4x128xf32>
    %76 = arith.addf %68, %75 : vector<2x4x4x128xf32>
    %c0_62 = arith.constant 0 : index
    %c1_63 = arith.constant 1 : index
    %c0_64 = arith.constant 0 : index
    %c0_65 = arith.constant 0 : index
    %77 = vector.load %arg12[%c0_62, %c1_63, %c0_64, %c0_65] : memref<2x5x5x128xbf16, #tpu.memory_space<vmem>>, vector<2x4x4x128xbf16>
    %78 = arith.extf %77 : vector<2x4x4x128xbf16> to vector<2x4x4x128xf32>
    %79 = vector.extract_strided_slice %30 {offsets = [2, 0, 0], sizes = [1, 1, 128], strides = [1, 1, 1]} : vector<3x3x128xf32> to vector<1x1x128xf32>
    %80 = vector.shape_cast %79 : vector<1x1x128xf32> to vector<128xf32>
    %81 = vector.shape_cast %80 : vector<128xf32> to vector<1x1x1x128xf32>
    %82 = vector.broadcast %81 : vector<1x1x1x128xf32> to vector<2x4x4x128xf32>
    %83 = arith.mulf %78, %82 : vector<2x4x4x128xf32>
    %84 = arith.addf %76, %83 : vector<2x4x4x128xf32>
    %c0_66 = arith.constant 0 : index
    %c1_67 = arith.constant 1 : index
    %c0_68 = arith.constant 0 : index
    %c0_69 = arith.constant 0 : index
    %85 = vector.load %arg13[%c0_66, %c1_67, %c0_68, %c0_69] : memref<2x5x4x128xbf16, #tpu.memory_space<vmem>>, vector<2x4x4x128xbf16>
    %86 = arith.extf %85 : vector<2x4x4x128xbf16> to vector<2x4x4x128xf32>
    %87 = vector.extract_strided_slice %30 {offsets = [2, 1, 0], sizes = [1, 1, 128], strides = [1, 1, 1]} : vector<3x3x128xf32> to vector<1x1x128xf32>
    %88 = vector.shape_cast %87 : vector<1x1x128xf32> to vector<128xf32>
    %89 = vector.shape_cast %88 : vector<128xf32> to vector<1x1x1x128xf32>
    %90 = vector.broadcast %89 : vector<1x1x1x128xf32> to vector<2x4x4x128xf32>
    %91 = arith.mulf %86, %90 : vector<2x4x4x128xf32>
    %92 = arith.addf %84, %91 : vector<2x4x4x128xf32>
    %c0_70 = arith.constant 0 : index
    %c1_71 = arith.constant 1 : index
    %c1_72 = arith.constant 1 : index
    %c0_73 = arith.constant 0 : index
    %93 = vector.load %arg12[%c0_70, %c1_71, %c1_72, %c0_73] : memref<2x5x5x128xbf16, #tpu.memory_space<vmem>>, vector<2x4x4x128xbf16>
    %94 = arith.extf %93 : vector<2x4x4x128xbf16> to vector<2x4x4x128xf32>
    %95 = vector.extract_strided_slice %30 {offsets = [2, 2, 0], sizes = [1, 1, 128], strides = [1, 1, 1]} : vector<3x3x128xf32> to vector<1x1x128xf32>
    %96 = vector.shape_cast %95 : vector<1x1x128xf32> to vector<128xf32>
    %97 = vector.shape_cast %96 : vector<128xf32> to vector<1x1x1x128xf32>
    %98 = vector.broadcast %97 : vector<1x1x1x128xf32> to vector<2x4x4x128xf32>
    %99 = arith.mulf %94, %98 : vector<2x4x4x128xf32>
    %100 = arith.addf %92, %99 : vector<2x4x4x128xf32>
    %c0_74 = arith.constant 0 : index
    %c0_75 = arith.constant 0 : index
    %101 = vector.load %arg4[%c0_74, %c0_75] : memref<1x128xf32, #tpu.memory_space<vmem>>, vector<1x128xf32>
    %102 = vector.shape_cast %101 : vector<1x128xf32> to vector<1x1x1x128xf32>
    %103 = vector.broadcast %102 : vector<1x1x1x128xf32> to vector<2x4x4x128xf32>
    %104 = arith.addf %100, %103 : vector<2x4x4x128xf32>
    %105 = arith.negf %104 : vector<2x4x4x128xf32>
    %106 = math.exp %105 : vector<2x4x4x128xf32>
    %cst_76 = arith.constant 1.000000e+00 : f32
    %107 = vector.broadcast %cst_76 : f32 to vector<2x4x4x128xf32>
    %108 = arith.addf %107, %106 : vector<2x4x4x128xf32>
    %109 = arith.divf %107, %108 : vector<2x4x4x128xf32>
    %110 = arith.mulf %104, %109 : vector<2x4x4x128xf32>
    %c0_77 = arith.constant 0 : index
    %c0_78 = arith.constant 0 : index
    %111 = vector.load %arg5[%c0_77, %c0_78] : memref<128x128xbf16, #tpu.memory_space<vmem>>, vector<128x128xbf16>
    %c0_79 = arith.constant 0 : index
    %c0_80 = arith.constant 0 : index
    %112 = vector.load %arg6[%c0_79, %c0_80] : memref<1x128xf32, #tpu.memory_space<vmem>>, vector<1x128xf32>
    %c0_81 = arith.constant 0 : index
    %c0_82 = arith.constant 0 : index
    %113 = vector.load %arg7[%c0_81, %c0_82] : memref<128x128xbf16, #tpu.memory_space<vmem>>, vector<128x128xbf16>
    %c0_83 = arith.constant 0 : index
    %c0_84 = arith.constant 0 : index
    %114 = vector.load %arg8[%c0_83, %c0_84] : memref<1x128xf32, #tpu.memory_space<vmem>>, vector<1x128xf32>
    %c0_85 = arith.constant 0 : index
    %c0_86 = arith.constant 0 : index
    %115 = vector.load %arg9[%c0_85, %c0_86] : memref<128x128xbf16, #tpu.memory_space<vmem>>, vector<128x128xbf16>
    %c0_87 = arith.constant 0 : index
    %c0_88 = arith.constant 0 : index
    %116 = vector.load %arg10[%c0_87, %c0_88] : memref<1x128xf32, #tpu.memory_space<vmem>>, vector<1x128xf32>
    %117 = vector.shape_cast %110 : vector<2x4x4x128xf32> to vector<2x16x128xf32>
    %cst_89 = arith.constant dense<0.000000e+00> : vector<2x128xf32>
    %118 = vector.multi_reduction <add>, %117, %cst_89 [1] : vector<2x16x128xf32> to vector<2x128xf32>
    %cst_90 = arith.constant 1.600000e+01 : f32
    %119 = vector.broadcast %cst_90 : f32 to vector<2x128xf32>
    %120 = arith.divf %118, %119 : vector<2x128xf32>
    %121 = arith.truncf %120 : vector<2x128xf32> to vector<2x128xbf16>
    %cst_91 = arith.constant dense<0.000000e+00> : vector<2x128xf32>
    %122 = tpu.matmul %121, %111, %cst_91 {dimension_numbers = #tpu.dot_dimension_numbers<[1], [0], [0], [1], [0, 0, 1, 1], [], []>} : vector<2x128xbf16>, vector<128x128xbf16>, vector<2x128xf32> -> vector<2x128xf32>
    %123 = vector.broadcast %112 : vector<1x128xf32> to vector<2x128xf32>
    %124 = arith.addf %122, %123 : vector<2x128xf32>
    %125 = arith.negf %124 : vector<2x128xf32>
    %126 = math.exp %125 : vector<2x128xf32>
    %cst_92 = arith.constant 1.000000e+00 : f32
    %127 = vector.broadcast %cst_92 : f32 to vector<2x128xf32>
    %128 = arith.addf %127, %126 : vector<2x128xf32>
    %129 = arith.divf %127, %128 : vector<2x128xf32>
    %130 = arith.mulf %124, %129 : vector<2x128xf32>
    %131 = arith.truncf %130 : vector<2x128xf32> to vector<2x128xbf16>
    %cst_93 = arith.constant dense<0.000000e+00> : vector<2x128xf32>
    %132 = tpu.matmul %131, %113, %cst_93 {dimension_numbers = #tpu.dot_dimension_numbers<[1], [0], [0], [1], [0, 0, 1, 1], [], []>} : vector<2x128xbf16>, vector<128x128xbf16>, vector<2x128xf32> -> vector<2x128xf32>
    %133 = vector.broadcast %114 : vector<1x128xf32> to vector<2x128xf32>
    %134 = arith.addf %132, %133 : vector<2x128xf32>
    %135 = arith.negf %134 : vector<2x128xf32>
    %136 = math.exp %135 : vector<2x128xf32>
    %cst_94 = arith.constant 1.000000e+00 : f32
    %137 = vector.broadcast %cst_94 : f32 to vector<2x128xf32>
    %138 = arith.addf %137, %136 : vector<2x128xf32>
    %139 = arith.divf %137, %138 : vector<2x128xf32>
    %140 = vector.shape_cast %139 : vector<2x128xf32> to vector<2x1x128xf32>
    %141 = vector.broadcast %140 : vector<2x1x128xf32> to vector<2x16x128xf32>
    %142 = arith.mulf %117, %141 : vector<2x16x128xf32>
    %143 = arith.truncf %142 : vector<2x16x128xf32> to vector<2x16x128xbf16>
    %144 = vector.shape_cast %143 : vector<2x16x128xbf16> to vector<32x128xbf16>
    %cst_95 = arith.constant dense<0.000000e+00> : vector<32x128xf32>
    %145 = tpu.matmul %144, %115, %cst_95 {dimension_numbers = #tpu.dot_dimension_numbers<[1], [0], [0], [1], [0, 0, 1, 1], [], []>} : vector<32x128xbf16>, vector<128x128xbf16>, vector<32x128xf32> -> vector<32x128xf32>
    %146 = vector.broadcast %116 : vector<1x128xf32> to vector<32x128xf32>
    %147 = arith.addf %145, %146 : vector<32x128xf32>
    %148 = vector.shape_cast %147 : vector<32x128xf32> to vector<2x4x4x128xf32>
    %149 = arith.truncf %148 : vector<2x4x4x128xf32> to vector<2x4x4x128xbf16>
    %c0_96 = arith.constant 0 : index
    %c0_97 = arith.constant 0 : index
    %c0_98 = arith.constant 0 : index
    %c0_99 = arith.constant 0 : index
    %150 = vector.load %arg11[%c0_96, %c0_97, %c0_98, %c0_99] : memref<2x4x4x128xbf16, #tpu.memory_space<vmem>>, vector<2x4x4x128xbf16>
    tpu.vector_store %arg11[%c0_96, %c0_97, %c0_98, %c0_99], %149 {strides = array<i32>} : memref<2x4x4x128xbf16, #tpu.memory_space<vmem>>, vector<2x4x4x128xbf16>,
    return
  }
}

module attributes {stable_mosaic.version = 11 : i64} {
  func.func @_mbconv_s1_kernel(%arg0: memref<2x4x4x128xbf16, #tpu.memory_space<vmem>>, %arg1: memref<128x128xbf16, #tpu.memory_space<vmem>>, %arg2: memref<1x128xf32, #tpu.memory_space<vmem>>, %arg3: memref<3x3x128xf32, #tpu.memory_space<vmem>>, %arg4: memref<1x128xf32, #tpu.memory_space<vmem>>, %arg5: memref<128x128xbf16, #tpu.memory_space<vmem>>, %arg6: memref<1x128xf32, #tpu.memory_space<vmem>>, %arg7: memref<128x128xbf16, #tpu.memory_space<vmem>>, %arg8: memref<1x128xf32, #tpu.memory_space<vmem>>, %arg9: memref<128x128xbf16, #tpu.memory_space<vmem>>, %arg10: memref<1x128xf32, #tpu.memory_space<vmem>>, %arg11: memref<2x4x4x128xbf16, #tpu.memory_space<vmem>>, %arg12: memref<2x6x6x128xbf16, #tpu.memory_space<vmem>>) attributes {dimension_semantics = [], scalar_prefetch = 0 : i64, scratch_operands = 1 : i64, tpu.core_type = #tpu.core_type<tc>} {
    %c0 = arith.constant 0 : index
    %c0_0 = arith.constant 0 : index
    %c0_1 = arith.constant 0 : index
    %c0_2 = arith.constant 0 : index
    %0 = vector.load %arg0[%c0, %c0_0, %c0_1, %c0_2] : memref<2x4x4x128xbf16, #tpu.memory_space<vmem>>, vector<2x4x4x128xbf16>
    %1 = vector.shape_cast %0 : vector<2x4x4x128xbf16> to vector<32x128xbf16>
    %c0_3 = arith.constant 0 : index
    %c0_4 = arith.constant 0 : index
    %2 = vector.load %arg1[%c0_3, %c0_4] : memref<128x128xbf16, #tpu.memory_space<vmem>>, vector<128x128xbf16>
    %cst = arith.constant dense<0.000000e+00> : vector<32x128xf32>
    %3 = tpu.matmul %1, %2, %cst {dimension_numbers = #tpu.dot_dimension_numbers<[1], [0], [0], [1], [0, 0, 1, 1], [], []>} : vector<32x128xbf16>, vector<128x128xbf16>, vector<32x128xf32> -> vector<32x128xf32>
    %c0_5 = arith.constant 0 : index
    %c0_6 = arith.constant 0 : index
    %4 = vector.load %arg2[%c0_5, %c0_6] : memref<1x128xf32, #tpu.memory_space<vmem>>, vector<1x128xf32>
    %5 = vector.broadcast %4 : vector<1x128xf32> to vector<32x128xf32>
    %6 = arith.addf %3, %5 : vector<32x128xf32>
    %7 = arith.negf %6 : vector<32x128xf32>
    %8 = math.exp %7 : vector<32x128xf32>
    %cst_7 = arith.constant 1.000000e+00 : f32
    %9 = vector.broadcast %cst_7 : f32 to vector<32x128xf32>
    %10 = arith.addf %9, %8 : vector<32x128xf32>
    %11 = arith.divf %9, %10 : vector<32x128xf32>
    %12 = arith.mulf %6, %11 : vector<32x128xf32>
    %13 = arith.truncf %12 : vector<32x128xf32> to vector<32x128xbf16>
    %14 = vector.shape_cast %13 : vector<32x128xbf16> to vector<2x4x4x128xbf16>
    %cst_8 = arith.constant 0.000000e+00 : bf16
    %15 = vector.broadcast %cst_8 : bf16 to vector<2x1x6x128xbf16>
    %c0_9 = arith.constant 0 : index
    %c0_10 = arith.constant 0 : index
    %c0_11 = arith.constant 0 : index
    %c0_12 = arith.constant 0 : index
    %16 = vector.load %arg12[%c0_9, %c0_10, %c0_11, %c0_12] : memref<2x6x6x128xbf16, #tpu.memory_space<vmem>>, vector<2x1x6x128xbf16>
    tpu.vector_store %arg12[%c0_9, %c0_10, %c0_11, %c0_12], %15 {strides = array<i32>} : memref<2x6x6x128xbf16, #tpu.memory_space<vmem>>, vector<2x1x6x128xbf16>,
    %cst_13 = arith.constant 0.000000e+00 : bf16
    %17 = vector.broadcast %cst_13 : bf16 to vector<2x1x6x128xbf16>
    %c0_14 = arith.constant 0 : index
    %c5 = arith.constant 5 : index
    %c0_15 = arith.constant 0 : index
    %c0_16 = arith.constant 0 : index
    %18 = vector.load %arg12[%c0_14, %c5, %c0_15, %c0_16] : memref<2x6x6x128xbf16, #tpu.memory_space<vmem>>, vector<2x1x6x128xbf16>
    tpu.vector_store %arg12[%c0_14, %c5, %c0_15, %c0_16], %17 {strides = array<i32>} : memref<2x6x6x128xbf16, #tpu.memory_space<vmem>>, vector<2x1x6x128xbf16>,
    %cst_17 = arith.constant 0.000000e+00 : bf16
    %19 = vector.broadcast %cst_17 : bf16 to vector<2x4x1x128xbf16>
    %c0_18 = arith.constant 0 : index
    %c1 = arith.constant 1 : index
    %c0_19 = arith.constant 0 : index
    %c0_20 = arith.constant 0 : index
    %20 = vector.load %arg12[%c0_18, %c1, %c0_19, %c0_20] : memref<2x6x6x128xbf16, #tpu.memory_space<vmem>>, vector<2x4x1x128xbf16>
    tpu.vector_store %arg12[%c0_18, %c1, %c0_19, %c0_20], %19 {strides = array<i32>} : memref<2x6x6x128xbf16, #tpu.memory_space<vmem>>, vector<2x4x1x128xbf16>,
    %cst_21 = arith.constant 0.000000e+00 : bf16
    %21 = vector.broadcast %cst_21 : bf16 to vector<2x4x1x128xbf16>
    %c0_22 = arith.constant 0 : index
    %c1_23 = arith.constant 1 : index
    %c5_24 = arith.constant 5 : index
    %c0_25 = arith.constant 0 : index
    %22 = vector.load %arg12[%c0_22, %c1_23, %c5_24, %c0_25] : memref<2x6x6x128xbf16, #tpu.memory_space<vmem>>, vector<2x4x1x128xbf16>
    tpu.vector_store %arg12[%c0_22, %c1_23, %c5_24, %c0_25], %21 {strides = array<i32>} : memref<2x6x6x128xbf16, #tpu.memory_space<vmem>>, vector<2x4x1x128xbf16>,
    %c0_26 = arith.constant 0 : index
    %c1_27 = arith.constant 1 : index
    %c1_28 = arith.constant 1 : index
    %c0_29 = arith.constant 0 : index
    %23 = vector.load %arg12[%c0_26, %c1_27, %c1_28, %c0_29] : memref<2x6x6x128xbf16, #tpu.memory_space<vmem>>, vector<2x4x4x128xbf16>
    tpu.vector_store %arg12[%c0_26, %c1_27, %c1_28, %c0_29], %14 {strides = array<i32>} : memref<2x6x6x128xbf16, #tpu.memory_space<vmem>>, vector<2x4x4x128xbf16>,
    %c0_30 = arith.constant 0 : index
    %c0_31 = arith.constant 0 : index
    %c0_32 = arith.constant 0 : index
    %24 = vector.load %arg3[%c0_30, %c0_31, %c0_32] : memref<3x3x128xf32, #tpu.memory_space<vmem>>, vector<3x3x128xf32>
    %cst_33 = arith.constant 0.000000e+00 : f32
    %25 = vector.broadcast %cst_33 : f32 to vector<2x4x4x128xf32>
    %c0_34 = arith.constant 0 : index
    %c0_35 = arith.constant 0 : index
    %c0_36 = arith.constant 0 : index
    %c0_37 = arith.constant 0 : index
    %26 = vector.load %arg12[%c0_34, %c0_35, %c0_36, %c0_37] : memref<2x6x6x128xbf16, #tpu.memory_space<vmem>>, vector<2x4x4x128xbf16>
    %27 = arith.extf %26 : vector<2x4x4x128xbf16> to vector<2x4x4x128xf32>
    %28 = vector.extract_strided_slice %24 {offsets = [0, 0, 0], sizes = [1, 1, 128], strides = [1, 1, 1]} : vector<3x3x128xf32> to vector<1x1x128xf32>
    %29 = vector.shape_cast %28 : vector<1x1x128xf32> to vector<128xf32>
    %30 = vector.shape_cast %29 : vector<128xf32> to vector<1x1x1x128xf32>
    %31 = vector.broadcast %30 : vector<1x1x1x128xf32> to vector<2x4x4x128xf32>
    %32 = arith.mulf %27, %31 : vector<2x4x4x128xf32>
    %33 = arith.addf %25, %32 : vector<2x4x4x128xf32>
    %c0_38 = arith.constant 0 : index
    %c0_39 = arith.constant 0 : index
    %c1_40 = arith.constant 1 : index
    %c0_41 = arith.constant 0 : index
    %34 = vector.load %arg12[%c0_38, %c0_39, %c1_40, %c0_41] : memref<2x6x6x128xbf16, #tpu.memory_space<vmem>>, vector<2x4x4x128xbf16>
    %35 = arith.extf %34 : vector<2x4x4x128xbf16> to vector<2x4x4x128xf32>
    %36 = vector.extract_strided_slice %24 {offsets = [0, 1, 0], sizes = [1, 1, 128], strides = [1, 1, 1]} : vector<3x3x128xf32> to vector<1x1x128xf32>
    %37 = vector.shape_cast %36 : vector<1x1x128xf32> to vector<128xf32>
    %38 = vector.shape_cast %37 : vector<128xf32> to vector<1x1x1x128xf32>
    %39 = vector.broadcast %38 : vector<1x1x1x128xf32> to vector<2x4x4x128xf32>
    %40 = arith.mulf %35, %39 : vector<2x4x4x128xf32>
    %41 = arith.addf %33, %40 : vector<2x4x4x128xf32>
    %c0_42 = arith.constant 0 : index
    %c0_43 = arith.constant 0 : index
    %c2 = arith.constant 2 : index
    %c0_44 = arith.constant 0 : index
    %42 = vector.load %arg12[%c0_42, %c0_43, %c2, %c0_44] : memref<2x6x6x128xbf16, #tpu.memory_space<vmem>>, vector<2x4x4x128xbf16>
    %43 = arith.extf %42 : vector<2x4x4x128xbf16> to vector<2x4x4x128xf32>
    %44 = vector.extract_strided_slice %24 {offsets = [0, 2, 0], sizes = [1, 1, 128], strides = [1, 1, 1]} : vector<3x3x128xf32> to vector<1x1x128xf32>
    %45 = vector.shape_cast %44 : vector<1x1x128xf32> to vector<128xf32>
    %46 = vector.shape_cast %45 : vector<128xf32> to vector<1x1x1x128xf32>
    %47 = vector.broadcast %46 : vector<1x1x1x128xf32> to vector<2x4x4x128xf32>
    %48 = arith.mulf %43, %47 : vector<2x4x4x128xf32>
    %49 = arith.addf %41, %48 : vector<2x4x4x128xf32>
    %c0_45 = arith.constant 0 : index
    %c1_46 = arith.constant 1 : index
    %c0_47 = arith.constant 0 : index
    %c0_48 = arith.constant 0 : index
    %50 = vector.load %arg12[%c0_45, %c1_46, %c0_47, %c0_48] : memref<2x6x6x128xbf16, #tpu.memory_space<vmem>>, vector<2x4x4x128xbf16>
    %51 = arith.extf %50 : vector<2x4x4x128xbf16> to vector<2x4x4x128xf32>
    %52 = vector.extract_strided_slice %24 {offsets = [1, 0, 0], sizes = [1, 1, 128], strides = [1, 1, 1]} : vector<3x3x128xf32> to vector<1x1x128xf32>
    %53 = vector.shape_cast %52 : vector<1x1x128xf32> to vector<128xf32>
    %54 = vector.shape_cast %53 : vector<128xf32> to vector<1x1x1x128xf32>
    %55 = vector.broadcast %54 : vector<1x1x1x128xf32> to vector<2x4x4x128xf32>
    %56 = arith.mulf %51, %55 : vector<2x4x4x128xf32>
    %57 = arith.addf %49, %56 : vector<2x4x4x128xf32>
    %c0_49 = arith.constant 0 : index
    %c1_50 = arith.constant 1 : index
    %c1_51 = arith.constant 1 : index
    %c0_52 = arith.constant 0 : index
    %58 = vector.load %arg12[%c0_49, %c1_50, %c1_51, %c0_52] : memref<2x6x6x128xbf16, #tpu.memory_space<vmem>>, vector<2x4x4x128xbf16>
    %59 = arith.extf %58 : vector<2x4x4x128xbf16> to vector<2x4x4x128xf32>
    %60 = vector.extract_strided_slice %24 {offsets = [1, 1, 0], sizes = [1, 1, 128], strides = [1, 1, 1]} : vector<3x3x128xf32> to vector<1x1x128xf32>
    %61 = vector.shape_cast %60 : vector<1x1x128xf32> to vector<128xf32>
    %62 = vector.shape_cast %61 : vector<128xf32> to vector<1x1x1x128xf32>
    %63 = vector.broadcast %62 : vector<1x1x1x128xf32> to vector<2x4x4x128xf32>
    %64 = arith.mulf %59, %63 : vector<2x4x4x128xf32>
    %65 = arith.addf %57, %64 : vector<2x4x4x128xf32>
    %c0_53 = arith.constant 0 : index
    %c1_54 = arith.constant 1 : index
    %c2_55 = arith.constant 2 : index
    %c0_56 = arith.constant 0 : index
    %66 = vector.load %arg12[%c0_53, %c1_54, %c2_55, %c0_56] : memref<2x6x6x128xbf16, #tpu.memory_space<vmem>>, vector<2x4x4x128xbf16>
    %67 = arith.extf %66 : vector<2x4x4x128xbf16> to vector<2x4x4x128xf32>
    %68 = vector.extract_strided_slice %24 {offsets = [1, 2, 0], sizes = [1, 1, 128], strides = [1, 1, 1]} : vector<3x3x128xf32> to vector<1x1x128xf32>
    %69 = vector.shape_cast %68 : vector<1x1x128xf32> to vector<128xf32>
    %70 = vector.shape_cast %69 : vector<128xf32> to vector<1x1x1x128xf32>
    %71 = vector.broadcast %70 : vector<1x1x1x128xf32> to vector<2x4x4x128xf32>
    %72 = arith.mulf %67, %71 : vector<2x4x4x128xf32>
    %73 = arith.addf %65, %72 : vector<2x4x4x128xf32>
    %c0_57 = arith.constant 0 : index
    %c2_58 = arith.constant 2 : index
    %c0_59 = arith.constant 0 : index
    %c0_60 = arith.constant 0 : index
    %74 = vector.load %arg12[%c0_57, %c2_58, %c0_59, %c0_60] : memref<2x6x6x128xbf16, #tpu.memory_space<vmem>>, vector<2x4x4x128xbf16>
    %75 = arith.extf %74 : vector<2x4x4x128xbf16> to vector<2x4x4x128xf32>
    %76 = vector.extract_strided_slice %24 {offsets = [2, 0, 0], sizes = [1, 1, 128], strides = [1, 1, 1]} : vector<3x3x128xf32> to vector<1x1x128xf32>
    %77 = vector.shape_cast %76 : vector<1x1x128xf32> to vector<128xf32>
    %78 = vector.shape_cast %77 : vector<128xf32> to vector<1x1x1x128xf32>
    %79 = vector.broadcast %78 : vector<1x1x1x128xf32> to vector<2x4x4x128xf32>
    %80 = arith.mulf %75, %79 : vector<2x4x4x128xf32>
    %81 = arith.addf %73, %80 : vector<2x4x4x128xf32>
    %c0_61 = arith.constant 0 : index
    %c2_62 = arith.constant 2 : index
    %c1_63 = arith.constant 1 : index
    %c0_64 = arith.constant 0 : index
    %82 = vector.load %arg12[%c0_61, %c2_62, %c1_63, %c0_64] : memref<2x6x6x128xbf16, #tpu.memory_space<vmem>>, vector<2x4x4x128xbf16>
    %83 = arith.extf %82 : vector<2x4x4x128xbf16> to vector<2x4x4x128xf32>
    %84 = vector.extract_strided_slice %24 {offsets = [2, 1, 0], sizes = [1, 1, 128], strides = [1, 1, 1]} : vector<3x3x128xf32> to vector<1x1x128xf32>
    %85 = vector.shape_cast %84 : vector<1x1x128xf32> to vector<128xf32>
    %86 = vector.shape_cast %85 : vector<128xf32> to vector<1x1x1x128xf32>
    %87 = vector.broadcast %86 : vector<1x1x1x128xf32> to vector<2x4x4x128xf32>
    %88 = arith.mulf %83, %87 : vector<2x4x4x128xf32>
    %89 = arith.addf %81, %88 : vector<2x4x4x128xf32>
    %c0_65 = arith.constant 0 : index
    %c2_66 = arith.constant 2 : index
    %c2_67 = arith.constant 2 : index
    %c0_68 = arith.constant 0 : index
    %90 = vector.load %arg12[%c0_65, %c2_66, %c2_67, %c0_68] : memref<2x6x6x128xbf16, #tpu.memory_space<vmem>>, vector<2x4x4x128xbf16>
    %91 = arith.extf %90 : vector<2x4x4x128xbf16> to vector<2x4x4x128xf32>
    %92 = vector.extract_strided_slice %24 {offsets = [2, 2, 0], sizes = [1, 1, 128], strides = [1, 1, 1]} : vector<3x3x128xf32> to vector<1x1x128xf32>
    %93 = vector.shape_cast %92 : vector<1x1x128xf32> to vector<128xf32>
    %94 = vector.shape_cast %93 : vector<128xf32> to vector<1x1x1x128xf32>
    %95 = vector.broadcast %94 : vector<1x1x1x128xf32> to vector<2x4x4x128xf32>
    %96 = arith.mulf %91, %95 : vector<2x4x4x128xf32>
    %97 = arith.addf %89, %96 : vector<2x4x4x128xf32>
    %c0_69 = arith.constant 0 : index
    %c0_70 = arith.constant 0 : index
    %98 = vector.load %arg4[%c0_69, %c0_70] : memref<1x128xf32, #tpu.memory_space<vmem>>, vector<1x128xf32>
    %99 = vector.shape_cast %98 : vector<1x128xf32> to vector<1x1x1x128xf32>
    %100 = vector.broadcast %99 : vector<1x1x1x128xf32> to vector<2x4x4x128xf32>
    %101 = arith.addf %97, %100 : vector<2x4x4x128xf32>
    %102 = arith.negf %101 : vector<2x4x4x128xf32>
    %103 = math.exp %102 : vector<2x4x4x128xf32>
    %cst_71 = arith.constant 1.000000e+00 : f32
    %104 = vector.broadcast %cst_71 : f32 to vector<2x4x4x128xf32>
    %105 = arith.addf %104, %103 : vector<2x4x4x128xf32>
    %106 = arith.divf %104, %105 : vector<2x4x4x128xf32>
    %107 = arith.mulf %101, %106 : vector<2x4x4x128xf32>
    %c0_72 = arith.constant 0 : index
    %c0_73 = arith.constant 0 : index
    %108 = vector.load %arg5[%c0_72, %c0_73] : memref<128x128xbf16, #tpu.memory_space<vmem>>, vector<128x128xbf16>
    %c0_74 = arith.constant 0 : index
    %c0_75 = arith.constant 0 : index
    %109 = vector.load %arg6[%c0_74, %c0_75] : memref<1x128xf32, #tpu.memory_space<vmem>>, vector<1x128xf32>
    %c0_76 = arith.constant 0 : index
    %c0_77 = arith.constant 0 : index
    %110 = vector.load %arg7[%c0_76, %c0_77] : memref<128x128xbf16, #tpu.memory_space<vmem>>, vector<128x128xbf16>
    %c0_78 = arith.constant 0 : index
    %c0_79 = arith.constant 0 : index
    %111 = vector.load %arg8[%c0_78, %c0_79] : memref<1x128xf32, #tpu.memory_space<vmem>>, vector<1x128xf32>
    %c0_80 = arith.constant 0 : index
    %c0_81 = arith.constant 0 : index
    %112 = vector.load %arg9[%c0_80, %c0_81] : memref<128x128xbf16, #tpu.memory_space<vmem>>, vector<128x128xbf16>
    %c0_82 = arith.constant 0 : index
    %c0_83 = arith.constant 0 : index
    %113 = vector.load %arg10[%c0_82, %c0_83] : memref<1x128xf32, #tpu.memory_space<vmem>>, vector<1x128xf32>
    %114 = vector.shape_cast %107 : vector<2x4x4x128xf32> to vector<2x16x128xf32>
    %cst_84 = arith.constant dense<0.000000e+00> : vector<2x128xf32>
    %115 = vector.multi_reduction <add>, %114, %cst_84 [1] : vector<2x16x128xf32> to vector<2x128xf32>
    %cst_85 = arith.constant 1.600000e+01 : f32
    %116 = vector.broadcast %cst_85 : f32 to vector<2x128xf32>
    %117 = arith.divf %115, %116 : vector<2x128xf32>
    %118 = arith.truncf %117 : vector<2x128xf32> to vector<2x128xbf16>
    %cst_86 = arith.constant dense<0.000000e+00> : vector<2x128xf32>
    %119 = tpu.matmul %118, %108, %cst_86 {dimension_numbers = #tpu.dot_dimension_numbers<[1], [0], [0], [1], [0, 0, 1, 1], [], []>} : vector<2x128xbf16>, vector<128x128xbf16>, vector<2x128xf32> -> vector<2x128xf32>
    %120 = vector.broadcast %109 : vector<1x128xf32> to vector<2x128xf32>
    %121 = arith.addf %119, %120 : vector<2x128xf32>
    %122 = arith.negf %121 : vector<2x128xf32>
    %123 = math.exp %122 : vector<2x128xf32>
    %cst_87 = arith.constant 1.000000e+00 : f32
    %124 = vector.broadcast %cst_87 : f32 to vector<2x128xf32>
    %125 = arith.addf %124, %123 : vector<2x128xf32>
    %126 = arith.divf %124, %125 : vector<2x128xf32>
    %127 = arith.mulf %121, %126 : vector<2x128xf32>
    %128 = arith.truncf %127 : vector<2x128xf32> to vector<2x128xbf16>
    %cst_88 = arith.constant dense<0.000000e+00> : vector<2x128xf32>
    %129 = tpu.matmul %128, %110, %cst_88 {dimension_numbers = #tpu.dot_dimension_numbers<[1], [0], [0], [1], [0, 0, 1, 1], [], []>} : vector<2x128xbf16>, vector<128x128xbf16>, vector<2x128xf32> -> vector<2x128xf32>
    %130 = vector.broadcast %111 : vector<1x128xf32> to vector<2x128xf32>
    %131 = arith.addf %129, %130 : vector<2x128xf32>
    %132 = arith.negf %131 : vector<2x128xf32>
    %133 = math.exp %132 : vector<2x128xf32>
    %cst_89 = arith.constant 1.000000e+00 : f32
    %134 = vector.broadcast %cst_89 : f32 to vector<2x128xf32>
    %135 = arith.addf %134, %133 : vector<2x128xf32>
    %136 = arith.divf %134, %135 : vector<2x128xf32>
    %137 = vector.shape_cast %136 : vector<2x128xf32> to vector<2x1x128xf32>
    %138 = vector.broadcast %137 : vector<2x1x128xf32> to vector<2x16x128xf32>
    %139 = arith.mulf %114, %138 : vector<2x16x128xf32>
    %140 = arith.truncf %139 : vector<2x16x128xf32> to vector<2x16x128xbf16>
    %141 = vector.shape_cast %140 : vector<2x16x128xbf16> to vector<32x128xbf16>
    %cst_90 = arith.constant dense<0.000000e+00> : vector<32x128xf32>
    %142 = tpu.matmul %141, %112, %cst_90 {dimension_numbers = #tpu.dot_dimension_numbers<[1], [0], [0], [1], [0, 0, 1, 1], [], []>} : vector<32x128xbf16>, vector<128x128xbf16>, vector<32x128xf32> -> vector<32x128xf32>
    %143 = vector.broadcast %113 : vector<1x128xf32> to vector<32x128xf32>
    %144 = arith.addf %142, %143 : vector<32x128xf32>
    %145 = vector.shape_cast %144 : vector<32x128xf32> to vector<2x4x4x128xf32>
    %c0_91 = arith.constant 0 : index
    %c0_92 = arith.constant 0 : index
    %c0_93 = arith.constant 0 : index
    %c0_94 = arith.constant 0 : index
    %146 = vector.load %arg0[%c0_91, %c0_92, %c0_93, %c0_94] : memref<2x4x4x128xbf16, #tpu.memory_space<vmem>>, vector<2x4x4x128xbf16>
    %147 = arith.extf %146 : vector<2x4x4x128xbf16> to vector<2x4x4x128xf32>
    %148 = arith.addf %145, %147 : vector<2x4x4x128xf32>
    %149 = arith.truncf %148 : vector<2x4x4x128xf32> to vector<2x4x4x128xbf16>
    %c0_95 = arith.constant 0 : index
    %c0_96 = arith.constant 0 : index
    %c0_97 = arith.constant 0 : index
    %c0_98 = arith.constant 0 : index
    %150 = vector.load %arg11[%c0_95, %c0_96, %c0_97, %c0_98] : memref<2x4x4x128xbf16, #tpu.memory_space<vmem>>, vector<2x4x4x128xbf16>
    tpu.vector_store %arg11[%c0_95, %c0_96, %c0_97, %c0_98], %149 {strides = array<i32>} : memref<2x4x4x128xbf16, #tpu.memory_space<vmem>>, vector<2x4x4x128xbf16>,
    return
  }
}

module attributes {stable_mosaic.version = 11 : i64} {
  func.func @_head_pool_fc_kernel(%arg0: memref<2x4x4x128xbf16, #tpu.memory_space<vmem>>, %arg1: memref<128x128xbf16, #tpu.memory_space<vmem>>, %arg2: memref<1x128xf32, #tpu.memory_space<vmem>>, %arg3: memref<128x128xbf16, #tpu.memory_space<vmem>>, %arg4: memref<1x128xf32, #tpu.memory_space<vmem>>, %arg5: memref<2x4xf32, #tpu.memory_space<vmem>>) attributes {dimension_semantics = [], scalar_prefetch = 0 : i64, scratch_operands = 0 : i64, tpu.core_type = #tpu.core_type<tc>} {
    %c0 = arith.constant 0 : index
    %c0_0 = arith.constant 0 : index
    %c0_1 = arith.constant 0 : index
    %c0_2 = arith.constant 0 : index
    %0 = vector.load %arg0[%c0, %c0_0, %c0_1, %c0_2] : memref<2x4x4x128xbf16, #tpu.memory_space<vmem>>, vector<2x4x4x128xbf16>
    %1 = vector.shape_cast %0 : vector<2x4x4x128xbf16> to vector<32x128xbf16>
    %c0_3 = arith.constant 0 : index
    %c0_4 = arith.constant 0 : index
    %2 = vector.load %arg1[%c0_3, %c0_4] : memref<128x128xbf16, #tpu.memory_space<vmem>>, vector<128x128xbf16>
    %cst = arith.constant dense<0.000000e+00> : vector<32x128xf32>
    %3 = tpu.matmul %1, %2, %cst {dimension_numbers = #tpu.dot_dimension_numbers<[1], [0], [0], [1], [0, 0, 1, 1], [], []>} : vector<32x128xbf16>, vector<128x128xbf16>, vector<32x128xf32> -> vector<32x128xf32>
    %c0_5 = arith.constant 0 : index
    %c0_6 = arith.constant 0 : index
    %4 = vector.load %arg2[%c0_5, %c0_6] : memref<1x128xf32, #tpu.memory_space<vmem>>, vector<1x128xf32>
    %5 = vector.broadcast %4 : vector<1x128xf32> to vector<32x128xf32>
    %6 = arith.addf %3, %5 : vector<32x128xf32>
    %7 = arith.negf %6 : vector<32x128xf32>
    %8 = math.exp %7 : vector<32x128xf32>
    %cst_7 = arith.constant 1.000000e+00 : f32
    %9 = vector.broadcast %cst_7 : f32 to vector<32x128xf32>
    %10 = arith.addf %9, %8 : vector<32x128xf32>
    %11 = arith.divf %9, %10 : vector<32x128xf32>
    %12 = arith.mulf %6, %11 : vector<32x128xf32>
    %13 = vector.shape_cast %12 : vector<32x128xf32> to vector<2x16x128xf32>
    %cst_8 = arith.constant dense<0.000000e+00> : vector<2x128xf32>
    %14 = vector.multi_reduction <add>, %13, %cst_8 [1] : vector<2x16x128xf32> to vector<2x128xf32>
    %cst_9 = arith.constant 1.600000e+01 : f32
    %15 = vector.broadcast %cst_9 : f32 to vector<2x128xf32>
    %16 = arith.divf %14, %15 : vector<2x128xf32>
    %17 = arith.truncf %16 : vector<2x128xf32> to vector<2x128xbf16>
    %c0_10 = arith.constant 0 : index
    %c0_11 = arith.constant 0 : index
    %18 = vector.load %arg3[%c0_10, %c0_11] : memref<128x128xbf16, #tpu.memory_space<vmem>>, vector<128x128xbf16>
    %cst_12 = arith.constant dense<0.000000e+00> : vector<2x128xf32>
    %19 = tpu.matmul %17, %18, %cst_12 {dimension_numbers = #tpu.dot_dimension_numbers<[1], [0], [0], [1], [0, 0, 1, 1], [], []>} : vector<2x128xbf16>, vector<128x128xbf16>, vector<2x128xf32> -> vector<2x128xf32>
    %c0_13 = arith.constant 0 : index
    %c0_14 = arith.constant 0 : index
    %20 = vector.load %arg4[%c0_13, %c0_14] : memref<1x128xf32, #tpu.memory_space<vmem>>, vector<1x128xf32>
    %21 = vector.broadcast %20 : vector<1x128xf32> to vector<2x128xf32>
    %22 = arith.addf %19, %21 : vector<2x128xf32>
    %23 = vector.extract_strided_slice %22 {offsets = [0, 0], sizes = [2, 4], strides = [1, 1]} : vector<2x128xf32> to vector<2x4xf32>
    %24 = arith.negf %23 : vector<2x4xf32>
    %25 = math.exp %24 : vector<2x4xf32>
    %cst_15 = arith.constant 1.000000e+00 : f32
    %26 = vector.broadcast %cst_15 : f32 to vector<2x4xf32>
    %27 = arith.addf %26, %25 : vector<2x4xf32>
    %28 = arith.divf %26, %27 : vector<2x4xf32>
    %c0_16 = arith.constant 0 : index
    %c0_17 = arith.constant 0 : index
    %29 = vector.load %arg5[%c0_16, %c0_17] : memref<2x4xf32, #tpu.memory_space<vmem>>, vector<2x4xf32>
    tpu.vector_store %arg5[%c0_16, %c0_17], %28 {strides = array<i32>} : memref<2x4xf32, #tpu.memory_space<vmem>>, vector<2x4xf32>,
    return
  }
}

</mosaic_0001>

<bundles_post_ra>
// kernel: effnet_forward.5
= control target key start
LH: loop header
LB: loop body
LE: loop exit
PB: predicated region body
PF: predicated region fallthrough
CT: control target
= control target key end

     0   :  { %s858_s1 = inlined_call_operand.vmem [shape: bf16[128,128], index: 1, kind: input, shape index: {}]   ;;  %s859_s0 = inlined_call_operand.vmem [shape: bf16[128,128], index: 0, kind: input, shape index: {}]   ;;  %s860_s2 = inlined_call_operand.vmem [shape: f32[1,128], index: 2, kind: input, shape index: {}]   ;;  %s861_s3 = inlined_call_operand.vmem [shape: bf16[128,128], index: 3, kind: output, shape index: {}]  }
   0x1   :  { %v619_v0 = vld [vmem:[%s858_s1 + $0x38] sm:$0xff]   ;;  %v620_v1 = vld [vmem:[%s858_s1 + $0x30] sm:$0xff]   ;;  %v621_v2 = vld [vmem:[%s858_s1 + $0x28] sm:$0xff]  }
   0x2   :  { %571 = vmatprep.subr.bf16.mxu0 %v619_v0  ;;  %603 = vmatprep.subr.bf16.mxu1 %v619_v0  ;;  %v622_v3 = vld [vmem:[%s858_s1 + $0x20] sm:$0xff]   ;;  %v623_v6 = vld [vmem:[%s858_s1 + $0x18] sm:$0xff]   ;;  %v624_v7 = vld [vmem:[%s858_s1 + $0x10] sm:$0xff]  }
   0x3   :  { %572 = vmatpush3.bf16.msra.mxu0 %v619_v0  ;;  %611 = vmatpush3.bf16.msra.mxu1 %v619_v0  ;;  %v627_v4 = vld [vmem:[%s859_s0] sm:$0xff]   ;;  %v625_v8 = vld [vmem:[%s858_s1 + $0x8] sm:$0xff]   ;;  %v631_v12 = vld [vmem:[%s859_s0 + $0x10] sm:$0xff]  }
   0x4   :  { %573 = vmatprep.subr.bf16.mxu0 %v620_v1  ;;  %604 = vmatprep.subr.bf16.mxu1 %v620_v1  ;;  %v628_v5 = vld [vmem:[%s859_s0 + $0x20] sm:$0xff]   ;;  %v629_v10 = vld [vmem:[%s859_s0 + $0x8] sm:$0xff]   ;;  %v632_v13 = vld [vmem:[%s859_s0 + $0x30] sm:$0xff]  }
   0x5   :  { %587 = vmatprep.mubr.bf16.mxu0 %v627_v4  ;;  %595 = vmatprep.mubr.bf16.mxu1 %v628_v5  ;;  %v626_v9 = vld [vmem:[%s858_s1] sm:$0xff]   ;;  %v630_v11 = vld [vmem:[%s859_s0 + $0x28] sm:$0xff]   ;;  %v633_v14 = vld [vmem:[%s859_s0 + $0x18] sm:$0xff]  }
   0x6   :  { %v634_v15 = vld [vmem:[%s859_s0 + $0x38] sm:$0xff]   ;;  %v443_v16 = vld [vmem:[%s860_s2] ss:$0 sm:$0xff] }
   0x7   :  { %574 = vmatpush3.bf16.msra.mxu0 %v620_v1  ;;  %612 = vmatpush3.bf16.msra.mxu1 %v620_v1 }
   0x8   :  { %575 = vmatprep.subr.bf16.mxu0 %v621_v2  ;;  %605 = vmatprep.subr.bf16.mxu1 %v621_v2 }
   0xb   :  { %576 = vmatpush3.bf16.msra.mxu0 %v621_v2  ;;  %613 = vmatpush3.bf16.msra.mxu1 %v621_v2 }
   0xc   :  { %577 = vmatprep.subr.bf16.mxu0 %v622_v3  ;;  %606 = vmatprep.subr.bf16.mxu1 %v622_v3 }
   0xf   :  { %578 = vmatpush3.bf16.msra.mxu0 %v622_v3  ;;  %614 = vmatpush3.bf16.msra.mxu1 %v622_v3 }
  0x10   :  { %579 = vmatprep.subr.bf16.mxu0 %v623_v6  ;;  %607 = vmatprep.subr.bf16.mxu1 %v623_v6 }
  0x13   :  { %580 = vmatpush3.bf16.msra.mxu0 %v623_v6  ;;  %615 = vmatpush3.bf16.msra.mxu1 %v623_v6 }
  0x14   :  { %581 = vmatprep.subr.bf16.mxu0 %v624_v7  ;;  %608 = vmatprep.subr.bf16.mxu1 %v624_v7 }
  0x17   :  { %582 = vmatpush3.bf16.msra.mxu0 %v624_v7  ;;  %616 = vmatpush3.bf16.msra.mxu1 %v624_v7 }
  0x18   :  { %583 = vmatprep.subr.bf16.mxu0 %v625_v8  ;;  %609 = vmatprep.subr.bf16.mxu1 %v625_v8 }
  0x1b   :  { %584 = vmatpush3.bf16.msra.mxu0 %v625_v8  ;;  %617 = vmatpush3.bf16.msra.mxu1 %v625_v8 }
  0x1c   :  { %585 = vmatprep.subr.bf16.mxu0 %v626_v9  ;;  %610 = vmatprep.subr.bf16.mxu1 %v626_v9 }
  0x1f   :  { %586 = vmatpush3.bf16.msra.mxu0 %v626_v9  ;;  %618 = vmatpush3.bf16.msra.mxu1 %v626_v9 }
  0x22   :  { %588 = vmatmul.mubr.bf16.vlgmr.msra.gmra.mxu0 %v629_v10  ;;  %596 = vmatmul.mubr.bf16.vlgmr.msra.gmra.mxu1 %v630_v11 }
  0x23   :  { %591 = vmatprep.mubr.bf16.mxu0 %v631_v12  ;;  %599 = vmatprep.mubr.bf16.mxu1 %v632_v13 }
  0x2a   :  { %592 = vmatmul.mubr.bf16.gmra.mxu0 %v633_v14  ;;  %600 = vmatmul.mubr.bf16.gmra.mxu1 %v634_v15 }
  0xe2   :  { %v589_v17 = vpop.f32.mrf.mxu0  ;;  %v597_v18 = vpop.f32.mrf.mxu1 }
  0xe3   :  { %v770_v19 = vadd.f32 %v589_v17, %v443_v16  ;;  %v772_v20 = vadd.f32 %v597_v18, %v443_v16 }
  0xe4   :  { %v184_v21 = vpop.f32.mrf.mxu0  ;;  %v216_v22 = vpop.f32.mrf.mxu1 }
  0xe5   :  { %v462_v23 = vmul.f32 -1.442695, %v770_v19  ;;  %v470_v24 = vmul.f32 -1.442695, %v772_v20  ;;  %v776_v25 = vadd.f32 %v443_v16, %v184_v21  ;;  %v778_v26 = vadd.f32 %v443_v16, %v216_v22 }
  0xe6   :  { %v590_v27 = vpop.f32.mrf.mxu0  ;;  %v598_v28 = vpop.f32.mrf.mxu1 }
  0xe7   :  { %635 = vpow2.f32 %v462_v23  ;;  %v460_v29 = vmul.f32 -1.442695, %v776_v25  ;;  %v468_v30 = vmul.f32 -1.442695, %v778_v26  ;;  %v782_v31 = vadd.f32 %v590_v27, %v443_v16 }
  0xe8   :  { %637 = vpow2.f32 %v470_v24  ;;  %v784_v32 = vadd.f32 %v598_v28, %v443_v16  ;;  %v187_v33 = vpop.f32.mrf.mxu0  ;;  %v219_v34 = vpop.f32.mrf.mxu1 }
  0xe9   :  { %639 = vpow2.f32 %v460_v29  ;;  %v463_v35 = vmul.f32 -1.442695, %v782_v31  ;;  %v787_v36 = vadd.f32 %v443_v16, %v187_v33  ;;  %v789_v37 = vadd.f32 %v443_v16, %v219_v34 }
  0xea   :  { %641 = vpow2.f32 %v468_v30  ;;  %v471_v38 = vmul.f32 -1.442695, %v784_v32  ;;  %v593_v39 = vpop.f32.mrf.mxu0  ;;  %v601_v40 = vpop.f32.mrf.mxu1 }
  0xeb   :  { %643 = vpow2.f32 %v463_v35  ;;  %v461_v41 = vmul.f32 -1.442695, %v787_v36  ;;  %v469_v42 = vmul.f32 -1.442695, %v789_v37  ;;  %v794_v43 = vadd.f32 %v593_v39, %v443_v16 }
  0xec   :  { %645 = vpow2.f32 %v471_v38  ;;  %v796_v44 = vadd.f32 %v601_v40, %v443_v16  ;;  %v200_v45 = vpop.f32.mrf.mxu0  ;;  %v232_v46 = vpop.f32.mrf.mxu1 }
  0xed   :  { %647 = vpow2.f32 %v461_v41  ;;  %v466_v47 = vmul.f32 -1.442695, %v794_v43  ;;  %v799_v48 = vadd.f32 %v443_v16, %v200_v45  ;;  %v801_v49 = vadd.f32 %v443_v16, %v232_v46 }
  0xee   :  { %649 = vpow2.f32 %v469_v42  ;;  %v474_v50 = vmul.f32 -1.442695, %v796_v44  ;;  %v594_v51 = vpop.f32.mrf.mxu0  ;;  %v602_v52 = vpop.f32.mrf.mxu1 }
  0xef   :  { %651 = vpow2.f32 %v466_v47  ;;  %v464_v53 = vmul.f32 -1.442695, %v799_v48  ;;  %v472_v54 = vmul.f32 -1.442695, %v801_v49  ;;  %v806_v55 = vadd.f32 %v594_v51, %v443_v16 }
  0xf0   :  { %653 = vpow2.f32 %v474_v50  ;;  %v808_v56 = vadd.f32 %v602_v52, %v443_v16  ;;  %v203_v57 = vpop.f32.mrf.mxu0  ;;  %v235_v58 = vpop.f32.mrf.mxu1 }
  0xf1   :  { %655 = vpow2.f32 %v464_v53  ;;  %v467_v59 = vmul.f32 -1.442695, %v806_v55  ;;  %v811_v60 = vadd.f32 %v443_v16, %v203_v57  ;;  %v813_v61 = vadd.f32 %v443_v16, %v235_v58 }
  0xf2   :  { %657 = vpow2.f32 %v472_v54  ;;  %v475_v62 = vmul.f32 -1.442695, %v808_v56 }
  0xf3   :  { %659 = vpow2.f32 %v467_v59  ;;  %v465_v63 = vmul.f32 -1.442695, %v811_v60  ;;  %v473_v0 = vmul.f32 -1.442695, %v813_v61 }
  0xf4   :  { %v636_v1 = vpop.eup %635  ;;  %661 = vpow2.f32 %v475_v62 }
  0xf5   :  { %v638_v2 = vpop.eup %637  ;;  %v297_v3 = vadd.f32 1.0, %v636_v1  ;;  %663 = vpow2.f32 %v465_v63 }
  0xf6   :  { %v640_v4 = vpop.eup %639  ;;  %v305_v5 = vadd.f32 1.0, %v638_v2  ;;  %665 = vpow2.f32 %v473_v0 }
  0xf7   :  { %v642_v6 = vpop.eup %641  ;;  %667 = vrcp.f32 %v297_v3  ;;  %v295_v7 = vadd.f32 1.0, %v640_v4 }
  0xf8   :  { %v644_v8 = vpop.eup %643  ;;  %669 = vrcp.f32 %v305_v5  ;;  %v303_v9 = vadd.f32 1.0, %v642_v6 }
  0xf9   :  { %v646_v10 = vpop.eup %645  ;;  %671 = vrcp.f32 %v295_v7  ;;  %v298_v11 = vadd.f32 1.0, %v644_v8 }
  0xfa   :  { %v648_v12 = vpop.eup %647  ;;  %673 = vrcp.f32 %v303_v9  ;;  %v306_v13 = vadd.f32 1.0, %v646_v10 }
  0xfb   :  { %v650_v14 = vpop.eup %649  ;;  %675 = vrcp.f32 %v298_v11  ;;  %v296_v15 = vadd.f32 1.0, %v648_v12 }
  0xfc   :  { %v652_v16 = vpop.eup %651  ;;  %677 = vrcp.f32 %v306_v13  ;;  %v304_v17 = vadd.f32 1.0, %v650_v14 }
  0xfd   :  { %v654_v18 = vpop.eup %653  ;;  %679 = vrcp.f32 %v296_v15  ;;  %v301_v21 = vadd.f32 1.0, %v652_v16 }
  0xfe   :  { %v656_v22 = vpop.eup %655  ;;  %681 = vrcp.f32 %v304_v17  ;;  %v309_v23 = vadd.f32 1.0, %v654_v18 }
  0xff   :  { %v658_v24 = vpop.eup %657  ;;  %683 = vrcp.f32 %v301_v21  ;;  %v299_v27 = vadd.f32 1.0, %v656_v22 }
 0x100   :  { %v660_v28 = vpop.eup %659  ;;  %685 = vrcp.f32 %v309_v23  ;;  %v307_v29 = vadd.f32 1.0, %v658_v24 }
 0x101   :  { %v662_v30 = vpop.eup %661  ;;  %687 = vrcp.f32 %v299_v27  ;;  %v302_v33 = vadd.f32 1.0, %v660_v28 }
 0x102   :  { %v664_v34 = vpop.eup %663  ;;  %689 = vrcp.f32 %v307_v29  ;;  %v310_v35 = vadd.f32 1.0, %v662_v30 }
 0x103   :  { %v666_v38 = vpop.eup %665  ;;  %691 = vrcp.f32 %v302_v33  ;;  %v300_v39 = vadd.f32 1.0, %v664_v34 }
 0x104   :  { %v668_v40 = vpop.eup %667  ;;  %693 = vrcp.f32 %v310_v35  ;;  %v308_v41 = vadd.f32 1.0, %v666_v38 }
 0x105   :  { %v670_v42 = vpop.eup %669  ;;  %695 = vrcp.f32 %v300_v39  ;;  %v345_v51 = vmul.f32 %v668_v40, %v770_v19 }
 0x106   :  { %v672_v45 = vpop.eup %671  ;;  %697 = vrcp.f32 %v308_v41  ;;  %v353_v54 = vmul.f32 %v670_v42, %v772_v20 }
 0x107   :  { %v674_v46 = vpop.eup %673  ;;  %v343_v59 = vmul.f32 %v672_v45, %v776_v25 }
 0x108   :  { %v676_v47 = vpop.eup %675  ;;  %v351_v1 = vmul.f32 %v674_v46, %v778_v26 }
 0x109   :  { %v678_v50 = vpop.eup %677  ;;  %v346_v52 = vmul.f32 %v676_v47, %v782_v31 }
 0x10a   :  { %v680_v53 = vpop.eup %679  ;;  %v354_v57 = vmul.f32 %v678_v50, %v784_v32 }
 0x10b   :  { %v682_v58 = vpop.eup %681  ;;  %v516_v62 = vpack.c.bf16 %v346_v52, %v345_v51  ;;  %v344_v63 = vmul.f32 %v680_v53, %v787_v36 }
 0x10c   :  { %v684_v0 = vpop.eup %683  ;;  %v536_v2 = vpack.c.bf16 %v354_v57, %v353_v54  ;;  %v352_v3 = vmul.f32 %v682_v58, %v789_v37 }
 0x10d   :  { %v686_v19 = vpop.eup %685  ;;  %548 = vst [vmem:[%s861_s3 + $0x8] sm:$0xff] %v516_v62   ;;  %v511_v20 = vpack.c.bf16 %v344_v63, %v343_v59  ;;  %v349_v37 = vmul.f32 %v684_v0, %v794_v43 }
 0x10e   :  { %v688_v31 = vpop.eup %687  ;;  %552 = vst [vmem:[%s861_s3 + $0x28] sm:$0xff] %v536_v2   ;;  %v531_v25 = vpack.c.bf16 %v352_v3, %v351_v1  ;;  %v357_v6 = vmul.f32 %v686_v19, %v796_v44 }
 0x10f   :  { %v690_v32 = vpop.eup %689  ;;  %512 = vst [vmem:[%s861_s3] sm:$0xff] %v511_v20   ;;  %v347_v9 = vmul.f32 %v688_v31, %v799_v48 }
 0x110   :  { %v692_v26 = vpop.eup %691  ;;  %551 = vst [vmem:[%s861_s3 + $0x20] sm:$0xff] %v531_v25   ;;  %v355_v12 = vmul.f32 %v690_v32, %v801_v49 }
 0x111   :  { %v694_v36 = vpop.eup %693  ;;  %v350_v4 = vmul.f32 %v692_v26, %v806_v55 }
 0x112   :  { %v696_v5 = vpop.eup %695  ;;  %v358_v7 = vmul.f32 %v694_v36, %v808_v56 }
 0x113   :  { %v698_v8 = vpop.eup %697  ;;  %v526_v10 = vpack.c.bf16 %v350_v4, %v349_v37  ;;  %v348_v11 = vmul.f32 %v696_v5, %v811_v60 }
 0x114   :  { %v546_v13 = vpack.c.bf16 %v358_v7, %v357_v6  ;;  %v356_v14 = vmul.f32 %v698_v8, %v813_v61 }
 0x115   :  { %550 = vst [vmem:[%s861_s3 + $0x18] sm:$0xff] %v526_v10   ;;  %v521_v43 = vpack.c.bf16 %v348_v11, %v347_v9 }
 0x116   :  { %554 = vst [vmem:[%s861_s3 + $0x38] sm:$0xff] %v546_v13   ;;  %v541_v44 = vpack.c.bf16 %v356_v14, %v355_v12 }
 0x117   :  { %549 = vst [vmem:[%s861_s3 + $0x10] sm:$0xff] %v521_v43  }
 0x118   :  { %553 = vst [vmem:[%s861_s3 + $0x30] sm:$0xff] %v541_v44  }

// kernel: effnet_forward.9
= control target key start
LH: loop header
LB: loop body
LE: loop exit
PB: predicated region body
PF: predicated region fallthrough
CT: control target
= control target key end

     0   :  { %v66_v3 = vlaneseq  ;;  %v526_v10 = vmov 1983009808   ;;  %s641_s0 = inlined_call_operand.vmem [shape: bf16[2,4,4,128], index: 0, kind: input, shape index: {}]   ;;  %s642_s1 = inlined_call_operand.vmem [shape: bf16[128,128], index: 1, kind: input, shape index: {}]   ;;  %s643_s2 = inlined_call_operand.vmem [shape: f32[1,128], index: 2, kind: input, shape index: {}]   ;;  %s644_s3 = inlined_call_operand.vmem [shape: bf16[128,128], index: 3, kind: input, shape index: {}]   ;;  %s645_s4 = inlined_call_operand.vmem [shape: f32[1,128], index: 4, kind: input, shape index: {}]   ;;  %s646_s5 = inlined_call_operand.hbm [shape: f32[2,4], index: 5, kind: output, shape index: {}]  }
   0x1   :  { %v468_v0 = vld [vmem:[%s642_s1 + $0x38] sm:$0xff]   ;;  %v469_v1 = vld [vmem:[%s642_s1 + $0x30] sm:$0xff]   ;;  %v470_v2 = vld [vmem:[%s642_s1 + $0x28] sm:$0xff]   ;;  %v64_v11 = vunpack.c.l.s4 %v526_v10 }
   0x2   :  { %424 = vmatprep.subr.bf16.mxu0 %v468_v0  ;;  %v471_v4 = vld [vmem:[%s642_s1 + $0x20] sm:$0xff]   ;;  %v472_v9 = vld [vmem:[%s642_s1 + $0x18] sm:$0xff]   ;;  %v67_v12 = vshrl.u32 %v66_v3, 7  ;;  %v473_v17 = vld [vmem:[%s642_s1 + $0x10] sm:$0xff]  }
   0x3   :  { %425 = vmatpush3.bf16.msra.mxu0 %v468_v0  ;;  %v22_v5 = vld [vmem:[%s641_s0] sm:$0x3]  ;;  %v23_v6 = vld [vmem:[%s641_s0 + $0x2] sm:$0x3]  ;;  %v24_v7 = vld [vmem:[%s641_s0 + $0x4] sm:$0x3]  ;;  %v65_v15 = vunpack.c.0.s8 %v64_v11 }
   0x4   :  { %426 = vmatprep.subr.bf16.mxu0 %v469_v1  ;;  %v25_v8 = vld [vmem:[%s641_s0 + $0x6] sm:$0x3]  ;;  %v61_v13 = vcombine.low %v22_v5, %v23_v6 }
   0x5   :  { %v62_v14 = vcombine.low %v24_v7, %v25_v8  ;;  %v68_v16 = vsub.s32 %v65_v15, %v67_v12 }
   0x7   :  { %427 = vmatpush3.bf16.msra.mxu0 %v469_v1  ;;  %v69_v18 = vrot.slane %v61_v13, %v68_v16  ;;  %v76_v19 = vrot.slane %v62_v14, %v68_v16 }
   0x8   :  { %428 = vmatprep.subr.bf16.mxu0 %v470_v2 }
   0xb   :  { %429 = vmatpush3.bf16.msra.mxu0 %v470_v2 }
   0xc   :  { %430 = vmatprep.subr.bf16.mxu0 %v471_v4 }
   0xf   :  { %431 = vmatpush3.bf16.msra.mxu0 %v471_v4 }
  0x10   :  { %432 = vmatprep.subr.bf16.mxu0 %v472_v9 }
  0x11   :  { %10 = vsyncpa [#allocation3], 0  ;;  %v77_v20 = vcombine.low %v69_v18, %v76_v19  ;;  %v26_v21 = vld [vmem:[%s641_s0 + $0x8] sm:$0x3]  ;;  %v27_v22 = vld [vmem:[%s641_s0 + $0xa] sm:$0x3] }
  0x12   :  { %v28_v23 = vld [vmem:[%s641_s0 + $0xc] sm:$0x3]  ;;  %v29_v24 = vld [vmem:[%s641_s0 + $0xe] sm:$0x3]  ;;  %v78_v26 = vcombine.low %v26_v21, %v27_v22  ;;  %v475_v28 = vld [vmem:[%s642_s1] sm:$0xff]   ;;  %v527_v33 = vmov 0.0  }
  0x13   :  { %433 = vmatpush3.bf16.msra.mxu0 %v472_v9  ;;  %v474_v25 = vld [vmem:[%s642_s1 + $0x8] sm:$0xff]   ;;  %440 = vmatprep.mubr.bf16.mxu0 %v77_v20  ;;  %v79_v27 = vcombine.low %v28_v23, %v29_v24  ;;  %v476_v32 = vld [vmem:[%s644_s3 + $0x38] sm:$0xff]   ;;  %v477_v34 = vld [vmem:[%s644_s3 + $0x30] sm:$0xff]   ;;  %vm528_vm0 = vmmov 0   ;;  %vm268_vm1 = vcmask 1041409   ;;  %s529_s16 = smov [#allocation2]  }
  0x14   :  { %434 = vmatprep.subr.bf16.mxu0 %v473_v17  ;;  %v86_v29 = vrot.slane %v78_v26, %v68_v16  ;;  %444 = vmatprep.subr.bf16.mxu1 %v527_v33  ;;  %v478_v35 = vld [vmem:[%s644_s3 + $0x28] sm:$0xff]   ;;  %v479_v36 = vld [vmem:[%s644_s3 + $0x20] sm:$0xff]   ;;  %v480_v37 = vld [vmem:[%s644_s3 + $0x18] sm:$0xff]   ;;  %s374_s17 = sshll.u32 %s529_s16, 4  ;;  %vm366_vm2 = vcmask 25600   ;;  %s375_s17 = int_to_ptr.vmem [resolvable:$true] %s374_s17 }
  0x15   :  { %v93_v30 = vrot.slane %v79_v27, %v68_v16  ;;  %445 = vmatpush3.bf16.msra.mxu1 %v476_v32  ;;  %v481_v38 = vld [vmem:[%s644_s3 + $0x10] sm:$0xff]   ;;  %460 = vmatprep.mubr.msk.bf16.mxu1 %vm528_vm0, %v527_v33  ;;  %v482_v39 = vld [vmem:[%s644_s3 + $0x8] sm:$0xff]   ;;  %v483_v40 = vld [vmem:[%s644_s3] sm:$0xff]   ;;  %s504_s18 = scalar_lea.vmem %s375_s17, 32  ;;  %p509_p1 = scmp.lt.s32.totalorder %s375_s17, %s375_s17 }
  0x16   :  { %446 = vmatprep.subr.bf16.mxu1 %v527_v33  ;;  %v382_v41 = vld [vmem:[%s643_s2] ss:$0 sm:$0xff]  ;;  %p505_p0 = scmp.ne.s32.totalorder %s375_s17, %s504_s18  ;;  %p510_p2 = scmp.lt.s32.totalorder %s504_s18, %s504_s18 }
  0x17   :  { %435 = vmatpush3.bf16.msra.mxu0 %v473_v17  ;;  %v94_v31 = vcombine.low %v86_v29, %v93_v30 }
  0x18   :  { %436 = vmatprep.subr.bf16.mxu0 %v474_v25  ;;  %p511_p3 = por %p510_p2, %p509_p1 }
  0x19   :  { %447 = vmatpush3.bf16.msra.mxu1 %v477_v34 }
  0x1a   :  { %448 = vmatprep.subr.bf16.mxu1 %v527_v33  ;;  %p512_p4 = pnand %p511_p3, %p505_p0 }
  0x1b   :  { %437 = vmatpush3.bf16.msra.mxu0 %v474_v25 }
  0x1c   :  { %438 = vmatprep.subr.bf16.mxu0 %v475_v28 }
  0x1d   :  { %449 = vmatpush3.bf16.msra.mxu1 %v478_v35 }
  0x1e   :  { %450 = vmatprep.subr.bf16.mxu1 %v527_v33 }
  0x1f   :  { %439 = vmatpush3.bf16.msra.mxu0 %v475_v28  ;;  %v395_v28 = vld [vmem:[%s645_s4] ss:$0 sm:$0xff] }
  0x21   :  { %451 = vmatpush3.bf16.msra.mxu1 %v479_v36 }
  0x22   :  { %441 = vmatmul.mubr.bf16.vlgmr.msra.gmra.mxu0 %v94_v31  ;;  %452 = vmatprep.subr.bf16.mxu1 %v527_v33 }
  0x25   :  { %453 = vmatpush3.bf16.msra.mxu1 %v480_v37 }
  0x26   :  { %454 = vmatprep.subr.bf16.mxu1 %v527_v33 }
  0x29   :  { %455 = vmatpush3.bf16.msra.mxu1 %v481_v38 }
  0x2a   :  { %456 = vmatprep.subr.bf16.mxu1 %v527_v33 }
  0x2d   :  { %457 = vmatpush3.bf16.msra.mxu1 %v482_v39 }
  0x2e   :  { %458 = vmatprep.subr.bf16.mxu1 %v527_v33 }
  0x31   :  { %459 = vmatpush3.bf16.msra.mxu1 %v483_v40 }
  0xe2   :  { %v442_v42 = vpop.f32.mrf.mxu0 }
  0xe3   :  { %v188_v43 = vadd.f32 %v442_v42, %v382_v41 }
  0xe4   :  { %v179_v44 = vpop.f32.mrf.mxu0 }
  0xe5   :  { %v393_v45 = vmul.f32 -1.442695, %v188_v43  ;;  %v180_v46 = vadd.f32 %v382_v41, %v179_v44 }
  0xe6   :  { %v443_v47 = vpop.f32.mrf.mxu0 }
  0xe7   :  { %484 = vpow2.f32 %v393_v45  ;;  %v391_v48 = vmul.f32 -1.442695, %v180_v46  ;;  %v191_v49 = vadd.f32 %v443_v47, %v382_v41 }
  0xe8   :  { %v182_v50 = vpop.f32.mrf.mxu0 }
  0xe9   :  { %486 = vpow2.f32 %v391_v48  ;;  %v394_v51 = vmul.f32 -1.442695, %v191_v49  ;;  %v183_v52 = vadd.f32 %v382_v41, %v182_v50 }
  0xeb   :  { %488 = vpow2.f32 %v394_v51  ;;  %v392_v53 = vmul.f32 -1.442695, %v183_v52 }
  0xed   :  { %490 = vpow2.f32 %v392_v53 }
  0xf4   :  { %v485_v54 = vpop.eup %484 }
  0xf5   :  { %v208_v55 = vadd.f32 1.0, %v485_v54 }
  0xf6   :  { %v487_v56 = vpop.eup %486 }
  0xf7   :  { %v206_v57 = vadd.f32 1.0, %v487_v56  ;;  %492 = vrcp.f32 %v208_v55 }
  0xf8   :  { %v489_v58 = vpop.eup %488 }
  0xf9   :  { %v209_v59 = vadd.f32 1.0, %v489_v58  ;;  %494 = vrcp.f32 %v206_v57 }
  0xfa   :  { %v491_v60 = vpop.eup %490 }
  0xfb   :  { %496 = vrcp.f32 %v209_v59  ;;  %v207_v61 = vadd.f32 1.0, %v491_v60 }
  0xfd   :  { %498 = vrcp.f32 %v207_v61 }
 0x104   :  { %v493_v62 = vpop.eup %492 }
 0x105   :  { %v220_v1 = vmul.f32 %v493_v62, %v188_v43 }
 0x106   :  { %v495_v63 = vpop.eup %494 }
 0x107   :  { %v218_v4 = vmul.f32 %v495_v63, %v180_v46 }
 0x108   :  { %v497_v0 = vpop.eup %496 }
 0x109   :  { %v221_v2 = vmul.f32 %v497_v0, %v191_v49 }
 0x10a   :  { %v499_v3 = vpop.eup %498 }
 0x10b   :  { %v229_v5 = vadd.f32 %v221_v2, %v220_v1  ;;  %v219_v6 = vmul.f32 %v499_v3, %v183_v52 }
 0x10d   :  { %v230_v7 = vrot.slane %v229_v5, 4  ;;  %v222_v8 = vadd.f32 %v219_v6, %v218_v4 }
 0x10f   :  { %v231_v9 = vadd.f32 %v230_v7, %v229_v5  ;;  %v223_v10 = vrot.slane %v222_v8, 4 }
 0x111   :  { %v232_v11 = vrot.slane %v231_v9, 2  ;;  %v224_v12 = vadd.f32 %v223_v10, %v222_v8 }
 0x113   :  { %v233_v13 = vadd.f32 %v232_v11, %v231_v9  ;;  %v225_v14 = vrot.slane %v224_v12, 2 }
 0x115   :  { %v234_v15 = vrot.slane %v233_v13, 1  ;;  %v226_v16 = vadd.f32 %v225_v14, %v224_v12 }
 0x117   :  { %v227_v17 = vrot.slane %v226_v16, 1  ;;  %v235_v18 = vadd.f32 %v234_v15, %v233_v13 }
 0x119   :  { %v228_v19 = vadd.f32 %v227_v17, %v226_v16  ;;  %v238_v20 = vmul.f32 0.0625, %v235_v18 }
 0x11b   :  { %v237_v21 = vmul.f32 0.0625, %v228_v19  ;;  %v240_v22 = vpack.c.bf16 %v238_v20, %v238_v20 }
 0x11d   :  { %v239_v23 = vpack.c.bf16 %v237_v21, %v237_v21  ;;  %v267_v25 = vunpack.c.l.b16 %v240_v22 }
 0x11f   :  { %v266_v24 = vunpack.c.l.b16 %v239_v23 }
 0x121   :  { %v269_v26 = vsel %vm268_vm1, %v267_v25, %v266_v24 }
 0x122   :  { %v270_v27 = vpack.c.b16 %v269_v26, %v269_v26 }
 0x124   :  { %461 = vmatmul.mubr.bf16.vlgmr.msra.gmra.mxu1 %v270_v27 }
 0x1e4   :  { %v354_v29 = vpop.f32.mrf.mxu1 }
 0x1e5   :  { %v355_v30 = vadd.f32 %v395_v28, %v354_v29 }
 0x1e6   :  { %v462_v31 = vpop.f32.mrf.mxu1 }
 0x1e7   :  { %v404_v32 = vmul.f32 -1.442695, %v355_v30 }
 0x1e8   :  { %v357_v33 = vpop.f32.mrf.mxu1 }
 0x1e9   :  { %500 = vpow2.f32 %v404_v32 }
 0x1ea   :  { %v463_v34 = vpop.f32.mrf.mxu1 }
 0x1f6   :  { %v501_v35 = vpop.eup %500 }
 0x1f7   :  { %v363_v36 = vadd.f32 1.0, %v501_v35 }
 0x1f9   :  { %502 = vrcp.f32 %v363_v36 }
 0x206   :  { %v503_v37 = vpop.eup %502 }
 0x207   :  { %367 = vst.msk [vmem:[#allocation2] sm:$0x3] %vm366_vm2, %v503_v37 }
 0x208   :  { %515 = shalt.err (!%p512_p4)
}
 0x209   :  { %377 = dma.vmem_to_hbm [thread:$0]  %s375_s17, 32, %s646_s5, [#allocation3]  }
 0x20a   :  { %524 = dma.done.wait [#allocation3], 32  }
 0x20b   :  { %525 = vsyncadd [#allocation3], 4294967264 }
 0x20c   :  { %381 = vsyncpa [#allocation3], 1 }

// kernel: effnet_forward.7
= control target key start
LH: loop header
LB: loop body
LE: loop exit
PB: predicated region body
PF: predicated region fallthrough
CT: control target
= control target key end

     0   :  { %v131_v0 = vlaneseq  ;;  %v2357_v2 = vmov 1983009808   ;;  %vm705_vm0 = vcmask 1040384   ;;  %vm706_vm1 = vsmask.f32 256  ;;  %s3118_s1 = inlined_call_operand.vmem [shape: bf16[128,128], index: 1, kind: input, shape index: {}]   ;;  %s3119_s0 = inlined_call_operand.vmem [shape: bf16[8,4,4,128], index: 0, kind: input, shape index: {}]   ;;  %s3120_s2 = inlined_call_operand.vmem [shape: f32[1,128], index: 2, kind: input, shape index: {}]   ;;  %s3121_s5 = inlined_call_operand.vmem [shape: bf16[128,128], index: 5, kind: input, shape index: {}]   ;;  %s3122_s3 = inlined_call_operand.vmem [shape: f32[3,3,128], index: 3, kind: input, shape index: {}]   ;;  %s3123_s4 = inlined_call_operand.vmem [shape: f32[1,128], index: 4, kind: input, shape index: {}]   ;;  %s3124_s7 = inlined_call_operand.vmem [shape: bf16[128,128], index: 7, kind: input, shape index: {}]   ;;  %s3125_s6 = inlined_call_operand.vmem [shape: f32[1,128], index: 6, kind: input, shape index: {}]   ;;  %s3126_s9 = inlined_call_operand.vmem [shape: bf16[128,128], index: 9, kind: input, shape index: {}]   ;;  %s3127_s8 = inlined_call_operand.vmem [shape: f32[1,128], index: 8, kind: input, shape index: {}]   ;;  %s3128_s10 = inlined_call_operand.vmem [shape: f32[1,128], index: 10, kind: input, shape index: {}]   ;;  %s3129_s11 = inlined_call_operand.vmem [shape: bf16[2,4,4,128], index: 11, kind: output, shape index: {}]  }
   0x1   :  { %v2221_v1 = vld [vmem:[%s3118_s1 + $0x38] sm:$0xff]   ;;  %v129_v3 = vunpack.c.l.s4 %v2357_v2  ;;  %v2222_v4 = vld [vmem:[%s3118_s1 + $0x30] sm:$0xff]   ;;  %v2223_v7 = vld [vmem:[%s3118_s1 + $0x28] sm:$0xff]   ;;  %vm695_vm3 = vcmask 1042432   ;;  %vm696_vm4 = vsmask.f32 2304 }
   0x2   :  { %2124 = vmatprep.subr.bf16.mxu0 %v2221_v1  ;;  %v2428_v6 = vshrl.u32 %v131_v0, 7  ;;  %v2224_v8 = vld [vmem:[%s3118_s1 + $0x20] sm:$0xff]   ;;  %v2225_v17 = vld [vmem:[%s3118_s1 + $0x18] sm:$0xff]   ;;  %v2226_v20 = vld [vmem:[%s3118_s1 + $0x10] sm:$0xff]   ;;  %vm2360_vm6 = vmmov 0   ;;  %vm1607_vm9 = vcmask 1041409  }
   0x3   :  { %2125 = vmatpush3.bf16.msra.mxu0 %v2221_v1  ;;  %v130_v5 = vunpack.c.0.s8 %v129_v3  ;;  %v39_v10 = vld [vmem:[%s3119_s0] sm:$0x3]  ;;  %v40_v11 = vld [vmem:[%s3119_s0 + $0x2] sm:$0x3]  ;;  %v41_v12 = vld [vmem:[%s3119_s0 + $0x4] sm:$0x3] }
   0x4   :  { %2126 = vmatprep.subr.bf16.mxu0 %v2222_v4  ;;  %v42_v13 = vld [vmem:[%s3119_s0 + $0x6] sm:$0x3]  ;;  %v126_v14 = vcombine.low %v39_v10, %v40_v11  ;;  %v2227_v21 = vld [vmem:[%s3118_s1 + $0x8] sm:$0xff]   ;;  %v47_v26 = vld [vmem:[%s3119_s0 + $0x10] sm:$0x3] }
   0x5   :  { %v2437_v9 = vsub.s32 %v130_v5, %v2428_v6  ;;  %v127_v15 = vcombine.low %v41_v12, %v42_v13  ;;  %v43_v22 = vld [vmem:[%s3119_s0 + $0x8] sm:$0x3]  ;;  %v44_v23 = vld [vmem:[%s3119_s0 + $0xa] sm:$0x3]  ;;  %v45_v24 = vld [vmem:[%s3119_s0 + $0xc] sm:$0x3] }
   0x6   :  { %v46_v25 = vld [vmem:[%s3119_s0 + $0xe] sm:$0x3]  ;;  %v48_v27 = vld [vmem:[%s3119_s0 + $0x12] sm:$0x3]  ;;  %v49_v28 = vld [vmem:[%s3119_s0 + $0x14] sm:$0x3]  ;;  %v143_v30 = vcombine.low %v43_v22, %v44_v23 }
   0x7   :  { %2127 = vmatpush3.bf16.msra.mxu0 %v2222_v4  ;;  %v134_v16 = vrot.slane %v126_v14, %v2437_v9  ;;  %v141_v18 = vrot.slane %v127_v15, %v2437_v9  ;;  %v50_v29 = vld [vmem:[%s3119_s0 + $0x16] sm:$0x3]  ;;  %v144_v31 = vcombine.low %v45_v24, %v46_v25  ;;  %v160_v32 = vcombine.low %v47_v26, %v48_v27  ;;  %v2228_v34 = vld [vmem:[%s3118_s1] sm:$0xff]   ;;  %v51_v37 = vld [vmem:[%s3119_s0 + $0x18] sm:$0x3] }
   0x8   :  { %2128 = vmatprep.subr.bf16.mxu0 %v2223_v7  ;;  %v161_v33 = vcombine.low %v49_v28, %v50_v29  ;;  %v151_v35 = vrot.slane %v143_v30, %v2437_v9  ;;  %v52_v38 = vld [vmem:[%s3119_s0 + $0x1a] sm:$0x3]  ;;  %v53_v41 = vld [vmem:[%s3119_s0 + $0x1c] sm:$0x3]  ;;  %v54_v42 = vld [vmem:[%s3119_s0 + $0x1e] sm:$0x3] }
   0x9   :  { %v142_v19 = vcombine.low %v134_v16, %v141_v18  ;;  %v158_v36 = vrot.slane %v144_v31, %v2437_v9  ;;  %v168_v39 = vrot.slane %v160_v32, %v2437_v9  ;;  %v55_v43 = vld [vmem:[%s3119_s0 + $0x20] sm:$0x3]  ;;  %v56_v44 = vld [vmem:[%s3119_s0 + $0x22] sm:$0x3]  ;;  %v57_v45 = vld [vmem:[%s3119_s0 + $0x24] sm:$0x3]  ;;  %v177_v48 = vcombine.low %v51_v37, %v52_v38 }
   0xa   :  { %v175_v40 = vrot.slane %v161_v33, %v2437_v9  ;;  %v58_v46 = vld [vmem:[%s3119_s0 + $0x26] sm:$0x3]  ;;  %v178_v49 = vcombine.low %v53_v41, %v54_v42  ;;  %v194_v51 = vcombine.low %v55_v43, %v56_v44  ;;  %v59_v55 = vld [vmem:[%s3119_s0 + $0x28] sm:$0x3]  ;;  %v60_v56 = vld [vmem:[%s3119_s0 + $0x2a] sm:$0x3] }
   0xb   :  { %2129 = vmatpush3.bf16.msra.mxu0 %v2223_v7  ;;  %2140 = vmatprep.mubr.bf16.mxu0 %v142_v19  ;;  %v159_v47 = vcombine.low %v151_v35, %v158_v36  ;;  %v195_v52 = vcombine.low %v57_v45, %v58_v46  ;;  %v185_v53 = vrot.slane %v177_v48, %v2437_v9  ;;  %v61_v59 = vld [vmem:[%s3119_s0 + $0x2c] sm:$0x3]  ;;  %v62_v60 = vld [vmem:[%s3119_s0 + $0x2e] sm:$0x3]  ;;  %v63_v61 = vld [vmem:[%s3119_s0 + $0x30] sm:$0x3] }
   0xc   :  { %2130 = vmatprep.subr.bf16.mxu0 %v2224_v8  ;;  %v176_v50 = vcombine.low %v168_v39, %v175_v40  ;;  %v192_v54 = vrot.slane %v178_v49, %v2437_v9  ;;  %v202_v57 = vrot.slane %v194_v51, %v2437_v9  ;;  %v64_v62 = vld [vmem:[%s3119_s0 + $0x32] sm:$0x3]  ;;  %v65_v63 = vld [vmem:[%s3119_s0 + $0x34] sm:$0x3]  ;;  %v66_v0 = vld [vmem:[%s3119_s0 + $0x36] sm:$0x3]  ;;  %v211_v2 = vcombine.low %v59_v55, %v60_v56 }
   0xd   :  { %v209_v58 = vrot.slane %v195_v52, %v2437_v9  ;;  %v212_v3 = vcombine.low %v61_v59, %v62_v60  ;;  %v228_v5 = vcombine.low %v63_v61, %v64_v62  ;;  %v229_v7 = vcombine.low %v65_v63, %v66_v0  ;;  %v67_v11 = vld [vmem:[%s3119_s0 + $0x38] sm:$0x3]  ;;  %v68_v14 = vld [vmem:[%s3119_s0 + $0x3a] sm:$0x3]  ;;  %v69_v15 = vld [vmem:[%s3119_s0 + $0x3c] sm:$0x3] }
   0xe   :  { %v193_v1 = vcombine.low %v185_v53, %v192_v54  ;;  %v70_v16 = vld [vmem:[%s3119_s0 + $0x3e] sm:$0x3]  ;;  %v245_v18 = vcombine.low %v67_v11, %v68_v14  ;;  %vm2563_vm2 = vmand %vm705_vm0, %vm706_vm1  ;;  %v720_v25 = vld [vmem:[#allocation2 + $0x18] sm:$0x1]  ;;  %v2358_v59 = vmov 0   ;;  %v2359_v24 = vmov 0.0  }
   0xf   :  { %2131 = vmatpush3.bf16.msra.mxu0 %v2224_v8  ;;  %v210_v4 = vcombine.low %v202_v57, %v209_v58  ;;  %v219_v8 = vrot.slane %v211_v2, %v2437_v9  ;;  %v226_v10 = vrot.slane %v212_v3, %v2437_v9  ;;  %v236_v12 = vrot.slane %v228_v5, %v2437_v9  ;;  %v726_v26 = vld [vmem:[#allocation2 + $0x20] sm:$0x1]  ;;  %v723_v29 = vld [vmem:[#allocation2 + $0x1c] sm:$0x1]  ;;  %v729_v30 = vld [vmem:[#allocation2 + $0x24] sm:$0x1] }
  0x10   :  { %2132 = vmatprep.subr.bf16.mxu0 %v2225_v17  ;;  %v243_v13 = vrot.slane %v229_v7, %v2437_v9  ;;  %v246_v19 = vcombine.low %v69_v15, %v70_v16  ;;  %v721_v27 = vsel %vm2563_vm2, 0, %v720_v25  ;;  %v727_v28 = vsel %vm2563_vm2, 0, %v726_v26  ;;  %v708_v33 = vld [vmem:[#allocation2 + $0x4] sm:$0x1]  ;;  %v711_v37 = vld [vmem:[#allocation2 + $0x8] sm:$0x1]  ;;  %vm697_vm5 = vmand %vm695_vm3, %vm696_vm4  ;;  %2156 = vmatprep.subr.bf16.mxu1 %v2359_v24 }
  0x11   :  { %722 = vst [vmem:[#allocation2 + $0x18] sm:$0x1] %v721_v27  ;;  %728 = vst [vmem:[#allocation2 + $0x20] sm:$0x1] %v727_v28  ;;  %v724_v31 = vsel %vm2563_vm2, 0, %v723_v29  ;;  %v730_v32 = vsel %vm2563_vm2, 0, %v729_v30  ;;  %2172 = vmatprep.mubr.msk.bf16.mxu1 %vm2360_vm6, %v2359_v24 }
  0x12   :  { %v260_v22 = vrot.slane %v246_v19, %v2437_v9  ;;  %725 = vst [vmem:[#allocation2 + $0x1c] sm:$0x1] %v724_v31  ;;  %731 = vst [vmem:[#allocation2 + $0x24] sm:$0x1] %v730_v32  ;;  %v709_v35 = vsel %vm2563_vm2, 0, %v708_v33  ;;  %v712_v39 = vsel %vm2563_vm2, 0, %v711_v37 }
  0x13   :  { %2133 = vmatpush3.bf16.msra.mxu0 %v2225_v17  ;;  %v227_v17 = vcombine.low %v219_v8, %v226_v10  ;;  %710 = vst [vmem:[#allocation2 + $0x4] sm:$0x1] %v709_v35  ;;  %v717_v38 = vld [vmem:[#allocation2 + $0x10] sm:$0x1]  ;;  %713 = vst [vmem:[#allocation2 + $0x8] sm:$0x1] %v712_v39 }
  0x14   :  { %2134 = vmatprep.subr.bf16.mxu0 %v2226_v20  ;;  %v718_v40 = vsel %vm2563_vm2, 0, %v717_v38  ;;  %v901_v41 = vld [vmem:[#allocation4 + $0x10] sm:$0x1]  ;;  %v904_v42 = vld [vmem:[#allocation4 + $0x14] sm:$0x1]  ;;  %v2229_v26 = vld [vmem:[%s3121_s5 + $0x38] sm:$0xff]  }
  0x15   :  { %719 = vst [vmem:[#allocation2 + $0x10] sm:$0x1] %v718_v40  ;;  %v907_v43 = vld [vmem:[#allocation4 + $0x18] sm:$0x1]  ;;  %v902_v44 = vsel %vm2563_vm2, 0, %v901_v41  ;;  %v905_v45 = vsel %vm2563_vm2, 0, %v904_v42  ;;  %2157 = vmatpush3.bf16.msra.mxu1 %v2229_v26 }
  0x16   :  { %v908_v46 = vsel %vm2563_vm2, 0, %v907_v43  ;;  %903 = vst [vmem:[#allocation4 + $0x10] sm:$0x1] %v902_v44  ;;  %906 = vst [vmem:[#allocation4 + $0x14] sm:$0x1] %v905_v45  ;;  %v2230_v29 = vld [vmem:[%s3121_s5 + $0x30] sm:$0xff]   ;;  %2158 = vmatprep.subr.bf16.mxu1 %v2359_v24 }
  0x17   :  { %2135 = vmatpush3.bf16.msra.mxu0 %v2226_v20  ;;  %v244_v20 = vcombine.low %v236_v12, %v243_v13  ;;  %909 = vst [vmem:[#allocation4 + $0x18] sm:$0x1] %v908_v46  ;;  %v889_v49 = vld [vmem:[#allocation4] sm:$0x1]  ;;  %v892_v53 = vld [vmem:[#allocation4 + $0x4] sm:$0x1] }
  0x18   :  { %2136 = vmatprep.subr.bf16.mxu0 %v2227_v21  ;;  %v890_v51 = vsel %vm2563_vm2, 0, %v889_v49  ;;  %v898_v54 = vld [vmem:[#allocation4 + $0xc] sm:$0x1]  ;;  %v893_v55 = vsel %vm2563_vm2, 0, %v892_v53  ;;  %v701_v57 = vld [vmem:[#allocation2 + $0x14] sm:$0x7] }
  0x19   :  { %891 = vst [vmem:[#allocation4] sm:$0x1] %v890_v51  ;;  %v899_v56 = vsel %vm2563_vm2, 0, %v898_v54  ;;  %894 = vst [vmem:[#allocation4 + $0x4] sm:$0x1] %v893_v55  ;;  %v702_v58 = vsel %vm697_vm5, 0, %v701_v57  ;;  %2159 = vmatpush3.bf16.msra.mxu1 %v2230_v29 }
  0x1a   :  { %900 = vst [vmem:[#allocation4 + $0xc] sm:$0x1] %v899_v56  ;;  %703 = vst [vmem:[#allocation2 + $0x14] sm:$0x7] %v702_v58  ;;  %v698_v60 = vld [vmem:[#allocation2] sm:$0x7]  ;;  %2160 = vmatprep.subr.bf16.mxu1 %v2359_v24 }
  0x1b   :  { %2137 = vmatpush3.bf16.msra.mxu0 %v2227_v21  ;;  %v253_v21 = vrot.slane %v245_v18, %v2437_v9  ;;  %879 = vst [vmem:[#allocation3 + $0xa] sm:$0x3] %v2358_v59  ;;  %878 = vst [vmem:[#allocation3] sm:$0x3] %v2358_v59  ;;  %v699_v61 = vsel %vm697_vm5, 0, %v698_v60  ;;  %v2660_v44 = vsub.s32 1, %v2428_v6 }
  0x1c   :  { %2138 = vmatprep.subr.bf16.mxu0 %v2228_v34  ;;  %700 = vst [vmem:[#allocation2] sm:$0x7] %v699_v61  ;;  %v2603_v62 = vld [vmem:[%s3120_s2] ss:$0 sm:$0xff]  ;;  %v2231_v45 = vld [vmem:[%s3121_s5 + $0x28] sm:$0xff]   ;;  %v2671_v51 = vsub.s32 0, %v2428_v6 }
  0x1d   :  { %v261_v23 = vcombine.low %v253_v21, %v260_v22  ;;  %v2674_v53 = vsub.s32 2, %v2428_v6  ;;  %v1057_v57 = vld [vmem:[%s3122_s3] sm:$0x7]  ;;  %2161 = vmatpush3.bf16.msra.mxu1 %v2231_v45  ;;  %vm852_vm7 = vsmask.f32 2306 }
  0x1e   :  { %2162 = vmatprep.subr.bf16.mxu1 %v2359_v24  ;;  %vm2786_vm8 = vmand %vm695_vm3, %vm852_vm7 }
  0x1f   :  { %2139 = vmatpush3.bf16.msra.mxu0 %v2228_v34  ;;  %v714_v34 = vld [vmem:[#allocation2 + $0xc] sm:$0x1] }
  0x20   :  { %v715_v36 = vsel %vm2563_vm2, 0, %v714_v34  ;;  %2176 = vmatprep.subr.bf16.mxu0 %v2359_v24 }
  0x21   :  { %716 = vst [vmem:[#allocation2 + $0xc] sm:$0x1] %v715_v36  ;;  %v1064_v40 = vld [vmem:[#allocation2 + $0x14] sm:$0x3] }
  0x22   :  { %2141 = vmatmul.mubr.bf16.vlgmr.msra.gmra.mxu0 %v159_v47  ;;  %v910_v47 = vld [vmem:[#allocation4 + $0x1c] sm:$0x1]  ;;  %v1092_v41 = vld [vmem:[#allocation3 + $0xa] sm:$0x3]  ;;  %v1072_v60 = vunpack.c.l.bf16 %v1064_v40  ;;  %v1088_v45 = vld [vmem:[#allocation3] sm:$0x3] }
  0x23   :  { %2144 = vmatprep.mubr.bf16.mxu0 %v176_v50  ;;  %v911_v48 = vsel %vm2563_vm2, 0, %v910_v47  ;;  %v895_v50 = vld [vmem:[#allocation4 + $0x8] sm:$0x1]  ;;  %v1100_v61 = vunpack.c.l.bf16 %v1092_v41 }
  0x24   :  { %912 = vst [vmem:[#allocation4 + $0x1c] sm:$0x1] %v911_v48  ;;  %v896_v52 = vsel %vm2563_vm2, 0, %v895_v50 }
  0x25   :  { %897 = vst [vmem:[#allocation4 + $0x8] sm:$0x1] %v896_v52  ;;  %v1128_v52 = vld [vmem:[#allocation2 + $0x14] sm:$0x7] }
  0x2a   :  { %2145 = vmatmul.mubr.bf16.gmra.mxu0 %v193_v1 }
  0x2b   :  { %2148 = vmatprep.mubr.bf16.mxu0 %v210_v4 }
  0x32   :  { %2149 = vmatmul.mubr.bf16.gmra.mxu0 %v227_v17 }
  0x33   :  { %2152 = vmatprep.mubr.bf16.mxu0 %v244_v20 }
  0x3a   :  { %2153 = vmatmul.mubr.bf16.gmra.mxu0 %v261_v23 }
  0x3b   :  { %2192 = vmatprep.mubr.msk.bf16.mxu0 %vm2360_vm6, %v2359_v24 }
  0xe2   :  { %v2142_v63 = vpop.f32.mrf.mxu0 }
  0xe3   :  { %v2606_v0 = vadd.f32 %v2142_v63, %v2603_v62  ;;  %v2232_v63 = vld [vmem:[%s3121_s5 + $0x20] sm:$0xff]  }
  0xe4   :  { %v352_v1 = vpop.f32.mrf.mxu0  ;;  %2163 = vmatpush3.bf16.msra.mxu1 %v2232_v63  ;;  %v1096_v63 = vunpack.c.l.bf16 %v1088_v45 }
  0xe5   :  { %v2016_v2 = vmul.f32 -1.442695, %v2606_v0  ;;  %v2610_v3 = vadd.f32 %v2603_v62, %v352_v1  ;;  %2164 = vmatprep.subr.bf16.mxu1 %v2359_v24 }
  0xe6   :  { %v2143_v4 = vpop.f32.mrf.mxu0 }
  0xe7   :  { %2253 = vpow2.f32 %v2016_v2  ;;  %v2014_v5 = vmul.f32 -1.442695, %v2610_v3  ;;  %v2614_v7 = vadd.f32 %v2143_v4, %v2603_v62  ;;  %v1136_v4 = vunpack.c.l.bf16 %v1128_v52 }
  0xe8   :  { %v355_v8 = vpop.f32.mrf.mxu0 }
  0xe9   :  { %2255 = vpow2.f32 %v2014_v5  ;;  %v2017_v10 = vmul.f32 -1.442695, %v2614_v7  ;;  %v2618_v11 = vadd.f32 %v2603_v62, %v355_v8 }
  0xea   :  { %v2146_v12 = vpop.f32.mrf.mxu0 }
  0xeb   :  { %2257 = vpow2.f32 %v2017_v10  ;;  %v2015_v13 = vmul.f32 -1.442695, %v2618_v11  ;;  %v2622_v14 = vadd.f32 %v2146_v12, %v2603_v62  ;;  %v2692_v12 = vrot.slane %v1057_v57, %v2660_v44 }
  0xec   :  { %v368_v15 = vpop.f32.mrf.mxu0 }
  0xed   :  { %2259 = vpow2.f32 %v2015_v13  ;;  %v2020_v16 = vmul.f32 -1.442695, %v2622_v14  ;;  %v2626_v17 = vadd.f32 %v2603_v62, %v368_v15  ;;  %v2695_v15 = vrot.slane %v1057_v57, %v2671_v51 }
  0xee   :  { %v2147_v18 = vpop.f32.mrf.mxu0 }
  0xef   :  { %2261 = vpow2.f32 %v2020_v16  ;;  %v2018_v19 = vmul.f32 -1.442695, %v2626_v17  ;;  %v2630_v20 = vadd.f32 %v2147_v18, %v2603_v62  ;;  %v2698_v16 = vrot.slane %v1057_v57, %v2674_v53 }
  0xf0   :  { %v371_v21 = vpop.f32.mrf.mxu0 }
  0xf1   :  { %2263 = vpow2.f32 %v2018_v19  ;;  %v2021_v22 = vmul.f32 -1.442695, %v2630_v20  ;;  %v2634_v23 = vadd.f32 %v2603_v62, %v371_v21  ;;  %v2233_v21 = vld [vmem:[%s3121_s5 + $0x18] sm:$0xff]   ;;  %v1148_v26 = vmul.f32 %v2698_v16, %v1136_v4 }
  0xf2   :  { %v2150_v25 = vpop.f32.mrf.mxu0  ;;  %2165 = vmatpush3.bf16.msra.mxu1 %v2233_v21 }
  0xf3   :  { %2265 = vpow2.f32 %v2021_v22  ;;  %v2019_v27 = vmul.f32 -1.442695, %v2634_v23  ;;  %v2645_v28 = vadd.f32 %v2150_v25, %v2603_v62  ;;  %v1084_v22 = vmul.f32 %v2695_v15, %v1072_v60  ;;  %2166 = vmatprep.subr.bf16.mxu1 %v2359_v24 }
  0xf4   :  { %v2254_v30 = vpop.eup %2253  ;;  %v384_v31 = vpop.f32.mrf.mxu0  ;;  %v1112_v25 = vmul.f32 %v2692_v12, %v1100_v61  ;;  %v1164_v41 = vrot.slane %v1148_v26, 1 }
  0xf5   :  { %v465_v32 = vadd.f32 1.0, %v2254_v30  ;;  %2267 = vpow2.f32 %v2019_v27  ;;  %v2024_v33 = vmul.f32 -1.442695, %v2645_v28  ;;  %v2652_v34 = vadd.f32 %v2603_v62, %v384_v31  ;;  %v1059_v31 = vld [vmem:[%s3122_s3 + $0x8] sm:$0x7] }
  0xf6   :  { %v2256_v35 = vpop.eup %2255  ;;  %v2151_v36 = vpop.f32.mrf.mxu0  ;;  %v1120_v40 = vadd.f32 %v1112_v25, %v1084_v22  ;;  %v2738_v57 = vrot.slane %v1059_v31, %v2674_v53 }
  0xf7   :  { %2269 = vrcp.f32 %v465_v32  ;;  %v463_v37 = vadd.f32 1.0, %v2256_v35  ;;  %v2022_v38 = vmul.f32 -1.442695, %v2652_v34  ;;  %v2657_v39 = vadd.f32 %v2151_v36, %v2603_v62  ;;  %v1058_v35 = vld [vmem:[%s3122_s3 + $0x4] sm:$0x7]  ;;  %v2234_v36 = vld [vmem:[%s3121_s5 + $0x10] sm:$0xff]  }
  0xf8   :  { %v2258_v42 = vpop.eup %2257  ;;  %2271 = vpow2.f32 %v2024_v33  ;;  %v387_v43 = vpop.f32.mrf.mxu0  ;;  %2167 = vmatpush3.bf16.msra.mxu1 %v2234_v36 }
  0xf9   :  { %2273 = vrcp.f32 %v463_v37  ;;  %v466_v46 = vadd.f32 1.0, %v2258_v42  ;;  %v2025_v47 = vmul.f32 -1.442695, %v2657_v39  ;;  %v2667_v48 = vadd.f32 %v2603_v62, %v387_v43  ;;  %v1060_v43 = vld [vmem:[#allocation2] sm:$0x3]  ;;  %2168 = vmatprep.subr.bf16.mxu1 %v2359_v24 }
  0xfa   :  { %v2260_v49 = vpop.eup %2259  ;;  %2275 = vpow2.f32 %v2022_v38  ;;  %v2154_v50 = vpop.f32.mrf.mxu0  ;;  %v2722_v42 = vrot.slane %v1059_v31, %v2671_v51  ;;  %v1068_v61 = vunpack.c.l.bf16 %v1060_v43 }
  0xfb   :  { %2277 = vrcp.f32 %v466_v46  ;;  %v464_v54 = vadd.f32 1.0, %v2260_v49  ;;  %v2023_v55 = vmul.f32 -1.442695, %v2667_v48  ;;  %v2678_v56 = vadd.f32 %v2154_v50, %v2603_v62 }
  0xfc   :  { %v2262_v58 = vpop.eup %2261  ;;  %2279 = vpow2.f32 %v2025_v47  ;;  %v400_v59 = vpop.f32.mrf.mxu0  ;;  %v2726_v49 = vrot.slane %v1058_v35, %v2671_v51  ;;  %v2729_v50 = vrot.slane %v1059_v31, %v2660_v44 }
  0xfd   :  { %2281 = vrcp.f32 %v464_v54  ;;  %v469_v1 = vadd.f32 1.0, %v2262_v58  ;;  %v2028_v2 = vmul.f32 -1.442695, %v2678_v56  ;;  %v2689_v8 = vadd.f32 %v2603_v62, %v400_v59  ;;  %v1124_v58 = vld [vmem:[#allocation2] sm:$0x7] }
  0xfe   :  { %v2264_v5 = vpop.eup %2263  ;;  %2283 = vpow2.f32 %v2023_v55  ;;  %v2155_v10 = vpop.f32.mrf.mxu0  ;;  %v2732_v54 = vrot.slane %v1058_v35, %v2660_v44  ;;  %v2735_v55 = vrot.slane %v1058_v35, %v2674_v53  ;;  %v2745_v53 = vadd.f32 %v1164_v41, %v1120_v40 }
  0xff   :  { %2285 = vrcp.f32 %v469_v1  ;;  %v467_v13 = vadd.f32 1.0, %v2264_v5  ;;  %v2701_v19 = vadd.f32 %v2155_v10, %v2603_v62  ;;  %v2026_v29 = vmul.f32 -1.442695, %v2689_v8  ;;  %v2235_v1 = vld [vmem:[%s3121_s5 + $0x8] sm:$0xff]  }
 0x100   :  { %v2266_v18 = vpop.eup %2265  ;;  %2287 = vpow2.f32 %v2028_v2  ;;  %2169 = vmatpush3.bf16.msra.mxu1 %v2235_v1 }
 0x101   :  { %2289 = vrcp.f32 %v467_v13  ;;  %v470_v30 = vadd.f32 1.0, %v2266_v18  ;;  %v2029_v33 = vmul.f32 -1.442695, %v2701_v19  ;;  %v1132_v18 = vunpack.c.l.bf16 %v1124_v58  ;;  %2170 = vmatprep.subr.bf16.mxu1 %v2359_v24 }
 0x102   :  { %v2268_v27 = vpop.eup %2267  ;;  %2291 = vpow2.f32 %v2026_v29  ;;  %v2751_v29 = vmul.f32 %v2695_v15, %v1068_v61 }
 0x103   :  { %v468_v38 = vadd.f32 1.0, %v2268_v27  ;;  %2293 = vrcp.f32 %v470_v30  ;;  %v2754_v30 = vmul.f32 %v2692_v12, %v1096_v63  ;;  %v2769_v40 = vmul.f32 %v2698_v16, %v1132_v18 }
 0x104   :  { %v2270_v32 = vpop.eup %2269  ;;  %2295 = vpow2.f32 %v2029_v33 }
 0x105   :  { %v2272_v37 = vpop.eup %2271  ;;  %v513_v44 = vmul.f32 %v2270_v32, %v2606_v0  ;;  %2297 = vrcp.f32 %v468_v38  ;;  %v403_v0 = vpop.f32.mrf.mxu0 }
 0x106   :  { %v2274_v46 = vpop.eup %2273  ;;  %v473_v47 = vadd.f32 1.0, %v2272_v37  ;;  %v2766_v38 = vadd.f32 %v2603_v62, %v403_v0 }
 0x107   :  { %v2276_v52 = vpop.eup %2275  ;;  %v511_v10 = vmul.f32 %v2274_v46, %v2610_v3  ;;  %v2236_v3 = vld [vmem:[%s3121_s5] sm:$0xff]  }
 0x108   :  { %v2278_v59 = vpop.eup %2277  ;;  %v471_v60 = vadd.f32 1.0, %v2276_v52  ;;  %2299 = vrcp.f32 %v473_v47  ;;  %2171 = vmatpush3.bf16.msra.mxu1 %v2236_v3 }
 0x109   :  { %v2280_v2 = vpop.eup %2279  ;;  %v514_v4 = vmul.f32 %v2278_v59, %v2614_v7 }
 0x10a   :  { %v2282_v5 = vpop.eup %2281  ;;  %v474_v13 = vadd.f32 1.0, %v2280_v2  ;;  %2301 = vrcp.f32 %v471_v60 }
 0x10b   :  { %v2284_v21 = vpop.eup %2283  ;;  %v528_v22 = vpack.c.bf16 %v514_v4, %v513_v44  ;;  %v2031_v25 = vpack.c.bf16 %v514_v4, %v514_v4  ;;  %v512_v26 = vmul.f32 %v2282_v5, %v2618_v11 }
 0x10c   :  { %v2286_v7 = vpop.eup %2285  ;;  %2303 = vrcp.f32 %v474_v13  ;;  %v472_v27 = vadd.f32 1.0, %v2284_v21 }
 0x10d   :  { %v2288_v31 = vpop.eup %2287  ;;  %v567_v32 = vrot.slane %v528_v22, %v2437_v9  ;;  %v574_v11 = vrot.slane %v2031_v25, %v2437_v9  ;;  %v527_v33 = vpack.c.bf16 %v512_v26, %v511_v10  ;;  %v2030_v35 = vpack.c.bf16 %v512_v26, %v512_v26  ;;  %v866_v26 = vld [vmem:[#allocation2 + $0x18] sm:$0x7] }
 0x10e   :  { %v2290_v36 = vpop.eup %2289  ;;  %v2763_v37 = vmul.f32 %v2286_v7, %v2622_v14  ;;  %2305 = vrcp.f32 %v472_v27  ;;  %v2778_v58 = vadd.f32 1.0, %v2288_v31 }
 0x10f   :  { %v575_v41 = vcombine.high %v567_v32, %v567_v32  ;;  %v576_v43 = vcombine.high %v574_v11, %v574_v11  ;;  %v766_v45 = vrot.slane %v567_v32, %v2437_v9  ;;  %v780_v46 = vrot.slane %v574_v11, %v2437_v9  ;;  %v2782_v4 = vpop.eup %2291  ;;  %v872_v11 = vld [vmem:[#allocation2 + $0x20] sm:$0x7] }
 0x110   :  { %v550_v47 = vrot.slane %v527_v33, %v2437_v9  ;;  %v557_v52 = vrot.slane %v2030_v35, %v2437_v9  ;;  %v2776_v14 = vmul.f32 %v2290_v36, %v2626_v17  ;;  %v2294_v18 = vpop.eup %2293  ;;  %2307 = vrcp.f32 %v2778_v58 }
 0x111   :  { %v773_v62 = vrot.slane %v575_v41, %v2437_v9  ;;  %v787_v59 = vrot.slane %v576_v43, %v2437_v9  ;;  %v817_v60 = vshrl.u32 %v766_v45, 16  ;;  %v820_v61 = vshll.u32 %v766_v45, 16  ;;  %v2792_v27 = vpop.eup %2295  ;;  %v869_v41 = vld [vmem:[#allocation2 + $0x1c] sm:$0x7]  ;;  %v875_v43 = vld [vmem:[#allocation2 + $0x24] sm:$0x7] }
 0x112   :  { %v831_v63 = vshrl.u32 %v780_v46, 16  ;;  %v834_v1 = vshll.u32 %v780_v46, 16  ;;  %v558_v2 = vcombine.high %v550_v47, %v550_v47  ;;  %v559_v44 = vcombine.high %v557_v52, %v557_v52  ;;  %v2298_v35 = vpop.eup %2297 }
 0x113   :  { %v819_v5 = vrot.slane %v817_v60, 7  ;;  %v824_v10 = vshrl.u32 %v773_v62, 16  ;;  %v827_v13 = vshll.u32 %v773_v62, 16  ;;  %v838_v17 = vshrl.u32 %v787_v59, 16 }
 0x114   :  { %v833_v21 = vrot.slane %v831_v63, 7  ;;  %v841_v22 = vshll.u32 %v787_v59, 16  ;;  %v738_v0 = vrot.slane %v550_v47, %v2437_v9  ;;  %v745_v7 = vrot.slane %v558_v2, %v2437_v9 }
 0x115   :  { %v822_v3 = vor.u32 %v820_v61, %v819_v5  ;;  %v826_v31 = vrot.slane %v824_v10, 7  ;;  %v840_v32 = vrot.slane %v838_v17, 7  ;;  %v752_v33 = vrot.slane %v557_v52, %v2437_v9  ;;  %v2300_v59 = vpop.eup %2299 }
 0x116   :  { %v836_v36 = vor.u32 %v834_v1, %v833_v21  ;;  %v759_v45 = vrot.slane %v559_v44, %v2437_v9  ;;  %v789_v46 = vshrl.u32 %v738_v0, 16  ;;  %v792_v62 = vshll.u32 %v738_v0, 16 }
 0x117   :  { %v829_v47 = vor.u32 %v827_v13, %v826_v31  ;;  %v843_v60 = vor.u32 %v841_v22, %v840_v32  ;;  %v867_v63 = vsel %vm2786_vm8, %v822_v3, %v866_v26  ;;  %v796_v61 = vshrl.u32 %v745_v7, 16  ;;  %v2302_v2 = vpop.eup %2301  ;;  %v854_v26 = vld [vmem:[#allocation2 + $0x4] sm:$0x7] }
 0x118   :  { %868 = vst [vmem:[#allocation2 + $0x18] sm:$0x7] %v867_v63  ;;  %v873_v52 = vsel %vm2786_vm8, %v836_v36, %v872_v11  ;;  %v791_v5 = vrot.slane %v789_v46, 7  ;;  %v799_v1 = vshll.u32 %v745_v7, 16  ;;  %v803_v10 = vshrl.u32 %v752_v33, 16 }
 0x119   :  { %v2304_v17 = vpop.eup %2303  ;;  %v870_v44 = vsel %vm2786_vm8, %v829_v47, %v869_v41  ;;  %874 = vst [vmem:[#allocation2 + $0x20] sm:$0x7] %v873_v52  ;;  %v876_v13 = vsel %vm2786_vm8, %v843_v60, %v875_v43  ;;  %v798_v21 = vrot.slane %v796_v61, 7  ;;  %v806_v22 = vshll.u32 %v752_v33, 16  ;;  %v857_v11 = vld [vmem:[#allocation2 + $0x8] sm:$0x7] }
 0x11a   :  { %871 = vst [vmem:[#allocation2 + $0x1c] sm:$0x7] %v870_v44  ;;  %877 = vst [vmem:[#allocation2 + $0x24] sm:$0x7] %v876_v13  ;;  %v794_v0 = vor.u32 %v792_v62, %v791_v5  ;;  %v805_v3 = vrot.slane %v803_v10, 7  ;;  %v810_v31 = vshrl.u32 %v759_v45, 16  ;;  %v518_v63 = vmul.f32 %v2294_v18, %v2630_v20 }
 0x11b   :  { %v813_v32 = vshll.u32 %v759_v45, 16  ;;  %v2306_v7 = vpop.eup %2305  ;;  %v801_v36 = vor.u32 %v799_v1, %v798_v21  ;;  %v860_v46 = vld [vmem:[#allocation2 + $0xc] sm:$0x7]  ;;  %v516_v41 = vmul.f32 %v2298_v35, %v2634_v23  ;;  %v521_v47 = vmul.f32 %v2300_v59, %v2645_v28  ;;  %v863_v61 = vld [vmem:[#allocation2 + $0x10] sm:$0x7] }
 0x11c   :  { %v808_v43 = vor.u32 %v806_v22, %v805_v3  ;;  %v812_v60 = vrot.slane %v810_v31, 7  ;;  %v855_v33 = vsel %vm2786_vm8, %v794_v0, %v854_v26  ;;  %v519_v62 = vmul.f32 %v2302_v2, %v2652_v34 }
 0x11d   :  { %856 = vst [vmem:[#allocation2 + $0x4] sm:$0x7] %v855_v33  ;;  %v858_v45 = vsel %vm2786_vm8, %v801_v36, %v857_v11  ;;  %v530_v52 = vpack.c.bf16 %v518_v63, %v2763_v37  ;;  %v2033_v5 = vpack.c.bf16 %v518_v63, %v518_v63  ;;  %v529_v20 = vpack.c.bf16 %v516_v41, %v2776_v14 }
 0x11e   :  { %v815_v23 = vor.u32 %v813_v32, %v812_v60  ;;  %859 = vst [vmem:[#allocation2 + $0x8] sm:$0x7] %v858_v45  ;;  %v861_v28 = vsel %vm2786_vm8, %v808_v43, %v860_v46  ;;  %v2032_v18 = vpack.c.bf16 %v516_v41, %v516_v41  ;;  %v522_v35 = vmul.f32 %v2304_v17, %v2657_v39 }
 0x11f   :  { %862 = vst [vmem:[#allocation2 + $0xc] sm:$0x7] %v861_v28  ;;  %v601_v34 = vrot.slane %v530_v52, %v2437_v9  ;;  %v608_v59 = vrot.slane %v2033_v5, %v2437_v9  ;;  %2040 = vst.sshfl [vmem:[#allocation3 + $0xc] sm:$0x3 pattern:$0x76325410] %v530_v52  ;;  %v584_v37 = vrot.slane %v529_v20, %v2437_v9 }
 0x120   :  { %2041 = vst.sshfl [vmem:[#allocation3 + $0x10] sm:$0x3 pattern:$0x76325410] %v2033_v5  ;;  %v520_v14 = vmul.f32 %v2306_v7, %v2667_v48  ;;  %v864_v2 = vsel %vm2786_vm8, %v815_v23, %v863_v61  ;;  %v591_v1 = vrot.slane %v2032_v18, %v2437_v9  ;;  %v532_v10 = vpack.c.bf16 %v522_v35, %v521_v47  ;;  %v1045_v23 = vld [vmem:[#allocation4 + $0x10] sm:$0x7] }
 0x121   :  { %2038 = vst.sshfl [vmem:[#allocation3 + $0x2] sm:$0x3 pattern:$0x76325410] %v529_v20  ;;  %v2035_v39 = vpack.c.bf16 %v522_v35, %v522_v35  ;;  %865 = vst [vmem:[#allocation2 + $0x10] sm:$0x7] %v864_v2  ;;  %v609_v17 = vcombine.high %v601_v34, %v601_v34  ;;  %v610_v44 = vcombine.high %v608_v59, %v608_v59 }
 0x122   :  { %2039 = vst.sshfl [vmem:[#allocation3 + $0x6] sm:$0x3 pattern:$0x76325410] %v2032_v18  ;;  %v592_v13 = vcombine.high %v584_v37, %v584_v37  ;;  %v531_v21 = vpack.c.bf16 %v520_v14, %v519_v62  ;;  %v593_v22 = vcombine.high %v591_v1, %v591_v1  ;;  %v635_v26 = vrot.slane %v532_v10, %v2437_v9  ;;  %v1048_v35 = vld [vmem:[#allocation4 + $0x14] sm:$0x7] }
 0x123   :  { %v642_v0 = vrot.slane %v2035_v39, %v2437_v9  ;;  %v2034_v3 = vpack.c.bf16 %v520_v14, %v520_v14  ;;  %886 = vst [vmem:[#allocation3 + $0xe] sm:$0x3] %v609_v17  ;;  %888 = vst [vmem:[#allocation3 + $0x12] sm:$0x3] %v610_v44  ;;  %v475_v31 = vadd.f32 1.0, %v2782_v4  ;;  %v478_v32 = vadd.f32 1.0, %v2792_v27 }
 0x124   :  { %882 = vst [vmem:[#allocation3 + $0x4] sm:$0x3] %v592_v13  ;;  %v618_v48 = vrot.slane %v531_v21, %v2437_v9  ;;  %884 = vst [vmem:[#allocation3 + $0x8] sm:$0x3] %v593_v22  ;;  %v643_v11 = vcombine.high %v635_v26, %v635_v26  ;;  %v947_v36 = vrot.slane %v635_v26, %v2437_v9  ;;  %v1051_v34 = vld [vmem:[#allocation4 + $0x18] sm:$0x7] }
 0x125   :  { %v644_v7 = vcombine.high %v642_v0, %v642_v0  ;;  %v961_v46 = vrot.slane %v642_v0, %v2437_v9  ;;  %v625_v63 = vrot.slane %v2034_v3, %v2437_v9  ;;  %2309 = vrcp.f32 %v475_v31  ;;  %v1054_v10 = vld [vmem:[#allocation4 + $0x1c] sm:$0x7]  ;;  %v1033_v22 = vld [vmem:[#allocation4] sm:$0x7]  ;;  %v1036_v31 = vld [vmem:[#allocation4 + $0x4] sm:$0x7] }
 0x126   :  { %v626_v41 = vcombine.high %v618_v48, %v618_v48  ;;  %v919_v47 = vrot.slane %v618_v48, %v2437_v9  ;;  %v954_v43 = vrot.slane %v643_v11, %v2437_v9  ;;  %v998_v4 = vshrl.u32 %v947_v36, 16  ;;  %v1065_v11 = vld [vmem:[#allocation2 + $0x18] sm:$0x3] }
 0x127   :  { %v968_v58 = vrot.slane %v644_v7, %v2437_v9  ;;  %v1001_v60 = vshll.u32 %v947_v36, 16  ;;  %v1012_v27 = vshrl.u32 %v961_v46, 16  ;;  %v1015_v33 = vshll.u32 %v961_v46, 16 }
 0x128   :  { %v627_v62 = vcombine.high %v625_v63, %v625_v63  ;;  %v926_v45 = vrot.slane %v626_v41, %v2437_v9  ;;  %v1000_v61 = vrot.slane %v998_v4, 7  ;;  %v1005_v52 = vshrl.u32 %v954_v43, 16  ;;  %v1066_v41 = vld [vmem:[#allocation2 + $0x1c] sm:$0x3] }
 0x129   :  { %v1008_v5 = vshll.u32 %v954_v43, 16  ;;  %v1019_v20 = vshrl.u32 %v968_v58, 16  ;;  %v1014_v28 = vrot.slane %v1012_v27, 7  ;;  %v1022_v18 = vshll.u32 %v968_v58, 16  ;;  %v1093_v27 = vld [vmem:[#allocation3 + $0xc] sm:$0x3] }
 0x12a   :  { %v933_v59 = vrot.slane %v625_v63, %v2437_v9  ;;  %v940_v37 = vrot.slane %v627_v62, %v2437_v9  ;;  %v1003_v14 = vor.u32 %v1001_v60, %v1000_v61  ;;  %v1007_v2 = vrot.slane %v1005_v52, 7  ;;  %v1067_v60 = vld [vmem:[#allocation2 + $0x20] sm:$0x3]  ;;  %v1094_v61 = vld [vmem:[#allocation3 + $0xe] sm:$0x3]  ;;  %v2308_v52 = vpop.eup %2307 }
 0x12b   :  { %v1021_v1 = vrot.slane %v1019_v20, 7  ;;  %v970_v39 = vshrl.u32 %v919_v47, 16  ;;  %v1017_v17 = vor.u32 %v1015_v33, %v1014_v28  ;;  %v973_v44 = vshll.u32 %v919_v47, 16 }
 0x12c   :  { %v977_v13 = vshrl.u32 %v926_v45, 16  ;;  %v980_v21 = vshll.u32 %v926_v45, 16  ;;  %v1010_v26 = vor.u32 %v1008_v5, %v1007_v2  ;;  %v1046_v3 = vsel %vm2786_vm8, %v1003_v14, %v1045_v23  ;;  %v1039_v23 = vld [vmem:[#allocation4 + $0x8] sm:$0x7]  ;;  %v1042_v14 = vld [vmem:[#allocation4 + $0xc] sm:$0x7] }
 0x12d   :  { %v1024_v0 = vor.u32 %v1022_v18, %v1021_v1  ;;  %v972_v48 = vrot.slane %v970_v39, 7  ;;  %1047 = vst [vmem:[#allocation4 + $0x10] sm:$0x7] %v1046_v3  ;;  %v1052_v7 = vsel %vm2786_vm8, %v1017_v17, %v1051_v34  ;;  %v984_v46 = vshrl.u32 %v933_v59, 16  ;;  %v1130_v17 = vld [vmem:[#allocation2 + $0x1c] sm:$0x7] }
 0x12e   :  { %v979_v36 = vrot.slane %v977_v13, 7  ;;  %v987_v63 = vshll.u32 %v933_v59, 16  ;;  %v1049_v47 = vsel %vm2786_vm8, %v1010_v26, %v1048_v35  ;;  %1053 = vst [vmem:[#allocation4 + $0x18] sm:$0x7] %v1052_v7  ;;  %v991_v4 = vshrl.u32 %v940_v37, 16 }
 0x12f   :  { %v1055_v43 = vsel %vm2786_vm8, %v1024_v0, %v1054_v10  ;;  %v975_v58 = vor.u32 %v973_v44, %v972_v48  ;;  %1050 = vst [vmem:[#allocation4 + $0x14] sm:$0x7] %v1049_v47  ;;  %v986_v62 = vrot.slane %v984_v46, 7  ;;  %v994_v45 = vshll.u32 %v940_v37, 16  ;;  %v1095_v35 = vld [vmem:[#allocation3 + $0x10] sm:$0x3] }
 0x130   :  { %1056 = vst [vmem:[#allocation4 + $0x1c] sm:$0x7] %v1055_v43  ;;  %v982_v33 = vor.u32 %v980_v21, %v979_v36  ;;  %2311 = vrcp.f32 %v478_v32  ;;  %v993_v5 = vrot.slane %v991_v4, 7  ;;  %v1073_v28 = vunpack.c.l.bf16 %v1065_v11  ;;  %v1129_v37 = vld [vmem:[#allocation2 + $0x18] sm:$0x7] }
 0x131   :  { %v1034_v20 = vsel %vm2786_vm8, %v975_v58, %v1033_v22  ;;  %v1074_v18 = vunpack.c.l.bf16 %v1066_v41  ;;  %v989_v34 = vor.u32 %v987_v63, %v986_v62  ;;  %v1075_v2 = vunpack.c.l.bf16 %v1067_v60  ;;  %v1131_v44 = vld [vmem:[#allocation2 + $0x20] sm:$0x7] }
 0x132   :  { %1035 = vst [vmem:[#allocation4] sm:$0x7] %v1034_v20  ;;  %v1037_v59 = vsel %vm2786_vm8, %v982_v33, %v1036_v31  ;;  %v1101_v1 = vunpack.c.l.bf16 %v1093_v27  ;;  %v2310_v32 = vpop.eup %2309  ;;  %v996_v10 = vor.u32 %v994_v45, %v993_v5  ;;  %v1102_v39 = vunpack.c.l.bf16 %v1094_v61 }
 0x133   :  { %1038 = vst [vmem:[#allocation4 + $0x4] sm:$0x7] %v1037_v59  ;;  %v1116_v13 = vadd.f32 %v2754_v30, %v2751_v29  ;;  %v1160_v21 = vrot.slane %v2769_v40, 1  ;;  %v1040_v22 = vsel %vm2786_vm8, %v989_v34, %v1039_v23  ;;  %v1085_v26 = vmul.f32 %v2695_v15, %v1073_v28 }
 0x134   :  { %v1103_v0 = vunpack.c.l.bf16 %v1095_v35  ;;  %v2027_v3 = vmul.f32 -1.442695, %v2766_v38  ;;  %1041 = vst [vmem:[#allocation4 + $0x8] sm:$0x7] %v1040_v22  ;;  %v1043_v48 = vsel %vm2786_vm8, %v996_v10, %v1042_v14  ;;  %v1086_v31 = vmul.f32 %v2695_v15, %v1074_v18  ;;  %v1188_v29 = vld [vmem:[#allocation4 + $0x10] sm:$0x3] }
 0x135   :  { %v1114_v11 = vmul.f32 %v2692_v12, %v1102_v39  ;;  %v1137_v7 = vunpack.c.l.bf16 %v1129_v37  ;;  %1044 = vst [vmem:[#allocation4 + $0xc] sm:$0x7] %v1043_v48  ;;  %v1087_v30 = vmul.f32 %v2695_v15, %v1075_v2  ;;  %v1113_v40 = vmul.f32 %v2692_v12, %v1101_v1  ;;  %v1190_v63 = vld [vmem:[#allocation4 + $0x18] sm:$0x3]  ;;  %v1252_v4 = vld [vmem:[#allocation4 + $0x10] sm:$0x7] }
 0x136   :  { %v1138_v36 = vunpack.c.l.bf16 %v1130_v17  ;;  %v1139_v46 = vunpack.c.l.bf16 %v1131_v44  ;;  %v1115_v41 = vmul.f32 %v2692_v12, %v1103_v0  ;;  %v1189_v25 = vld [vmem:[#allocation4 + $0x14] sm:$0x3]  ;;  %v1196_v58 = vunpack.c.l.bf16 %v1188_v29  ;;  %v1254_v18 = vld [vmem:[#allocation4 + $0x18] sm:$0x7]  ;;  %v1313_v22 = vld [vmem:[#allocation2 + $0x1c] sm:$0x3] }
 0x137   :  { %v1149_v47 = vmul.f32 %v2698_v16, %v1137_v7  ;;  %v1191_v43 = vld [vmem:[#allocation4 + $0x1c] sm:$0x3]  ;;  %v2866_v60 = vadd.f32 %v1160_v21, %v1116_v13  ;;  %v1121_v27 = vadd.f32 %v1113_v40, %v1085_v26  ;;  %v1197_v45 = vunpack.c.l.bf16 %v1189_v25  ;;  %v1253_v61 = vld [vmem:[#allocation4 + $0x14] sm:$0x7]  ;;  %v1315_v7 = vld [vmem:[#allocation2 + $0x24] sm:$0x3] }
 0x138   :  { %v1150_v33 = vmul.f32 %v2698_v16, %v1138_v36  ;;  %v1151_v62 = vmul.f32 %v2698_v16, %v1139_v46  ;;  %v1122_v5 = vadd.f32 %v1114_v11, %v1086_v31  ;;  %v1198_v23 = vunpack.c.l.bf16 %v1190_v63  ;;  %v1255_v35 = vld [vmem:[#allocation4 + $0x1c] sm:$0x7]  ;;  %v1314_v11 = vld [vmem:[#allocation2 + $0x20] sm:$0x3] }
 0x139   :  { %v1165_v20 = vrot.slane %v1149_v47, 1  ;;  %v1199_v28 = vunpack.c.l.bf16 %v1191_v43  ;;  %v1123_v34 = vadd.f32 %v1115_v41, %v1087_v30  ;;  %v1260_v2 = vunpack.c.l.bf16 %v1252_v4  ;;  %v1312_v21 = vld [vmem:[#allocation2 + $0x18] sm:$0x3] }
 0x13a   :  { %v1166_v59 = vrot.slane %v1150_v33, 1  ;;  %v1167_v14 = vrot.slane %v1151_v62, 1  ;;  %v525_v1 = vmul.f32 %v2308_v52, %v2678_v56  ;;  %v2872_v37 = vmul.f32 %v2310_v32, %v2689_v8 }
 0x13b   :  { %v1261_v10 = vunpack.c.l.bf16 %v1253_v61  ;;  %2313 = vpow2.f32 %v2027_v3  ;;  %v1208_v39 = vmul.f32 %v2726_v49, %v1196_v58  ;;  %v1209_v17 = vmul.f32 %v2726_v49, %v1197_v45  ;;  %v1348_v45 = vld [vmem:[#allocation3 + $0xc] sm:$0x3]  ;;  %v1349_v61 = vld [vmem:[#allocation3 + $0xe] sm:$0x3] }
 0x13c   :  { %v1262_v44 = vunpack.c.l.bf16 %v1254_v18  ;;  %v1263_v13 = vunpack.c.l.bf16 %v1255_v35  ;;  %v1181_v0 = vadd.f32 %v1165_v20, %v1121_v27  ;;  %v1182_v48 = vadd.f32 %v1166_v59, %v1122_v5 }
 0x13d   :  { %v2312_v26 = vpop.eup %2311  ;;  %v1210_v31 = vmul.f32 %v2726_v49, %v1198_v23  ;;  %v1211_v56 = vmul.f32 %v2726_v49, %v1199_v28  ;;  %v1183_v52 = vadd.f32 %v1167_v14, %v1123_v34  ;;  %v1272_v32 = vmul.f32 %v2735_v55, %v1260_v2  ;;  %v1384_v28 = vld [vmem:[#allocation2 + $0x18] sm:$0x7]  ;;  %v1385_v14 = vld [vmem:[#allocation2 + $0x1c] sm:$0x7]  ;;  %v1386_v2 = vld [vmem:[#allocation2 + $0x20] sm:$0x7] }
 0x13e   :  { %v526_v8 = vmul.f32 %v2312_v26, %v2701_v19  ;;  %v2881_v3 = vmul.f32 %v2735_v55, %v1261_v10  ;;  %v1274_v29 = vmul.f32 %v2735_v55, %v1262_v44  ;;  %v2885_v30 = vmul.f32 %v2735_v55, %v1263_v13 }
 0x13f   :  { %v1320_v40 = vunpack.c.l.bf16 %v1312_v21  ;;  %v1321_v36 = vunpack.c.l.bf16 %v1313_v22  ;;  %v1216_v41 = vadd.f32 %v1208_v39, %v2745_v53  ;;  %v1217_v19 = vadd.f32 %v1209_v17, %v1181_v0  ;;  %v1350_v0 = vld [vmem:[#allocation3 + $0x10] sm:$0x3] }
 0x140   :  { %v534_v46 = vpack.c.bf16 %v526_v8, %v525_v1  ;;  %v2037_v63 = vpack.c.bf16 %v526_v8, %v526_v8  ;;  %v1218_v47 = vadd.f32 %v1210_v31, %v1182_v48  ;;  %v1219_v25 = vadd.f32 %v1211_v56, %v1183_v52  ;;  %v1387_v1 = vld [vmem:[#allocation2 + $0x24] sm:$0x7]  ;;  %v1351_v48 = vld [vmem:[#allocation3 + $0x12] sm:$0x3] }
 0x141   :  { %v1322_v43 = vunpack.c.l.bf16 %v1314_v11  ;;  %v1323_v58 = vunpack.c.l.bf16 %v1315_v7  ;;  %v1288_v33 = vrot.slane %v1272_v32, 1  ;;  %v1289_v62 = vrot.slane %v2881_v3, 1 }
 0x142   :  { %v669_v4 = vrot.slane %v534_v46, %v2437_v9  ;;  %v676_v27 = vrot.slane %v2037_v63, %v2437_v9  ;;  %v1290_v5 = vrot.slane %v1274_v29, 1  ;;  %v1291_v20 = vrot.slane %v2885_v30, 1 }
 0x143   :  { %v1332_v23 = vmul.f32 %v2722_v42, %v1320_v40  ;;  %v1333_v53 = vmul.f32 %v2722_v42, %v1321_v36  ;;  %v1334_v10 = vmul.f32 %v2722_v42, %v1322_v43  ;;  %v1335_v39 = vmul.f32 %v2722_v42, %v1323_v58 }
 0x144   :  { %v677_v18 = vcombine.high %v669_v4, %v669_v4  ;;  %v678_v35 = vcombine.high %v676_v27, %v676_v27  ;;  %v1224_v34 = vunpack.c.l.bf16 %v669_v4  ;;  %v1226_v59 = vunpack.c.l.bf16 %v676_v27  ;;  %v1061_v27 = vld [vmem:[#allocation2 + $0x4] sm:$0x3] }
 0x145   :  { %v1356_v17 = vunpack.c.l.bf16 %v1348_v45  ;;  %v1357_v44 = vunpack.c.l.bf16 %v1349_v61  ;;  %v1392_v31 = vunpack.c.l.bf16 %v1384_v28  ;;  %v1393_v56 = vunpack.c.l.bf16 %v1385_v14 }
 0x146   :  { %v1225_v13 = vunpack.c.l.bf16 %v677_v18  ;;  %v1227_v21 = vunpack.c.l.bf16 %v678_v35  ;;  %v1236_v22 = vmul.f32 %v2732_v54, %v1224_v34  ;;  %v1238_v26 = vmul.f32 %v2732_v54, %v1226_v59  ;;  %v1063_v18 = vld [vmem:[#allocation2 + $0xc] sm:$0x3] }
 0x147   :  { %v1394_v8 = vunpack.c.l.bf16 %v1386_v2  ;;  %v1395_v52 = vunpack.c.l.bf16 %v1387_v1  ;;  %v1358_v30 = vunpack.c.l.bf16 %v1350_v0  ;;  %v1359_v40 = vunpack.c.l.bf16 %v1351_v48  ;;  %v1089_v2 = vld [vmem:[#allocation3 + $0x2] sm:$0x3]  ;;  %v1125_v1 = vld [vmem:[#allocation2 + $0x4] sm:$0x7] }
 0x148   :  { %v2314_v32 = vpop.eup %2313  ;;  %v1237_v3 = vmul.f32 %v2732_v54, %v1225_v13  ;;  %v1239_v11 = vmul.f32 %v2732_v54, %v1227_v21  ;;  %v1244_v7 = vadd.f32 %v1236_v22, %v1216_v41  ;;  %v1246_v29 = vadd.f32 %v1238_v26, %v1218_v47  ;;  %v1062_v47 = vld [vmem:[#allocation2 + $0x8] sm:$0x3]  ;;  %v1090_v22 = vld [vmem:[#allocation3 + $0x4] sm:$0x3]  ;;  %v1091_v26 = vld [vmem:[#allocation3 + $0x6] sm:$0x3] }
 0x149   :  { %v1404_v36 = vmul.f32 %v2738_v57, %v1392_v31  ;;  %v2902_v46 = vmul.f32 %v2738_v57, %v1393_v56  ;;  %v1368_v45 = vmul.f32 %v2729_v50, %v1356_v17  ;;  %v1369_v61 = vmul.f32 %v2729_v50, %v1357_v44 }
 0x14a   :  { %v1245_v63 = vadd.f32 %v1237_v3, %v1217_v19  ;;  %v1247_v43 = vadd.f32 %v1239_v11, %v1219_v25  ;;  %v1304_v58 = vadd.f32 %v1288_v33, %v1244_v7  ;;  %v1306_v4 = vadd.f32 %v1290_v5, %v1246_v29  ;;  %v1184_v7 = vld [vmem:[#allocation4] sm:$0x3]  ;;  %v1185_v29 = vld [vmem:[#allocation4 + $0x4] sm:$0x3] }
 0x14b   :  { %v1406_v28 = vmul.f32 %v2738_v57, %v1394_v8  ;;  %v2908_v41 = vmul.f32 %v2738_v57, %v1395_v52  ;;  %v1370_v19 = vmul.f32 %v2729_v50, %v1358_v30  ;;  %v1371_v25 = vmul.f32 %v2729_v50, %v1359_v40 }
 0x14c   :  { %v1305_v35 = vadd.f32 %v1289_v62, %v1245_v63  ;;  %v1307_v34 = vadd.f32 %v1291_v20, %v1247_v43  ;;  %v1340_v59 = vadd.f32 %v1332_v23, %v1304_v58  ;;  %v1342_v14 = vadd.f32 %v1334_v10, %v1306_v4  ;;  %v1126_v23 = vld [vmem:[#allocation2 + $0x8] sm:$0x7]  ;;  %v1127_v10 = vld [vmem:[#allocation2 + $0xc] sm:$0x7]  ;;  %v1186_v58 = vld [vmem:[#allocation4 + $0x8] sm:$0x3] }
 0x14d   :  { %v476_v33 = vadd.f32 1.0, %v2314_v32  ;;  %v1069_v5 = vunpack.c.l.bf16 %v1061_v27  ;;  %v1420_v17 = vrot.slane %v1404_v36, 1  ;;  %v1421_v44 = vrot.slane %v2902_v46, 1  ;;  %v1187_v4 = vld [vmem:[#allocation4 + $0xc] sm:$0x3] }
 0x14e   :  { %v1070_v13 = vunpack.c.l.bf16 %v1062_v47  ;;  %v1071_v21 = vunpack.c.l.bf16 %v1063_v18  ;;  %v1341_v0 = vadd.f32 %v1333_v53, %v1305_v35  ;;  %v1422_v62 = vrot.slane %v1406_v28, 1  ;;  %v1248_v47 = vld [vmem:[#allocation4] sm:$0x7] }
 0x14f   :  { %v1423_v20 = vrot.slane %v2908_v41, 1  ;;  %2315 = vrcp.f32 %v476_v33  ;;  %v1343_v48 = vadd.f32 %v1335_v39, %v1307_v34  ;;  %v1376_v31 = vadd.f32 %v1368_v45, %v1340_v59  ;;  %v1249_v33 = vld [vmem:[#allocation4 + $0x4] sm:$0x7] }
 0x150   :  { %v1378_v56 = vadd.f32 %v1370_v19, %v1342_v14  ;;  %v1081_v8 = vmul.f32 %v2695_v15, %v1069_v5  ;;  %v1097_v52 = vunpack.c.l.bf16 %v1089_v2  ;;  %v1098_v32 = vunpack.c.l.bf16 %v1090_v22  ;;  %v1250_v5 = vld [vmem:[#allocation4 + $0x8] sm:$0x7] }
 0x151   :  { %v1099_v3 = vunpack.c.l.bf16 %v1091_v26  ;;  %v1133_v11 = vunpack.c.l.bf16 %v1125_v1  ;;  %v1082_v30 = vmul.f32 %v2695_v15, %v1070_v13  ;;  %v1083_v53 = vmul.f32 %v2695_v15, %v1071_v21  ;;  %v1251_v13 = vld [vmem:[#allocation4 + $0xc] sm:$0x7] }
 0x152   :  { %v1134_v40 = vunpack.c.l.bf16 %v1126_v23  ;;  %v1135_v36 = vunpack.c.l.bf16 %v1127_v10  ;;  %v1377_v46 = vadd.f32 %v1369_v61, %v1341_v0  ;;  %v1109_v63 = vmul.f32 %v2692_v12, %v1097_v52  ;;  %v1308_v0 = vld [vmem:[#allocation2 + $0x4] sm:$0x3]  ;;  %v1310_v52 = vld [vmem:[#allocation2 + $0xc] sm:$0x3] }
 0x153   :  { %v1110_v39 = vmul.f32 %v2692_v12, %v1098_v32  ;;  %v1145_v43 = vmul.f32 %v2698_v16, %v1133_v11  ;;  %v1192_v28 = vunpack.c.l.bf16 %v1184_v7  ;;  %v1193_v41 = vunpack.c.l.bf16 %v1185_v29  ;;  %v1311_v11 = vld [vmem:[#allocation2 + $0x10] sm:$0x3] }
 0x154   :  { %v1146_v27 = vmul.f32 %v2698_v16, %v1134_v40  ;;  %v1147_v45 = vmul.f32 %v2698_v16, %v1135_v36  ;;  %v1379_v18 = vadd.f32 %v1371_v25, %v1343_v48  ;;  %v2922_v15 = vadd.f32 %v1420_v17, %v1376_v31 }
 0x155   :  { %v2924_v35 = vadd.f32 %v1422_v62, %v1378_v56  ;;  %v1111_v61 = vmul.f32 %v2692_v12, %v1099_v3  ;;  %v1117_v34 = vadd.f32 %v1109_v63, %v1081_v8  ;;  %v1161_v59 = vrot.slane %v1145_v43, 1  ;;  %v1309_v8 = vld [vmem:[#allocation2 + $0x8] sm:$0x3]  ;;  %v1344_v43 = vld [vmem:[#allocation3 + $0x2] sm:$0x3] }
 0x156   :  { %v1194_v14 = vunpack.c.l.bf16 %v1186_v58  ;;  %v1195_v19 = vunpack.c.l.bf16 %v1187_v4  ;;  %v2927_v2 = vadd.f32 %v1421_v44, %v1377_v46  ;;  %v1118_v1 = vadd.f32 %v1110_v39, %v1082_v30  ;;  %v1345_v58 = vld [vmem:[#allocation3 + $0x4] sm:$0x3]  ;;  %v1346_v4 = vld [vmem:[#allocation3 + $0x6] sm:$0x3] }
 0x157   :  { %v1162_v16 = vrot.slane %v1146_v27, 1  ;;  %v1256_v21 = vunpack.c.l.bf16 %v1248_v47  ;;  %v1119_v22 = vadd.f32 %v1111_v61, %v1083_v53  ;;  %v1163_v25 = vrot.slane %v1147_v45, 1  ;;  %v1347_v47 = vld [vmem:[#allocation3 + $0x8] sm:$0x3]  ;;  %v1380_v61 = vld [vmem:[#allocation2 + $0x4] sm:$0x7] }
 0x158   :  { %v1204_v17 = vmul.f32 %v2726_v49, %v1192_v28  ;;  %v1205_v26 = vmul.f32 %v2726_v49, %v1193_v41  ;;  %v2931_v12 = vadd.f32 %v1423_v20, %v1379_v18  ;;  %v1206_v62 = vmul.f32 %v2726_v49, %v1194_v14 }
 0x159   :  { %v1257_v23 = vunpack.c.l.bf16 %v1249_v33  ;;  %v1258_v10 = vunpack.c.l.bf16 %v1250_v5  ;;  %v1177_v48 = vadd.f32 %v1161_v59, %v1117_v34  ;;  %v1207_v44 = vmul.f32 %v2726_v49, %v1195_v19  ;;  %v1381_v34 = vld [vmem:[#allocation2 + $0x8] sm:$0x7] }
 0x15a   :  { %v1259_v31 = vunpack.c.l.bf16 %v1251_v13  ;;  %v2936_v56 = vmul.f32 %v2735_v55, %v1256_v21  ;;  %v1178_v32 = vadd.f32 %v1162_v16, %v1118_v1  ;;  %v1316_v7 = vunpack.c.l.bf16 %v1308_v0  ;;  %v1382_v13 = vld [vmem:[#allocation2 + $0xc] sm:$0x7] }
 0x15b   :  { %v2939_v3 = vmul.f32 %v2735_v55, %v1257_v23  ;;  %v2942_v20 = vmul.f32 %v2735_v55, %v1258_v10  ;;  %v1179_v30 = vadd.f32 %v1163_v25, %v1119_v22  ;;  %v1212_v53 = vadd.f32 %v1204_v17, %v2866_v60  ;;  %v1383_v10 = vld [vmem:[#allocation2 + $0x10] sm:$0x7] }
 0x15c   :  { %v2316_v29 = vpop.eup %2315  ;;  %v1213_v49 = vadd.f32 %v1205_v26, %v1177_v48  ;;  %v2946_v40 = vmul.f32 %v2735_v55, %v1259_v31  ;;  %v1214_v46 = vadd.f32 %v1206_v62, %v1178_v32  ;;  %v1317_v63 = vunpack.c.l.bf16 %v1309_v8  ;;  %v2042_v32 = vld [vmem:[%s3123_s4] ss:$0 sm:$0xff] }
 0x15d   :  { %v524_v36 = vmul.f32 %v2316_v29, %v2766_v38  ;;  %v1318_v39 = vunpack.c.l.bf16 %v1310_v52  ;;  %v1215_v27 = vadd.f32 %v1207_v44, %v1179_v30  ;;  %v1284_v45 = vrot.slane %v2936_v56, 1 }
 0x15e   :  { %v1285_v28 = vrot.slane %v2939_v3, 1  ;;  %v1319_v41 = vunpack.c.l.bf16 %v1311_v11  ;;  %v1286_v55 = vrot.slane %v2942_v20, 1  ;;  %v1328_v38 = vmul.f32 %v2722_v42, %v1316_v7 }
 0x15f   :  { %v533_v60 = vpack.c.bf16 %v524_v36, %v2872_v37  ;;  %v2036_v18 = vpack.c.bf16 %v524_v36, %v524_v36  ;;  %v1287_v59 = vrot.slane %v2946_v40, 1  ;;  %v1352_v14 = vunpack.c.l.bf16 %v1344_v43 }
 0x160   :  { %v1353_v19 = vunpack.c.l.bf16 %v1345_v58  ;;  %v1354_v33 = vunpack.c.l.bf16 %v1346_v4  ;;  %v1329_v16 = vmul.f32 %v2722_v42, %v1317_v63  ;;  %v1330_v37 = vmul.f32 %v2722_v42, %v1318_v39 }
 0x161   :  { %v652_v5 = vrot.slane %v533_v60, %v2437_v9  ;;  %v659_v1 = vrot.slane %v2036_v18, %v2437_v9  ;;  %v1331_v21 = vmul.f32 %v2722_v42, %v1319_v41  ;;  %v1355_v22 = vunpack.c.l.bf16 %v1347_v47 }
 0x162   :  { %v1388_v25 = vunpack.c.l.bf16 %v1380_v61  ;;  %v1389_v17 = vunpack.c.l.bf16 %v1381_v34  ;;  %v1364_v48 = vmul.f32 %v2729_v50, %v1352_v14  ;;  %v1365_v44 = vmul.f32 %v2729_v50, %v1353_v19 }
 0x163   :  { %v660_v26 = vcombine.high %v652_v5, %v652_v5  ;;  %v661_v0 = vcombine.high %v659_v1, %v659_v1  ;;  %v1220_v62 = vunpack.c.l.bf16 %v652_v5  ;;  %v1222_v23 = vunpack.c.l.bf16 %v659_v1 }
 0x164   :  { %v1366_v9 = vmul.f32 %v2729_v50, %v1354_v33  ;;  %v1390_v31 = vunpack.c.l.bf16 %v1382_v13  ;;  %v1367_v3 = vmul.f32 %v2729_v50, %v1355_v22  ;;  %v1391_v20 = vunpack.c.l.bf16 %v1383_v10 }
 0x165   :  { %v1221_v56 = vunpack.c.l.bf16 %v660_v26  ;;  %v1223_v8 = vunpack.c.l.bf16 %v661_v0  ;;  %v1232_v52 = vmul.f32 %v2732_v54, %v1220_v62  ;;  %v1234_v42 = vmul.f32 %v2732_v54, %v1222_v23 }
 0x166   :  { %v1400_v11 = vmul.f32 %v2738_v57, %v1388_v25  ;;  %v1401_v7 = vmul.f32 %v2738_v57, %v1389_v17  ;;  %v1402_v63 = vmul.f32 %v2738_v57, %v1390_v31  ;;  %v2975_v39 = vadd.f32 %v2042_v32, %v2922_v15 }
 0x167   :  { %v1233_v29 = vmul.f32 %v2732_v54, %v1221_v56  ;;  %v1235_v30 = vmul.f32 %v2732_v54, %v1223_v8  ;;  %v1240_v40 = vadd.f32 %v1232_v52, %v1212_v53  ;;  %v1242_v36 = vadd.f32 %v1234_v42, %v1214_v46 }
 0x168   :  { %v2978_v43 = vadd.f32 %v2042_v32, %v2927_v2  ;;  %v2981_v50 = vadd.f32 %v2042_v32, %v2924_v35  ;;  %v1403_v60 = vmul.f32 %v2738_v57, %v1391_v20  ;;  %v2985_v54 = vadd.f32 %v2042_v32, %v2931_v12 }
 0x169   :  { %v1241_v58 = vadd.f32 %v1233_v29, %v1213_v49  ;;  %v1243_v4 = vadd.f32 %v1235_v30, %v1215_v27  ;;  %v1300_v41 = vadd.f32 %v1284_v45, %v1240_v40  ;;  %v1302_v47 = vadd.f32 %v1286_v55, %v1242_v36 }
 0x16a   :  { %v2047_v53 = vmul.f32 -1.442695, %v2975_v39  ;;  %v2048_v15 = vmul.f32 -1.442695, %v2978_v43  ;;  %v1416_v34 = vrot.slane %v1400_v11, 1  ;;  %v1418_v35 = vrot.slane %v1402_v63, 1 }
 0x16b   :  { %v1301_v46 = vadd.f32 %v1285_v28, %v1241_v58  ;;  %v1303_v18 = vadd.f32 %v1287_v59, %v1243_v4  ;;  %v1336_v2 = vadd.f32 %v1328_v38, %v1300_v41  ;;  %v1338_v61 = vadd.f32 %v1330_v37, %v1302_v47 }
 0x16c   :  { %2317 = vpow2.f32 %v2047_v53  ;;  %v2049_v49 = vmul.f32 -1.442695, %v2981_v50  ;;  %v1417_v14 = vrot.slane %v1401_v7, 1  ;;  %v1419_v12 = vrot.slane %v1403_v60, 1 }
 0x16d   :  { %v1337_v27 = vadd.f32 %v1329_v16, %v1301_v46  ;;  %v1339_v45 = vadd.f32 %v1331_v21, %v1303_v18  ;;  %v1372_v55 = vadd.f32 %v1364_v48, %v1336_v2  ;;  %v1374_v57 = vadd.f32 %v1366_v9, %v1338_v61 }
 0x16e   :  { %2319 = vpow2.f32 %v2048_v15  ;;  %v2050_v19 = vmul.f32 -1.442695, %v2985_v54 }
 0x16f   :  { %v1373_v33 = vadd.f32 %v1365_v44, %v1337_v27  ;;  %v1375_v5 = vadd.f32 %v1367_v3, %v1339_v45  ;;  %v1432_v28 = vadd.f32 %v1416_v34, %v1372_v55  ;;  %v1434_v59 = vadd.f32 %v1418_v35, %v1374_v57 }
 0x170   :  { %2321 = vpow2.f32 %v2049_v49 }
 0x171   :  { %v1433_v38 = vadd.f32 %v1417_v14, %v1373_v33  ;;  %v1435_v1 = vadd.f32 %v1419_v12, %v1375_v5  ;;  %v1447_v37 = vadd.f32 %v2042_v32, %v1432_v28  ;;  %v1449_v13 = vadd.f32 %v2042_v32, %v1434_v59 }
 0x172   :  { %2323 = vpow2.f32 %v2050_v19 }
 0x173   :  { %v1448_v22 = vadd.f32 %v2042_v32, %v1433_v38  ;;  %v1450_v16 = vadd.f32 %v2042_v32, %v1435_v1  ;;  %v2043_v21 = vmul.f32 -1.442695, %v1447_v37  ;;  %v2045_v25 = vmul.f32 -1.442695, %v1449_v13 }
 0x175   :  { %2325 = vpow2.f32 %v2043_v21  ;;  %v2044_v17 = vmul.f32 -1.442695, %v1448_v22  ;;  %v2046_v26 = vmul.f32 -1.442695, %v1450_v16 }
 0x176   :  { %2327 = vpow2.f32 %v2045_v25  ;;  %v2237_v25 = vld [vmem:[%s3124_s7 + $0x38] sm:$0xff]  }
 0x177   :  { %2329 = vpow2.f32 %v2044_v17  ;;  %2177 = vmatpush3.bf16.msra.mxu0 %v2237_v25  ;;  %v2238_v17 = vld [vmem:[%s3124_s7 + $0x30] sm:$0xff]  }
 0x178   :  { %2331 = vpow2.f32 %v2046_v26  ;;  %2178 = vmatprep.subr.bf16.mxu0 %v2359_v24  ;;  %v2239_v26 = vld [vmem:[%s3124_s7 + $0x28] sm:$0xff]  }
 0x179   :  { %v2318_v0 = vpop.eup %2317 }
 0x17a   :  { %v1483_v62 = vadd.f32 1.0, %v2318_v0  ;;  %v2240_v0 = vld [vmem:[%s3124_s7 + $0x20] sm:$0xff]  }
 0x17b   :  { %v2320_v23 = vpop.eup %2319  ;;  %2179 = vmatpush3.bf16.msra.mxu0 %v2238_v17 }
 0x17c   :  { %v1484_v10 = vadd.f32 1.0, %v2320_v23  ;;  %2333 = vrcp.f32 %v1483_v62  ;;  %2180 = vmatprep.subr.bf16.mxu0 %v2359_v24  ;;  %v2241_v62 = vld [vmem:[%s3124_s7 + $0x18] sm:$0xff]   ;;  %v2242_v23 = vld [vmem:[%s3124_s7 + $0x10] sm:$0xff]  }
 0x17d   :  { %v2322_v48 = vpop.eup %2321 }
 0x17e   :  { %v1485_v44 = vadd.f32 1.0, %v2322_v48  ;;  %2335 = vrcp.f32 %v1484_v10  ;;  %v2243_v10 = vld [vmem:[%s3124_s7 + $0x8] sm:$0xff]   ;;  %v2244_v48 = vld [vmem:[%s3124_s7] sm:$0xff]  }
 0x17f   :  { %v2324_v9 = vpop.eup %2323  ;;  %2181 = vmatpush3.bf16.msra.mxu0 %v2239_v26 }
 0x180   :  { %v1486_v31 = vadd.f32 1.0, %v2324_v9  ;;  %2337 = vrcp.f32 %v1485_v44  ;;  %2182 = vmatprep.subr.bf16.mxu0 %v2359_v24  ;;  %v2051_v44 = vld [vmem:[%s3125_s6] ss:$0 sm:$0xff] }
 0x182   :  { %v2326_v56 = vpop.eup %2325  ;;  %2339 = vrcp.f32 %v1486_v31 }
 0x183   :  { %v2328_v8 = vpop.eup %2327  ;;  %v1479_v52 = vadd.f32 1.0, %v2326_v56  ;;  %2183 = vmatpush3.bf16.msra.mxu0 %v2240_v0 }
 0x184   :  { %v2330_v42 = vpop.eup %2329  ;;  %v1481_v32 = vadd.f32 1.0, %v2328_v8  ;;  %2184 = vmatprep.subr.bf16.mxu0 %v2359_v24 }
 0x185   :  { %v2332_v3 = vpop.eup %2331  ;;  %v1480_v20 = vadd.f32 1.0, %v2330_v42  ;;  %2341 = vrcp.f32 %v1479_v52 }
 0x186   :  { %v1482_v11 = vadd.f32 1.0, %v2332_v3  ;;  %2343 = vrcp.f32 %v1481_v32 }
 0x187   :  { %2345 = vrcp.f32 %v1480_v20  ;;  %2185 = vmatpush3.bf16.msra.mxu0 %v2241_v62 }
 0x188   :  { %2347 = vrcp.f32 %v1482_v11  ;;  %2186 = vmatprep.subr.bf16.mxu0 %v2359_v24 }
 0x189   :  { %v2334_v7 = vpop.eup %2333 }
 0x18a   :  { %v2995_v36 = vmul.f32 %v2334_v7, %v2975_v39 }
 0x18b   :  { %v2336_v29 = vpop.eup %2335  ;;  %2187 = vmatpush3.bf16.msra.mxu0 %v2242_v23 }
 0x18c   :  { %v2992_v30 = vmul.f32 %v2336_v29, %v2978_v43  ;;  %2188 = vmatprep.subr.bf16.mxu0 %v2359_v24  ;;  %v2246_v29 = vld [vmem:[%s3126_s9 + $0x30] sm:$0xff]  }
 0x18d   :  { %v2338_v40 = vpop.eup %2337 }
 0x18e   :  { %v2998_v58 = vmul.f32 %v2338_v40, %v2981_v50  ;;  %v1572_v41 = vcombine.low %v2995_v36, %v2992_v30  ;;  %v2247_v40 = vld [vmem:[%s3126_s9 + $0x28] sm:$0xff]  }
 0x18f   :  { %v2340_v63 = vpop.eup %2339  ;;  %2189 = vmatpush3.bf16.msra.mxu0 %v2243_v10 }
 0x190   :  { %v3001_v4 = vmul.f32 %v2340_v63, %v2985_v54  ;;  %2190 = vmatprep.subr.bf16.mxu0 %v2359_v24  ;;  %v2245_v24 = vld [vmem:[%s3126_s9 + $0x38] sm:$0xff]   ;;  %v2248_v63 = vld [vmem:[%s3126_s9 + $0x20] sm:$0xff]  }
 0x191   :  { %2196 = vmatprep.subr.bf16.mxu1 %v2245_v24 }
 0x192   :  { %v2342_v47 = vpop.eup %2341  ;;  %v1573_v60 = vcombine.low %v2998_v58, %v3001_v4 }
 0x193   :  { %v2344_v43 = vpop.eup %2343  ;;  %v3007_v39 = vmul.f32 %v2342_v47, %v1447_v37  ;;  %2191 = vmatpush3.bf16.msra.mxu0 %v2244_v48  ;;  %v2250_v47 = vld [vmem:[%s3126_s9 + $0x10] sm:$0xff]  }
 0x194   :  { %v2346_v53 = vpop.eup %2345  ;;  %v1585_v15 = vadd.f32 %v1573_v60, %v1572_v41  ;;  %v3011_v50 = vmul.f32 %v2344_v43, %v1449_v13  ;;  %v2249_v41 = vld [vmem:[%s3126_s9 + $0x18] sm:$0xff]   ;;  %v2251_v60 = vld [vmem:[%s3126_s9 + $0x8] sm:$0xff]   ;;  %v2252_v43 = vld [vmem:[%s3126_s9] sm:$0xff]  }
 0x195   :  { %v2348_v46 = vpop.eup %2347  ;;  %v3009_v18 = vmul.f32 %v2346_v53, %v1448_v22  ;;  %v2061_v53 = vld [vmem:[%s3127_s8] ss:$0 sm:$0xff] }
 0x196   :  { %v3013_v2 = vmul.f32 %v2348_v46, %v1450_v16  ;;  %v1586_v54 = vrot.slane %v1585_v15, 4 }
 0x197   :  { %v1570_v61 = vcombine.low %v3007_v39, %v3009_v18 }
 0x198   :  { %v1571_v34 = vcombine.low %v3011_v50, %v3013_v2  ;;  %v1587_v35 = vadd.f32 %v1586_v54, %v1585_v15 }
 0x19a   :  { %v1578_v49 = vadd.f32 %v1571_v34, %v1570_v61  ;;  %v1588_v27 = vrot.slane %v1587_v35, 2 }
 0x19c   :  { %v1579_v45 = vrot.slane %v1578_v49, 4  ;;  %v1589_v55 = vadd.f32 %v1588_v27, %v1587_v35 }
 0x19e   :  { %v1580_v57 = vadd.f32 %v1579_v45, %v1578_v49  ;;  %v1590_v14 = vrot.slane %v1589_v55, 1  ;;  %v2361_v45 = vmov 1966171168  }
 0x1a0   :  { %v1581_v12 = vrot.slane %v1580_v57, 2  ;;  %v1591_v19 = vadd.f32 %v1590_v14, %v1589_v55  ;;  %v1809_v55 = vunpack.c.l.s4 %v2361_v45 }
 0x1a2   :  { %v1582_v33 = vadd.f32 %v1581_v12, %v1580_v57  ;;  %v1594_v28 = vmul.f32 0.0625, %v1591_v19  ;;  %v1810_v57 = vunpack.c.0.s8 %v1809_v55 }
 0x1a4   :  { %v1583_v5 = vrot.slane %v1582_v33, 1  ;;  %v1596_v1 = vpack.c.bf16 %v1594_v28, %v1594_v28  ;;  %v1813_v14 = vsub.s32 %v1810_v57, %v2428_v6 }
 0x1a6   :  { %v1584_v59 = vadd.f32 %v1583_v5, %v1582_v33  ;;  %v1606_v22 = vunpack.c.l.b16 %v1596_v1 }
 0x1a8   :  { %v1593_v38 = vmul.f32 0.0625, %v1584_v59 }
 0x1aa   :  { %v1595_v37 = vpack.c.bf16 %v1593_v38, %v1593_v38 }
 0x1ac   :  { %v1605_v13 = vunpack.c.l.b16 %v1595_v37 }
 0x1ae   :  { %v1608_v16 = vsel %vm1607_vm9, %v1606_v22, %v1605_v13 }
 0x1af   :  { %v1609_v21 = vpack.c.b16 %v1608_v16, %v1608_v16 }
 0x1b1   :  { %2173 = vmatmul.mubr.bf16.vlgmr.msra.gmra.mxu1 %v1609_v21 }
 0x1b2   :  { %2197 = vmatpush3.bf16.msra.mxu1 %v2245_v24 }
 0x1b3   :  { %2198 = vmatprep.subr.bf16.mxu1 %v2246_v29 }
 0x1b6   :  { %2199 = vmatpush3.bf16.msra.mxu1 %v2246_v29 }
 0x1b7   :  { %2200 = vmatprep.subr.bf16.mxu1 %v2247_v40 }
 0x1ba   :  { %2201 = vmatpush3.bf16.msra.mxu1 %v2247_v40 }
 0x1bb   :  { %2202 = vmatprep.subr.bf16.mxu1 %v2248_v63 }
 0x1be   :  { %2203 = vmatpush3.bf16.msra.mxu1 %v2248_v63 }
 0x1bf   :  { %2204 = vmatprep.subr.bf16.mxu1 %v2249_v41 }
 0x1c2   :  { %2205 = vmatpush3.bf16.msra.mxu1 %v2249_v41 }
 0x1c3   :  { %2206 = vmatprep.subr.bf16.mxu1 %v2250_v47 }
 0x1c6   :  { %2207 = vmatpush3.bf16.msra.mxu1 %v2250_v47 }
 0x1c7   :  { %2208 = vmatprep.subr.bf16.mxu1 %v2251_v60 }
 0x1ca   :  { %2209 = vmatpush3.bf16.msra.mxu1 %v2251_v60 }
 0x1cb   :  { %2210 = vmatprep.subr.bf16.mxu1 %v2252_v43 }
 0x1ce   :  { %2211 = vmatpush3.bf16.msra.mxu1 %v2252_v43 }
 0x271   :  { %v1693_v9 = vpop.f32.mrf.mxu1 }
 0x272   :  { %v1694_v31 = vadd.f32 %v2051_v44, %v1693_v9 }
 0x273   :  { %v2174_v56 = vpop.f32.mrf.mxu1 }
 0x274   :  { %v2060_v8 = vmul.f32 -1.442695, %v1694_v31 }
 0x275   :  { %v1696_v52 = vpop.f32.mrf.mxu1 }
 0x276   :  { %2349 = vpow2.f32 %v2060_v8 }
 0x277   :  { %v2175_v42 = vpop.f32.mrf.mxu1 }
 0x283   :  { %v2350_v32 = vpop.eup %2349 }
 0x284   :  { %v1702_v3 = vadd.f32 1.0, %v2350_v32 }
 0x286   :  { %2351 = vrcp.f32 %v1702_v3 }
 0x293   :  { %v2352_v20 = vpop.eup %2351 }
 0x294   :  { %v1705_v11 = vmul.f32 %v2352_v20, %v1694_v31 }
 0x296   :  { %v1706_v7 = vpack.c.bf16 %v1705_v11, %v1705_v11 }
 0x298   :  { %2193 = vmatmul.mubr.bf16.vlgmr.msra.gmra.mxu0 %v1706_v7 }
 0x358   :  { %v1795_v15 = vpop.f32.mrf.mxu0 }
 0x359   :  { %v1796_v46 = vadd.f32 %v2061_v53, %v1795_v15 }
 0x35a   :  { %v2194_v54 = vpop.f32.mrf.mxu0 }
 0x35b   :  { %v2070_v61 = vmul.f32 -1.442695, %v1796_v46 }
 0x35c   :  { %v1798_v34 = vpop.f32.mrf.mxu0 }
 0x35d   :  { %2353 = vpow2.f32 %v2070_v61 }
 0x35e   :  { %v2195_v35 = vpop.f32.mrf.mxu0 }
 0x36a   :  { %v2354_v49 = vpop.eup %2353 }
 0x36b   :  { %v1804_v27 = vadd.f32 1.0, %v2354_v49 }
 0x36d   :  { %2355 = vrcp.f32 %v1804_v27 }
 0x37a   :  { %v2356_v12 = vpop.eup %2355 }
 0x37b   :  { %v1814_v19 = vrot.slane %v2356_v12, %v1813_v14 }
 0x37d   :  { %v1815_v33 = vcombine.high %v1814_v19, %v1814_v19  ;;  %v1822_v5 = vrot.slane %v1814_v19, %v1813_v14 }
 0x37f   :  { %v1833_v28 = vrot.slane %v1822_v5, %v2671_v51  ;;  %v1829_v59 = vrot.slane %v1815_v33, %v1813_v14 }
 0x381   :  { %v1840_v38 = vcombine.high %v1833_v28, %v1833_v28  ;;  %v1837_v1 = vrot.slane %v1829_v59, %v2671_v51  ;;  %v1844_v37 = vmul.f32 %v1833_v28, %v3007_v39  ;;  %v1846_v22 = vmul.f32 %v1833_v28, %v3011_v50  ;;  %v2071_v50 = vld [vmem:[%s3128_s10] ss:$0 sm:$0xff] }
 0x383   :  { %v1845_v13 = vmul.f32 %v1840_v38, %v3009_v18  ;;  %v1847_v16 = vmul.f32 %v1840_v38, %v3013_v2  ;;  %v1841_v21 = vcombine.high %v1837_v1, %v1837_v1  ;;  %v1848_v6 = vmul.f32 %v1837_v1, %v2995_v36 }
 0x384   :  { %v1850_v25 = vmul.f32 %v1837_v1, %v2998_v58 }
 0x385   :  { %v1860_v17 = vcombine.low %v1844_v37, %v1845_v13  ;;  %v1861_v26 = vcombine.low %v1846_v22, %v1847_v16  ;;  %v1849_v0 = vmul.f32 %v1841_v21, %v2992_v30  ;;  %v1851_v62 = vmul.f32 %v1841_v21, %v3001_v4 }
 0x387   :  { %v1868_v51 = vpack.c.bf16 %v1861_v26, %v1860_v17  ;;  %v1862_v23 = vcombine.low %v1848_v6, %v1849_v0  ;;  %v1863_v39 = vcombine.low %v1850_v25, %v1851_v62 }
 0x389   :  { %2212 = vmatprep.mubr.bf16.mxu1 %v1868_v51  ;;  %v1869_v18 = vpack.c.bf16 %v1863_v39, %v1862_v23 }
 0x38b   :  { %2213 = vmatmul.mubr.bf16.vlgmr.msra.gmra.mxu1 %v1869_v18 }
 0x44b   :  { %v2214_v2 = vpop.f32.mrf.mxu1 }
 0x44c   :  { %v1967_v36 = vadd.f32 %v2214_v2, %v2071_v50 }
 0x44d   :  { %v1958_v10 = vpop.f32.mrf.mxu1 }
 0x44e   :  { %v1979_v58 = vcombine.high %v1967_v36, %v1967_v36  ;;  %v1989_v48 = vpack.c.bf16 %v1967_v36, %v1967_v36  ;;  %v1959_v44 = vadd.f32 %v2071_v50, %v1958_v10 }
 0x44f   :  { %v2215_v9 = vpop.f32.mrf.mxu1 }
 0x450   :  { %v1990_v30 = vpack.c.bf16 %v1979_v58, %v1979_v58  ;;  %1997 = vst [vmem:[%s3129_s11 + $0x8] sm:$0x3] %v1989_v48  ;;  %v1977_v4 = vcombine.high %v1959_v44, %v1959_v44  ;;  %v1985_v31 = vpack.c.bf16 %v1959_v44, %v1959_v44  ;;  %v1970_v56 = vadd.f32 %v2215_v9, %v2071_v50 }
 0x451   :  { %v1961_v8 = vpop.f32.mrf.mxu1 }
 0x452   :  { %1998 = vst [vmem:[%s3129_s11 + $0xa] sm:$0x3] %v1990_v30  ;;  %v1986_v52 = vpack.c.bf16 %v1977_v4, %v1977_v4  ;;  %1993 = vst [vmem:[%s3129_s11] sm:$0x3] %v1985_v31  ;;  %v1980_v42 = vcombine.high %v1970_v56, %v1970_v56  ;;  %v1991_v32 = vpack.c.bf16 %v1970_v56, %v1970_v56 }
 0x453   :  { %v1962_v3 = vadd.f32 %v2071_v50, %v1961_v8 }
 0x454   :  { %1994 = vst [vmem:[%s3129_s11 + $0x2] sm:$0x3] %v1986_v52  ;;  %v1992_v20 = vpack.c.bf16 %v1980_v42, %v1980_v42  ;;  %1999 = vst [vmem:[%s3129_s11 + $0xc] sm:$0x3] %v1991_v32 }
 0x455   :  { %v1978_v11 = vcombine.high %v1962_v3, %v1962_v3  ;;  %v1987_v7 = vpack.c.bf16 %v1962_v3, %v1962_v3 }
 0x456   :  { %2000 = vst [vmem:[%s3129_s11 + $0xe] sm:$0x3] %v1992_v20 }
 0x457   :  { %v1988_v24 = vpack.c.bf16 %v1978_v11, %v1978_v11  ;;  %1995 = vst [vmem:[%s3129_s11 + $0x4] sm:$0x3] %v1987_v7 }
 0x459   :  { %1996 = vst [vmem:[%s3129_s11 + $0x6] sm:$0x3] %v1988_v24 }

// kernel: effnet_forward.8
= control target key start
LH: loop header
LB: loop body
LE: loop exit
PB: predicated region body
PF: predicated region fallthrough
CT: control target
= control target key end

     0   :  { %v83_v0 = vlaneseq  ;;  %v1809_v2 = vmov 1983009808   ;;  %vm283_vm0 = vcmask 1040384   ;;  %vm284_vm1 = vsmask.f32 256  ;;  %s2384_s1 = inlined_call_operand.vmem [shape: bf16[128,128], index: 1, kind: input, shape index: {}]   ;;  %s2385_s0 = inlined_call_operand.vmem [shape: bf16[2,4,4,128], index: 0, kind: input, shape index: {}]   ;;  %s2386_s5 = inlined_call_operand.vmem [shape: bf16[128,128], index: 5, kind: input, shape index: {}]   ;;  %s2387_s2 = inlined_call_operand.vmem [shape: f32[1,128], index: 2, kind: input, shape index: {}]   ;;  %s2388_s3 = inlined_call_operand.vmem [shape: f32[3,3,128], index: 3, kind: input, shape index: {}]   ;;  %s2389_s4 = inlined_call_operand.vmem [shape: f32[1,128], index: 4, kind: input, shape index: {}]   ;;  %s2390_s7 = inlined_call_operand.vmem [shape: bf16[128,128], index: 7, kind: input, shape index: {}]   ;;  %s2391_s6 = inlined_call_operand.vmem [shape: f32[1,128], index: 6, kind: input, shape index: {}]   ;;  %s2392_s9 = inlined_call_operand.vmem [shape: bf16[128,128], index: 9, kind: input, shape index: {}]   ;;  %s2393_s8 = inlined_call_operand.vmem [shape: f32[1,128], index: 8, kind: input, shape index: {}]   ;;  %s2394_s10 = inlined_call_operand.vmem [shape: f32[1,128], index: 10, kind: input, shape index: {}]   ;;  %s2395_s11 = inlined_call_operand.vmem [shape: bf16[2,4,4,128], index: 11, kind: output, shape index: {}]  }
   0x1   :  { %v1721_v1 = vld [vmem:[%s2384_s1 + $0x38] sm:$0xff]   ;;  %v81_v3 = vunpack.c.l.s4 %v1809_v2  ;;  %v1722_v4 = vld [vmem:[%s2384_s1 + $0x30] sm:$0xff]   ;;  %v1723_v7 = vld [vmem:[%s2384_s1 + $0x28] sm:$0xff]   ;;  %vm310_vm2 = vcmask 1042434   ;;  %vm311_vm3 = vsmask.f32 7946 }
   0x2   :  { %1636 = vmatprep.subr.bf16.mxu0 %v1721_v1  ;;  %v1880_v6 = vshrl.u32 %v83_v0, 7  ;;  %v1724_v8 = vld [vmem:[%s2384_s1 + $0x20] sm:$0xff]   ;;  %v1725_v17 = vld [vmem:[%s2384_s1 + $0x18] sm:$0xff]   ;;  %v1726_v20 = vld [vmem:[%s2384_s1 + $0x10] sm:$0xff]   ;;  %v1810_v2 = vmov 0   ;;  %vm1812_vm6 = vmmov 0  }
   0x3   :  { %1637 = vmatpush3.bf16.msra.mxu0 %v1721_v1  ;;  %v82_v5 = vunpack.c.0.s8 %v81_v3  ;;  %v39_v10 = vld [vmem:[%s2385_s0] sm:$0x3]  ;;  %v40_v11 = vld [vmem:[%s2385_s0 + $0x2] sm:$0x3]  ;;  %v41_v12 = vld [vmem:[%s2385_s0 + $0x4] sm:$0x3] }
   0x4   :  { %1638 = vmatprep.subr.bf16.mxu0 %v1722_v4  ;;  %v42_v13 = vld [vmem:[%s2385_s0 + $0x6] sm:$0x3]  ;;  %v78_v14 = vcombine.low %v39_v10, %v40_v11  ;;  %v43_v21 = vld [vmem:[%s2385_s0 + $0x8] sm:$0x3]  ;;  %v44_v22 = vld [vmem:[%s2385_s0 + $0xa] sm:$0x3] }
   0x5   :  { %v1889_v9 = vsub.s32 %v82_v5, %v1880_v6  ;;  %v79_v15 = vcombine.low %v41_v12, %v42_v13  ;;  %v45_v23 = vld [vmem:[%s2385_s0 + $0xc] sm:$0x3]  ;;  %v46_v24 = vld [vmem:[%s2385_s0 + $0xe] sm:$0x3]  ;;  %v95_v26 = vcombine.low %v43_v21, %v44_v22  ;;  %v1728_v28 = vld [vmem:[%s2384_s1] sm:$0xff]   ;;  %v1811_v3 = vmov 0.0  }
   0x6   :  { %v1727_v25 = vld [vmem:[%s2384_s1 + $0x8] sm:$0xff]   ;;  %v96_v27 = vcombine.low %v45_v23, %v46_v24  ;;  %vm1931_vm4 = vmand %vm283_vm0, %vm284_vm1  ;;  %v298_v33 = vld [vmem:[#allocation2 + $0x1c] sm:$0x1]  ;;  %277 = vst [vmem:[#allocation2] sm:$0x7] %v1810_v2  ;;  %1656 = vmatprep.subr.bf16.mxu1 %v1811_v3  ;;  %1672 = vmatprep.mubr.msk.bf16.mxu1 %vm1812_vm6, %v1811_v3  ;;  %vm457_vm7 = vcmask 1042432  }
   0x7   :  { %1639 = vmatpush3.bf16.msra.mxu0 %v1722_v4  ;;  %v86_v16 = vrot.slane %v78_v14, %v1889_v9  ;;  %v93_v18 = vrot.slane %v79_v15, %v1889_v9  ;;  %v103_v29 = vrot.slane %v95_v26, %v1889_v9  ;;  %v304_v34 = vld [vmem:[#allocation2 + $0x24] sm:$0x1]  ;;  %v299_v35 = vsel %vm1931_vm4, 0, %v298_v33  ;;  %vm1939_vm5 = vmand %vm310_vm2, %vm311_vm3  ;;  %v325_v38 = vld [vmem:[#allocation2 + $0x1c] sm:$0x4] }
   0x8   :  { %1640 = vmatprep.subr.bf16.mxu0 %v1723_v7  ;;  %v110_v30 = vrot.slane %v96_v27, %v1889_v9  ;;  %v305_v36 = vsel %vm1931_vm4, 0, %v304_v34  ;;  %v331_v39 = vld [vmem:[#allocation2 + $0x24] sm:$0x4]  ;;  %300 = vst [vmem:[#allocation2 + $0x1c] sm:$0x1] %v299_v35  ;;  %v326_v42 = vsel %vm1939_vm5, 0, %v325_v38 }
   0x9   :  { %v94_v19 = vcombine.low %v86_v16, %v93_v18  ;;  %v301_v40 = vld [vmem:[#allocation2 + $0x20] sm:$0x1]  ;;  %306 = vst [vmem:[#allocation2 + $0x24] sm:$0x1] %v305_v36  ;;  %v307_v41 = vld [vmem:[#allocation2 + $0x28] sm:$0x1] }
   0xa   :  { %v111_v31 = vcombine.low %v103_v29, %v110_v30  ;;  %v332_v43 = vsel %vm1939_vm5, 0, %v331_v39  ;;  %v302_v44 = vsel %vm1931_vm4, 0, %v301_v40  ;;  %v308_v45 = vsel %vm1931_vm4, 0, %v307_v41  ;;  %327 = vst [vmem:[#allocation2 + $0x1c] sm:$0x4] %v326_v42  ;;  %v1729_v4 = vld [vmem:[%s2386_s5 + $0x38] sm:$0xff]  }
   0xb   :  { %1641 = vmatpush3.bf16.msra.mxu0 %v1723_v7  ;;  %1652 = vmatprep.mubr.bf16.mxu0 %v94_v19  ;;  %v328_v46 = vld [vmem:[#allocation2 + $0x20] sm:$0x4]  ;;  %333 = vst [vmem:[#allocation2 + $0x24] sm:$0x4] %v332_v43  ;;  %v334_v47 = vld [vmem:[#allocation2 + $0x28] sm:$0x4] }
   0xc   :  { %1642 = vmatprep.subr.bf16.mxu0 %v1724_v8  ;;  %303 = vst [vmem:[#allocation2 + $0x20] sm:$0x1] %v302_v44  ;;  %309 = vst [vmem:[#allocation2 + $0x28] sm:$0x1] %v308_v45  ;;  %v329_v48 = vsel %vm1939_vm5, 0, %v328_v46  ;;  %v335_v49 = vsel %vm1939_vm5, 0, %v334_v47  ;;  %1657 = vmatpush3.bf16.msra.mxu1 %v1729_v4 }
   0xd   :  { %v286_v50 = vld [vmem:[#allocation2 + $0x4] sm:$0x1]  ;;  %v292_v51 = vld [vmem:[#allocation2 + $0xc] sm:$0x1]  ;;  %330 = vst [vmem:[#allocation2 + $0x20] sm:$0x4] %v329_v48  ;;  %1658 = vmatprep.subr.bf16.mxu1 %v1811_v3 }
   0xe   :  { %336 = vst [vmem:[#allocation2 + $0x28] sm:$0x4] %v335_v49  ;;  %v287_v52 = vsel %vm1931_vm4, 0, %v286_v50  ;;  %v289_v53 = vld [vmem:[#allocation2 + $0x8] sm:$0x1]  ;;  %v293_v54 = vsel %vm1931_vm4, 0, %v292_v51 }
   0xf   :  { %1643 = vmatpush3.bf16.msra.mxu0 %v1724_v8  ;;  %v295_v55 = vld [vmem:[#allocation2 + $0x10] sm:$0x1]  ;;  %288 = vst [vmem:[#allocation2 + $0x4] sm:$0x1] %v287_v52  ;;  %v290_v56 = vsel %vm1931_vm4, 0, %v289_v53  ;;  %v1731_v7 = vld [vmem:[%s2386_s5 + $0x28] sm:$0xff]  }
  0x10   :  { %1644 = vmatprep.subr.bf16.mxu0 %v1725_v17  ;;  %294 = vst [vmem:[#allocation2 + $0xc] sm:$0x1] %v293_v54  ;;  %v296_v57 = vsel %vm1931_vm4, 0, %v295_v55  ;;  %v313_v58 = vld [vmem:[#allocation2 + $0x4] sm:$0x4]  ;;  %v1730_v5 = vld [vmem:[%s2386_s5 + $0x30] sm:$0xff]  }
  0x11   :  { %v316_v59 = vld [vmem:[#allocation2 + $0x8] sm:$0x4]  ;;  %291 = vst [vmem:[#allocation2 + $0x8] sm:$0x1] %v290_v56  ;;  %297 = vst [vmem:[#allocation2 + $0x10] sm:$0x1] %v296_v57  ;;  %1659 = vmatpush3.bf16.msra.mxu1 %v1730_v5 }
  0x12   :  { %v314_v60 = vsel %vm1939_vm5, 0, %v313_v58  ;;  %v317_v61 = vsel %vm1939_vm5, 0, %v316_v59  ;;  %v319_v62 = vld [vmem:[#allocation2 + $0xc] sm:$0x4]  ;;  %v322_v63 = vld [vmem:[#allocation2 + $0x10] sm:$0x4]  ;;  %1660 = vmatprep.subr.bf16.mxu1 %v1811_v3 }
  0x13   :  { %1645 = vmatpush3.bf16.msra.mxu0 %v1725_v17  ;;  %315 = vst [vmem:[#allocation2 + $0x4] sm:$0x4] %v314_v60  ;;  %318 = vst [vmem:[#allocation2 + $0x8] sm:$0x4] %v317_v61  ;;  %v320_v0 = vsel %vm1939_vm5, 0, %v319_v62  ;;  %v323_v1 = vsel %vm1939_vm5, 0, %v322_v63 }
  0x14   :  { %1646 = vmatprep.subr.bf16.mxu0 %v1726_v20  ;;  %321 = vst [vmem:[#allocation2 + $0xc] sm:$0x4] %v320_v0  ;;  %324 = vst [vmem:[#allocation2 + $0x10] sm:$0x4] %v323_v1  ;;  %v1732_v8 = vld [vmem:[%s2386_s5 + $0x20] sm:$0xff]   ;;  %v1733_v10 = vld [vmem:[%s2386_s5 + $0x18] sm:$0xff]  }
  0x15   :  { %278 = vst [vmem:[#allocation2 + $0x18] sm:$0x7] %v1810_v2  ;;  %280 = vst [vmem:[#allocation2 + $0x14] sm:$0x7] %v1810_v2  ;;  %1661 = vmatpush3.bf16.msra.mxu1 %v1731_v7  ;;  %v1734_v11 = vld [vmem:[%s2386_s5 + $0x10] sm:$0xff]   ;;  %v1735_v12 = vld [vmem:[%s2386_s5 + $0x8] sm:$0xff]  }
  0x16   :  { %281 = vst [vmem:[#allocation2 + $0x2c] sm:$0x7] %v1810_v2  ;;  %1662 = vmatprep.subr.bf16.mxu1 %v1811_v3  ;;  %v1736_v13 = vld [vmem:[%s2386_s5] sm:$0xff]   ;;  %v2016_v34 = vsub.s32 1, %v1880_v6  ;;  %v2022_v39 = vsub.s32 0, %v1880_v6  ;;  %v2028_v45 = vsub.s32 2, %v1880_v6 }
  0x17   :  { %1647 = vmatpush3.bf16.msra.mxu0 %v1726_v20  ;;  %v1545_v14 = vld [vmem:[%s2387_s2] ss:$0 sm:$0xff]  ;;  %v583_v43 = vld [vmem:[#allocation2] sm:$0x6]  ;;  %vm458_vm8 = vsmask.f32 2306 }
  0x18   :  { %1648 = vmatprep.subr.bf16.mxu0 %v1727_v25  ;;  %v484_v36 = vld [vmem:[%s2388_s3] sm:$0x7]  ;;  %v591_v51 = vunpack.c.l.bf16 %v583_v43  ;;  %v2049_v7 = vld [vmem:[%s2388_s3 + $0x8] sm:$0x7]  ;;  %vm2095_vm9 = vmand %vm457_vm7, %vm458_vm8  ;;  %vm1123_vm10 = vcmask 1041409  }
  0x19   :  { %1663 = vmatpush3.bf16.msra.mxu1 %v1732_v8  ;;  %v523_v38 = vld [vmem:[#allocation2] sm:$0x7]  ;;  %v2025_v41 = vrot.slane %v484_v36, %v2016_v34  ;;  %v2031_v49 = vrot.slane %v484_v36, %v2022_v39  ;;  %v2036_v55 = vrot.slane %v484_v36, %v2028_v45 }
  0x1a   :  { %1664 = vmatprep.subr.bf16.mxu1 %v1811_v3  ;;  %v531_v44 = vunpack.c.l.bf16 %v523_v38  ;;  %v487_v46 = vld [vmem:[#allocation2] sm:$0x3] }
  0x1b   :  { %1649 = vmatpush3.bf16.msra.mxu0 %v1727_v25  ;;  %v495_v52 = vunpack.c.l.bf16 %v487_v46  ;;  %v2040_v59 = vmul.f32 %v2036_v55, %v591_v51 }
  0x1c   :  { %1650 = vmatprep.subr.bf16.mxu0 %v1728_v28  ;;  %v527_v37 = vld [vmem:[#allocation2 + $0x18] sm:$0x7]  ;;  %v543_v53 = vmul.f32 %v2025_v41, %v531_v44  ;;  %v839_v61 = vld [vmem:[#allocation2 + $0x14] sm:$0x7] }
  0x1d   :  { %1665 = vmatpush3.bf16.msra.mxu1 %v1733_v10  ;;  %v535_v40 = vunpack.c.l.bf16 %v527_v37  ;;  %v491_v42 = vld [vmem:[#allocation2 + $0x18] sm:$0x3]  ;;  %v843_v62 = vld [vmem:[#allocation2 + $0x2c] sm:$0x7]  ;;  %v507_v0 = vmul.f32 %v2031_v49, %v495_v52  ;;  %v899_v8 = vld [vmem:[#allocation2 + $0x14] sm:$0x6] }
  0x1e   :  { %1666 = vmatprep.subr.bf16.mxu1 %v1811_v3  ;;  %v587_v47 = vld [vmem:[#allocation2 + $0x18] sm:$0x6]  ;;  %v499_v48 = vunpack.c.l.bf16 %v491_v42  ;;  %v559_v1 = vrot.slane %v543_v53, 1 }
  0x1f   :  { %1651 = vmatpush3.bf16.msra.mxu0 %v1728_v28  ;;  %v547_v50 = vmul.f32 %v2025_v41, %v535_v40  ;;  %v595_v54 = vunpack.c.l.bf16 %v587_v47 }
  0x20   :  { %1676 = vmatprep.subr.bf16.mxu0 %v1811_v3  ;;  %v511_v57 = vmul.f32 %v2031_v49, %v499_v48 }
  0x21   :  { %1667 = vmatpush3.bf16.msra.mxu1 %v1734_v11  ;;  %v563_v58 = vrot.slane %v547_v50, 1  ;;  %v2044_v2 = vmul.f32 %v2036_v55, %v595_v54 }
  0x22   :  { %1653 = vmatmul.mubr.bf16.vlgmr.msra.gmra.mxu0 %v111_v31  ;;  %1668 = vmatprep.subr.bf16.mxu1 %v1811_v3 }
  0x23   :  { %1692 = vmatprep.mubr.msk.bf16.mxu0 %vm1812_vm6, %v1811_v3  ;;  %v2051_v11 = vadd.f32 %v563_v58, %v511_v57 }
  0x25   :  { %1669 = vmatpush3.bf16.msra.mxu1 %v1735_v12  ;;  %v619_v12 = vrot.slane %v2040_v59, 2 }
  0x26   :  { %1670 = vmatprep.subr.bf16.mxu1 %v1811_v3 }
  0x29   :  { %1671 = vmatpush3.bf16.msra.mxu1 %v1736_v13  ;;  %v847_v13 = vunpack.c.l.bf16 %v839_v61 }
  0xe2   :  { %v1654_v15 = vpop.f32.mrf.mxu0 }
  0xe3   :  { %v205_v16 = vadd.f32 %v1654_v15, %v1545_v14 }
  0xe4   :  { %v196_v17 = vpop.f32.mrf.mxu0 }
  0xe5   :  { %v1556_v18 = vmul.f32 -1.442695, %v205_v16  ;;  %v2009_v19 = vadd.f32 %v1545_v14, %v196_v17 }
  0xe6   :  { %v1655_v20 = vpop.f32.mrf.mxu0 }
  0xe7   :  { %1753 = vpow2.f32 %v1556_v18  ;;  %v1554_v21 = vmul.f32 -1.442695, %v2009_v19  ;;  %v208_v22 = vadd.f32 %v1655_v20, %v1545_v14  ;;  %v2059_v20 = vld [vmem:[%s2388_s3 + $0x4] sm:$0x7] }
  0xe8   :  { %v199_v23 = vpop.f32.mrf.mxu0 }
  0xe9   :  { %1755 = vpow2.f32 %v1554_v21  ;;  %v1557_v24 = vmul.f32 -1.442695, %v208_v22  ;;  %v2012_v25 = vadd.f32 %v1545_v14, %v199_v23  ;;  %v851_v14 = vunpack.c.l.bf16 %v843_v62 }
  0xea   :  { %v2061_v21 = vadd.f32 %v559_v1, %v507_v0  ;;  %v2066_v23 = vrot.slane %v2049_v7, %v2016_v34 }
  0xeb   :  { %1757 = vpow2.f32 %v1557_v24  ;;  %v1555_v26 = vmul.f32 -1.442695, %v2012_v25  ;;  %v907_v24 = vunpack.c.l.bf16 %v899_v8 }
  0xed   :  { %1759 = vpow2.f32 %v1555_v26 }
  0xf4   :  { %v1754_v27 = vpop.eup %1753 }
  0xf5   :  { %v225_v28 = vadd.f32 1.0, %v1754_v27 }
  0xf6   :  { %v1756_v29 = vpop.eup %1755 }
  0xf7   :  { %v223_v30 = vadd.f32 1.0, %v1756_v29  ;;  %1761 = vrcp.f32 %v225_v28  ;;  %v903_v28 = vld [vmem:[#allocation2 + $0x2c] sm:$0x6]  ;;  %v2072_v29 = vrot.slane %v2059_v20, %v2022_v39 }
  0xf8   :  { %v1758_v31 = vpop.eup %1757  ;;  %v911_v42 = vunpack.c.l.bf16 %v903_v28  ;;  %v803_v28 = vld [vmem:[#allocation2 + $0x14] sm:$0x3] }
  0xf9   :  { %v226_v32 = vadd.f32 1.0, %v1758_v31  ;;  %1763 = vrcp.f32 %v223_v30  ;;  %v2075_v30 = vmul.f32 %v2066_v23, %v847_v13  ;;  %v2078_v31 = vmul.f32 %v2066_v23, %v851_v14 }
  0xfa   :  { %v1760_v33 = vpop.eup %1759 }
  0xfb   :  { %1765 = vrcp.f32 %v226_v32  ;;  %v224_v35 = vadd.f32 1.0, %v1760_v33  ;;  %v2082_v32 = vrot.slane %v2049_v7, %v2028_v45 }
  0xfd   :  { %1767 = vrcp.f32 %v224_v35  ;;  %v2089_v43 = vmul.f32 %v2082_v32, %v907_v24  ;;  %v2104_v24 = vmul.f32 %v2082_v32, %v911_v42 }
 0x104   :  { %v1762_v56 = vpop.eup %1761 }
 0x105   :  { %v237_v4 = vmul.f32 %v1762_v56, %v205_v16 }
 0x106   :  { %v1764_v60 = vpop.eup %1763 }
 0x107   :  { %v235_v15 = vmul.f32 %v1764_v60, %v2009_v19 }
 0x108   :  { %v1766_v63 = vpop.eup %1765 }
 0x109   :  { %v238_v5 = vmul.f32 %v1766_v63, %v208_v22  ;;  %v623_v22 = vrot.slane %v2044_v2, 2  ;;  %v472_v63 = vld [vmem:[#allocation2 + $0x1c] sm:$0x7]  ;;  %v875_v2 = vrot.slane %v2075_v30, 1 }
 0x10a   :  { %v1768_v10 = vpop.eup %1767 }
 0x10b   :  { %v240_v17 = vpack.c.bf16 %v238_v5, %v237_v4  ;;  %v1559_v16 = vpack.c.bf16 %v238_v5, %v238_v5  ;;  %v236_v18 = vmul.f32 %v1768_v10, %v2012_v25  ;;  %v478_v10 = vld [vmem:[#allocation2 + $0x24] sm:$0x7] }
 0x10d   :  { %v267_v19 = vrot.slane %v240_v17, %v1889_v9  ;;  %v274_v26 = vrot.slane %v1559_v16, %v1889_v9  ;;  %v239_v27 = vpack.c.bf16 %v236_v18, %v235_v15  ;;  %v1558_v25 = vpack.c.bf16 %v236_v18, %v236_v18  ;;  %v475_v15 = vld [vmem:[#allocation2 + $0x20] sm:$0x7]  ;;  %v481_v17 = vld [vmem:[#allocation2 + $0x28] sm:$0x7] }
 0x10f   :  { %v275_v33 = vcombine.high %v267_v19, %v267_v19  ;;  %v276_v35 = vcombine.high %v274_v26, %v274_v26  ;;  %v371_v36 = vrot.slane %v267_v19, %v1889_v9  ;;  %v385_v37 = vrot.slane %v274_v26, %v1889_v9 }
 0x110   :  { %v250_v38 = vrot.slane %v239_v27, %v1889_v9  ;;  %v257_v40 = vrot.slane %v1558_v25, %v1889_v9 }
 0x111   :  { %v378_v44 = vrot.slane %v275_v33, %v1889_v9  ;;  %v392_v46 = vrot.slane %v276_v35, %v1889_v9  ;;  %v422_v47 = vshrl.u32 %v371_v36, 16  ;;  %v425_v48 = vshll.u32 %v371_v36, 16 }
 0x112   :  { %v436_v50 = vshrl.u32 %v385_v37, 16  ;;  %v439_v51 = vshll.u32 %v385_v37, 16  ;;  %v258_v52 = vcombine.high %v250_v38, %v250_v38  ;;  %v259_v53 = vcombine.high %v257_v40, %v257_v40 }
 0x113   :  { %v424_v54 = vrot.slane %v422_v47, 7  ;;  %v429_v56 = vshrl.u32 %v378_v44, 16  ;;  %v432_v57 = vshll.u32 %v378_v44, 16  ;;  %v443_v58 = vshrl.u32 %v392_v46, 16 }
 0x114   :  { %v438_v60 = vrot.slane %v436_v50, 7  ;;  %v446_v61 = vshll.u32 %v392_v46, 16  ;;  %v343_v0 = vrot.slane %v250_v38, %v1889_v9  ;;  %v350_v1 = vrot.slane %v258_v52, %v1889_v9  ;;  %v807_v38 = vld [vmem:[#allocation2 + $0x2c] sm:$0x3]  ;;  %v460_v46 = vld [vmem:[#allocation2 + $0x4] sm:$0x7] }
 0x115   :  { %v427_v4 = vor.u32 %v425_v48, %v424_v54  ;;  %v431_v5 = vrot.slane %v429_v56, 7  ;;  %v445_v8 = vrot.slane %v443_v58, 7  ;;  %v357_v13 = vrot.slane %v257_v40, %v1889_v9  ;;  %v463_v52 = vld [vmem:[#allocation2 + $0x8] sm:$0x7]  ;;  %v466_v54 = vld [vmem:[#allocation2 + $0xc] sm:$0x7] }
 0x116   :  { %v441_v14 = vor.u32 %v439_v51, %v438_v60  ;;  %v364_v16 = vrot.slane %v259_v53, %v1889_v9  ;;  %v394_v18 = vshrl.u32 %v343_v0, 16  ;;  %v401_v25 = vshrl.u32 %v350_v1, 16 }
 0x117   :  { %v434_v19 = vor.u32 %v432_v57, %v431_v5  ;;  %v448_v26 = vor.u32 %v446_v61, %v445_v8  ;;  %v473_v27 = vsel %vm2095_vm9, %v427_v4, %v472_v63  ;;  %v397_v36 = vshll.u32 %v343_v0, 16  ;;  %v469_v4 = vld [vmem:[#allocation2 + $0x10] sm:$0x7] }
 0x118   :  { %474 = vst [vmem:[#allocation2 + $0x1c] sm:$0x7] %v473_v27  ;;  %v479_v33 = vsel %vm2095_vm9, %v441_v14, %v478_v10  ;;  %v396_v35 = vrot.slane %v394_v18, 7  ;;  %v408_v37 = vshrl.u32 %v357_v13, 16  ;;  %v403_v42 = vrot.slane %v401_v25, 7 }
 0x119   :  { %v476_v9 = vsel %vm2095_vm9, %v434_v19, %v475_v15  ;;  %480 = vst [vmem:[#allocation2 + $0x24] sm:$0x7] %v479_v33  ;;  %v482_v40 = vsel %vm2095_vm9, %v448_v26, %v481_v17  ;;  %v404_v44 = vshll.u32 %v350_v1, 16  ;;  %v411_v50 = vshll.u32 %v357_v13, 16 }
 0x11a   :  { %477 = vst [vmem:[#allocation2 + $0x20] sm:$0x7] %v476_v9  ;;  %483 = vst [vmem:[#allocation2 + $0x28] sm:$0x7] %v482_v40  ;;  %v399_v47 = vor.u32 %v397_v36, %v396_v35  ;;  %v410_v48 = vrot.slane %v408_v37, 7  ;;  %v415_v51 = vshrl.u32 %v364_v16, 16  ;;  %v2117_v56 = vadd.f32 %v623_v22, %v2051_v11 }
 0x11b   :  { %v406_v53 = vor.u32 %v404_v44, %v403_v42  ;;  %v811_v57 = vunpack.c.l.bf16 %v803_v28  ;;  %v815_v58 = vunpack.c.l.bf16 %v807_v38  ;;  %v418_v63 = vshll.u32 %v364_v16, 16 }
 0x11c   :  { %v413_v60 = vor.u32 %v411_v50, %v410_v48  ;;  %v417_v61 = vrot.slane %v415_v51, 7  ;;  %v461_v0 = vsel %vm2095_vm9, %v399_v47, %v460_v46  ;;  %v2125_v5 = vrot.slane %v2049_v7, %v2022_v39 }
 0x11d   :  { %462 = vst [vmem:[#allocation2 + $0x4] sm:$0x7] %v461_v0  ;;  %v464_v1 = vsel %vm2095_vm9, %v406_v53, %v463_v52  ;;  %v879_v11 = vrot.slane %v2078_v31, 1  ;;  %v935_v10 = vrot.slane %v2089_v43, 2  ;;  %v939_v13 = vrot.slane %v2104_v24, 2 }
 0x11e   :  { %v420_v22 = vor.u32 %v418_v63, %v417_v61  ;;  %465 = vst [vmem:[#allocation2 + $0x8] sm:$0x7] %v464_v1  ;;  %v467_v8 = vsel %vm2095_vm9, %v413_v60, %v466_v54  ;;  %v2136_v7 = vadd.f32 %v619_v12, %v2061_v21  ;;  %v2140_v16 = vrot.slane %v2059_v20, %v2016_v34 }
 0x11f   :  { %468 = vst [vmem:[#allocation2 + $0xc] sm:$0x7] %v467_v8  ;;  %v492_v14 = vld [vmem:[#allocation2 + $0x1c] sm:$0x3]  ;;  %v2144_v18 = vrot.slane %v2059_v20, %v2028_v45  ;;  %v2147_v19 = vmul.f32 %v2125_v5, %v811_v57  ;;  %v2152_v20 = vmul.f32 %v2125_v5, %v815_v58 }
 0x120   :  { %v528_v15 = vld [vmem:[#allocation2 + $0x1c] sm:$0x7]  ;;  %v470_v26 = vsel %vm2095_vm9, %v420_v22, %v469_v4  ;;  %v494_v27 = vld [vmem:[#allocation2 + $0x24] sm:$0x3]  ;;  %v500_v25 = vunpack.c.l.bf16 %v492_v14 }
 0x121   :  { %v588_v17 = vld [vmem:[#allocation2 + $0x1c] sm:$0x6]  ;;  %v530_v28 = vld [vmem:[#allocation2 + $0x24] sm:$0x7]  ;;  %v536_v59 = vunpack.c.l.bf16 %v528_v15  ;;  %471 = vst [vmem:[#allocation2 + $0x10] sm:$0x7] %v470_v26  ;;  %v502_v34 = vunpack.c.l.bf16 %v494_v27 }
 0x122   :  { %v590_v12 = vld [vmem:[#allocation2 + $0x24] sm:$0x6]  ;;  %v596_v21 = vunpack.c.l.bf16 %v588_v17  ;;  %v493_v33 = vld [vmem:[#allocation2 + $0x20] sm:$0x3]  ;;  %v538_v36 = vunpack.c.l.bf16 %v530_v28  ;;  %v512_v62 = vmul.f32 %v2031_v49, %v500_v25 }
 0x123   :  { %v529_v35 = vld [vmem:[#allocation2 + $0x20] sm:$0x7]  ;;  %v598_v45 = vunpack.c.l.bf16 %v590_v12  ;;  %v501_v38 = vunpack.c.l.bf16 %v493_v33  ;;  %v548_v40 = vmul.f32 %v2025_v41, %v536_v59  ;;  %v514_v42 = vmul.f32 %v2031_v49, %v502_v34 }
 0x124   :  { %v589_v37 = vld [vmem:[#allocation2 + $0x20] sm:$0x6]  ;;  %v537_v9 = vunpack.c.l.bf16 %v529_v35  ;;  %v550_v44 = vmul.f32 %v2025_v41, %v538_v36  ;;  %v608_v47 = vmul.f32 %v2036_v55, %v596_v21  ;;  %v488_v48 = vld [vmem:[#allocation2 + $0x4] sm:$0x3] }
 0x125   :  { %v597_v46 = vunpack.c.l.bf16 %v589_v37  ;;  %v513_v50 = vmul.f32 %v2031_v49, %v501_v38  ;;  %v524_v51 = vld [vmem:[#allocation2 + $0x4] sm:$0x7]  ;;  %v564_v53 = vrot.slane %v548_v40, 1  ;;  %v610_v54 = vmul.f32 %v2036_v55, %v598_v45  ;;  %v489_v57 = vld [vmem:[#allocation2 + $0x8] sm:$0x3] }
 0x126   :  { %v549_v52 = vmul.f32 %v2025_v41, %v537_v9  ;;  %v496_v58 = vunpack.c.l.bf16 %v488_v48  ;;  %v525_v60 = vld [vmem:[#allocation2 + $0x8] sm:$0x7]  ;;  %v532_v61 = vunpack.c.l.bf16 %v524_v51  ;;  %v566_v63 = vrot.slane %v550_v44, 1  ;;  %v490_v1 = vld [vmem:[#allocation2 + $0xc] sm:$0x3] }
 0x127   :  { %v609_v0 = vmul.f32 %v2036_v55, %v597_v46  ;;  %v497_v4 = vunpack.c.l.bf16 %v489_v57  ;;  %v526_v22 = vld [vmem:[#allocation2 + $0xc] sm:$0x7]  ;;  %v533_v8 = vunpack.c.l.bf16 %v525_v60  ;;  %v580_v15 = vadd.f32 %v564_v53, %v512_v62  ;;  %v584_v28 = vld [vmem:[#allocation2 + $0x4] sm:$0x6]  ;;  %v585_v59 = vld [vmem:[#allocation2 + $0x8] sm:$0x6] }
 0x128   :  { %v565_v14 = vrot.slane %v549_v52, 1  ;;  %v498_v17 = vunpack.c.l.bf16 %v490_v1  ;;  %v508_v26 = vmul.f32 %v2031_v49, %v496_v58  ;;  %v534_v27 = vunpack.c.l.bf16 %v526_v22  ;;  %v586_v12 = vld [vmem:[#allocation2 + $0xc] sm:$0x6]  ;;  %v643_v53 = vld [vmem:[#allocation2 + $0x4] sm:$0x3] }
 0x129   :  { %v544_v25 = vmul.f32 %v2025_v41, %v532_v61  ;;  %v509_v21 = vmul.f32 %v2031_v49, %v497_v4  ;;  %v545_v33 = vmul.f32 %v2025_v41, %v533_v8  ;;  %v582_v35 = vadd.f32 %v566_v63, %v514_v42  ;;  %v644_v57 = vld [vmem:[#allocation2 + $0x8] sm:$0x3]  ;;  %v646_v60 = vld [vmem:[#allocation2 + $0x10] sm:$0x3]  ;;  %v648_v22 = vld [vmem:[#allocation2 + $0x20] sm:$0x3] }
 0x12a   :  { %v581_v34 = vadd.f32 %v565_v14, %v513_v50  ;;  %v510_v36 = vmul.f32 %v2031_v49, %v498_v17  ;;  %v546_v37 = vmul.f32 %v2025_v41, %v534_v27  ;;  %v592_v38 = vunpack.c.l.bf16 %v584_v28  ;;  %v645_v41 = vld [vmem:[#allocation2 + $0xc] sm:$0x3] }
 0x12b   :  { %v560_v45 = vrot.slane %v544_v25, 1  ;;  %v561_v62 = vrot.slane %v545_v33, 1  ;;  %v593_v9 = vunpack.c.l.bf16 %v585_v59  ;;  %v594_v40 = vunpack.c.l.bf16 %v586_v12 }
 0x12c   :  { %v624_v44 = vrot.slane %v608_v47, 2  ;;  %v562_v46 = vrot.slane %v546_v37, 1  ;;  %v604_v51 = vmul.f32 %v2036_v55, %v592_v38  ;;  %v625_v52 = vrot.slane %v609_v0, 2  ;;  %v647_v47 = vld [vmem:[#allocation2 + $0x1c] sm:$0x3] }
 0x12d   :  { %v576_v48 = vadd.f32 %v560_v45, %v508_v26  ;;  %v577_v58 = vadd.f32 %v561_v62, %v509_v21  ;;  %v605_v42 = vmul.f32 %v2036_v55, %v593_v9  ;;  %v606_v49 = vmul.f32 %v2036_v55, %v594_v40  ;;  %v649_v0 = vld [vmem:[#allocation2 + $0x24] sm:$0x3]  ;;  %v650_v26 = vld [vmem:[#allocation2 + $0x28] sm:$0x3] }
 0x12e   :  { %v626_v50 = vrot.slane %v610_v54, 2  ;;  %v578_v61 = vadd.f32 %v562_v46, %v510_v36  ;;  %v620_v63 = vrot.slane %v604_v51, 2  ;;  %v640_v1 = vadd.f32 %v624_v44, %v580_v15  ;;  %v679_v9 = vld [vmem:[#allocation2 + $0x4] sm:$0x7]  ;;  %v680_v40 = vld [vmem:[#allocation2 + $0x8] sm:$0x7] }
 0x12f   :  { %v641_v4 = vadd.f32 %v625_v52, %v581_v34  ;;  %v621_v8 = vrot.slane %v605_v42, 2  ;;  %v622_v14 = vrot.slane %v606_v49, 2  ;;  %v651_v27 = vunpack.c.l.bf16 %v643_v53  ;;  %v683_v44 = vld [vmem:[#allocation2 + $0x1c] sm:$0x7]  ;;  %v681_v53 = vld [vmem:[#allocation2 + $0xc] sm:$0x7] }
 0x130   :  { %v642_v17 = vadd.f32 %v626_v50, %v582_v35  ;;  %v636_v25 = vadd.f32 %v620_v63, %v576_v48  ;;  %v652_v28 = vunpack.c.l.bf16 %v644_v57  ;;  %v653_v59 = vunpack.c.l.bf16 %v645_v41  ;;  %v682_v57 = vld [vmem:[#allocation2 + $0x10] sm:$0x7] }
 0x131   :  { %v654_v12 = vunpack.c.l.bf16 %v646_v60  ;;  %v637_v55 = vadd.f32 %v621_v8, %v577_v58  ;;  %v638_v54 = vadd.f32 %v622_v14, %v578_v61  ;;  %v655_v21 = vunpack.c.l.bf16 %v647_v47  ;;  %v684_v58 = vld [vmem:[#allocation2 + $0x20] sm:$0x7]  ;;  %v685_v60 = vld [vmem:[#allocation2 + $0x24] sm:$0x7]  ;;  %v686_v61 = vld [vmem:[#allocation2 + $0x28] sm:$0x7] }
 0x132   :  { %v656_v33 = vunpack.c.l.bf16 %v648_v22  ;;  %v657_v36 = vunpack.c.l.bf16 %v649_v0  ;;  %v658_v37 = vunpack.c.l.bf16 %v650_v26  ;;  %v663_v15 = vmul.f32 %v2072_v29, %v651_v27 }
 0x133   :  { %v664_v34 = vmul.f32 %v2072_v29, %v652_v28  ;;  %v665_v45 = vmul.f32 %v2072_v29, %v653_v59  ;;  %v666_v35 = vmul.f32 %v2072_v29, %v654_v12  ;;  %v667_v38 = vmul.f32 %v2072_v29, %v655_v21 }
 0x134   :  { %v668_v62 = vmul.f32 %v2072_v29, %v656_v33  ;;  %v669_v46 = vmul.f32 %v2072_v29, %v657_v36  ;;  %v670_v48 = vmul.f32 %v2072_v29, %v658_v37  ;;  %v671_v51 = vadd.f32 %v663_v15, %v2136_v7  ;;  %v740_v33 = vld [vmem:[#allocation2 + $0x8] sm:$0x6]  ;;  %v741_v36 = vld [vmem:[#allocation2 + $0xc] sm:$0x6] }
 0x135   :  { %v672_v52 = vadd.f32 %v664_v34, %v636_v25  ;;  %v673_v42 = vadd.f32 %v665_v45, %v637_v55  ;;  %v674_v49 = vadd.f32 %v666_v35, %v638_v54  ;;  %v675_v50 = vadd.f32 %v667_v38, %v2117_v56  ;;  %v742_v35 = vld [vmem:[#allocation2 + $0x10] sm:$0x6] }
 0x136   :  { %v676_v41 = vadd.f32 %v668_v62, %v640_v1  ;;  %v677_v63 = vadd.f32 %v669_v46, %v641_v4  ;;  %v678_v47 = vadd.f32 %v670_v48, %v642_v17  ;;  %v687_v22 = vunpack.c.l.bf16 %v679_v9  ;;  %v739_v17 = vld [vmem:[#allocation2 + $0x4] sm:$0x6]  ;;  %v744_v46 = vld [vmem:[#allocation2 + $0x20] sm:$0x6] }
 0x137   :  { %v688_v8 = vunpack.c.l.bf16 %v680_v40  ;;  %v689_v14 = vunpack.c.l.bf16 %v681_v53  ;;  %v690_v0 = vunpack.c.l.bf16 %v682_v57  ;;  %v691_v29 = vunpack.c.l.bf16 %v683_v44  ;;  %v743_v44 = vld [vmem:[#allocation2 + $0x1c] sm:$0x6] }
 0x138   :  { %v692_v26 = vunpack.c.l.bf16 %v684_v58  ;;  %v693_v7 = vunpack.c.l.bf16 %v685_v60  ;;  %v694_v27 = vunpack.c.l.bf16 %v686_v61  ;;  %v699_v25 = vmul.f32 %v2140_v16, %v687_v22  ;;  %v746_v60 = vld [vmem:[#allocation2 + $0x28] sm:$0x6] }
 0x139   :  { %v700_v28 = vmul.f32 %v2140_v16, %v688_v8  ;;  %v701_v59 = vmul.f32 %v2140_v16, %v689_v14  ;;  %v702_v56 = vmul.f32 %v2140_v16, %v690_v0  ;;  %v703_v1 = vmul.f32 %v2140_v16, %v691_v29 }
 0x13a   :  { %v704_v4 = vmul.f32 %v2140_v16, %v692_v26  ;;  %v705_v12 = vmul.f32 %v2140_v16, %v693_v7  ;;  %v706_v55 = vmul.f32 %v2140_v16, %v694_v27  ;;  %v715_v54 = vrot.slane %v699_v25, 1  ;;  %v745_v16 = vld [vmem:[#allocation2 + $0x24] sm:$0x6] }
 0x13b   :  { %v716_v21 = vrot.slane %v700_v28, 1  ;;  %v717_v37 = vrot.slane %v701_v59, 1  ;;  %v718_v15 = vrot.slane %v702_v56, 1  ;;  %v719_v34 = vrot.slane %v703_v1, 1  ;;  %v801_v1 = vld [vmem:[#allocation2 + $0xc] sm:$0x3] }
 0x13c   :  { %v720_v45 = vrot.slane %v704_v4, 1  ;;  %v721_v38 = vrot.slane %v705_v12, 1  ;;  %v722_v62 = vrot.slane %v706_v55, 1  ;;  %v731_v9 = vadd.f32 %v715_v54, %v671_v51  ;;  %v802_v4 = vld [vmem:[#allocation2 + $0x10] sm:$0x3] }
 0x13d   :  { %v732_v40 = vadd.f32 %v716_v21, %v672_v52  ;;  %v733_v48 = vadd.f32 %v717_v37, %v673_v42  ;;  %v734_v53 = vadd.f32 %v718_v15, %v674_v49  ;;  %v735_v57 = vadd.f32 %v719_v34, %v675_v50  ;;  %v804_v21 = vld [vmem:[#allocation2 + $0x20] sm:$0x3]  ;;  %v805_v34 = vld [vmem:[#allocation2 + $0x24] sm:$0x3] }
 0x13e   :  { %v736_v58 = vadd.f32 %v720_v45, %v676_v41  ;;  %v737_v61 = vadd.f32 %v721_v38, %v677_v63  ;;  %v738_v22 = vadd.f32 %v722_v62, %v678_v47  ;;  %v747_v8 = vunpack.c.l.bf16 %v739_v17  ;;  %v800_v63 = vld [vmem:[#allocation2 + $0x8] sm:$0x3] }
 0x13f   :  { %v748_v14 = vunpack.c.l.bf16 %v740_v33  ;;  %v749_v0 = vunpack.c.l.bf16 %v741_v36  ;;  %v750_v29 = vunpack.c.l.bf16 %v742_v35  ;;  %v751_v26 = vunpack.c.l.bf16 %v743_v44  ;;  %v806_v45 = vld [vmem:[#allocation2 + $0x28] sm:$0x3] }
 0x140   :  { %v752_v7 = vunpack.c.l.bf16 %v744_v46  ;;  %v753_v27 = vunpack.c.l.bf16 %v745_v16  ;;  %v754_v25 = vunpack.c.l.bf16 %v746_v60  ;;  %v759_v51 = vmul.f32 %v2144_v18, %v747_v8 }
 0x141   :  { %v760_v52 = vmul.f32 %v2144_v18, %v748_v14  ;;  %v761_v42 = vmul.f32 %v2144_v18, %v749_v0  ;;  %v762_v49 = vmul.f32 %v2144_v18, %v750_v29  ;;  %v763_v50 = vmul.f32 %v2144_v18, %v751_v26  ;;  %v836_v26 = vld [vmem:[#allocation2 + $0x8] sm:$0x7] }
 0x142   :  { %v764_v41 = vmul.f32 %v2144_v18, %v752_v7  ;;  %v765_v47 = vmul.f32 %v2144_v18, %v753_v27  ;;  %v766_v28 = vmul.f32 %v2144_v18, %v754_v25  ;;  %v775_v59 = vrot.slane %v759_v51, 2  ;;  %v837_v7 = vld [vmem:[#allocation2 + $0xc] sm:$0x7]  ;;  %v840_v25 = vld [vmem:[#allocation2 + $0x20] sm:$0x7] }
 0x143   :  { %v776_v56 = vrot.slane %v760_v52, 2  ;;  %v777_v17 = vrot.slane %v761_v42, 2  ;;  %v778_v12 = vrot.slane %v762_v49, 2  ;;  %v779_v55 = vrot.slane %v763_v50, 2  ;;  %v841_v51 = vld [vmem:[#allocation2 + $0x24] sm:$0x7] }
 0x144   :  { %v780_v54 = vrot.slane %v764_v41, 2  ;;  %v781_v33 = vrot.slane %v765_v47, 2  ;;  %v782_v36 = vrot.slane %v766_v28, 2  ;;  %v791_v37 = vadd.f32 %v775_v59, %v731_v9  ;;  %v842_v52 = vld [vmem:[#allocation2 + $0x28] sm:$0x7] }
 0x145   :  { %v792_v15 = vadd.f32 %v776_v56, %v732_v40  ;;  %v793_v35 = vadd.f32 %v777_v17, %v733_v48  ;;  %v794_v38 = vadd.f32 %v778_v12, %v734_v53  ;;  %v795_v62 = vadd.f32 %v779_v55, %v735_v57  ;;  %v838_v53 = vld [vmem:[#allocation2 + $0x10] sm:$0x7]  ;;  %v897_v17 = vld [vmem:[#allocation2 + $0xc] sm:$0x6] }
 0x146   :  { %v796_v44 = vadd.f32 %v780_v54, %v736_v58  ;;  %v797_v18 = vadd.f32 %v781_v33, %v737_v61  ;;  %v798_v46 = vadd.f32 %v782_v36, %v738_v22  ;;  %v808_v16 = vunpack.c.l.bf16 %v800_v63 }
 0x147   :  { %v809_v60 = vunpack.c.l.bf16 %v801_v1  ;;  %v810_v8 = vunpack.c.l.bf16 %v802_v4  ;;  %v812_v14 = vunpack.c.l.bf16 %v804_v21  ;;  %v813_v0 = vunpack.c.l.bf16 %v805_v34  ;;  %v896_v4 = vld [vmem:[#allocation2 + $0x8] sm:$0x6]  ;;  %v900_v34 = vld [vmem:[#allocation2 + $0x20] sm:$0x6] }
 0x148   :  { %v814_v29 = vunpack.c.l.bf16 %v806_v45  ;;  %v820_v27 = vmul.f32 %v2125_v5, %v808_v16  ;;  %v831_v40 = vadd.f32 %v2147_v19, %v794_v38  ;;  %v835_v48 = vadd.f32 %v2152_v20, %v798_v46  ;;  %v901_v38 = vld [vmem:[#allocation2 + $0x24] sm:$0x6] }
 0x149   :  { %v821_v9 = vmul.f32 %v2125_v5, %v809_v60  ;;  %v822_v57 = vmul.f32 %v2125_v5, %v810_v8  ;;  %v824_v58 = vmul.f32 %v2125_v5, %v812_v14  ;;  %v825_v61 = vmul.f32 %v2125_v5, %v813_v0 }
 0x14a   :  { %v826_v22 = vmul.f32 %v2125_v5, %v814_v29  ;;  %v828_v42 = vadd.f32 %v820_v27, %v791_v37  ;;  %v844_v50 = vunpack.c.l.bf16 %v836_v26  ;;  %v845_v41 = vunpack.c.l.bf16 %v837_v7 }
 0x14b   :  { %v829_v49 = vadd.f32 %v821_v9, %v792_v15  ;;  %v830_v63 = vadd.f32 %v822_v57, %v793_v35  ;;  %v832_v19 = vadd.f32 %v824_v58, %v795_v62  ;;  %v833_v47 = vadd.f32 %v825_v61, %v796_v44  ;;  %v898_v15 = vld [vmem:[#allocation2 + $0x10] sm:$0x6] }
 0x14c   :  { %v834_v20 = vadd.f32 %v826_v22, %v797_v18  ;;  %v846_v28 = vunpack.c.l.bf16 %v838_v53  ;;  %v848_v59 = vunpack.c.l.bf16 %v840_v25  ;;  %v849_v56 = vunpack.c.l.bf16 %v841_v51  ;;  %v1560_v51 = vld [vmem:[%s2389_s4] ss:$0 sm:$0xff] }
 0x14d   :  { %v850_v1 = vunpack.c.l.bf16 %v842_v52  ;;  %v856_v12 = vmul.f32 %v2066_v23, %v844_v50  ;;  %v857_v5 = vmul.f32 %v2066_v23, %v845_v41  ;;  %v891_v55 = vadd.f32 %v875_v2, %v831_v40 }
 0x14e   :  { %v895_v54 = vadd.f32 %v879_v11, %v835_v48  ;;  %v858_v21 = vmul.f32 %v2066_v23, %v846_v28  ;;  %v860_v33 = vmul.f32 %v2066_v23, %v848_v59  ;;  %v861_v36 = vmul.f32 %v2066_v23, %v849_v56  ;;  %v902_v11 = vld [vmem:[#allocation2 + $0x28] sm:$0x6] }
 0x14f   :  { %v862_v37 = vmul.f32 %v2066_v23, %v850_v1  ;;  %v872_v45 = vrot.slane %v856_v12, 1  ;;  %v873_v35 = vrot.slane %v857_v5, 1  ;;  %v904_v62 = vunpack.c.l.bf16 %v896_v4 }
 0x150   :  { %v905_v44 = vunpack.c.l.bf16 %v897_v17  ;;  %v874_v30 = vrot.slane %v858_v21, 1  ;;  %v876_v2 = vrot.slane %v860_v33, 1  ;;  %v877_v18 = vrot.slane %v861_v36, 1 }
 0x151   :  { %v878_v31 = vrot.slane %v862_v37, 1  ;;  %v888_v46 = vadd.f32 %v872_v45, %v828_v42  ;;  %v889_v16 = vadd.f32 %v873_v35, %v829_v49  ;;  %v906_v60 = vunpack.c.l.bf16 %v898_v15 }
 0x152   :  { %v908_v8 = vunpack.c.l.bf16 %v900_v34  ;;  %v890_v14 = vadd.f32 %v874_v30, %v830_v63  ;;  %v892_v0 = vadd.f32 %v876_v2, %v832_v19  ;;  %v893_v29 = vadd.f32 %v877_v18, %v833_v47 }
 0x153   :  { %v894_v23 = vadd.f32 %v878_v31, %v834_v20  ;;  %v909_v26 = vunpack.c.l.bf16 %v901_v38  ;;  %v910_v7 = vunpack.c.l.bf16 %v902_v11  ;;  %v916_v27 = vmul.f32 %v2082_v32, %v904_v62 }
 0x154   :  { %v917_v9 = vmul.f32 %v2082_v32, %v905_v44  ;;  %v918_v40 = vmul.f32 %v2082_v32, %v906_v60  ;;  %v920_v48 = vmul.f32 %v2082_v32, %v908_v8  ;;  %v951_v53 = vadd.f32 %v935_v10, %v891_v55 }
 0x155   :  { %v955_v57 = vadd.f32 %v939_v13, %v895_v54  ;;  %v921_v58 = vmul.f32 %v2082_v32, %v909_v26  ;;  %v922_v61 = vmul.f32 %v2082_v32, %v910_v7  ;;  %v932_v22 = vrot.slane %v916_v27, 2 }
 0x156   :  { %v933_v25 = vrot.slane %v917_v9, 2  ;;  %v934_v52 = vrot.slane %v918_v40, 2  ;;  %v936_v42 = vrot.slane %v920_v48, 2  ;;  %v2229_v49 = vadd.f32 %v1560_v51, %v951_v53 }
 0x157   :  { %v2231_v50 = vadd.f32 %v1560_v51, %v955_v57  ;;  %v937_v43 = vrot.slane %v921_v58, 2  ;;  %v938_v10 = vrot.slane %v922_v61, 2  ;;  %v948_v24 = vadd.f32 %v932_v22, %v888_v46 }
 0x158   :  { %v949_v13 = vadd.f32 %v933_v25, %v889_v16  ;;  %v950_v41 = vadd.f32 %v934_v52, %v890_v14  ;;  %v952_v63 = vadd.f32 %v936_v42, %v892_v0  ;;  %v1564_v32 = vmul.f32 -1.442695, %v2229_v49 }
 0x159   :  { %v1568_v19 = vmul.f32 -1.442695, %v2231_v50  ;;  %v953_v47 = vadd.f32 %v937_v43, %v893_v29  ;;  %v954_v20 = vadd.f32 %v938_v10, %v894_v23  ;;  %v963_v28 = vadd.f32 %v1560_v51, %v948_v24 }
 0x15a   :  { %v964_v59 = vadd.f32 %v1560_v51, %v949_v13  ;;  %v965_v56 = vadd.f32 %v1560_v51, %v950_v41  ;;  %v967_v1 = vadd.f32 %v1560_v51, %v952_v63  ;;  %1769 = vpow2.f32 %v1564_v32 }
 0x15b   :  { %v968_v4 = vadd.f32 %v1560_v51, %v953_v47  ;;  %v969_v17 = vadd.f32 %v1560_v51, %v954_v20  ;;  %v1561_v12 = vmul.f32 -1.442695, %v963_v28  ;;  %1771 = vpow2.f32 %v1568_v19 }
 0x15c   :  { %v1562_v5 = vmul.f32 -1.442695, %v964_v59  ;;  %v1563_v55 = vmul.f32 -1.442695, %v965_v56  ;;  %v1565_v54 = vmul.f32 -1.442695, %v967_v1 }
 0x15d   :  { %1773 = vpow2.f32 %v1561_v12  ;;  %v1566_v21 = vmul.f32 -1.442695, %v968_v4  ;;  %v1567_v33 = vmul.f32 -1.442695, %v969_v17 }
 0x15e   :  { %1775 = vpow2.f32 %v1562_v5 }
 0x15f   :  { %1777 = vpow2.f32 %v1563_v55 }
 0x160   :  { %1779 = vpow2.f32 %v1565_v54  ;;  %v1737_v54 = vld [vmem:[%s2390_s7 + $0x38] sm:$0xff]  }
 0x161   :  { %1781 = vpow2.f32 %v1566_v21  ;;  %1677 = vmatpush3.bf16.msra.mxu0 %v1737_v54  ;;  %v1738_v21 = vld [vmem:[%s2390_s7 + $0x30] sm:$0xff]  }
 0x162   :  { %1783 = vpow2.f32 %v1567_v33  ;;  %1678 = vmatprep.subr.bf16.mxu0 %v1811_v3  ;;  %v1739_v33 = vld [vmem:[%s2390_s7 + $0x28] sm:$0xff]  }
 0x165   :  { %1679 = vmatpush3.bf16.msra.mxu0 %v1738_v21 }
 0x166   :  { %1680 = vmatprep.subr.bf16.mxu0 %v1811_v3 }
 0x167   :  { %v1770_v36 = vpop.eup %1769 }
 0x168   :  { %v998_v37 = vadd.f32 1.0, %v1770_v36  ;;  %v1772_v15 = vpop.eup %1771  ;;  %v1740_v36 = vld [vmem:[%s2390_s7 + $0x20] sm:$0xff]  }
 0x169   :  { %v1002_v45 = vadd.f32 1.0, %v1772_v15  ;;  %1681 = vmatpush3.bf16.msra.mxu0 %v1739_v33  ;;  %v1742_v15 = vld [vmem:[%s2390_s7 + $0x10] sm:$0xff]  }
 0x16a   :  { %v1774_v34 = vpop.eup %1773  ;;  %1785 = vrcp.f32 %v998_v37  ;;  %1682 = vmatprep.subr.bf16.mxu0 %v1811_v3  ;;  %v1741_v37 = vld [vmem:[%s2390_s7 + $0x18] sm:$0xff]  }
 0x16b   :  { %v1776_v35 = vpop.eup %1775  ;;  %v995_v38 = vadd.f32 1.0, %v1774_v34  ;;  %1787 = vrcp.f32 %v1002_v45  ;;  %v1743_v34 = vld [vmem:[%s2390_s7 + $0x8] sm:$0xff]   ;;  %v1744_v45 = vld [vmem:[%s2390_s7] sm:$0xff]  }
 0x16c   :  { %v1778_v62 = vpop.eup %1777  ;;  %v996_v44 = vadd.f32 1.0, %v1776_v35  ;;  %v1569_v35 = vld [vmem:[%s2391_s6] ss:$0 sm:$0xff] }
 0x16d   :  { %v1780_v30 = vpop.eup %1779  ;;  %v997_v2 = vadd.f32 1.0, %v1778_v62  ;;  %1789 = vrcp.f32 %v995_v38  ;;  %1683 = vmatpush3.bf16.msra.mxu0 %v1740_v36 }
 0x16e   :  { %v1782_v18 = vpop.eup %1781  ;;  %v999_v31 = vadd.f32 1.0, %v1780_v30  ;;  %1791 = vrcp.f32 %v996_v44  ;;  %1684 = vmatprep.subr.bf16.mxu0 %v1811_v3 }
 0x16f   :  { %v1784_v11 = vpop.eup %1783  ;;  %v1000_v46 = vadd.f32 1.0, %v1782_v18  ;;  %1793 = vrcp.f32 %v997_v2 }
 0x170   :  { %v1001_v16 = vadd.f32 1.0, %v1784_v11  ;;  %1795 = vrcp.f32 %v999_v31 }
 0x171   :  { %1797 = vrcp.f32 %v1000_v46  ;;  %1685 = vmatpush3.bf16.msra.mxu0 %v1741_v37 }
 0x172   :  { %1799 = vrcp.f32 %v1001_v16  ;;  %1686 = vmatprep.subr.bf16.mxu0 %v1811_v3 }
 0x175   :  { %1687 = vmatpush3.bf16.msra.mxu0 %v1742_v15 }
 0x176   :  { %1688 = vmatprep.subr.bf16.mxu0 %v1811_v3 }
 0x177   :  { %v1786_v60 = vpop.eup %1785 }
 0x178   :  { %v1788_v8 = vpop.eup %1787  ;;  %v2242_v9 = vmul.f32 %v1786_v60, %v2229_v49 }
 0x179   :  { %v2255_v25 = vmul.f32 %v1788_v8, %v2231_v50  ;;  %1689 = vmatpush3.bf16.msra.mxu0 %v1743_v34  ;;  %v1746_v8 = vld [vmem:[%s2392_s9 + $0x30] sm:$0xff]   ;;  %v1502_v34 = vld [vmem:[%s2385_s0 + $0x2] sm:$0x3] }
 0x17a   :  { %v1790_v14 = vpop.eup %1789  ;;  %1690 = vmatprep.subr.bf16.mxu0 %v1811_v3  ;;  %v1745_v3 = vld [vmem:[%s2392_s9 + $0x38] sm:$0xff]  }
 0x17b   :  { %v1792_v0 = vpop.eup %1791  ;;  %v2237_v7 = vmul.f32 %v1790_v14, %v963_v28  ;;  %1696 = vmatprep.subr.bf16.mxu1 %v1745_v3  ;;  %v1747_v14 = vld [vmem:[%s2392_s9 + $0x28] sm:$0xff]  }
 0x17c   :  { %v1794_v29 = vpop.eup %1793  ;;  %v2235_v23 = vmul.f32 %v1792_v0, %v964_v59  ;;  %v1748_v0 = vld [vmem:[%s2392_s9 + $0x20] sm:$0xff]  }
 0x17d   :  { %v1796_v26 = vpop.eup %1795  ;;  %v2239_v27 = vmul.f32 %v1794_v29, %v965_v56  ;;  %1691 = vmatpush3.bf16.msra.mxu0 %v1744_v45  ;;  %v1749_v29 = vld [vmem:[%s2392_s9 + $0x18] sm:$0xff]  }
 0x17e   :  { %v1798_v40 = vpop.eup %1797  ;;  %v1086_v57 = vcombine.low %v2237_v7, %v2235_v23  ;;  %v2250_v61 = vmul.f32 %v1796_v26, %v967_v1  ;;  %v1750_v26 = vld [vmem:[%s2392_s9 + $0x10] sm:$0xff]  }
 0x17f   :  { %v1800_v48 = vpop.eup %1799  ;;  %v2244_v53 = vmul.f32 %v1798_v40, %v968_v4  ;;  %v1087_v58 = vcombine.low %v2239_v27, %v2242_v9  ;;  %v1751_v40 = vld [vmem:[%s2392_s9 + $0x8] sm:$0xff]  }
 0x180   :  { %v2252_v22 = vmul.f32 %v1800_v48, %v969_v17  ;;  %v1752_v48 = vld [vmem:[%s2392_s9] sm:$0xff]  }
 0x181   :  { %v1094_v51 = vadd.f32 %v1087_v58, %v1086_v57  ;;  %v1088_v52 = vcombine.low %v2250_v61, %v2244_v53  ;;  %v1579_v57 = vld [vmem:[%s2393_s8] ss:$0 sm:$0xff] }
 0x182   :  { %v1089_v42 = vcombine.low %v2252_v22, %v2255_v25 }
 0x183   :  { %v1095_v49 = vrot.slane %v1094_v51, 4 }
 0x184   :  { %v1101_v43 = vadd.f32 %v1089_v42, %v1088_v52 }
 0x185   :  { %v1096_v10 = vadd.f32 %v1095_v49, %v1094_v51 }
 0x186   :  { %v1102_v24 = vrot.slane %v1101_v43, 4 }
 0x187   :  { %v1097_v13 = vrot.slane %v1096_v10, 2 }
 0x188   :  { %v1103_v41 = vadd.f32 %v1102_v24, %v1101_v43 }
 0x189   :  { %v1098_v63 = vadd.f32 %v1097_v13, %v1096_v10  ;;  %v1813_v13 = vmov 1966171168  }
 0x18a   :  { %v1104_v32 = vrot.slane %v1103_v41, 2 }
 0x18b   :  { %v1099_v19 = vrot.slane %v1098_v63, 1 }
 0x18c   :  { %v1105_v47 = vadd.f32 %v1104_v32, %v1103_v41  ;;  %v1325_v41 = vunpack.c.l.s4 %v1813_v13 }
 0x18d   :  { %v1100_v20 = vadd.f32 %v1099_v19, %v1098_v63 }
 0x18e   :  { %v1106_v50 = vrot.slane %v1105_v47, 1  ;;  %v1326_v63 = vunpack.c.0.s8 %v1325_v41 }
 0x18f   :  { %v1109_v28 = vmul.f32 0.0625, %v1100_v20 }
 0x190   :  { %v1107_v59 = vadd.f32 %v1106_v50, %v1105_v47  ;;  %v1329_v32 = vsub.s32 %v1326_v63, %v1880_v6 }
 0x191   :  { %v1111_v56 = vpack.c.bf16 %v1109_v28, %v1109_v28 }
 0x192   :  { %v1110_v1 = vmul.f32 0.0625, %v1107_v59 }
 0x193   :  { %v1121_v17 = vunpack.c.l.b16 %v1111_v56 }
 0x194   :  { %v1112_v4 = vpack.c.bf16 %v1110_v1, %v1110_v1 }
 0x196   :  { %v1122_v12 = vunpack.c.l.b16 %v1112_v4 }
 0x198   :  { %v1124_v5 = vsel %vm1123_vm10, %v1122_v12, %v1121_v17 }
 0x199   :  { %v1125_v55 = vpack.c.b16 %v1124_v5, %v1124_v5 }
 0x19b   :  { %1673 = vmatmul.mubr.bf16.vlgmr.msra.gmra.mxu1 %v1125_v55 }
 0x19c   :  { %1697 = vmatpush3.bf16.msra.mxu1 %v1745_v3 }
 0x19d   :  { %1698 = vmatprep.subr.bf16.mxu1 %v1746_v8 }
 0x1a0   :  { %1699 = vmatpush3.bf16.msra.mxu1 %v1746_v8 }
 0x1a1   :  { %1700 = vmatprep.subr.bf16.mxu1 %v1747_v14 }
 0x1a4   :  { %1701 = vmatpush3.bf16.msra.mxu1 %v1747_v14 }
 0x1a5   :  { %1702 = vmatprep.subr.bf16.mxu1 %v1748_v0 }
 0x1a8   :  { %1703 = vmatpush3.bf16.msra.mxu1 %v1748_v0 }
 0x1a9   :  { %1704 = vmatprep.subr.bf16.mxu1 %v1749_v29 }
 0x1ac   :  { %1705 = vmatpush3.bf16.msra.mxu1 %v1749_v29 }
 0x1ad   :  { %1706 = vmatprep.subr.bf16.mxu1 %v1750_v26 }
 0x1b0   :  { %1707 = vmatpush3.bf16.msra.mxu1 %v1750_v26 }
 0x1b1   :  { %1708 = vmatprep.subr.bf16.mxu1 %v1751_v40 }
 0x1b4   :  { %1709 = vmatpush3.bf16.msra.mxu1 %v1751_v40 }
 0x1b5   :  { %1710 = vmatprep.subr.bf16.mxu1 %v1752_v48 }
 0x1b8   :  { %1711 = vmatpush3.bf16.msra.mxu1 %v1752_v48 }
 0x25b   :  { %v1209_v38 = vpop.f32.mrf.mxu1 }
 0x25c   :  { %v1210_v62 = vadd.f32 %v1569_v35, %v1209_v38 }
 0x25d   :  { %v1674_v44 = vpop.f32.mrf.mxu1 }
 0x25e   :  { %v1578_v30 = vmul.f32 -1.442695, %v1210_v62  ;;  %v1503_v44 = vld [vmem:[%s2385_s0 + $0x4] sm:$0x3] }
 0x25f   :  { %v1212_v2 = vpop.f32.mrf.mxu1  ;;  %v1511_v8 = vunpack.c.l.bf16 %v1503_v44 }
 0x260   :  { %1801 = vpow2.f32 %v1578_v30 }
 0x261   :  { %v1675_v18 = vpop.f32.mrf.mxu1 }
 0x26d   :  { %v1802_v31 = vpop.eup %1801 }
 0x26e   :  { %v1218_v11 = vadd.f32 1.0, %v1802_v31 }
 0x270   :  { %1803 = vrcp.f32 %v1218_v11  ;;  %v1510_v11 = vunpack.c.l.bf16 %v1502_v34 }
 0x27d   :  { %v1804_v46 = vpop.eup %1803 }
 0x27e   :  { %v1221_v16 = vmul.f32 %v1804_v46, %v1210_v62  ;;  %v1507_v62 = vld [vmem:[%s2385_s0 + $0xc] sm:$0x3]  ;;  %v1508_v46 = vld [vmem:[%s2385_s0 + $0xe] sm:$0x3] }
 0x27f   :  { %v1515_v3 = vunpack.c.l.bf16 %v1507_v62  ;;  %v1516_v48 = vunpack.c.l.bf16 %v1508_v46 }
 0x280   :  { %v1222_v60 = vpack.c.bf16 %v1221_v16, %v1221_v16  ;;  %v1504_v16 = vld [vmem:[%s2385_s0 + $0x6] sm:$0x3] }
 0x282   :  { %1693 = vmatmul.mubr.bf16.vlgmr.msra.gmra.mxu0 %v1222_v60 }
 0x342   :  { %v1311_v58 = vpop.f32.mrf.mxu0 }
 0x343   :  { %v1312_v51 = vadd.f32 %v1579_v57, %v1311_v58  ;;  %v1512_v58 = vunpack.c.l.bf16 %v1504_v16 }
 0x344   :  { %v1694_v52 = vpop.f32.mrf.mxu0 }
 0x345   :  { %v1588_v42 = vmul.f32 -1.442695, %v1312_v51 }
 0x346   :  { %v1314_v49 = vpop.f32.mrf.mxu0 }
 0x347   :  { %1805 = vpow2.f32 %v1588_v42 }
 0x348   :  { %v1695_v43 = vpop.f32.mrf.mxu0 }
 0x354   :  { %v1806_v10 = vpop.eup %1805 }
 0x355   :  { %v1320_v24 = vadd.f32 1.0, %v1806_v10 }
 0x357   :  { %1807 = vrcp.f32 %v1320_v24 }
 0x364   :  { %v1808_v19 = vpop.eup %1807 }
 0x365   :  { %v1330_v47 = vrot.slane %v1808_v19, %v1329_v32 }
 0x367   :  { %v1331_v20 = vcombine.high %v1330_v47, %v1330_v47  ;;  %v1338_v50 = vrot.slane %v1330_v47, %v1329_v32 }
 0x369   :  { %v1349_v28 = vrot.slane %v1338_v50, %v2022_v39  ;;  %v1345_v59 = vrot.slane %v1331_v20, %v1329_v32 }
 0x36b   :  { %v1356_v56 = vcombine.high %v1349_v28, %v1349_v28  ;;  %v1353_v1 = vrot.slane %v1345_v59, %v2022_v39  ;;  %v1360_v4 = vmul.f32 %v1349_v28, %v2237_v7  ;;  %v1362_v12 = vmul.f32 %v1349_v28, %v2239_v27  ;;  %v1505_v27 = vld [vmem:[%s2385_s0 + $0x8] sm:$0x3] }
 0x36d   :  { %v1361_v17 = vmul.f32 %v1356_v56, %v2235_v23  ;;  %v1363_v5 = vmul.f32 %v1356_v56, %v2242_v9  ;;  %v1357_v55 = vcombine.high %v1353_v1, %v1353_v1  ;;  %v1364_v6 = vmul.f32 %v1353_v1, %v2250_v61  ;;  %v1589_v9 = vld [vmem:[%s2394_s10] ss:$0 sm:$0xff] }
 0x36e   :  { %v1366_v54 = vmul.f32 %v1353_v1, %v2252_v22  ;;  %v1501_v61 = vld [vmem:[%s2385_s0] sm:$0x3]  ;;  %v1513_v22 = vunpack.c.l.bf16 %v1505_v27 }
 0x36f   :  { %v1376_v21 = vcombine.low %v1360_v4, %v1361_v17  ;;  %v1377_v33 = vcombine.low %v1362_v12, %v1363_v5  ;;  %v1365_v36 = vmul.f32 %v1357_v55, %v2244_v53  ;;  %v1367_v37 = vmul.f32 %v1357_v55, %v2255_v25  ;;  %v1506_v53 = vld [vmem:[%s2385_s0 + $0xa] sm:$0x3] }
 0x370   :  { %v1514_v35 = vunpack.c.l.bf16 %v1506_v53  ;;  %v1509_v38 = vunpack.c.l.bf16 %v1501_v61 }
 0x371   :  { %v1384_v39 = vpack.c.bf16 %v1377_v33, %v1376_v21  ;;  %v1378_v15 = vcombine.low %v1364_v6, %v1365_v36  ;;  %v1379_v7 = vcombine.low %v1366_v54, %v1367_v37 }
 0x373   :  { %1712 = vmatprep.mubr.bf16.mxu1 %v1384_v39  ;;  %v1385_v23 = vpack.c.bf16 %v1379_v7, %v1378_v15 }
 0x375   :  { %1713 = vmatmul.mubr.bf16.vlgmr.msra.gmra.mxu1 %v1385_v23 }
 0x435   :  { %v1714_v25 = vpop.f32.mrf.mxu1 }
 0x436   :  { %v1483_v45 = vadd.f32 %v1714_v25, %v1589_v9 }
 0x437   :  { %v1474_v30 = vpop.f32.mrf.mxu1 }
 0x438   :  { %v1495_v2 = vcombine.high %v1483_v45, %v1483_v45  ;;  %v1521_v18 = vadd.f32 %v1513_v22, %v1483_v45  ;;  %v1475_v31 = vadd.f32 %v1589_v9, %v1474_v30 }
 0x439   :  { %v1715_v60 = vpop.f32.mrf.mxu1 }
 0x43a   :  { %v1522_v14 = vadd.f32 %v1514_v35, %v1495_v2  ;;  %v1529_v0 = vpack.c.bf16 %v1521_v18, %v1521_v18  ;;  %v1493_v29 = vcombine.high %v1475_v31, %v1475_v31  ;;  %v1517_v26 = vadd.f32 %v1509_v38, %v1475_v31 }
 0x43b   :  { %v1486_v40 = vadd.f32 %v1715_v60, %v1589_v9  ;;  %v1477_v57 = vpop.f32.mrf.mxu1 }
 0x43c   :  { %v1530_v51 = vpack.c.bf16 %v1522_v14, %v1522_v14  ;;  %1537 = vst [vmem:[%s2395_s11 + $0x8] sm:$0x3] %v1529_v0  ;;  %v1518_v52 = vadd.f32 %v1510_v11, %v1493_v29  ;;  %v1525_v42 = vpack.c.bf16 %v1517_v26, %v1517_v26  ;;  %v1478_v49 = vadd.f32 %v1589_v9, %v1477_v57 }
 0x43d   :  { %v1496_v43 = vcombine.high %v1486_v40, %v1486_v40  ;;  %v1523_v10 = vadd.f32 %v1515_v3, %v1486_v40 }
 0x43e   :  { %1538 = vst [vmem:[%s2395_s11 + $0xa] sm:$0x3] %v1530_v51  ;;  %v1526_v24 = vpack.c.bf16 %v1518_v52, %v1518_v52  ;;  %1533 = vst [vmem:[%s2395_s11] sm:$0x3] %v1525_v42  ;;  %v1494_v13 = vcombine.high %v1478_v49, %v1478_v49  ;;  %v1519_v41 = vadd.f32 %v1511_v8, %v1478_v49 }
 0x43f   :  { %v1524_v63 = vadd.f32 %v1516_v48, %v1496_v43  ;;  %v1531_v32 = vpack.c.bf16 %v1523_v10, %v1523_v10 }
 0x440   :  { %1534 = vst [vmem:[%s2395_s11 + $0x2] sm:$0x3] %v1526_v24  ;;  %v1520_v19 = vadd.f32 %v1512_v58, %v1494_v13  ;;  %v1527_v47 = vpack.c.bf16 %v1519_v41, %v1519_v41 }
 0x441   :  { %v1532_v20 = vpack.c.bf16 %v1524_v63, %v1524_v63  ;;  %1539 = vst [vmem:[%s2395_s11 + $0xc] sm:$0x3] %v1531_v32 }
 0x442   :  { %v1528_v50 = vpack.c.bf16 %v1520_v19, %v1520_v19  ;;  %1535 = vst [vmem:[%s2395_s11 + $0x4] sm:$0x3] %v1527_v47 }
 0x443   :  { %1540 = vst [vmem:[%s2395_s11 + $0xe] sm:$0x3] %v1532_v20 }
 0x444   :  { %1536 = vst [vmem:[%s2395_s11 + $0x6] sm:$0x3] %v1528_v50 }

// kernel: effnet_forward.6
= control target key start
LH: loop header
LB: loop body
LE: loop exit
PB: predicated region body
PF: predicated region fallthrough
CT: control target
= control target key end

     0   :  { %v4703_v0 = vmov 0.0   ;;  %vm2766_vm0 = vmmov 0   ;;  %v2767_v2 = vmov 0   ;;  %v453_v5 = vlaneseq  ;;  %v62_v8 = vld [vmem:[#allocation2 + $0x8] sm:$0x1]  ;;  %s4693_s3 = inlined_call_operand.vmem [shape: bf16[128,128], index: 3, kind: input, shape index: {}]   ;;  %s4694_s0 = inlined_call_operand.vmem [shape: bf16[2,8,8,128], index: 0, kind: input, shape index: {}]   ;;  %s4695_s1 = inlined_call_operand.vmem [shape: f32[3,3,128], index: 1, kind: input, shape index: {}]   ;;  %s4696_s2 = inlined_call_operand.vmem [shape: f32[1,128], index: 2, kind: input, shape index: {}]   ;;  %s4697_s5 = inlined_call_operand.vmem [shape: bf16[128,128], index: 5, kind: input, shape index: {}]   ;;  %s4698_s4 = inlined_call_operand.vmem [shape: f32[1,128], index: 4, kind: input, shape index: {}]   ;;  %s4699_s7 = inlined_call_operand.vmem [shape: bf16[128,128], index: 7, kind: input, shape index: {}]   ;;  %s4700_s6 = inlined_call_operand.vmem [shape: f32[1,128], index: 6, kind: input, shape index: {}]   ;;  %s4701_s8 = inlined_call_operand.vmem [shape: f32[1,128], index: 8, kind: input, shape index: {}]   ;;  %s4702_s9 = inlined_call_operand.vmem [shape: bf16[2,8,8,128], index: 9, kind: output, shape index: {}]  }
   0x1   :  { %2593 = vmatprep.subr.bf16.mxu1 %v4703_v0  ;;  %v2669_v1 = vld [vmem:[%s4693_s3 + $0x38] sm:$0xff]   ;;  %2609 = vmatprep.mubr.msk.bf16.mxu1 %vm2766_vm0, %v4703_v0  ;;  %49 = vst [vmem:[#allocation2] sm:$0xf] %v2767_v2  ;;  %50 = vst [vmem:[#allocation2 + $0x4] sm:$0x1] %v2767_v2  ;;  %v2670_v3 = vld [vmem:[%s4693_s3 + $0x30] sm:$0xff]  }
   0x2   :  { %51 = vst [vmem:[#allocation2 + $0x50] sm:$0xf] %v2767_v2  ;;  %52 = vst [vmem:[#allocation2 + $0x54] sm:$0x1] %v2767_v2  ;;  %2594 = vmatpush3.bf16.msra.mxu1 %v2669_v1  ;;  %v2671_v4 = vld [vmem:[%s4693_s3 + $0x28] sm:$0xff]   ;;  %v2672_v6 = vld [vmem:[%s4693_s3 + $0x20] sm:$0xff]  }
   0x3   :  { %54 = vst [vmem:[#allocation2 + $0x48] sm:$0xf] %v2767_v2  ;;  %55 = vst [vmem:[#allocation2 + $0x4c] sm:$0x1] %v2767_v2  ;;  %2595 = vmatprep.subr.bf16.mxu1 %v4703_v0  ;;  %vm59_vm1 = vcmask 1040384   ;;  %v2673_v7 = vld [vmem:[%s4693_s3 + $0x18] sm:$0xff]  }
   0x4   :  { %56 = vst [vmem:[#allocation2 + $0x98] sm:$0xf] %v2767_v2  ;;  %57 = vst [vmem:[#allocation2 + $0x9c] sm:$0x1] %v2767_v2  ;;  %v2840_v9 = vshrl.u32 %v453_v5, 7  ;;  %v2674_v20 = vld [vmem:[%s4693_s3 + $0x10] sm:$0xff]  }
   0x5   :  { %v2845_v10 = vld [vmem:[%s4694_s0] sm:$0xf]  ;;  %vm60_vm2 = vsmask.f32 256  ;;  %v65_v11 = vld [vmem:[#allocation2 + $0x10] sm:$0x1] }
   0x6   :  { %2596 = vmatpush3.bf16.msra.mxu1 %v2670_v3  ;;  %4833 = vst [vmem:[#allocation3_spill] sm:$0xff] %v2840_v9  ;;  %vm2848_vm3 = vmand %vm59_vm1, %vm60_vm2  ;;  %v68_v13 = vld [vmem:[#allocation2 + $0x18] sm:$0x1]  ;;  %v71_v14 = vld [vmem:[#allocation2 + $0x20] sm:$0x1]  ;;  %v161_v24 = vshrl.u32 %v2845_v10, 16 }
   0x7   :  { %2597 = vmatprep.subr.bf16.mxu1 %v4703_v0  ;;  %vm110_vm4 = vsmask.f32 7938  ;;  %v63_v15 = vsel %vm2848_vm3, 0, %v62_v8  ;;  %v66_v16 = vsel %vm2848_vm3, 0, %v65_v11  ;;  %v69_v17 = vsel %vm2848_vm3, 0, %v68_v13  ;;  %v2675_v38 = vld [vmem:[%s4693_s3 + $0x8] sm:$0xff]  }
   0x8   :  { %v72_v18 = vsel %vm2848_vm3, 0, %v71_v14  ;;  %v74_v19 = vld [vmem:[#allocation2 + $0x28] sm:$0x1]  ;;  %64 = vst [vmem:[#allocation2 + $0x8] sm:$0x1] %v63_v15  ;;  %vm2882_vm5 = vmand %vm59_vm1, %vm110_vm4  ;;  %v2676_v55 = vld [vmem:[%s4693_s3] sm:$0xff]  }
   0x9   :  { %67 = vst [vmem:[#allocation2 + $0x10] sm:$0x1] %v66_v16  ;;  %70 = vst [vmem:[#allocation2 + $0x18] sm:$0x1] %v69_v17  ;;  %v75_v21 = vsel %vm2848_vm3, 0, %v74_v19  ;;  %vm320_vm6 = vcmask 1043456  }
   0xa   :  { %2598 = vmatpush3.bf16.msra.mxu1 %v2671_v4  ;;  %73 = vst [vmem:[#allocation2 + $0x20] sm:$0x1] %v72_v18  ;;  %v77_v22 = vld [vmem:[#allocation2 + $0x30] sm:$0x1]  ;;  %v80_v23 = vld [vmem:[#allocation2 + $0x38] sm:$0x1]  ;;  %vm3069_vm7 = vmand %vm320_vm6, %vm110_vm4 }
   0xb   :  { %2599 = vmatprep.subr.bf16.mxu1 %v4703_v0  ;;  %76 = vst [vmem:[#allocation2 + $0x28] sm:$0x1] %v75_v21  ;;  %v78_v25 = vsel %vm2848_vm3, 0, %v77_v22  ;;  %v81_v26 = vsel %vm2848_vm3, 0, %v80_v23  ;;  %v83_v27 = vld [vmem:[#allocation2 + $0x40] sm:$0x1] }
   0xc   :  { %v86_v28 = vld [vmem:[#allocation2 + $0x58] sm:$0x1]  ;;  %79 = vst [vmem:[#allocation2 + $0x30] sm:$0x1] %v78_v25  ;;  %82 = vst [vmem:[#allocation2 + $0x38] sm:$0x1] %v81_v26 }
   0xd   :  { %v84_v29 = vsel %vm2848_vm3, 0, %v83_v27  ;;  %v87_v30 = vsel %vm2848_vm3, 0, %v86_v28  ;;  %v89_v31 = vld [vmem:[#allocation2 + $0x60] sm:$0x1]  ;;  %v92_v32 = vld [vmem:[#allocation2 + $0x68] sm:$0x1] }
   0xe   :  { %2600 = vmatpush3.bf16.msra.mxu1 %v2672_v6  ;;  %85 = vst [vmem:[#allocation2 + $0x40] sm:$0x1] %v84_v29  ;;  %88 = vst [vmem:[#allocation2 + $0x58] sm:$0x1] %v87_v30  ;;  %v90_v33 = vsel %vm2848_vm3, 0, %v89_v31  ;;  %v93_v34 = vsel %vm2848_vm3, 0, %v92_v32 }
   0xf   :  { %2601 = vmatprep.subr.bf16.mxu1 %v4703_v0  ;;  %v95_v35 = vld [vmem:[#allocation2 + $0x70] sm:$0x1]  ;;  %v98_v36 = vld [vmem:[#allocation2 + $0x78] sm:$0x1]  ;;  %91 = vst [vmem:[#allocation2 + $0x60] sm:$0x1] %v90_v33 }
  0x10   :  { %94 = vst [vmem:[#allocation2 + $0x68] sm:$0x1] %v93_v34  ;;  %v96_v39 = vsel %vm2848_vm3, 0, %v95_v35  ;;  %v99_v40 = vsel %vm2848_vm3, 0, %v98_v36  ;;  %v101_v41 = vld [vmem:[#allocation2 + $0x80] sm:$0x1] }
  0x11   :  { %v104_v42 = vld [vmem:[#allocation2 + $0x88] sm:$0x1]  ;;  %97 = vst [vmem:[#allocation2 + $0x70] sm:$0x1] %v96_v39  ;;  %100 = vst [vmem:[#allocation2 + $0x78] sm:$0x1] %v99_v40 }
  0x12   :  { %2602 = vmatpush3.bf16.msra.mxu1 %v2673_v7  ;;  %v102_v43 = vsel %vm2848_vm3, 0, %v101_v41  ;;  %v105_v44 = vsel %vm2848_vm3, 0, %v104_v42  ;;  %v107_v45 = vld [vmem:[#allocation2 + $0x90] sm:$0x1]  ;;  %v112_v46 = vld [vmem:[#allocation2 + $0xc] sm:$0x1] }
  0x13   :  { %2603 = vmatprep.subr.bf16.mxu1 %v4703_v0  ;;  %103 = vst [vmem:[#allocation2 + $0x80] sm:$0x1] %v102_v43  ;;  %106 = vst [vmem:[#allocation2 + $0x88] sm:$0x1] %v105_v44  ;;  %v108_v47 = vsel %vm2848_vm3, 0, %v107_v45  ;;  %v113_v48 = vsel %vm2882_vm5, 0, %v112_v46 }
  0x14   :  { %v115_v49 = vld [vmem:[#allocation2 + $0x14] sm:$0x1]  ;;  %v118_v50 = vld [vmem:[#allocation2 + $0x1c] sm:$0x1]  ;;  %109 = vst [vmem:[#allocation2 + $0x90] sm:$0x1] %v108_v47 }
  0x15   :  { %114 = vst [vmem:[#allocation2 + $0xc] sm:$0x1] %v113_v48  ;;  %v116_v51 = vsel %vm2882_vm5, 0, %v115_v49  ;;  %v119_v52 = vsel %vm2882_vm5, 0, %v118_v50  ;;  %v121_v53 = vld [vmem:[#allocation2 + $0x24] sm:$0x1] }
  0x16   :  { %2604 = vmatpush3.bf16.msra.mxu1 %v2674_v20  ;;  %v124_v54 = vld [vmem:[#allocation2 + $0x2c] sm:$0x1]  ;;  %117 = vst [vmem:[#allocation2 + $0x14] sm:$0x1] %v116_v51  ;;  %120 = vst [vmem:[#allocation2 + $0x1c] sm:$0x1] %v119_v52 }
  0x17   :  { %2605 = vmatprep.subr.bf16.mxu1 %v4703_v0  ;;  %v122_v56 = vsel %vm2882_vm5, 0, %v121_v53  ;;  %v125_v57 = vsel %vm2882_vm5, 0, %v124_v54  ;;  %v127_v58 = vld [vmem:[#allocation2 + $0x34] sm:$0x1]  ;;  %v130_v59 = vld [vmem:[#allocation2 + $0x3c] sm:$0x1] }
  0x18   :  { %v2916_v60 = vld [vmem:[%s4694_s0 + $0x4] sm:$0xf]  ;;  %v2921_v61 = vld [vmem:[%s4694_s0 + $0x8] sm:$0xf]  ;;  %123 = vst [vmem:[#allocation2 + $0x24] sm:$0x1] %v122_v56 }
  0x19   :  { %126 = vst [vmem:[#allocation2 + $0x2c] sm:$0x1] %v125_v57  ;;  %v128_v62 = vsel %vm2882_vm5, 0, %v127_v58  ;;  %v131_v63 = vsel %vm2882_vm5, 0, %v130_v59  ;;  %v133_v1 = vld [vmem:[#allocation2 + $0x44] sm:$0x1] }
  0x1a   :  { %v136_v2 = vld [vmem:[#allocation2 + $0x5c] sm:$0x1]  ;;  %2606 = vmatpush3.bf16.msra.mxu1 %v2675_v38  ;;  %v36_v3 = vld [vmem:[%s4694_s0 + $0xc] sm:$0xf]  ;;  %129 = vst [vmem:[#allocation2 + $0x34] sm:$0x1] %v128_v62 }
  0x1b   :  { %132 = vst [vmem:[#allocation2 + $0x3c] sm:$0x1] %v131_v63  ;;  %v134_v4 = vsel %vm2882_vm5, 0, %v133_v1  ;;  %v137_v5 = vsel %vm2882_vm5, 0, %v136_v2  ;;  %v139_v6 = vld [vmem:[#allocation2 + $0x64] sm:$0x1]  ;;  %2607 = vmatprep.subr.bf16.mxu1 %v4703_v0 }
  0x1c   :  { %v142_v7 = vld [vmem:[#allocation2 + $0x6c] sm:$0x1]  ;;  %v37_v8 = vld [vmem:[%s4694_s0 + $0x10] sm:$0xf]  ;;  %135 = vst [vmem:[#allocation2 + $0x44] sm:$0x1] %v134_v4 }
  0x1d   :  { %138 = vst [vmem:[#allocation2 + $0x5c] sm:$0x1] %v137_v5  ;;  %v140_v11 = vsel %vm2882_vm5, 0, %v139_v6  ;;  %v143_v13 = vsel %vm2882_vm5, 0, %v142_v7  ;;  %v145_v14 = vld [vmem:[#allocation2 + $0x74] sm:$0x1] }
  0x1e   :  { %v148_v15 = vld [vmem:[#allocation2 + $0x7c] sm:$0x1]  ;;  %141 = vst [vmem:[#allocation2 + $0x64] sm:$0x1] %v140_v11  ;;  %144 = vst [vmem:[#allocation2 + $0x6c] sm:$0x1] %v143_v13  ;;  %2608 = vmatpush3.bf16.msra.mxu1 %v2676_v55 }
  0x1f   :  { %v146_v16 = vsel %vm2882_vm5, 0, %v145_v14  ;;  %v149_v17 = vsel %vm2882_vm5, 0, %v148_v15  ;;  %v151_v18 = vld [vmem:[#allocation2 + $0x84] sm:$0x1]  ;;  %v154_v19 = vld [vmem:[#allocation2 + $0x8c] sm:$0x1]  ;;  %2613 = vmatprep.subr.bf16.mxu1 %v4703_v0 }
  0x20   :  { %147 = vst [vmem:[#allocation2 + $0x74] sm:$0x1] %v146_v16  ;;  %150 = vst [vmem:[#allocation2 + $0x7c] sm:$0x1] %v149_v17  ;;  %v152_v20 = vsel %vm2882_vm5, 0, %v151_v18  ;;  %v155_v21 = vsel %vm2882_vm5, 0, %v154_v19 }
  0x21   :  { %v157_v22 = vld [vmem:[#allocation2 + $0x94] sm:$0x1]  ;;  %v2952_v23 = vrot.slane %v161_v24, 7  ;;  %v164_v25 = vshll.u32 %v2845_v10, 16  ;;  %153 = vst [vmem:[#allocation2 + $0x84] sm:$0x1] %v152_v20 }
  0x22   :  { %v38_v26 = vld [vmem:[%s4694_s0 + $0x14] sm:$0xf]  ;;  %156 = vst [vmem:[#allocation2 + $0x8c] sm:$0x1] %v155_v21  ;;  %v158_v27 = vsel %vm2882_vm5, 0, %v157_v22  ;;  %v169_v28 = vshrl.u32 %v2916_v60, 16 }
  0x23   :  { %v172_v29 = vshll.u32 %v2916_v60, 16  ;;  %v177_v30 = vshrl.u32 %v2921_v61, 16  ;;  %159 = vst [vmem:[#allocation2 + $0x94] sm:$0x1] %v158_v27  ;;  %v2964_v24 = vor.u32 %v164_v25, %v2952_v23  ;;  %v167_v10 = vrot.slane %v2952_v23, 4 }
  0x24   :  { %v180_v31 = vshll.u32 %v2921_v61, 16  ;;  %v185_v32 = vshrl.u32 %v36_v3, 16  ;;  %v39_v33 = vld [vmem:[%s4694_s0 + $0x18] sm:$0xf]  ;;  %v2972_v34 = vrot.slane %v169_v28, 7  ;;  %v188_v36 = vshll.u32 %v36_v3, 16 }
  0x25   :  { %v2974_v35 = vrot.slane %v177_v30, 7  ;;  %v193_v37 = vshrl.u32 %v37_v8, 16  ;;  %v40_v38 = vld [vmem:[%s4694_s0 + $0x1c] sm:$0xf]  ;;  %v196_v40 = vshll.u32 %v37_v8, 16  ;;  %v201_v41 = vshrl.u32 %v38_v26, 16 }
  0x26   :  { %v2979_v39 = vrot.slane %v185_v32, 7  ;;  %v204_v42 = vshll.u32 %v38_v26, 16  ;;  %v41_v43 = vld [vmem:[%s4694_s0 + $0x20] sm:$0xf]  ;;  %v2985_v44 = vor.u32 %v172_v29, %v2972_v34  ;;  %v175_v45 = vrot.slane %v2972_v34, 4 }
  0x27   :  { %v2989_v46 = vor.u32 %v180_v31, %v2974_v35  ;;  %v183_v47 = vrot.slane %v2974_v35, 4  ;;  %v42_v48 = vld [vmem:[%s4694_s0 + $0x24] sm:$0xf]  ;;  %v2999_v51 = vrot.slane %v193_v37, 7  ;;  %v3001_v52 = vrot.slane %v201_v41, 7 }
  0x28   :  { %v2996_v49 = vor.u32 %v188_v36, %v2979_v39  ;;  %v191_v50 = vrot.slane %v2979_v39, 4  ;;  %v43_v53 = vld [vmem:[%s4694_s0 + $0x28] sm:$0xf]  ;;  %v209_v54 = vshrl.u32 %v39_v33, 16  ;;  %v212_v55 = vshll.u32 %v39_v33, 16 }
  0x29   :  { %v217_v56 = vshrl.u32 %v40_v38, 16  ;;  %v220_v57 = vshll.u32 %v40_v38, 16  ;;  %v44_v58 = vld [vmem:[%s4694_s0 + $0x2c] sm:$0xf]  ;;  %v3010_v59 = vor.u32 %v196_v40, %v2999_v51  ;;  %v199_v60 = vrot.slane %v2999_v51, 4 }
  0x2a   :  { %v3014_v61 = vor.u32 %v204_v42, %v3001_v52  ;;  %v207_v62 = vrot.slane %v3001_v52, 4  ;;  %v45_v63 = vld [vmem:[%s4694_s0 + $0x30] sm:$0xf]  ;;  %v3020_v1 = vrot.slane %v209_v54, 7  ;;  %v225_v3 = vshrl.u32 %v41_v43, 16 }
  0x2b   :  { %v3022_v2 = vrot.slane %v217_v56, 7  ;;  %v228_v4 = vshll.u32 %v41_v43, 16  ;;  %v46_v5 = vld [vmem:[%s4694_s0 + $0x34] sm:$0xf]  ;;  %v233_v6 = vshrl.u32 %v42_v48, 16  ;;  %v236_v7 = vshll.u32 %v42_v48, 16 }
  0x2c   :  { %v241_v8 = vshrl.u32 %v43_v53, 16  ;;  %v244_v11 = vshll.u32 %v43_v53, 16  ;;  %v3028_v13 = vor.u32 %v212_v55, %v3020_v1  ;;  %v47_v17 = vld [vmem:[%s4694_s0 + $0x38] sm:$0xf]  ;;  %v3038_v18 = vrot.slane %v225_v3, 7 }
  0x2d   :  { %v3032_v15 = vor.u32 %v220_v57, %v3022_v2  ;;  %v3040_v19 = vrot.slane %v233_v6, 7  ;;  %v249_v21 = vshrl.u32 %v44_v58, 16  ;;  %v3047_v22 = vld [vmem:[%s4694_s0 + $0x3c] sm:$0xf]  ;;  %v252_v25 = vshll.u32 %v44_v58, 16 }
  0x2e   :  { %v3042_v20 = vrot.slane %v241_v8, 7  ;;  %v257_v26 = vshrl.u32 %v45_v63, 16  ;;  %v260_v27 = vshll.u32 %v45_v63, 16  ;;  %v265_v28 = vshrl.u32 %v46_v5, 16  ;;  %v322_v33 = vld [vmem:[#allocation2 + $0x8] sm:$0xf] }
  0x2f   :  { %v3050_v29 = vor.u32 %v228_v4, %v3038_v18  ;;  %v3054_v31 = vor.u32 %v236_v7, %v3040_v19  ;;  %v325_v36 = vld [vmem:[#allocation2 + $0xc] sm:$0x1]  ;;  %v328_v37 = vld [vmem:[#allocation2 + $0x10] sm:$0xf]  ;;  %v3061_v41 = vrot.slane %v249_v21, 7  ;;  %v268_v53 = vshll.u32 %v46_v5, 16 }
  0x30   :  { %v3058_v38 = vor.u32 %v244_v11, %v3042_v20  ;;  %v3063_v42 = vrot.slane %v257_v26, 7  ;;  %v331_v43 = vld [vmem:[#allocation2 + $0x14] sm:$0x1]  ;;  %v3065_v48 = vrot.slane %v265_v28, 7  ;;  %v273_v54 = vshrl.u32 %v47_v17, 16 }
  0x31   :  { %v276_v55 = vshll.u32 %v47_v17, 16  ;;  %v334_v57 = vld [vmem:[#allocation2 + $0x18] sm:$0xf]  ;;  %v337_v58 = vld [vmem:[#allocation2 + $0x1c] sm:$0x1]  ;;  %v3074_v4 = vor.u32 %v252_v25, %v3061_v41  ;;  %v281_v28 = vshrl.u32 %v3047_v22, 16  ;;  %v323_v5 = vsel %vm3069_vm7, %v2964_v24, %v322_v33 }
  0x32   :  { %v340_v63 = vld [vmem:[#allocation2 + $0x20] sm:$0xf]  ;;  %v343_v3 = vld [vmem:[#allocation2 + $0x24] sm:$0x1]  ;;  %v3078_v7 = vor.u32 %v260_v27, %v3063_v42  ;;  %v346_v8 = vld [vmem:[#allocation2 + $0x28] sm:$0xf]  ;;  %v3082_v17 = vor.u32 %v268_v53, %v3065_v48  ;;  %v326_v53 = vsel %vm2848_vm3, %v167_v10, %v325_v36  ;;  %v332_v23 = vsel %vm2848_vm3, %v175_v45, %v331_v43 }
  0x33   :  { %v349_v11 = vld [vmem:[#allocation2 + $0x2c] sm:$0x1]  ;;  %v3085_v26 = vrot.slane %v273_v54, 7  ;;  %v352_v25 = vld [vmem:[#allocation2 + $0x30] sm:$0xf]  ;;  %v284_v27 = vshll.u32 %v3047_v22, 16  ;;  %v329_v54 = vsel %vm3069_vm7, %v2985_v44, %v328_v37  ;;  %v335_v44 = vsel %vm3069_vm7, %v2989_v46, %v334_v57 }
  0x34   :  { %v355_v0 = vld [vmem:[#allocation2 + $0x34] sm:$0x1]  ;;  %v358_v40 = vld [vmem:[#allocation2 + $0x38] sm:$0xf]  ;;  %v361_v6 = vld [vmem:[#allocation2 + $0x3c] sm:$0x1]  ;;  %v338_v33 = vsel %vm2848_vm3, %v183_v47, %v337_v58  ;;  %v341_v36 = vsel %vm3069_vm7, %v2996_v49, %v340_v63  ;;  %v344_v34 = vsel %vm2848_vm3, %v191_v50, %v343_v3  ;;  %v347_v46 = vsel %vm3069_vm7, %v3010_v59, %v346_v8 }
  0x35   :  { %v364_v21 = vld [vmem:[#allocation2 + $0x40] sm:$0xf]  ;;  %v367_v32 = vld [vmem:[#allocation2 + $0x44] sm:$0x1]  ;;  %v370_v30 = vld [vmem:[#allocation2 + $0x58] sm:$0xf]  ;;  %v3100_v16 = vor.u32 %v276_v55, %v3085_v26  ;;  %v350_v39 = vsel %vm2848_vm3, %v199_v60, %v349_v11  ;;  %v353_v50 = vsel %vm3069_vm7, %v3014_v61, %v352_v25  ;;  %v359_v51 = vsel %vm3069_vm7, %v3028_v13, %v358_v40 }
  0x36   :  { %v279_v22 = vrot.slane %v3085_v26, 4  ;;  %v3103_v14 = vrot.slane %v281_v28, 7  ;;  %324 = vst [vmem:[#allocation2 + $0x8] sm:$0xf] %v323_v5  ;;  %327 = vst [vmem:[#allocation2 + $0xc] sm:$0x1] %v326_v53 }
  0x37   :  { %330 = vst [vmem:[#allocation2 + $0x10] sm:$0xf] %v329_v54  ;;  %v373_v24 = vld [vmem:[#allocation2 + $0x5c] sm:$0x1]  ;;  %v376_v10 = vld [vmem:[#allocation2 + $0x60] sm:$0xf] }
  0x38   :  { %333 = vst [vmem:[#allocation2 + $0x14] sm:$0x1] %v332_v23  ;;  %v379_v45 = vld [vmem:[#allocation2 + $0x64] sm:$0x1]  ;;  %v382_v37 = vld [vmem:[#allocation2 + $0x68] sm:$0xf]  ;;  %v3124_v55 = vor.u32 %v284_v27, %v3103_v14 }
  0x39   :  { %v385_v43 = vld [vmem:[#allocation2 + $0x6c] sm:$0x1]  ;;  %v287_v35 = vrot.slane %v3103_v14, 4  ;;  %336 = vst [vmem:[#allocation2 + $0x18] sm:$0xf] %v335_v44  ;;  %v356_v14 = vsel %vm2848_vm3, %v207_v62, %v355_v0  ;;  %v4840_v59 = vrot.slane %v3020_v1, 4  ;;  %v365_v0 = vsel %vm3069_vm7, %v3032_v15, %v364_v21 }
  0x3a   :  { %339 = vst [vmem:[#allocation2 + $0x1c] sm:$0x1] %v338_v33  ;;  %342 = vst [vmem:[#allocation2 + $0x20] sm:$0xf] %v341_v36  ;;  %v388_v47 = vld [vmem:[#allocation2 + $0x70] sm:$0xf]  ;;  %v371_v62 = vsel %vm3069_vm7, %v3050_v29, %v370_v30 }
  0x3b   :  { %345 = vst [vmem:[#allocation2 + $0x24] sm:$0x1] %v344_v34  ;;  %v391_v49 = vld [vmem:[#allocation2 + $0x74] sm:$0x1]  ;;  %348 = vst [vmem:[#allocation2 + $0x28] sm:$0xf] %v347_v46  ;;  %v362_v60 = vsel %vm2848_vm3, %v4840_v59, %v361_v6 }
  0x3c   :  { %351 = vst [vmem:[#allocation2 + $0x2c] sm:$0x1] %v350_v39  ;;  %v394_v57 = vld [vmem:[#allocation2 + $0x78] sm:$0xf]  ;;  %v397_v58 = vld [vmem:[#allocation2 + $0x7c] sm:$0x1] }
  0x3d   :  { %v400_v63 = vld [vmem:[#allocation2 + $0x80] sm:$0xf]  ;;  %354 = vst [vmem:[#allocation2 + $0x30] sm:$0xf] %v353_v50  ;;  %357 = vst [vmem:[#allocation2 + $0x34] sm:$0x1] %v356_v14 }
  0x3e   :  { %360 = vst [vmem:[#allocation2 + $0x38] sm:$0xf] %v359_v51  ;;  %363 = vst [vmem:[#allocation2 + $0x3c] sm:$0x1] %v362_v60  ;;  %v4841_v52 = vrot.slane %v3022_v2, 4  ;;  %v4842_v1 = vrot.slane %v3038_v18, 4  ;;  %v377_v2 = vsel %vm3069_vm7, %v3054_v31, %v376_v10  ;;  %v383_v18 = vsel %vm3069_vm7, %v3058_v38, %v382_v37 }
  0x3f   :  { %v403_v40 = vld [vmem:[#allocation2 + $0x84] sm:$0x1]  ;;  %v406_v3 = vld [vmem:[#allocation2 + $0x88] sm:$0xf]  ;;  %v409_v6 = vld [vmem:[#allocation2 + $0x8c] sm:$0x1] }
  0x40   :  { %v368_v61 = vsel %vm2848_vm3, %v4841_v52, %v367_v32  ;;  %v374_v13 = vsel %vm2848_vm3, %v4842_v1, %v373_v24  ;;  %366 = vst [vmem:[#allocation2 + $0x40] sm:$0xf] %v365_v0  ;;  %372 = vst [vmem:[#allocation2 + $0x58] sm:$0xf] %v371_v62  ;;  %v4843_v15 = vrot.slane %v3040_v19, 4  ;;  %v4844_v30 = vrot.slane %v3042_v20, 4 }
  0x41   :  { %369 = vst [vmem:[#allocation2 + $0x44] sm:$0x1] %v368_v61  ;;  %375 = vst [vmem:[#allocation2 + $0x5c] sm:$0x1] %v374_v13  ;;  %v412_v5 = vld [vmem:[#allocation2 + $0x90] sm:$0xf]  ;;  %v389_v19 = vsel %vm3069_vm7, %v3074_v4, %v388_v47  ;;  %v395_v20 = vsel %vm3069_vm7, %v3078_v7, %v394_v57  ;;  %v410_v7 = vsel %vm2848_vm3, %v279_v22, %v409_v6 }
  0x42   :  { %v380_v29 = vsel %vm2848_vm3, %v4843_v15, %v379_v45  ;;  %v386_v32 = vsel %vm2848_vm3, %v4844_v30, %v385_v43  ;;  %v415_v8 = vld [vmem:[#allocation2 + $0x94] sm:$0x1]  ;;  %378 = vst [vmem:[#allocation2 + $0x60] sm:$0xf] %v377_v2  ;;  %384 = vst [vmem:[#allocation2 + $0x68] sm:$0xf] %v383_v18 }
  0x43   :  { %381 = vst [vmem:[#allocation2 + $0x64] sm:$0x1] %v380_v29  ;;  %387 = vst [vmem:[#allocation2 + $0x6c] sm:$0x1] %v386_v32  ;;  %v4845_v31 = vrot.slane %v3061_v41, 4  ;;  %v4846_v11 = vrot.slane %v3063_v42, 4  ;;  %v401_v41 = vsel %vm3069_vm7, %v3082_v17, %v400_v63  ;;  %v407_v42 = vsel %vm3069_vm7, %v3100_v16, %v406_v3 }
  0x44   :  { %390 = vst [vmem:[#allocation2 + $0x70] sm:$0xf] %v389_v19  ;;  %396 = vst [vmem:[#allocation2 + $0x78] sm:$0xf] %v395_v20  ;;  %v4847_v4 = vrot.slane %v3065_v48, 4  ;;  %v413_v48 = vsel %vm3069_vm7, %v3124_v55, %v412_v5  ;;  %v416_v17 = vsel %vm2848_vm3, %v287_v35, %v415_v8  ;;  %v3210_v25 = vsub.s32 0, %v2840_v9 }
  0x45   :  { %v392_v38 = vsel %vm2848_vm3, %v4845_v31, %v391_v49  ;;  %v398_v21 = vsel %vm2848_vm3, %v4846_v11, %v397_v58  ;;  %402 = vst [vmem:[#allocation2 + $0x80] sm:$0xf] %v401_v41  ;;  %408 = vst [vmem:[#allocation2 + $0x88] sm:$0xf] %v407_v42  ;;  %v3215_v16 = vld [vmem:[%s4695_s1] sm:$0x7] }
  0x46   :  { %393 = vst [vmem:[#allocation2 + $0x74] sm:$0x1] %v392_v38  ;;  %399 = vst [vmem:[#allocation2 + $0x7c] sm:$0x1] %v398_v21  ;;  %v404_v28 = vsel %vm2848_vm3, %v4847_v4, %v403_v40  ;;  %v3217_v26 = vld [vmem:[#allocation2] ss:$8 sps:$4 sm:$0xff]   ;;  %v456_v12 = vrot.slane %v3215_v16, %v3210_v25 }
  0x47   :  { %405 = vst [vmem:[#allocation2 + $0x84] sm:$0x1] %v404_v28  ;;  %411 = vst [vmem:[#allocation2 + $0x8c] sm:$0x1] %v410_v7  ;;  %v3219_v27 = vld [vmem:[#allocation2 + $0x4] sm:$0x1]  ;;  %v437_v36 = vunpack.c.l.bf16 %v3217_v26  ;;  %v438_v34 = vunpack.c.h.bf16 %v3217_v26 }
  0x48   :  { %4848 = vst [vmem:[#allocation4_spill] sm:$0xff] %v3210_v25  ;;  %414 = vst [vmem:[#allocation2 + $0x90] sm:$0xf] %v413_v48  ;;  %v3221_v53 = vld [vmem:[#allocation2 + $0xc] sm:$0x1]  ;;  %v3236_v10 = vsub.s32 1, %v2840_v9  ;;  %v4719_v45 = vunpack.c.l.bf16 %v3219_v27 }
  0x49   :  { %417 = vst [vmem:[#allocation2 + $0x94] sm:$0x1] %v416_v17  ;;  %4849 = vst [vmem:[#allocation5_spill] sm:$0xff] %v3215_v16  ;;  %v3223_v56 = vld [vmem:[#allocation2 + $0x10] ss:$8 sps:$4 sm:$0xff]   ;;  %v3239_v44 = vsub.s32 2, %v2840_v9  ;;  %v4722_v37 = vunpack.c.l.bf16 %v3221_v53  ;;  %v3259_v14 = vmul.f32 %v456_v12, %v437_v36  ;;  %v3268_v58 = vmul.f32 %v456_v12, %v438_v34 }
  0x4a   :  { %4850 = vst [vmem:[#allocation6_spill] sm:$0xff] %v3219_v27  ;;  %4851 = vst [vmem:[#allocation7_spill] sm:$0xff] %v3221_v53  ;;  %v3227_v54 = vld [vmem:[#allocation2 + $0x14] sm:$0x1]  ;;  %v3229_v22 = vld [vmem:[#allocation2 + $0x1c] sm:$0x1]  ;;  %v439_v55 = vunpack.c.l.bf16 %v3223_v56  ;;  %v4717_v35 = vunpack.c.h.bf16 %v3223_v56 }
  0x4b   :  { %4852 = vst [vmem:[#allocation8_spill] sm:$0xff] %v3227_v54  ;;  %4853 = vst [vmem:[#allocation9_spill] sm:$0xff] %v3229_v22  ;;  %v3231_v23 = vld [vmem:[#allocation2 + $0x20] ss:$8 sps:$4 sm:$0xff]   ;;  %v3233_v24 = vld [vmem:[#allocation2 + $0x24] sm:$0x1]  ;;  %v4876_v9 = vunpack.c.l.bf16 %v3229_v22 }
  0x4c   :  { %4854 = vst [vmem:[#allocation10_spill] sm:$0xff] %v3233_v24  ;;  %4855 = vst [vmem:[#allocation11_spill] sm:$0xff] %v3236_v10  ;;  %v3241_v33 = vld [vmem:[#allocation2 + $0x30] ss:$8 sps:$4 sm:$0xff]   ;;  %v3253_v47 = vld [vmem:[#allocation2 + $0x60] ss:$8 sps:$4 sm:$0xff]   ;;  %v4716_v49 = vunpack.c.l.bf16 %v3231_v23  ;;  %v4713_v50 = vunpack.c.h.bf16 %v3231_v23  ;;  %v3272_v63 = vmul.f32 %v456_v12, %v439_v55  ;;  %v3280_v62 = vmul.f32 %v456_v12, %v4717_v35 }
  0x4d   :  { %4856 = vst [vmem:[#allocation12_spill] sm:$0xff] %v3239_v44  ;;  %v3247_v43 = vld [vmem:[#allocation2 + $0x50] ss:$8 sps:$4 sm:$0xff]   ;;  %v4712_v60 = vunpack.c.l.bf16 %v3241_v33  ;;  %v4711_v57 = vunpack.c.h.bf16 %v3241_v33  ;;  %v3274_v0 = vld [vmem:[#allocation2 + $0x80] ss:$8 sps:$4 sm:$0xff]   ;;  %v4705_v13 = vunpack.c.l.bf16 %v3253_v47  ;;  %v4707_v40 = vunpack.c.h.bf16 %v3253_v47 }
  0x4e   :  { %v3262_v59 = vld [vmem:[#allocation2 + $0x70] ss:$8 sps:$4 sm:$0xff]   ;;  %v4709_v52 = vunpack.c.l.bf16 %v3247_v43  ;;  %v4706_v61 = vunpack.c.h.bf16 %v3247_v43  ;;  %v3284_v1 = vmul.f32 %v456_v12, %v4716_v49  ;;  %v3290_v3 = vmul.f32 %v456_v12, %v4713_v50  ;;  %v3296_v2 = vld [vmem:[#allocation2 + $0x2c] sm:$0x1]  ;;  %v3308_v32 = vld [vmem:[#allocation2 + $0x34] sm:$0x1] }
  0x4f   :  { %v3294_v6 = vmul.f32 %v456_v12, %v4712_v60  ;;  %4857 = vst [vmem:[#allocation13_spill] sm:$0xff] %v3296_v2  ;;  %v4708_v15 = vunpack.c.l.bf16 %v3262_v59  ;;  %v4710_v29 = vunpack.c.h.bf16 %v3262_v59  ;;  %v3302_v18 = vmul.f32 %v456_v12, %v4711_v57  ;;  %4858 = vst [vmem:[#allocation14_spill] sm:$0xff] %v3308_v32  ;;  %v3310_v5 = vld [vmem:[#allocation2 + $0x3c] sm:$0x1]  ;;  %v3312_v8 = vld [vmem:[#allocation2 + $0x54] sm:$0x1] }
  0x50   :  { %v3306_v30 = vmul.f32 %v456_v12, %v4709_v52  ;;  %4859 = vst [vmem:[#allocation15_spill] sm:$0xff] %v3310_v5  ;;  %4860 = vst [vmem:[#allocation16_spill] sm:$0xff] %v3312_v8  ;;  %v4714_v19 = vunpack.c.l.bf16 %v3274_v0  ;;  %v4715_v31 = vunpack.c.h.bf16 %v3274_v0  ;;  %v3318_v38 = vmul.f32 %v456_v12, %v4706_v61  ;;  %v3324_v11 = vld [vmem:[#allocation2 + $0x5c] sm:$0x1]  ;;  %v3326_v21 = vld [vmem:[#allocation2 + $0x64] sm:$0x1] }
  0x51   :  { %v3322_v20 = vmul.f32 %v456_v12, %v4705_v13  ;;  %4861 = vst [vmem:[#allocation17_spill] sm:$0xff] %v3324_v11  ;;  %4862 = vst [vmem:[#allocation18_spill] sm:$0xff] %v3326_v21  ;;  %v3328_v41 = vld [vmem:[#allocation2 + $0x6c] sm:$0x1]  ;;  %v3330_v4 = vld [vmem:[#allocation2] sm:$0xe]  ;;  %v3334_v28 = vmul.f32 %v456_v12, %v4707_v40  ;;  %v3338_v42 = vmul.f32 %v456_v12, %v4708_v15  ;;  %v4877_v26 = vunpack.c.l.bf16 %v3231_v23 }
  0x52   :  { %4863 = vst [vmem:[#allocation19_spill] sm:$0xff] %v3328_v41  ;;  %4864 = vst [vmem:[#allocation20_spill] sm:$0xff] %v3330_v4  ;;  %v3342_v7 = vmul.f32 %v456_v12, %v4710_v29  ;;  %v3344_v48 = vld [vmem:[#allocation2 + $0x74] sm:$0x1]  ;;  %v3346_v17 = vld [vmem:[#allocation2 + $0x7c] sm:$0x1]  ;;  %v3353_v40 = vmul.f32 %v456_v12, %v4714_v19  ;;  %v3357_v15 = vmul.f32 %v456_v12, %v4715_v31  ;;  %v4874_v19 = vunpack.c.l.bf16 %v3227_v54 }
  0x53   :  { %4865 = vst [vmem:[#allocation21_spill] sm:$0xff] %v3344_v48  ;;  %4866 = vst [vmem:[#allocation22_spill] sm:$0xff] %v3346_v17  ;;  %v3348_v13 = vld [vmem:[#allocation2 + $0x84] sm:$0x1]  ;;  %v3359_v52 = vld [vmem:[#allocation2 + $0x8c] sm:$0x1]  ;;  %v524_v57 = vrot.slane %v3215_v16, %v3236_v10  ;;  %v4875_v29 = vunpack.c.h.bf16 %v3223_v56  ;;  %v4878_v35 = vunpack.c.l.bf16 %v3233_v24  ;;  %v4882_v56 = vunpack.c.l.bf16 %v3308_v32 }
  0x54   :  { %4867 = vst [vmem:[#allocation23_spill] sm:$0xff] %v3348_v13  ;;  %4868 = vst [vmem:[#allocation24_spill] sm:$0xff] %v3353_v40  ;;  %v3364_v60 = vld [vmem:[#allocation2 + $0x8] sm:$0xe]  ;;  %v3366_v50 = vld [vmem:[#allocation2 + $0x10] sm:$0xe] }
  0x55   :  { %4869 = vst [vmem:[#allocation25_spill] sm:$0xff] %v3357_v15  ;;  %4870 = vst [vmem:[#allocation26_spill] sm:$0xff] %v3359_v52  ;;  %v3372_v31 = vld [vmem:[#allocation2 + $0x18] sm:$0xe]  ;;  %vm589_vm8 = vcmask 1046528   ;;  %v525_v12 = vmul.f32 %v524_v57, %v437_v36  ;;  %v526_v49 = vmul.f32 %v524_v57, %v4719_v45  ;;  %v527_v39 = vmul.f32 %v524_v57, %v438_v34 }
  0x56   :  { %4871 = vst [vmem:[#allocation27_spill] sm:$0xff] %v3364_v60  ;;  %4872 = vst [vmem:[#allocation28_spill] sm:$0xff] %v3366_v50  ;;  %v528_v46 = vmul.f32 %v524_v57, %v4722_v37  ;;  %v529_v61 = vmul.f32 %v524_v57, %v439_v55  ;;  %v530_v51 = vmul.f32 %v524_v57, %v4874_v19  ;;  %v4879_v37 = vunpack.c.h.bf16 %v3231_v23 }
  0x57   :  { %4873 = vst [vmem:[#allocation29_spill] sm:$0xff] %v3372_v31  ;;  %v531_v36 = vmul.f32 %v524_v57, %v4875_v29  ;;  %v532_v45 = vmul.f32 %v524_v57, %v4876_v9  ;;  %v533_v34 = vmul.f32 %v524_v57, %v4877_v26  ;;  %v534_v10 = vmul.f32 %v524_v57, %v4878_v35 }
  0x58   :  { %v535_v25 = vmul.f32 %v524_v57, %v4879_v37  ;;  %v4880_v55 = vunpack.c.l.bf16 %v3296_v2  ;;  %v4881_v19 = vunpack.c.l.bf16 %v3241_v33  ;;  %v538_v29 = vmul.f32 %v524_v57, %v4882_v56 }
  0x59   :  { %v4883_v9 = vunpack.c.h.bf16 %v3241_v33  ;;  %v4884_v26 = vunpack.c.l.bf16 %v3310_v5  ;;  %v4885_v35 = vunpack.c.l.bf16 %v3247_v43  ;;  %v4886_v23 = vunpack.c.l.bf16 %v3312_v8 }
  0x5a   :  { %v536_v31 = vmul.f32 %v524_v57, %v4880_v55  ;;  %v537_v54 = vmul.f32 %v524_v57, %v4881_v19  ;;  %v4887_v55 = vunpack.c.h.bf16 %v3247_v43  ;;  %v4888_v19 = vunpack.c.l.bf16 %v3324_v11 }
  0x5b   :  { %v539_v22 = vmul.f32 %v524_v57, %v4883_v9  ;;  %v540_v50 = vmul.f32 %v524_v57, %v4884_v26  ;;  %v541_v24 = vmul.f32 %v524_v57, %v4885_v35  ;;  %v542_v37 = vmul.f32 %v524_v57, %v4886_v23 }
  0x5c   :  { %v543_v2 = vmul.f32 %v524_v57, %v4887_v55  ;;  %v544_v53 = vmul.f32 %v524_v57, %v4888_v19  ;;  %v4889_v56 = vunpack.c.l.bf16 %v3253_v47  ;;  %v4890_v33 = vunpack.c.l.bf16 %v3326_v21 }
  0x5d   :  { %v4891_v26 = vunpack.c.h.bf16 %v3253_v47  ;;  %v590_v60 = vrot.slane %v525_v12, 1  ;;  %v591_v35 = vrot.slane %v526_v49, 1  ;;  %v593_v27 = vrot.slane %v527_v39, 1 }
  0x5e   :  { %v545_v32 = vmul.f32 %v524_v57, %v4889_v56  ;;  %v546_v9 = vmul.f32 %v524_v57, %v4890_v33  ;;  %v594_v8 = vrot.slane %v528_v46, 1  ;;  %v4892_v23 = vunpack.c.l.bf16 %v3328_v41 }
  0x5f   :  { %v547_v5 = vmul.f32 %v524_v57, %v4891_v26  ;;  %v4893_v55 = vunpack.c.l.bf16 %v3262_v59  ;;  %v596_v19 = vrot.slane %v529_v61, 1  ;;  %v597_v4 = vrot.slane %v530_v51, 1 }
  0x60   :  { %v548_v43 = vmul.f32 %v524_v57, %v4892_v23  ;;  %v4894_v56 = vunpack.c.l.bf16 %v3344_v48  ;;  %v4895_v33 = vunpack.c.h.bf16 %v3262_v59  ;;  %v4896_v47 = vunpack.c.l.bf16 %v3346_v17 }
  0x61   :  { %v549_v11 = vmul.f32 %v524_v57, %v4893_v55  ;;  %v4897_v39 = vunpack.c.l.bf16 %v3274_v0  ;;  %v4898_v49 = vunpack.c.l.bf16 %v3348_v13  ;;  %v4899_v23 = vunpack.c.h.bf16 %v3274_v0 }
  0x62   :  { %v550_v16 = vmul.f32 %v524_v57, %v4894_v56  ;;  %v551_v21 = vmul.f32 %v524_v57, %v4895_v33  ;;  %v552_v12 = vmul.f32 %v524_v57, %v4896_v47  ;;  %v4900_v51 = vunpack.c.l.bf16 %v3359_v52 }
  0x63   :  { %v553_v46 = vmul.f32 %v524_v57, %v4897_v39  ;;  %v554_v26 = vmul.f32 %v524_v57, %v4898_v49  ;;  %v555_v55 = vmul.f32 %v524_v57, %v4899_v23  ;;  %v599_v48 = vrot.slane %v531_v36, 1 }
  0x64   :  { %v556_v61 = vmul.f32 %v524_v57, %v4900_v51  ;;  %v592_v56 = vsel %vm589_vm8, %v590_v60, %v591_v35  ;;  %v595_v59 = vsel %vm589_vm8, %v593_v27, %v594_v8  ;;  %v600_v33 = vrot.slane %v532_v45, 1 }
  0x65   :  { %v602_v17 = vrot.slane %v533_v34, 1  ;;  %v598_v47 = vsel %vm589_vm8, %v596_v19, %v597_v4  ;;  %v603_v41 = vrot.slane %v534_v10, 1  ;;  %v605_v39 = vrot.slane %v535_v25, 1  ;;  %v679_v19 = vld [vmem:[#allocation2 + $0x58] sm:$0xe] }
  0x66   :  { %v606_v44 = vrot.slane %v536_v31, 1  ;;  %v608_v13 = vrot.slane %v537_v54, 1  ;;  %v609_v49 = vrot.slane %v538_v29, 1  ;;  %v611_v15 = vrot.slane %v539_v22, 1 }
  0x67   :  { %v612_v0 = vrot.slane %v540_v50, 1  ;;  %v614_v23 = vrot.slane %v541_v24, 1  ;;  %v615_v40 = vrot.slane %v542_v37, 1  ;;  %v617_v52 = vrot.slane %v543_v2, 1  ;;  %v675_v37 = vld [vmem:[#allocation2 + $0x28] sm:$0xe] }
  0x68   :  { %v618_v57 = vrot.slane %v544_v53, 1  ;;  %v620_v36 = vrot.slane %v545_v32, 1  ;;  %v621_v51 = vrot.slane %v546_v9, 1  ;;  %v623_v60 = vrot.slane %v547_v5, 1 }
  0x69   :  { %v624_v35 = vrot.slane %v548_v43, 1  ;;  %v626_v27 = vrot.slane %v549_v11, 1  ;;  %v627_v45 = vrot.slane %v550_v16, 1  ;;  %v629_v8 = vrot.slane %v551_v21, 1 }
  0x6a   :  { %v630_v34 = vrot.slane %v552_v12, 1  ;;  %v601_v10 = vsel %vm589_vm8, %v599_v48, %v600_v33  ;;  %v604_v25 = vsel %vm589_vm8, %v602_v17, %v603_v41  ;;  %v632_v54 = vrot.slane %v553_v46, 1  ;;  %v680_v12 = vld [vmem:[#allocation2 + $0x60] sm:$0xe]  ;;  %v3513_v33 = vld [vmem:[#allocation2 + $0x88] sm:$0xe] }
  0x6b   :  { %v633_v31 = vrot.slane %v554_v26, 1  ;;  %v607_v22 = vsel %vm589_vm8, %v605_v39, %v606_v44  ;;  %v610_v24 = vsel %vm589_vm8, %v608_v13, %v609_v49  ;;  %v635_v50 = vrot.slane %v555_v55, 1  ;;  %v682_v55 = vld [vmem:[#allocation2 + $0x70] sm:$0xe] }
  0x6c   :  { %v636_v53 = vrot.slane %v556_v61, 1  ;;  %v613_v2 = vsel %vm589_vm8, %v611_v15, %v612_v0  ;;  %v616_v32 = vsel %vm589_vm8, %v614_v23, %v615_v40  ;;  %v619_v16 = vsel %vm589_vm8, %v617_v52, %v618_v57  ;;  %v3474_v15 = vld [vmem:[#allocation2 + $0x50] sm:$0xe]  ;;  %v683_v61 = vld [vmem:[#allocation2 + $0x78] sm:$0xe]  ;;  %v4906_v23 = vld [vmem:[#allocation12_spill] sm:$0xff] }
  0x6d   :  { %v622_v5 = vsel %vm589_vm8, %v620_v36, %v621_v51  ;;  %v625_v11 = vsel %vm589_vm8, %v623_v60, %v624_v35  ;;  %v628_v21 = vsel %vm589_vm8, %v626_v27, %v627_v45  ;;  %v631_v41 = vsel %vm589_vm8, %v629_v8, %v630_v34  ;;  %v4907_v57 = vld [vmem:[#allocation5_spill] sm:$0xff]  ;;  %v3520_v51 = vld [vmem:[#allocation2 + $0x18] ss:$8 sps:$4 sm:$0xff]  }
  0x6e   :  { %v3462_v44 = vadd.f32 %v592_v56, %v3259_v14  ;;  %v634_v13 = vsel %vm589_vm8, %v632_v54, %v633_v31  ;;  %v3466_v4 = vadd.f32 %v595_v59, %v3268_v58  ;;  %v3469_v40 = vadd.f32 %v598_v47, %v3272_v63  ;;  %v674_v58 = vld [vmem:[#allocation2 + $0x20] sm:$0xe]  ;;  %v676_v63 = vld [vmem:[#allocation2 + $0x30] sm:$0xe]  ;;  %4908 = vst [vmem:[#allocation5_spill] sm:$0xff] %v3520_v51  ;;  %v4939_v54 = vld [vmem:[#allocation18_spill] sm:$0xff] }
  0x6f   :  { %v3472_v52 = vadd.f32 %v601_v10, %v3280_v62  ;;  %v637_v48 = vsel %vm589_vm8, %v635_v50, %v636_v53  ;;  %v3478_v17 = vadd.f32 %v604_v25, %v3284_v1  ;;  %v3481_v14 = vadd.f32 %v607_v22, %v3290_v3  ;;  %v677_v3 = vld [vmem:[#allocation2 + $0x38] sm:$0xe]  ;;  %v684_v59 = vld [vmem:[#allocation2 + $0x80] sm:$0xe]  ;;  %v3522_v60 = vld [vmem:[#allocation2 + $0x28] ss:$8 sps:$4 sm:$0xff]  }
  0x70   :  { %v3484_v29 = vadd.f32 %v610_v24, %v3294_v6  ;;  %v3487_v9 = vadd.f32 %v613_v2, %v3302_v18  ;;  %v3490_v62 = vadd.f32 %v616_v32, %v3306_v30  ;;  %v3493_v43 = vadd.f32 %v619_v16, %v3318_v38  ;;  %v4901_v30 = vld [vmem:[#allocation24_spill] sm:$0xff]  ;;  %4909 = vst [vmem:[#allocation31_spill] sm:$0xff] %v3522_v60  ;;  %v3524_v34 = vld [vmem:[#allocation2 + $0x38] ss:$8 sps:$4 sm:$0xff]   ;;  %v4937_v31 = vld [vmem:[#allocation17_spill] sm:$0xff] }
  0x71   :  { %v3496_v1 = vadd.f32 %v622_v5, %v3322_v20  ;;  %v3499_v6 = vadd.f32 %v625_v11, %v3334_v28  ;;  %v3502_v46 = vadd.f32 %v628_v21, %v3338_v42  ;;  %v3505_v18 = vadd.f32 %v631_v41, %v3342_v7  ;;  %v681_v38 = vld [vmem:[#allocation2 + $0x68] sm:$0xe]  ;;  %v4903_v20 = vld [vmem:[#allocation25_spill] sm:$0xff]  ;;  %4910 = vst [vmem:[#allocation32_spill] sm:$0xff] %v3524_v34  ;;  %v4913_v5 = vld [vmem:[#allocation6_spill] sm:$0xff] }
  0x72   :  { %v3508_v26 = vadd.f32 %v634_v13, %v4901_v30  ;;  %v3511_v56 = vadd.f32 %v637_v48, %v4903_v20  ;;  %v690_v28 = vunpack.c.l.bf16 %v674_v58  ;;  %v691_v47 = vunpack.c.l.bf16 %v675_v37  ;;  %v3515_v42 = vld [vmem:[#allocation2 + $0x8] ss:$8 sps:$4 sm:$0xff]   ;;  %v4915_v41 = vld [vmem:[#allocation27_spill] sm:$0xff] }
  0x73   :  { %v692_v39 = vunpack.c.l.bf16 %v676_v63  ;;  %4905 = vst [vmem:[#allocation30_spill] sm:$0xff] %v3515_v42  ;;  %v693_v49 = vunpack.c.l.bf16 %v677_v3  ;;  %v694_v7 = vunpack.c.l.bf16 %v3474_v15  ;;  %v695_v0 = vunpack.c.l.bf16 %v679_v19  ;;  %v4911_v2 = vld [vmem:[#allocation20_spill] sm:$0xff]  ;;  %v4917_v58 = vld [vmem:[#allocation7_spill] sm:$0xff]  ;;  %v4929_v48 = vld [vmem:[#allocation13_spill] sm:$0xff] }
  0x74   :  { %4902 = vst [vmem:[#allocation24_spill] sm:$0xff] %v3508_v26  ;;  %4904 = vst [vmem:[#allocation25_spill] sm:$0xff] %v3511_v56  ;;  %v705_v36 = vrot.slane %v4907_v57, %v4906_v23  ;;  %v696_v35 = vunpack.c.l.bf16 %v680_v12  ;;  %v697_v27 = vunpack.c.l.bf16 %v681_v38  ;;  %v698_v45 = vunpack.c.l.bf16 %v682_v55  ;;  %v4919_v3 = vld [vmem:[#allocation28_spill] sm:$0xff]  ;;  %v4941_v60 = vld [vmem:[#allocation19_spill] sm:$0xff] }
  0x75   :  { %v699_v8 = vunpack.c.l.bf16 %v683_v61  ;;  %v700_v10 = vunpack.c.l.bf16 %v684_v59  ;;  %v701_v25 = vunpack.c.l.bf16 %v3513_v33  ;;  %vm770_vm9 = vcmask 1045504   ;;  %v4921_v30 = vld [vmem:[#allocation8_spill] sm:$0xff]  ;;  %v4923_v61 = vld [vmem:[#allocation29_spill] sm:$0xff] }
  0x76   :  { %v4912_v32 = vunpack.c.l.bf16 %v4911_v2  ;;  %v4914_v11 = vunpack.c.l.bf16 %v4913_v5  ;;  %v4916_v13 = vunpack.c.l.bf16 %v4915_v41  ;;  %v4918_v37 = vunpack.c.l.bf16 %v4917_v58  ;;  %v4925_v33 = vld [vmem:[#allocation9_spill] sm:$0xff]  ;;  %v4927_v5 = vld [vmem:[#allocation10_spill] sm:$0xff]  ;;  %v4935_v22 = vld [vmem:[#allocation16_spill] sm:$0xff] }
  0x77   :  { %v4920_v19 = vunpack.c.l.bf16 %v4919_v3  ;;  %v4922_v38 = vunpack.c.l.bf16 %v4921_v30  ;;  %v4924_v20 = vunpack.c.l.bf16 %v4923_v61  ;;  %v4926_v57 = vunpack.c.l.bf16 %v4925_v33  ;;  %v4931_v3 = vld [vmem:[#allocation14_spill] sm:$0xff] }
  0x78   :  { %v706_v16 = vmul.f32 %v705_v36, %v4912_v32  ;;  %v707_v21 = vmul.f32 %v705_v36, %v4914_v11  ;;  %v708_v15 = vmul.f32 %v705_v36, %v4916_v13  ;;  %v709_v63 = vmul.f32 %v705_v36, %v4918_v37 }
  0x79   :  { %v710_v12 = vmul.f32 %v705_v36, %v4920_v19  ;;  %v711_v55 = vmul.f32 %v705_v36, %v4922_v38  ;;  %v712_v59 = vmul.f32 %v705_v36, %v4924_v20  ;;  %v713_v2 = vmul.f32 %v705_v36, %v4926_v57  ;;  %v4933_v38 = vld [vmem:[#allocation15_spill] sm:$0xff] }
  0x7a   :  { %v714_v32 = vmul.f32 %v705_v36, %v690_v28  ;;  %v4928_v11 = vunpack.c.l.bf16 %v4927_v5  ;;  %v716_v13 = vmul.f32 %v705_v36, %v691_v47  ;;  %v4930_v58 = vunpack.c.l.bf16 %v4929_v48 }
  0x7b   :  { %v718_v53 = vmul.f32 %v705_v36, %v692_v39  ;;  %v4932_v19 = vunpack.c.l.bf16 %v4931_v3  ;;  %v720_v30 = vmul.f32 %v705_v36, %v693_v49  ;;  %v4934_v24 = vunpack.c.l.bf16 %v4933_v38 }
  0x7c   :  { %v715_v41 = vmul.f32 %v705_v36, %v4928_v11  ;;  %v717_v37 = vmul.f32 %v705_v36, %v4930_v58  ;;  %v722_v20 = vmul.f32 %v705_v36, %v694_v7  ;;  %v4936_v33 = vunpack.c.l.bf16 %v4935_v22 }
  0x7d   :  { %v719_v50 = vmul.f32 %v705_v36, %v4932_v19  ;;  %v721_v61 = vmul.f32 %v705_v36, %v4934_v24  ;;  %v724_v28 = vmul.f32 %v705_v36, %v695_v0  ;;  %v4938_v5 = vunpack.c.l.bf16 %v4937_v31 }
  0x7e   :  { %v723_v57 = vmul.f32 %v705_v36, %v4936_v33  ;;  %v726_v47 = vmul.f32 %v705_v36, %v696_v35  ;;  %v4940_v48 = vunpack.c.l.bf16 %v4939_v54  ;;  %v728_v39 = vmul.f32 %v705_v36, %v697_v27  ;;  %v4943_v33 = vld [vmem:[#allocation21_spill] sm:$0xff] }
  0x7f   :  { %v725_v11 = vmul.f32 %v705_v36, %v4938_v5  ;;  %v771_v23 = vrot.slane %v706_v16, 2  ;;  %v772_v3 = vrot.slane %v707_v21, 2  ;;  %v774_v19 = vrot.slane %v708_v15, 2  ;;  %v4945_v5 = vld [vmem:[#allocation22_spill] sm:$0xff] }
  0x80   :  { %v727_v58 = vmul.f32 %v705_v36, %v4940_v48  ;;  %v775_v49 = vrot.slane %v709_v63, 2  ;;  %v4942_v38 = vunpack.c.l.bf16 %v4941_v60  ;;  %v730_v7 = vmul.f32 %v705_v36, %v698_v45  ;;  %v4947_v48 = vld [vmem:[#allocation23_spill] sm:$0xff]  ;;  %v4949_v15 = vld [vmem:[#allocation26_spill] sm:$0xff] }
  0x81   :  { %v777_v51 = vrot.slane %v710_v12, 2  ;;  %v778_v22 = vrot.slane %v711_v55, 2  ;;  %v4944_v0 = vunpack.c.l.bf16 %v4943_v33  ;;  %v732_v31 = vmul.f32 %v705_v36, %v699_v8 }
  0x82   :  { %v729_v24 = vmul.f32 %v705_v36, %v4942_v38  ;;  %v4946_v35 = vunpack.c.l.bf16 %v4945_v5  ;;  %v734_v54 = vmul.f32 %v705_v36, %v700_v10  ;;  %v4948_v27 = vunpack.c.l.bf16 %v4947_v48 }
  0x83   :  { %v731_v42 = vmul.f32 %v705_v36, %v4944_v0  ;;  %v736_v21 = vmul.f32 %v705_v36, %v701_v25  ;;  %v4950_v63 = vunpack.c.l.bf16 %v4949_v15  ;;  %v780_v60 = vrot.slane %v712_v59, 2 }
  0x84   :  { %v733_v34 = vmul.f32 %v705_v36, %v4946_v35  ;;  %v735_v16 = vmul.f32 %v705_v36, %v4948_v27  ;;  %v773_v45 = vsel %vm770_vm9, %v771_v23, %v772_v3  ;;  %v776_v12 = vsel %vm770_vm9, %v774_v19, %v775_v49 }
  0x85   :  { %v737_v56 = vmul.f32 %v705_v36, %v4950_v63  ;;  %v781_v55 = vrot.slane %v713_v2, 2  ;;  %v783_v38 = vrot.slane %v714_v32, 2  ;;  %v779_v8 = vsel %vm770_vm9, %v777_v51, %v778_v22 }
  0x86   :  { %v784_v33 = vrot.slane %v715_v41, 2  ;;  %v786_v0 = vrot.slane %v716_v13, 2  ;;  %v787_v5 = vrot.slane %v717_v37, 2  ;;  %v789_v10 = vrot.slane %v718_v53, 2 }
  0x87   :  { %v790_v35 = vrot.slane %v719_v50, 2  ;;  %v792_v48 = vrot.slane %v720_v30, 2  ;;  %v793_v27 = vrot.slane %v721_v61, 2  ;;  %v795_v25 = vrot.slane %v722_v20, 2 }
  0x88   :  { %v796_v26 = vrot.slane %v723_v57, 2  ;;  %v798_v15 = vrot.slane %v724_v28, 2  ;;  %v799_v36 = vrot.slane %v725_v11, 2  ;;  %v801_v59 = vrot.slane %v726_v47, 2 }
  0x89   :  { %v802_v63 = vrot.slane %v727_v58, 2  ;;  %v804_v23 = vrot.slane %v728_v39, 2  ;;  %v805_v3 = vrot.slane %v729_v24, 2  ;;  %v807_v19 = vrot.slane %v730_v7, 2  ;;  %v3596_v7 = vld [vmem:[%s4695_s1 + $0x4] sm:$0x7] }
  0x8a   :  { %v808_v2 = vrot.slane %v731_v42, 2  ;;  %v810_v32 = vrot.slane %v732_v31, 2  ;;  %v811_v49 = vrot.slane %v733_v34, 2  ;;  %v782_v51 = vsel %vm770_vm9, %v780_v60, %v781_v55  ;;  %4951 = vst [vmem:[#allocation20_spill] sm:$0xff] %v3596_v7  ;;  %v3608_v60 = vld [vmem:[#allocation2 + $0x68] ss:$8 sps:$4 sm:$0xff]  }
  0x8b   :  { %v785_v41 = vsel %vm770_vm9, %v783_v38, %v784_v33  ;;  %v813_v53 = vrot.slane %v734_v54, 2  ;;  %v814_v50 = vrot.slane %v735_v16, 2  ;;  %v788_v13 = vsel %vm770_vm9, %v786_v0, %v787_v5  ;;  %v3602_v16 = vld [vmem:[#allocation2 + $0x58] ss:$8 sps:$4 sm:$0xff]   ;;  %v4955_v55 = vld [vmem:[#allocation25_spill] sm:$0xff]  ;;  %v4957_v33 = vld [vmem:[#allocation4_spill] sm:$0xff] }
  0x8c   :  { %v791_v37 = vsel %vm770_vm9, %v789_v10, %v790_v35  ;;  %v816_v30 = vrot.slane %v736_v21, 2  ;;  %v817_v61 = vrot.slane %v737_v56, 2  ;;  %v794_v20 = vsel %vm770_vm9, %v792_v48, %v793_v27  ;;  %v3637_v0 = vld [vmem:[#allocation2 + $0x1c] sm:$0x1]  ;;  %v3639_v5 = vld [vmem:[#allocation2 + $0x24] sm:$0x1] }
  0x8d   :  { %v797_v57 = vsel %vm770_vm9, %v795_v25, %v796_v26  ;;  %v800_v42 = vsel %vm770_vm9, %v798_v15, %v799_v36  ;;  %v803_v34 = vsel %vm770_vm9, %v801_v59, %v802_v63  ;;  %v806_v28 = vsel %vm770_vm9, %v804_v23, %v805_v3  ;;  %4958 = vst [vmem:[#allocation7_spill] sm:$0xff] %v3637_v0  ;;  %v3641_v10 = vld [vmem:[#allocation2 + $0x2c] sm:$0x1]  ;;  %v3647_v15 = vld [vmem:[#allocation2 + $0x34] sm:$0x1] }
  0x8e   :  { %v809_v11 = vsel %vm770_vm9, %v807_v19, %v808_v2  ;;  %v812_v47 = vsel %vm770_vm9, %v810_v32, %v811_v49  ;;  %v835_v58 = vadd.f32 %v773_v45, %v3462_v44  ;;  %v815_v39 = vsel %vm770_vm9, %v813_v53, %v814_v50  ;;  %v3610_v45 = vld [vmem:[#allocation2 + $0x78] ss:$8 sps:$4 sm:$0xff]   ;;  %4959 = vst [vmem:[#allocation28_spill] sm:$0xff] %v3639_v5  ;;  %v3708_v32 = vld [vmem:[#allocation2 + $0x5c] sm:$0x1] }
  0x8f   :  { %v836_v56 = vadd.f32 %v776_v12, %v3466_v4  ;;  %v837_v24 = vadd.f32 %v779_v8, %v3469_v40  ;;  %v838_v26 = vadd.f32 %v782_v51, %v3472_v52  ;;  %v818_v22 = vsel %vm770_vm9, %v816_v30, %v817_v61  ;;  %4960 = vst [vmem:[#allocation8_spill] sm:$0xff] %v3641_v10  ;;  %v4962_v49 = vld [vmem:[#allocation30_spill] sm:$0xff] }
  0x90   :  { %v839_v31 = vadd.f32 %v785_v41, %v3478_v17  ;;  %v840_v54 = vadd.f32 %v788_v13, %v3481_v14  ;;  %v841_v44 = vadd.f32 %v791_v37, %v3484_v29  ;;  %v842_v4 = vadd.f32 %v794_v20, %v3487_v9  ;;  %v4952_v9 = vld [vmem:[#allocation24_spill] sm:$0xff]  ;;  %4961 = vst [vmem:[#allocation29_spill] sm:$0xff] %v3647_v15  ;;  %v4965_v13 = vld [vmem:[#allocation5_spill] sm:$0xff] }
  0x91   :  { %v843_v40 = vadd.f32 %v797_v57, %v3490_v62  ;;  %v844_v52 = vadd.f32 %v800_v42, %v3493_v43  ;;  %v845_v21 = vadd.f32 %v803_v34, %v3496_v1  ;;  %v3613_v17 = vadd.f32 %v806_v28, %v3499_v6  ;;  %v3624_v62 = vld [vmem:[#allocation2 + $0x88] ss:$8 sps:$4 sm:$0xff]   ;;  %v3626_v43 = vld [vmem:[#allocation2 + $0xc] sm:$0x1]  ;;  %v3628_v1 = vld [vmem:[#allocation2 + $0x14] sm:$0x1] }
  0x92   :  { %v3616_v14 = vadd.f32 %v809_v11, %v3502_v46  ;;  %v3619_v29 = vadd.f32 %v812_v47, %v3505_v18  ;;  %v3622_v12 = vadd.f32 %v815_v39, %v4952_v9  ;;  %4953 = vst [vmem:[#allocation6_spill] sm:$0xff] %v3626_v43  ;;  %4954 = vst [vmem:[#allocation27_spill] sm:$0xff] %v3628_v1  ;;  %v4956_v6 = vld [vmem:[#allocation32_spill] sm:$0xff]  ;;  %v4755_v46 = vunpack.c.l.bf16 %v3602_v16  ;;  %v4968_v42 = vld [vmem:[#allocation31_spill] sm:$0xff] }
  0x93   :  { %v3631_v38 = vadd.f32 %v818_v22, %v4955_v55  ;;  %v4758_v8 = vunpack.c.h.bf16 %v4956_v6  ;;  %v886_v18 = vrot.slane %v3596_v7, %v4957_v33  ;;  %v4756_v35 = vunpack.c.h.bf16 %v3602_v16  ;;  %4974 = vst [vmem:[#allocation13_spill] sm:$0xff] %v3708_v32 }
  0x94   :  { %v4757_v48 = vunpack.c.l.bf16 %v3608_v60  ;;  %v4759_v27 = vunpack.c.h.bf16 %v3608_v60  ;;  %v4760_v25 = vunpack.c.l.bf16 %v3610_v45  ;;  %v4761_v36 = vunpack.c.h.bf16 %v3610_v45 }
  0x95   :  { %v4762_v59 = vunpack.c.l.bf16 %v3624_v62  ;;  %v4763_v63 = vunpack.c.h.bf16 %v3624_v62  ;;  %v4764_v23 = vunpack.c.l.bf16 %v3626_v43  ;;  %v4765_v3 = vunpack.c.l.bf16 %v3628_v1 }
  0x96   :  { %v4767_v19 = vunpack.c.l.bf16 %v3637_v0  ;;  %v4769_v2 = vunpack.c.l.bf16 %v3639_v5  ;;  %v4963_v51 = vunpack.c.l.bf16 %v4962_v49  ;;  %v4964_v53 = vunpack.c.h.bf16 %v4962_v49 }
  0x97   :  { %v4966_v37 = vunpack.c.l.bf16 %v4965_v13  ;;  %v4967_v20 = vunpack.c.h.bf16 %v4965_v13  ;;  %v4969_v34 = vunpack.c.l.bf16 %v4968_v42  ;;  %v4970_v11 = vunpack.c.h.bf16 %v4968_v42 }
  0x98   :  { %v887_v41 = vmul.f32 %v886_v18, %v4963_v51  ;;  %v888_v50 = vmul.f32 %v886_v18, %v4964_v53  ;;  %v4971_v39 = vunpack.c.l.bf16 %v4956_v6  ;;  %v894_v9 = vmul.f32 %v886_v18, %v4758_v8  ;;  %v3696_v8 = vld [vmem:[#allocation2 + $0x3c] sm:$0x1] }
  0x99   :  { %v889_v30 = vmul.f32 %v886_v18, %v4966_v37  ;;  %v890_v57 = vmul.f32 %v886_v18, %v4967_v20  ;;  %v891_v28 = vmul.f32 %v886_v18, %v4969_v34  ;;  %v892_v47 = vmul.f32 %v886_v18, %v4970_v11  ;;  %4972 = vst [vmem:[#allocation9_spill] sm:$0xff] %v3696_v8 }
  0x9a   :  { %v893_v22 = vmul.f32 %v886_v18, %v4971_v39  ;;  %v895_v55 = vmul.f32 %v886_v18, %v4755_v46  ;;  %v896_v51 = vmul.f32 %v886_v18, %v4756_v35  ;;  %v897_v53 = vmul.f32 %v886_v18, %v4757_v48 }
  0x9b   :  { %v898_v37 = vmul.f32 %v886_v18, %v4759_v27  ;;  %v899_v20 = vmul.f32 %v886_v18, %v4760_v25  ;;  %v900_v34 = vmul.f32 %v886_v18, %v4761_v36  ;;  %v901_v11 = vmul.f32 %v886_v18, %v4762_v59  ;;  %v3698_v27 = vld [vmem:[#allocation2 + $0x44] sm:$0x1] }
  0x9c   :  { %v902_v39 = vmul.f32 %v886_v18, %v4763_v63  ;;  %v3690_v46 = vadd.f32 %v887_v41, %v835_v58  ;;  %v3692_v35 = vadd.f32 %v888_v50, %v836_v56  ;;  %v3694_v48 = vadd.f32 %v889_v30, %v837_v24  ;;  %4973 = vst [vmem:[#allocation10_spill] sm:$0xff] %v3698_v27  ;;  %v3710_v58 = vld [vmem:[#allocation2 + $0x64] sm:$0x1]  ;;  %v3712_v56 = vld [vmem:[#allocation2 + $0x6c] sm:$0x1] }
  0x9d   :  { %v3700_v25 = vadd.f32 %v890_v57, %v838_v26  ;;  %v3702_v61 = vadd.f32 %v891_v28, %v839_v31  ;;  %v3704_v36 = vadd.f32 %v892_v47, %v840_v54  ;;  %v3706_v59 = vadd.f32 %v893_v22, %v841_v44  ;;  %4975 = vst [vmem:[#allocation14_spill] sm:$0xff] %v3710_v58  ;;  %v3722_v31 = vld [vmem:[#allocation2 + $0x74] sm:$0x1]  ;;  %v3724_v54 = vld [vmem:[#allocation2 + $0x7c] sm:$0x1]  ;;  %v4985_v47 = vld [vmem:[#allocation11_spill] sm:$0xff] }
  0x9e   :  { %4976 = vst [vmem:[#allocation15_spill] sm:$0xff] %v3712_v56  ;;  %v3714_v24 = vadd.f32 %v894_v9, %v842_v4  ;;  %v3716_v18 = vadd.f32 %v895_v55, %v843_v40  ;;  %v3718_v41 = vadd.f32 %v896_v51, %v844_v52  ;;  %v3720_v26 = vadd.f32 %v897_v53, %v845_v21  ;;  %v3726_v44 = vld [vmem:[#allocation2 + $0x84] sm:$0x1]  ;;  %v3740_v52 = vld [vmem:[#allocation2 + $0x8c] sm:$0x1] }
  0x9f   :  { %4977 = vst [vmem:[#allocation16_spill] sm:$0xff] %v3722_v31  ;;  %4978 = vst [vmem:[#allocation17_spill] sm:$0xff] %v3724_v54  ;;  %v3729_v50 = vadd.f32 %v898_v37, %v3613_v17  ;;  %v3732_v30 = vadd.f32 %v899_v20, %v3616_v14  ;;  %v3735_v4 = vadd.f32 %v900_v34, %v3619_v29  ;;  %v3742_v21 = vld [vmem:[#allocation2 + $0x94] sm:$0x1]  ;;  %v3744_v57 = vld [vmem:[#allocation2 + $0x8] sm:$0xe]  ;;  %v4990_v53 = vunpack.c.l.bf16 %v4962_v49 }
  0xa0   :  { %4979 = vst [vmem:[#allocation18_spill] sm:$0xff] %v3726_v44  ;;  %v3738_v40 = vadd.f32 %v901_v11, %v3622_v12  ;;  %4981 = vst [vmem:[#allocation21_spill] sm:$0xff] %v3740_v52  ;;  %v3747_v28 = vadd.f32 %v902_v39, %v3631_v38  ;;  %v954_v29 = vrot.slane %v3596_v7, %v4985_v47  ;;  %v3753_v22 = vld [vmem:[#allocation2 + $0x10] sm:$0xe]  ;;  %v3755_v12 = vld [vmem:[#allocation2 + $0x18] sm:$0xe]  ;;  %v4991_v34 = vunpack.c.h.bf16 %v4962_v49 }
  0xa1   :  { %4982 = vst [vmem:[#allocation22_spill] sm:$0xff] %v3742_v21  ;;  %4983 = vst [vmem:[#allocation23_spill] sm:$0xff] %v3744_v57  ;;  %v3757_v9 = vld [vmem:[#allocation2 + $0x20] sm:$0xe]  ;;  %v3763_v37 = vld [vmem:[#allocation2 + $0x28] sm:$0xe]  ;;  %v4992_v55 = vunpack.c.l.bf16 %v4965_v13  ;;  %v4993_v51 = vunpack.c.h.bf16 %v4965_v13  ;;  %v4994_v49 = vunpack.c.l.bf16 %v4968_v42  ;;  %v4995_v11 = vunpack.c.l.bf16 %v3641_v10 }
  0xa2   :  { %4980 = vst [vmem:[#allocation19_spill] sm:$0xff] %v3738_v40  ;;  %4984 = vst [vmem:[#allocation26_spill] sm:$0xff] %v3747_v28  ;;  %v955_v14 = vmul.f32 %v954_v29, %v4990_v53  ;;  %v956_v20 = vmul.f32 %v954_v29, %v4764_v23  ;;  %v957_v17 = vmul.f32 %v954_v29, %v4991_v34  ;;  %v4999_v13 = vunpack.c.l.bf16 %v3696_v8 }
  0xa3   :  { %4986 = vst [vmem:[#allocation24_spill] sm:$0xff] %v3753_v22  ;;  %4987 = vst [vmem:[#allocation25_spill] sm:$0xff] %v3755_v12  ;;  %v958_v63 = vmul.f32 %v954_v29, %v4765_v3  ;;  %v959_v39 = vmul.f32 %v954_v29, %v4992_v55  ;;  %v960_v38 = vmul.f32 %v954_v29, %v4767_v19  ;;  %v4996_v3 = vunpack.c.h.bf16 %v4968_v42 }
  0xa4   :  { %4988 = vst [vmem:[#allocation32_spill] sm:$0xff] %v3757_v9  ;;  %4989 = vst [vmem:[#allocation30_spill] sm:$0xff] %v3763_v37  ;;  %v961_v53 = vmul.f32 %v954_v29, %v4993_v51  ;;  %v962_v23 = vmul.f32 %v954_v29, %v4769_v2  ;;  %v963_v34 = vmul.f32 %v954_v29, %v4994_v49  ;;  %v4997_v55 = vunpack.c.l.bf16 %v3647_v15 }
  0xa5   :  { %v964_v47 = vmul.f32 %v954_v29, %v4995_v11  ;;  %v965_v33 = vmul.f32 %v954_v29, %v4996_v3  ;;  %v4998_v19 = vunpack.c.l.bf16 %v4956_v6  ;;  %v968_v51 = vmul.f32 %v954_v29, %v4999_v13 }
  0xa6   :  { %v966_v37 = vmul.f32 %v954_v29, %v4997_v55  ;;  %v5000_v2 = vunpack.c.h.bf16 %v4956_v6  ;;  %v5001_v49 = vunpack.c.l.bf16 %v3698_v27  ;;  %v5002_v11 = vunpack.c.l.bf16 %v3602_v16 }
  0xa7   :  { %v967_v9 = vmul.f32 %v954_v29, %v4998_v19  ;;  %v5003_v3 = vunpack.c.l.bf16 %v3708_v32  ;;  %v5004_v55 = vunpack.c.h.bf16 %v3602_v16  ;;  %v5005_v19 = vunpack.c.l.bf16 %v3710_v58 }
  0xa8   :  { %v969_v5 = vmul.f32 %v954_v29, %v5000_v2  ;;  %v970_v0 = vmul.f32 %v954_v29, %v5001_v49  ;;  %v971_v10 = vmul.f32 %v954_v29, %v5002_v11  ;;  %v5006_v13 = vunpack.c.l.bf16 %v3608_v60 }
  0xa9   :  { %v972_v42 = vmul.f32 %v954_v29, %v5003_v3  ;;  %v973_v15 = vmul.f32 %v954_v29, %v5004_v55  ;;  %v974_v12 = vmul.f32 %v954_v29, %v5005_v19  ;;  %v5007_v6 = vunpack.c.l.bf16 %v3712_v56 }
  0xaa   :  { %v975_v8 = vmul.f32 %v954_v29, %v5006_v13  ;;  %v5008_v49 = vunpack.c.h.bf16 %v3608_v60  ;;  %v1019_v1 = vrot.slane %v955_v14, 1  ;;  %v1020_v11 = vrot.slane %v956_v20, 1 }
  0xab   :  { %v976_v2 = vmul.f32 %v954_v29, %v5007_v6  ;;  %v1022_v22 = vrot.slane %v957_v17, 1  ;;  %v1023_v32 = vrot.slane %v958_v63, 1  ;;  %v5009_v3 = vunpack.c.l.bf16 %v3722_v31 }
  0xac   :  { %v977_v27 = vmul.f32 %v954_v29, %v5008_v49  ;;  %v5010_v55 = vunpack.c.l.bf16 %v3610_v45  ;;  %v1025_v19 = vrot.slane %v959_v39, 1  ;;  %v1026_v43 = vrot.slane %v960_v38, 1 }
  0xad   :  { %v978_v16 = vmul.f32 %v954_v29, %v5009_v3  ;;  %v5011_v13 = vunpack.c.l.bf16 %v3724_v54  ;;  %v5012_v6 = vunpack.c.h.bf16 %v3610_v45  ;;  %v5013_v60 = vunpack.c.l.bf16 %v3726_v44 }
  0xae   :  { %v979_v58 = vmul.f32 %v954_v29, %v5010_v55  ;;  %v5014_v17 = vunpack.c.l.bf16 %v3624_v62  ;;  %v5015_v20 = vunpack.c.l.bf16 %v3740_v52  ;;  %v5016_v3 = vunpack.c.h.bf16 %v3624_v62 }
  0xaf   :  { %v980_v57 = vmul.f32 %v954_v29, %v5011_v13  ;;  %v981_v56 = vmul.f32 %v954_v29, %v5012_v6  ;;  %v982_v14 = vmul.f32 %v954_v29, %v5013_v60  ;;  %v5017_v38 = vunpack.c.l.bf16 %v3742_v21 }
  0xb0   :  { %v983_v63 = vmul.f32 %v954_v29, %v5014_v17  ;;  %v984_v49 = vmul.f32 %v954_v29, %v5015_v20  ;;  %v985_v55 = vmul.f32 %v954_v29, %v5016_v3  ;;  %v1028_v54 = vrot.slane %v961_v53, 1 }
  0xb1   :  { %v986_v39 = vmul.f32 %v954_v29, %v5017_v38  ;;  %v1021_v13 = vsel %vm589_vm8, %v1019_v1, %v1020_v11  ;;  %v1024_v45 = vsel %vm589_vm8, %v1022_v22, %v1023_v32  ;;  %v1029_v6 = vrot.slane %v962_v23, 1 }
  0xb2   :  { %v1031_v44 = vrot.slane %v963_v34, 1  ;;  %v1027_v60 = vsel %vm589_vm8, %v1025_v19, %v1026_v43  ;;  %v1032_v31 = vrot.slane %v964_v47, 1  ;;  %v1034_v17 = vrot.slane %v965_v33, 1  ;;  %v1109_v19 = vld [vmem:[#allocation2 + $0x68] sm:$0xe] }
  0xb3   :  { %v1035_v7 = vrot.slane %v966_v37, 1  ;;  %v1037_v52 = vrot.slane %v967_v9, 1  ;;  %v1038_v20 = vrot.slane %v968_v51, 1  ;;  %v1040_v28 = vrot.slane %v969_v5, 1 }
  0xb4   :  { %v1041_v62 = vrot.slane %v970_v0, 1  ;;  %v1043_v3 = vrot.slane %v971_v10, 1  ;;  %v1044_v40 = vrot.slane %v972_v42, 1  ;;  %v1046_v21 = vrot.slane %v973_v15, 1  ;;  %v1106_v42 = vld [vmem:[#allocation2 + $0x40] sm:$0xe] }
  0xb5   :  { %v1047_v29 = vrot.slane %v974_v12, 1  ;;  %v1049_v53 = vrot.slane %v975_v8, 1  ;;  %v1050_v38 = vrot.slane %v976_v2, 1  ;;  %v1052_v1 = vrot.slane %v977_v27, 1  ;;  %v1107_v2 = vld [vmem:[#allocation2 + $0x58] sm:$0xe] }
  0xb6   :  { %v1053_v11 = vrot.slane %v978_v16, 1  ;;  %v1055_v32 = vrot.slane %v979_v58, 1  ;;  %v1056_v23 = vrot.slane %v980_v57, 1  ;;  %v1058_v22 = vrot.slane %v981_v56, 1 }
  0xb7   :  { %v1059_v34 = vrot.slane %v982_v14, 1  ;;  %v1030_v43 = vsel %vm589_vm8, %v1028_v54, %v1029_v6  ;;  %v1033_v33 = vsel %vm589_vm8, %v1031_v44, %v1032_v31  ;;  %v1061_v47 = vrot.slane %v983_v63, 1  ;;  %v1110_v14 = vld [vmem:[#allocation2 + $0x70] sm:$0xe] }
  0xb8   :  { %v1062_v9 = vrot.slane %v984_v49, 1  ;;  %v1036_v0 = vsel %vm589_vm8, %v1034_v17, %v1035_v7  ;;  %v1039_v5 = vsel %vm589_vm8, %v1037_v52, %v1038_v20  ;;  %v1064_v10 = vrot.slane %v985_v55, 1  ;;  %v1112_v55 = vld [vmem:[#allocation2 + $0x80] sm:$0xe]  ;;  %v5023_v17 = vld [vmem:[#allocation20_spill] sm:$0xff] }
  0xb9   :  { %v1065_v15 = vrot.slane %v986_v39, 1  ;;  %v1042_v8 = vsel %vm589_vm8, %v1040_v28, %v1041_v62  ;;  %v1045_v27 = vsel %vm589_vm8, %v1043_v3, %v1044_v40  ;;  %v1048_v58 = vsel %vm589_vm8, %v1046_v21, %v1047_v29  ;;  %v1104_v28 = vld [vmem:[#allocation2 + $0x30] sm:$0xe]  ;;  %v1113_v39 = vld [vmem:[#allocation2 + $0x88] sm:$0xe] }
  0xba   :  { %v1051_v56 = vsel %vm589_vm8, %v1049_v53, %v1050_v38  ;;  %v1054_v54 = vsel %vm589_vm8, %v1052_v1, %v1053_v11  ;;  %v1057_v31 = vsel %vm589_vm8, %v1055_v32, %v1056_v23  ;;  %v1060_v44 = vsel %vm589_vm8, %v1058_v22, %v1059_v34  ;;  %v3906_v62 = vld [vmem:[#allocation2 + $0x20] ss:$8 sps:$4 sm:$0xff]  }
  0xbb   :  { %v3853_v7 = vadd.f32 %v1021_v13, %v3690_v46  ;;  %v1063_v52 = vsel %vm589_vm8, %v1061_v47, %v1062_v9  ;;  %v3857_v57 = vadd.f32 %v1024_v45, %v3692_v35  ;;  %v3860_v40 = vadd.f32 %v1027_v60, %v3694_v48  ;;  %v1105_v35 = vld [vmem:[#allocation2 + $0x38] sm:$0xe]  ;;  %v1114_v45 = vld [vmem:[#allocation2 + $0x90] sm:$0xe]  ;;  %v5058_v22 = vld [vmem:[#allocation16_spill] sm:$0xff] }
  0xbc   :  { %v3863_v21 = vadd.f32 %v1030_v43, %v3700_v25  ;;  %v1066_v12 = vsel %vm589_vm8, %v1064_v10, %v1065_v15  ;;  %v3867_v37 = vadd.f32 %v1033_v33, %v3702_v61  ;;  %v3870_v46 = vadd.f32 %v1036_v0, %v3704_v36  ;;  %v1108_v36 = vld [vmem:[#allocation2 + $0x60] sm:$0xe]  ;;  %v5028_v0 = vld [vmem:[#allocation6_spill] sm:$0xff]  ;;  %v5030_v15 = vld [vmem:[#allocation24_spill] sm:$0xff] }
  0xbd   :  { %v3873_v51 = vadd.f32 %v1039_v5, %v3706_v59  ;;  %v3876_v48 = vadd.f32 %v1042_v8, %v3714_v24  ;;  %v3879_v25 = vadd.f32 %v1045_v27, %v3716_v18  ;;  %v3882_v16 = vadd.f32 %v1048_v58, %v3718_v41  ;;  %v5018_v18 = vld [vmem:[#allocation19_spill] sm:$0xff]  ;;  %v1111_v41 = vld [vmem:[#allocation2 + $0x78] sm:$0xe] }
  0xbe   :  { %v3885_v61 = vadd.f32 %v1051_v56, %v3720_v26  ;;  %v3888_v59 = vadd.f32 %v1054_v54, %v3729_v50  ;;  %v3891_v63 = vadd.f32 %v1057_v31, %v3732_v30  ;;  %v3894_v24 = vadd.f32 %v1060_v44, %v3735_v4  ;;  %v5020_v26 = vld [vmem:[#allocation26_spill] sm:$0xff]  ;;  %v5022_v50 = vld [vmem:[#allocation12_spill] sm:$0xff]  ;;  %v5026_v33 = vld [vmem:[#allocation23_spill] sm:$0xff] }
  0xbf   :  { %v3897_v49 = vadd.f32 %v1063_v52, %v5018_v18  ;;  %v3900_v13 = vadd.f32 %v1066_v12, %v5020_v26  ;;  %v1120_v6 = vunpack.c.l.bf16 %v1104_v28  ;;  %v1121_v60 = vunpack.c.l.bf16 %v1105_v35  ;;  %v3904_v30 = vld [vmem:[#allocation2 + $0x10] ss:$8 sps:$4 sm:$0xff]   ;;  %5025 = vst [vmem:[#allocation26_spill] sm:$0xff] %v3906_v62  ;;  %v5032_v56 = vld [vmem:[#allocation27_spill] sm:$0xff] }
  0xc0   :  { %v1134_v20 = vrot.slane %v5023_v17, %v5022_v50  ;;  %5024 = vst [vmem:[#allocation19_spill] sm:$0xff] %v3904_v30  ;;  %v1122_v4 = vunpack.c.l.bf16 %v1106_v42  ;;  %v1123_v3 = vunpack.c.l.bf16 %v1107_v2  ;;  %v1124_v29 = vunpack.c.l.bf16 %v1108_v36  ;;  %v5034_v44 = vld [vmem:[#allocation25_spill] sm:$0xff]  ;;  %v5036_v12 = vld [vmem:[#allocation7_spill] sm:$0xff]  ;;  %v5038_v2 = vld [vmem:[#allocation32_spill] sm:$0xff] }
  0xc1   :  { %5019 = vst [vmem:[#allocation5_spill] sm:$0xff] %v3897_v49  ;;  %5021 = vst [vmem:[#allocation31_spill] sm:$0xff] %v3900_v13  ;;  %v1125_v53 = vunpack.c.l.bf16 %v1109_v19  ;;  %v1126_v38 = vunpack.c.l.bf16 %v1110_v14  ;;  %v1127_v1 = vunpack.c.l.bf16 %v1111_v41  ;;  %v1128_v11 = vunpack.c.l.bf16 %v1112_v55  ;;  %v5040_v14 = vld [vmem:[#allocation28_spill] sm:$0xff]  ;;  %v5042_v55 = vld [vmem:[#allocation30_spill] sm:$0xff] }
  0xc2   :  { %v1129_v32 = vunpack.c.l.bf16 %v1113_v39  ;;  %v1130_v23 = vunpack.c.l.bf16 %v1114_v45  ;;  %v5027_v47 = vunpack.c.l.bf16 %v5026_v33  ;;  %v5029_v5 = vunpack.c.l.bf16 %v5028_v0  ;;  %v5044_v45 = vld [vmem:[#allocation8_spill] sm:$0xff]  ;;  %v5046_v0 = vld [vmem:[#allocation29_spill] sm:$0xff]  ;;  %v5054_v58 = vld [vmem:[#allocation14_spill] sm:$0xff] }
  0xc3   :  { %v5031_v8 = vunpack.c.l.bf16 %v5030_v15  ;;  %v5033_v54 = vunpack.c.l.bf16 %v5032_v56  ;;  %v5035_v52 = vunpack.c.l.bf16 %v5034_v44  ;;  %v5037_v35 = vunpack.c.l.bf16 %v5036_v12  ;;  %v5048_v56 = vld [vmem:[#allocation9_spill] sm:$0xff]  ;;  %v5050_v12 = vld [vmem:[#allocation10_spill] sm:$0xff]  ;;  %v5056_v43 = vld [vmem:[#allocation15_spill] sm:$0xff] }
  0xc4   :  { %v1135_v9 = vmul.f32 %v1134_v20, %v5027_v47  ;;  %v1136_v10 = vmul.f32 %v1134_v20, %v5029_v5  ;;  %v5039_v36 = vunpack.c.l.bf16 %v5038_v2  ;;  %v5041_v18 = vunpack.c.l.bf16 %v5040_v14  ;;  %v5052_v14 = vld [vmem:[#allocation13_spill] sm:$0xff] }
  0xc5   :  { %v1137_v27 = vmul.f32 %v1134_v20, %v5031_v8  ;;  %v1138_v31 = vmul.f32 %v1134_v20, %v5033_v54  ;;  %v1139_v28 = vmul.f32 %v1134_v20, %v5035_v52  ;;  %v1140_v42 = vmul.f32 %v1134_v20, %v5037_v35 }
  0xc6   :  { %v1141_v19 = vmul.f32 %v1134_v20, %v5039_v36  ;;  %v1142_v41 = vmul.f32 %v1134_v20, %v5041_v18  ;;  %v5043_v39 = vunpack.c.l.bf16 %v5042_v55  ;;  %v5045_v17 = vunpack.c.l.bf16 %v5044_v45 }
  0xc7   :  { %v1145_v47 = vmul.f32 %v1134_v20, %v1120_v6  ;;  %v5047_v5 = vunpack.c.l.bf16 %v5046_v0  ;;  %v1147_v8 = vmul.f32 %v1134_v20, %v1121_v60  ;;  %v5049_v54 = vunpack.c.l.bf16 %v5048_v56 }
  0xc8   :  { %v1143_v26 = vmul.f32 %v1134_v20, %v5043_v39  ;;  %v1144_v33 = vmul.f32 %v1134_v20, %v5045_v17  ;;  %v1149_v52 = vmul.f32 %v1134_v20, %v1122_v4  ;;  %v5051_v35 = vunpack.c.l.bf16 %v5050_v12 }
  0xc9   :  { %v1146_v15 = vmul.f32 %v1134_v20, %v5047_v5  ;;  %v1148_v44 = vmul.f32 %v1134_v20, %v5049_v54  ;;  %v1151_v36 = vmul.f32 %v1134_v20, %v1123_v3  ;;  %v5053_v18 = vunpack.c.l.bf16 %v5052_v14 }
  0xca   :  { %v1150_v2 = vmul.f32 %v1134_v20, %v5051_v35  ;;  %v1153_v39 = vmul.f32 %v1134_v20, %v1124_v29  ;;  %v5055_v45 = vunpack.c.l.bf16 %v5054_v58  ;;  %v1155_v6 = vmul.f32 %v1134_v20, %v1125_v53 }
  0xcb   :  { %v1152_v55 = vmul.f32 %v1134_v20, %v5053_v18  ;;  %v5057_v0 = vunpack.c.l.bf16 %v5056_v43  ;;  %v1157_v60 = vmul.f32 %v1134_v20, %v1126_v38  ;;  %v1199_v34 = vrot.slane %v1135_v9, 2  ;;  %v5060_v18 = vld [vmem:[#allocation17_spill] sm:$0xff] }
  0xcc   :  { %v1154_v17 = vmul.f32 %v1134_v20, %v5055_v45  ;;  %v1200_v56 = vrot.slane %v1136_v10, 2  ;;  %v1202_v54 = vrot.slane %v1137_v27, 2  ;;  %v1203_v4 = vrot.slane %v1138_v31, 2  ;;  %v5062_v45 = vld [vmem:[#allocation18_spill] sm:$0xff] }
  0xcd   :  { %v1156_v5 = vmul.f32 %v1134_v20, %v5057_v0  ;;  %v5059_v12 = vunpack.c.l.bf16 %v5058_v22  ;;  %v1159_v3 = vmul.f32 %v1134_v20, %v1127_v1  ;;  %v1205_v50 = vrot.slane %v1139_v28, 2  ;;  %v5064_v0 = vld [vmem:[#allocation21_spill] sm:$0xff]  ;;  %v5066_v27 = vld [vmem:[#allocation22_spill] sm:$0xff] }
  0xce   :  { %v1206_v14 = vrot.slane %v1140_v42, 2  ;;  %v5061_v29 = vunpack.c.l.bf16 %v5060_v18  ;;  %v1161_v58 = vmul.f32 %v1134_v20, %v1128_v11  ;;  %v5063_v53 = vunpack.c.l.bf16 %v5062_v45 }
  0xcf   :  { %v1158_v35 = vmul.f32 %v1134_v20, %v5059_v12  ;;  %v1163_v43 = vmul.f32 %v1134_v20, %v1129_v32  ;;  %v5065_v38 = vunpack.c.l.bf16 %v5064_v0  ;;  %v1165_v10 = vmul.f32 %v1134_v20, %v1130_v23 }
  0xd0   :  { %v1160_v62 = vmul.f32 %v1134_v20, %v5061_v29  ;;  %v1162_v30 = vmul.f32 %v1134_v20, %v5063_v53  ;;  %v5067_v31 = vunpack.c.l.bf16 %v5066_v27  ;;  %v1208_v22 = vrot.slane %v1141_v19, 2 }
  0xd1   :  { %v1164_v9 = vmul.f32 %v1134_v20, %v5065_v38  ;;  %v1201_v1 = vsel %vm770_vm9, %v1199_v34, %v1200_v56  ;;  %v1204_v28 = vsel %vm770_vm9, %v1202_v54, %v1203_v4  ;;  %v1209_v42 = vrot.slane %v1142_v41, 2 }
  0xd2   :  { %v1166_v13 = vmul.f32 %v1134_v20, %v5067_v31  ;;  %v1211_v12 = vrot.slane %v1143_v26, 2  ;;  %v1207_v11 = vsel %vm770_vm9, %v1205_v50, %v1206_v14  ;;  %v1212_v18 = vrot.slane %v1144_v33, 2 }
  0xd3   :  { %v1214_v29 = vrot.slane %v1145_v47, 2  ;;  %v1215_v45 = vrot.slane %v1146_v15, 2  ;;  %v1217_v32 = vrot.slane %v1147_v8, 2  ;;  %v1218_v53 = vrot.slane %v1148_v44, 2 }
  0xd4   :  { %v1220_v0 = vrot.slane %v1149_v52, 2  ;;  %v1221_v38 = vrot.slane %v1150_v2, 2  ;;  %v1223_v23 = vrot.slane %v1151_v36, 2  ;;  %v1224_v49 = vrot.slane %v1152_v55, 2 }
  0xd5   :  { %v1226_v27 = vrot.slane %v1153_v39, 2  ;;  %v1227_v20 = vrot.slane %v1154_v17, 2  ;;  %v1229_v19 = vrot.slane %v1155_v6, 2  ;;  %v1230_v31 = vrot.slane %v1156_v5, 2 }
  0xd6   :  { %v1232_v34 = vrot.slane %v1157_v60, 2  ;;  %v1233_v56 = vrot.slane %v1158_v35, 2  ;;  %v1235_v54 = vrot.slane %v1159_v3, 2  ;;  %v1236_v41 = vrot.slane %v1160_v62, 2 }
  0xd7   :  { %v1238_v26 = vrot.slane %v1161_v58, 2  ;;  %v1239_v4 = vrot.slane %v1162_v30, 2  ;;  %v1210_v50 = vsel %vm770_vm9, %v1208_v22, %v1209_v42  ;;  %v1213_v33 = vsel %vm770_vm9, %v1211_v12, %v1212_v18  ;;  %v5070_v42 = vld [vmem:[#allocation31_spill] sm:$0xff]  ;;  %v4040_v18 = vld [vmem:[#allocation2 + $0x1c] sm:$0x1] }
  0xd8   :  { %v1241_v47 = vrot.slane %v1163_v43, 2  ;;  %v1242_v15 = vrot.slane %v1164_v9, 2  ;;  %v1216_v8 = vsel %vm770_vm9, %v1214_v29, %v1215_v45  ;;  %v1219_v44 = vsel %vm770_vm9, %v1217_v32, %v1218_v53  ;;  %v3991_v43 = vld [vmem:[#allocation2 + $0x30] ss:$8 sps:$4 sm:$0xff]   ;;  %v4012_v9 = vld [vmem:[#allocation2 + $0x60] ss:$8 sps:$4 sm:$0xff]  }
  0xd9   :  { %v1244_v52 = vrot.slane %v1165_v10, 2  ;;  %v1245_v2 = vrot.slane %v1166_v13, 2  ;;  %v1222_v36 = vsel %vm770_vm9, %v1220_v0, %v1221_v38  ;;  %v1225_v55 = vsel %vm770_vm9, %v1223_v23, %v1224_v49  ;;  %5072 = vst [vmem:[#allocation6_spill] sm:$0xff] %v4040_v18  ;;  %v4042_v29 = vld [vmem:[#allocation2 + $0x24] sm:$0x1]  ;;  %v5074_v0 = vld [vmem:[#allocation4_spill] sm:$0xff] }
  0xda   :  { %v1228_v62 = vsel %vm770_vm9, %v1226_v27, %v1227_v20  ;;  %v1231_v30 = vsel %vm770_vm9, %v1229_v19, %v1230_v31  ;;  %v1234_v39 = vsel %vm770_vm9, %v1232_v34, %v1233_v56  ;;  %v1237_v17 = vsel %vm770_vm9, %v1235_v54, %v1236_v41  ;;  %5073 = vst [vmem:[#allocation24_spill] sm:$0xff] %v4042_v29  ;;  %v4049_v23 = vld [vmem:[#allocation2 + $0x2c] sm:$0x1]  ;;  %v4051_v27 = vld [vmem:[#allocation2 + $0x34] sm:$0x1] }
  0xdb   :  { %v1240_v6 = vsel %vm770_vm9, %v1238_v26, %v1239_v4  ;;  %v3969_v5 = vadd.f32 %v1201_v1, %v3853_v7  ;;  %v1243_v60 = vsel %vm770_vm9, %v1241_v47, %v1242_v15  ;;  %v3973_v13 = vadd.f32 %v1204_v28, %v3857_v57  ;;  %v3993_v57 = vld [vmem:[#allocation2 + $0x40] ss:$8 sps:$4 sm:$0xff]   ;;  %v5069_v1 = vld [vmem:[#allocation5_spill] sm:$0xff]  ;;  %5075 = vst [vmem:[#allocation27_spill] sm:$0xff] %v4049_v23  ;;  %v4053_v20 = vld [vmem:[#allocation2 + $0x3c] sm:$0x1] }
  0xdc   :  { %v3976_v49 = vadd.f32 %v1207_v11, %v3860_v40  ;;  %v3979_v35 = vadd.f32 %v1210_v50, %v3863_v21  ;;  %v1246_v3 = vsel %vm770_vm9, %v1244_v52, %v1245_v2  ;;  %v3983_v14 = vadd.f32 %v1213_v33, %v3867_v37  ;;  %v3998_v40 = vld [vmem:[%s4695_s1 + $0x8] sm:$0x7]  ;;  %v4026_v28 = vld [vmem:[#allocation2 + $0x70] ss:$8 sps:$4 sm:$0xff]   ;;  %5076 = vst [vmem:[#allocation25_spill] sm:$0xff] %v4051_v27 }
  0xdd   :  { %v3986_v58 = vadd.f32 %v1216_v8, %v3870_v46  ;;  %v3989_v7 = vadd.f32 %v1219_v44, %v3873_v51  ;;  %5068 = vst [vmem:[#allocation20_spill] sm:$0xff] %v3998_v40  ;;  %v4001_v21 = vadd.f32 %v1222_v36, %v3876_v48  ;;  %v4004_v37 = vadd.f32 %v1225_v55, %v3879_v25  ;;  %v4059_v54 = vld [vmem:[#allocation2 + $0x44] sm:$0x1] }
  0xde   :  { %v4007_v46 = vadd.f32 %v1228_v62, %v3882_v16  ;;  %v4010_v51 = vadd.f32 %v1231_v30, %v3885_v61  ;;  %v4015_v10 = vadd.f32 %v1234_v39, %v3888_v59  ;;  %v4018_v22 = vadd.f32 %v1237_v17, %v3891_v63  ;;  %v4028_v16 = vld [vmem:[#allocation2 + $0x80] ss:$8 sps:$4 sm:$0xff]   ;;  %v4030_v61 = vld [vmem:[#allocation2 + $0x90] ss:$8 sps:$4 sm:$0xff]   ;;  %5077 = vst [vmem:[#allocation7_spill] sm:$0xff] %v4053_v20 }
  0xdf   :  { %v4021_v48 = vadd.f32 %v1240_v6, %v3894_v24  ;;  %v4024_v25 = vadd.f32 %v1243_v60, %v5069_v1  ;;  %v4033_v12 = vadd.f32 %v1246_v3, %v5070_v42  ;;  %v4805_v59 = vunpack.c.l.bf16 %v3991_v43  ;;  %v4038_v24 = vld [vmem:[#allocation2 + $0x14] sm:$0x1]  ;;  %5078 = vst [vmem:[#allocation32_spill] sm:$0xff] %v4059_v54  ;;  %v5079_v44 = vld [vmem:[#allocation19_spill] sm:$0xff]  ;;  %v5082_v62 = vld [vmem:[#allocation26_spill] sm:$0xff] }
  0xe0   :  { %v4800_v63 = vunpack.c.h.bf16 %v3991_v43  ;;  %v4794_v11 = vunpack.c.l.bf16 %v3993_v57  ;;  %5071 = vst [vmem:[#allocation23_spill] sm:$0xff] %v4038_v24  ;;  %v4795_v45 = vunpack.c.h.bf16 %v3993_v57  ;;  %v4796_v32 = vunpack.c.l.bf16 %v4012_v9 }
  0xe1   :  { %v4797_v53 = vunpack.c.h.bf16 %v4012_v9  ;;  %v1315_v38 = vrot.slane %v3998_v40, %v5074_v0  ;;  %v4798_v19 = vunpack.c.l.bf16 %v4026_v28  ;;  %v4799_v31 = vunpack.c.h.bf16 %v4026_v28 }
  0xe2   :  { %v4801_v34 = vunpack.c.l.bf16 %v4028_v16  ;;  %v4802_v56 = vunpack.c.h.bf16 %v4028_v16  ;;  %v4803_v41 = vunpack.c.l.bf16 %v4030_v61  ;;  %v4804_v26 = vunpack.c.h.bf16 %v4030_v61 }
  0xe3   :  { %v4806_v4 = vunpack.c.l.bf16 %v4038_v24  ;;  %v4807_v50 = vunpack.c.l.bf16 %v4040_v18  ;;  %v4810_v33 = vunpack.c.l.bf16 %v4042_v29  ;;  %v4812_v47 = vunpack.c.l.bf16 %v4049_v23 }
  0xe4   :  { %v5080_v52 = vunpack.c.l.bf16 %v5079_v44  ;;  %v5081_v36 = vunpack.c.h.bf16 %v5079_v44  ;;  %v5083_v30 = vunpack.c.l.bf16 %v5082_v62  ;;  %v5084_v6 = vunpack.c.h.bf16 %v5082_v62 }
  0xe5   :  { %v1320_v3 = vmul.f32 %v1315_v38, %v4805_v59  ;;  %v1321_v1 = vmul.f32 %v1315_v38, %v4800_v63  ;;  %v1322_v42 = vmul.f32 %v1315_v38, %v4794_v11  ;;  %v1327_v17 = vmul.f32 %v1315_v38, %v4799_v31  ;;  %v4111_v63 = vld [vmem:[#allocation2 + $0x4c] sm:$0x1] }
  0xe6   :  { %v1316_v2 = vmul.f32 %v1315_v38, %v5080_v52  ;;  %v1317_v55 = vmul.f32 %v1315_v38, %v5081_v36  ;;  %v1318_v39 = vmul.f32 %v1315_v38, %v5083_v30  ;;  %v1319_v60 = vmul.f32 %v1315_v38, %v5084_v6  ;;  %5085 = vst [vmem:[#allocation28_spill] sm:$0xff] %v4111_v63 }
  0xe7   :  { %v1323_v52 = vmul.f32 %v1315_v38, %v4795_v45  ;;  %v1324_v36 = vmul.f32 %v1315_v38, %v4796_v32  ;;  %v1325_v30 = vmul.f32 %v1315_v38, %v4797_v53  ;;  %v1326_v6 = vmul.f32 %v1315_v38, %v4798_v19 }
  0xe8   :  { %v1328_v8 = vmul.f32 %v1315_v38, %v4801_v34  ;;  %v1329_v11 = vmul.f32 %v1315_v38, %v4802_v56  ;;  %v1330_v45 = vmul.f32 %v1315_v38, %v4803_v41  ;;  %v1331_v32 = vmul.f32 %v1315_v38, %v4804_v26  ;;  %v4113_v34 = vld [vmem:[#allocation2 + $0x64] sm:$0x1] }
  0xe9   :  { %v4103_v53 = vadd.f32 %v1316_v2, %v3969_v5  ;;  %v4106_v19 = vadd.f32 %v1317_v55, %v3973_v13  ;;  %v4109_v31 = vadd.f32 %v1318_v39, %v3976_v49  ;;  %5086 = vst [vmem:[#allocation30_spill] sm:$0xff] %v4113_v34  ;;  %v4116_v56 = vadd.f32 %v1319_v60, %v3979_v35  ;;  %v4127_v13 = vld [vmem:[#allocation2 + $0x6c] sm:$0x1]  ;;  %v4129_v49 = vld [vmem:[#allocation2 + $0x74] sm:$0x1] }
  0xea   :  { %v4119_v41 = vadd.f32 %v1320_v3, %v3983_v14  ;;  %v4122_v38 = vadd.f32 %v1321_v1, %v3986_v58  ;;  %v4125_v5 = vadd.f32 %v1322_v42, %v3989_v7  ;;  %5087 = vst [vmem:[#allocation8_spill] sm:$0xff] %v4127_v13  ;;  %5088 = vst [vmem:[#allocation29_spill] sm:$0xff] %v4129_v49  ;;  %v4131_v2 = vld [vmem:[#allocation2 + $0x7c] sm:$0x1]  ;;  %v4145_v7 = vld [vmem:[#allocation2 + $0x84] sm:$0x1]  ;;  %v5108_v26 = vunpack.c.l.bf16 %v4051_v27 }
  0xeb   :  { %5089 = vst [vmem:[#allocation9_spill] sm:$0xff] %v4131_v2  ;;  %v4134_v55 = vadd.f32 %v1323_v52, %v4001_v21  ;;  %v4137_v35 = vadd.f32 %v1324_v36, %v4004_v37  ;;  %v4140_v14 = vadd.f32 %v1325_v30, %v4007_v46  ;;  %v4143_v58 = vadd.f32 %v1326_v6, %v4010_v51  ;;  %v4147_v39 = vld [vmem:[#allocation2 + $0x8c] sm:$0x1]  ;;  %v4149_v60 = vld [vmem:[#allocation2 + $0x94] sm:$0x1] }
  0xec   :  { %5090 = vst [vmem:[#allocation10_spill] sm:$0xff] %v4145_v7  ;;  %5091 = vst [vmem:[#allocation13_spill] sm:$0xff] %v4147_v39  ;;  %v4152_v3 = vadd.f32 %v1327_v17, %v4015_v10  ;;  %v4155_v21 = vadd.f32 %v1328_v8, %v4018_v22  ;;  %v4158_v37 = vadd.f32 %v1329_v11, %v4021_v48  ;;  %v4163_v51 = vld [vmem:[#allocation2 + $0x9c] sm:$0x1]  ;;  %v4165_v1 = vld [vmem:[#allocation2 + $0x10] sm:$0xe]  ;;  %v5105_v17 = vunpack.c.l.bf16 %v5082_v62 }
  0xed   :  { %5092 = vst [vmem:[#allocation14_spill] sm:$0xff] %v4149_v60  ;;  %v4161_v46 = vadd.f32 %v1330_v45, %v4024_v25  ;;  %5094 = vst [vmem:[#allocation16_spill] sm:$0xff] %v4163_v51  ;;  %v4167_v42 = vld [vmem:[#allocation2 + $0x18] sm:$0xe]  ;;  %v4170_v52 = vadd.f32 %v1331_v32, %v4033_v12  ;;  %v5098_v8 = vld [vmem:[#allocation11_spill] sm:$0xff]  ;;  %v5103_v32 = vunpack.c.l.bf16 %v5079_v44  ;;  %v5106_v36 = vunpack.c.h.bf16 %v5082_v62 }
  0xee   :  { %5095 = vst [vmem:[#allocation17_spill] sm:$0xff] %v4165_v1  ;;  %5096 = vst [vmem:[#allocation18_spill] sm:$0xff] %v4167_v42  ;;  %v1383_v48 = vrot.slane %v3998_v40, %v5098_v8  ;;  %v4176_v11 = vld [vmem:[#allocation2 + $0x20] sm:$0xe]  ;;  %v4178_v25 = vld [vmem:[#allocation2 + $0x28] sm:$0xe]  ;;  %v5104_v8 = vunpack.c.h.bf16 %v5079_v44  ;;  %v5107_v44 = vunpack.c.l.bf16 %v3991_v43  ;;  %v5112_v62 = vunpack.c.l.bf16 %v4059_v54 }
  0xef   :  { %5093 = vst [vmem:[#allocation15_spill] sm:$0xff] %v4161_v46  ;;  %5097 = vst [vmem:[#allocation21_spill] sm:$0xff] %v4170_v52  ;;  %v4180_v45 = vld [vmem:[#allocation2 + $0x30] sm:$0xe]  ;;  %v4186_v30 = vld [vmem:[#allocation2 + $0x38] sm:$0xe] }
  0xf0   :  { %5099 = vst [vmem:[#allocation22_spill] sm:$0xff] %v4176_v11  ;;  %5100 = vst [vmem:[#allocation5_spill] sm:$0xff] %v4178_v25  ;;  %v1384_v15 = vmul.f32 %v1383_v48, %v5103_v32  ;;  %v1385_v6 = vmul.f32 %v1383_v48, %v4806_v4  ;;  %v1386_v59 = vmul.f32 %v1383_v48, %v5104_v8  ;;  %vm1935_vm10 = vcmask 1041409  }
  0xf1   :  { %5101 = vst [vmem:[#allocation31_spill] sm:$0xff] %v4180_v45  ;;  %5102 = vst [vmem:[#allocation19_spill] sm:$0xff] %v4186_v30  ;;  %v1387_v10 = vmul.f32 %v1383_v48, %v4807_v50  ;;  %v1388_v22 = vmul.f32 %v1383_v48, %v5105_v17  ;;  %v1389_v12 = vmul.f32 %v1383_v48, %v4810_v33  ;;  %v5109_v50 = vunpack.c.h.bf16 %v3991_v43 }
  0xf2   :  { %v1390_v32 = vmul.f32 %v1383_v48, %v5106_v36  ;;  %v1391_v4 = vmul.f32 %v1383_v48, %v4812_v47  ;;  %v1392_v8 = vmul.f32 %v1383_v48, %v5107_v44  ;;  %v1393_v0 = vmul.f32 %v1383_v48, %v5108_v26 }
  0xf3   :  { %v1394_v30 = vmul.f32 %v1383_v48, %v5109_v50  ;;  %v5110_v17 = vunpack.c.l.bf16 %v4053_v20  ;;  %v5111_v33 = vunpack.c.l.bf16 %v3993_v57  ;;  %v1397_v36 = vmul.f32 %v1383_v48, %v5112_v62 }
  0xf4   :  { %v5113_v47 = vunpack.c.h.bf16 %v3993_v57  ;;  %v5114_v44 = vunpack.c.l.bf16 %v4111_v63  ;;  %v5115_v26 = vunpack.c.l.bf16 %v4012_v9  ;;  %v5116_v43 = vunpack.c.l.bf16 %v4113_v34 }
  0xf5   :  { %v1395_v45 = vmul.f32 %v1383_v48, %v5110_v17  ;;  %v1396_v25 = vmul.f32 %v1383_v48, %v5111_v33  ;;  %v5117_v17 = vunpack.c.h.bf16 %v4012_v9  ;;  %v5118_v33 = vunpack.c.l.bf16 %v4127_v13 }
  0xf6   :  { %v1398_v23 = vmul.f32 %v1383_v48, %v5113_v47  ;;  %v1399_v29 = vmul.f32 %v1383_v48, %v5114_v44  ;;  %v1400_v27 = vmul.f32 %v1383_v48, %v5115_v26  ;;  %v1401_v50 = vmul.f32 %v1383_v48, %v5116_v43 }
  0xf7   :  { %v1402_v20 = vmul.f32 %v1383_v48, %v5117_v17  ;;  %v1403_v11 = vmul.f32 %v1383_v48, %v5118_v33  ;;  %v5119_v62 = vunpack.c.l.bf16 %v4026_v28  ;;  %v5120_v57 = vunpack.c.l.bf16 %v4129_v49 }
  0xf8   :  { %v5121_v44 = vunpack.c.h.bf16 %v4026_v28  ;;  %v1448_v18 = vrot.slane %v1384_v15, 1  ;;  %v1449_v26 = vrot.slane %v1385_v6, 1  ;;  %v1451_v42 = vrot.slane %v1386_v59, 1 }
  0xf9   :  { %v1404_v54 = vmul.f32 %v1383_v48, %v5119_v62  ;;  %v1405_v47 = vmul.f32 %v1383_v48, %v5120_v57  ;;  %v1452_v34 = vrot.slane %v1387_v10, 1  ;;  %v5122_v43 = vunpack.c.l.bf16 %v4131_v2 }
  0xfa   :  { %v1406_v63 = vmul.f32 %v1383_v48, %v5121_v44  ;;  %v5123_v17 = vunpack.c.l.bf16 %v4028_v16  ;;  %v1454_v33 = vrot.slane %v1388_v22, 1  ;;  %v1455_v24 = vrot.slane %v1389_v12, 1 }
  0xfb   :  { %v1407_v9 = vmul.f32 %v1383_v48, %v5122_v43  ;;  %v5124_v62 = vunpack.c.l.bf16 %v4145_v7  ;;  %v5125_v57 = vunpack.c.h.bf16 %v4028_v16  ;;  %v5126_v28 = vunpack.c.l.bf16 %v4147_v39 }
  0xfc   :  { %v1408_v13 = vmul.f32 %v1383_v48, %v5123_v17  ;;  %v5127_v59 = vunpack.c.l.bf16 %v4030_v61  ;;  %v5128_v6 = vunpack.c.l.bf16 %v4149_v60  ;;  %v5129_v43 = vunpack.c.h.bf16 %v4030_v61 }
  0xfd   :  { %v1409_v1 = vmul.f32 %v1383_v48, %v5124_v62  ;;  %v1410_v49 = vmul.f32 %v1383_v48, %v5125_v57  ;;  %v1411_v15 = vmul.f32 %v1383_v48, %v5126_v28  ;;  %v5130_v22 = vunpack.c.l.bf16 %v4163_v51 }
  0xfe   :  { %v1412_v10 = vmul.f32 %v1383_v48, %v5127_v59  ;;  %v1413_v44 = vmul.f32 %v1383_v48, %v5128_v6  ;;  %v1414_v17 = vmul.f32 %v1383_v48, %v5129_v43  ;;  %v1457_v7 = vrot.slane %v1390_v32, 1 }
  0xff   :  { %v1415_v12 = vmul.f32 %v1383_v48, %v5130_v22  ;;  %v1450_v62 = vsel %vm589_vm8, %v1448_v18, %v1449_v26  ;;  %v1453_v16 = vsel %vm589_vm8, %v1451_v42, %v1452_v34  ;;  %v1458_v57 = vrot.slane %v1391_v4, 1 }
 0x100   :  { %v1460_v39 = vrot.slane %v1392_v8, 1  ;;  %v1456_v28 = vsel %vm589_vm8, %v1454_v33, %v1455_v24  ;;  %v1461_v2 = vrot.slane %v1393_v0, 1  ;;  %v1463_v59 = vrot.slane %v1394_v30, 1  ;;  %v1539_v33 = vld [vmem:[#allocation2 + $0x78] sm:$0xe] }
 0x101   :  { %v1464_v52 = vrot.slane %v1395_v45, 1  ;;  %v1466_v60 = vrot.slane %v1396_v25, 1  ;;  %v1467_v6 = vrot.slane %v1397_v36, 1  ;;  %v1469_v46 = vrot.slane %v1398_v23, 1 }
 0x102   :  { %v1470_v61 = vrot.slane %v1399_v29, 1  ;;  %v1472_v43 = vrot.slane %v1400_v27, 1  ;;  %v1473_v40 = vrot.slane %v1401_v50, 1  ;;  %v1475_v51 = vrot.slane %v1402_v20, 1  ;;  %v1535_v50 = vld [vmem:[#allocation2 + $0x48] sm:$0xe] }
 0x103   :  { %v1476_v48 = vrot.slane %v1403_v11, 1  ;;  %v1478_v32 = vrot.slane %v1404_v54, 1  ;;  %v1479_v22 = vrot.slane %v1405_v47, 1  ;;  %v1481_v18 = vrot.slane %v1406_v63, 1  ;;  %v1537_v47 = vld [vmem:[#allocation2 + $0x68] sm:$0xe] }
 0x104   :  { %v1482_v26 = vrot.slane %v1407_v9, 1  ;;  %v1484_v34 = vrot.slane %v1408_v13, 1  ;;  %v1485_v4 = vrot.slane %v1409_v1, 1  ;;  %v1487_v42 = vrot.slane %v1410_v49, 1 }
 0x105   :  { %v1488_v8 = vrot.slane %v1411_v15, 1  ;;  %v1459_v24 = vsel %vm589_vm8, %v1457_v7, %v1458_v57  ;;  %v1462_v0 = vsel %vm589_vm8, %v1460_v39, %v1461_v2  ;;  %v1490_v25 = vrot.slane %v1412_v10, 1  ;;  %v1540_v15 = vld [vmem:[#allocation2 + $0x80] sm:$0xe]  ;;  %v5136_v57 = vld [vmem:[#allocation21_spill] sm:$0xff] }
 0x106   :  { %v1491_v45 = vrot.slane %v1413_v44, 1  ;;  %v1465_v29 = vsel %vm589_vm8, %v1463_v59, %v1464_v52  ;;  %v1468_v23 = vsel %vm589_vm8, %v1466_v60, %v1467_v6  ;;  %v1493_v27 = vrot.slane %v1414_v17, 1  ;;  %v1542_v44 = vld [vmem:[#allocation2 + $0x90] sm:$0xe]  ;;  %v1543_v17 = vld [vmem:[#allocation2 + $0x98] sm:$0xe] }
 0x107   :  { %v1494_v20 = vrot.slane %v1415_v12, 1  ;;  %v1471_v54 = vsel %vm589_vm8, %v1469_v46, %v1470_v61  ;;  %v1474_v63 = vsel %vm589_vm8, %v1472_v43, %v1473_v40  ;;  %v1477_v13 = vsel %vm589_vm8, %v1475_v51, %v1476_v48  ;;  %v1536_v51 = vld [vmem:[#allocation2 + $0x60] sm:$0xe]  ;;  %v5133_v12 = vld [vmem:[#allocation20_spill] sm:$0xff] }
 0x108   :  { %v1480_v49 = vsel %vm589_vm8, %v1478_v32, %v1479_v22  ;;  %v1483_v7 = vsel %vm589_vm8, %v1481_v18, %v1482_v26  ;;  %v1486_v2 = vsel %vm589_vm8, %v1484_v34, %v1485_v4  ;;  %v1489_v39 = vsel %vm589_vm8, %v1487_v42, %v1488_v8  ;;  %v5138_v18 = vld [vmem:[#allocation17_spill] sm:$0xff]  ;;  %v5140_v4 = vld [vmem:[#allocation23_spill] sm:$0xff] }
 0x109   :  { %v4276_v1 = vadd.f32 %v1450_v62, %v4103_v53  ;;  %v1492_v60 = vsel %vm589_vm8, %v1490_v25, %v1491_v45  ;;  %v4280_v52 = vadd.f32 %v1453_v16, %v4106_v19  ;;  %v4283_v40 = vadd.f32 %v1456_v28, %v4109_v31  ;;  %v1534_v19 = vld [vmem:[#allocation2 + $0x40] sm:$0xe]  ;;  %v5144_v45 = vld [vmem:[#allocation6_spill] sm:$0xff] }
 0x10a   :  { %v4286_v46 = vadd.f32 %v1459_v24, %v4116_v56  ;;  %v1495_v11 = vsel %vm589_vm8, %v1493_v27, %v1494_v20  ;;  %v4290_v30 = vadd.f32 %v1462_v0, %v4119_v41  ;;  %v4293_v53 = vadd.f32 %v1465_v29, %v4122_v38  ;;  %v1538_v38 = vld [vmem:[#allocation2 + $0x70] sm:$0xe]  ;;  %v5142_v24 = vld [vmem:[#allocation18_spill] sm:$0xff] }
 0x10b   :  { %v4296_v36 = vadd.f32 %v1468_v23, %v4125_v5  ;;  %v4299_v31 = vadd.f32 %v1471_v54, %v4134_v55  ;;  %v4302_v56 = vadd.f32 %v1474_v63, %v4137_v35  ;;  %v4305_v9 = vadd.f32 %v1477_v13, %v4140_v14  ;;  %v1541_v35 = vld [vmem:[#allocation2 + $0x88] sm:$0xe]  ;;  %v5146_v27 = vld [vmem:[#allocation22_spill] sm:$0xff] }
 0x10c   :  { %v4308_v41 = vadd.f32 %v1480_v49, %v4143_v58  ;;  %v4311_v5 = vadd.f32 %v1483_v7, %v4152_v3  ;;  %v4314_v10 = vadd.f32 %v1486_v2, %v4155_v21  ;;  %v4317_v55 = vadd.f32 %v1489_v39, %v4158_v37  ;;  %v5132_v14 = vld [vmem:[#allocation12_spill] sm:$0xff]  ;;  %v5134_v58 = vld [vmem:[#allocation15_spill] sm:$0xff]  ;;  %v5150_v7 = vld [vmem:[#allocation5_spill] sm:$0xff] }
 0x10d   :  { %v1563_v62 = vrot.slane %v5133_v12, %v5132_v14  ;;  %v4322_v16 = vadd.f32 %v1492_v60, %v5134_v58  ;;  %v4325_v28 = vadd.f32 %v1495_v11, %v5136_v57  ;;  %v1550_v3 = vunpack.c.l.bf16 %v1534_v19  ;;  %v5148_v63 = vld [vmem:[#allocation24_spill] sm:$0xff]  ;;  %v5152_v60 = vld [vmem:[#allocation27_spill] sm:$0xff] }
 0x10e   :  { %5131 = vst [vmem:[#allocation26_spill] sm:$0xff] %v4317_v55  ;;  %v1551_v59 = vunpack.c.l.bf16 %v1535_v50  ;;  %v1552_v6 = vunpack.c.l.bf16 %v1536_v51  ;;  %v1553_v21 = vunpack.c.l.bf16 %v1537_v47  ;;  %v1554_v61 = vunpack.c.l.bf16 %v1538_v38  ;;  %v5154_v19 = vld [vmem:[#allocation31_spill] sm:$0xff]  ;;  %v5156_v38 = vld [vmem:[#allocation25_spill] sm:$0xff] }
 0x10f   :  { %5135 = vst [vmem:[#allocation11_spill] sm:$0xff] %v4322_v16  ;;  %5137 = vst [vmem:[#allocation12_spill] sm:$0xff] %v4325_v28  ;;  %v1555_v43 = vunpack.c.l.bf16 %v1539_v33  ;;  %v1556_v37 = vunpack.c.l.bf16 %v1540_v15  ;;  %v1557_v48 = vunpack.c.l.bf16 %v1541_v35  ;;  %v1558_v32 = vunpack.c.l.bf16 %v1542_v44  ;;  %v5158_v35 = vld [vmem:[#allocation19_spill] sm:$0xff] }
 0x110   :  { %v1559_v22 = vunpack.c.l.bf16 %v1543_v17  ;;  %v5139_v26 = vunpack.c.l.bf16 %v5138_v18  ;;  %v5141_v42 = vunpack.c.l.bf16 %v5140_v4  ;;  %v5143_v0 = vunpack.c.l.bf16 %v5142_v24  ;;  %v5160_v14 = vld [vmem:[#allocation7_spill] sm:$0xff]  ;;  %v5162_v18 = vld [vmem:[#allocation32_spill] sm:$0xff] }
 0x111   :  { %v5145_v29 = vunpack.c.l.bf16 %v5144_v45  ;;  %v5147_v20 = vunpack.c.l.bf16 %v5146_v27  ;;  %v5149_v13 = vunpack.c.l.bf16 %v5148_v63  ;;  %v5151_v2 = vunpack.c.l.bf16 %v5150_v7  ;;  %v5164_v24 = vld [vmem:[#allocation28_spill] sm:$0xff]  ;;  %v5166_v27 = vld [vmem:[#allocation30_spill] sm:$0xff] }
 0x112   :  { %v1564_v34 = vmul.f32 %v1563_v62, %v5139_v26  ;;  %v1565_v8 = vmul.f32 %v1563_v62, %v5141_v42  ;;  %v1566_v25 = vmul.f32 %v1563_v62, %v5143_v0  ;;  %v5153_v51 = vunpack.c.l.bf16 %v5152_v60  ;;  %v5168_v7 = vld [vmem:[#allocation8_spill] sm:$0xff] }
 0x113   :  { %v1567_v23 = vmul.f32 %v1563_v62, %v5145_v29  ;;  %v1568_v54 = vmul.f32 %v1563_v62, %v5147_v20  ;;  %v1569_v49 = vmul.f32 %v1563_v62, %v5149_v13  ;;  %v1570_v39 = vmul.f32 %v1563_v62, %v5151_v2 }
 0x114   :  { %v1571_v11 = vmul.f32 %v1563_v62, %v5153_v51  ;;  %v5155_v50 = vunpack.c.l.bf16 %v5154_v19  ;;  %v5157_v33 = vunpack.c.l.bf16 %v5156_v38  ;;  %v5159_v44 = vunpack.c.l.bf16 %v5158_v35  ;;  %v5170_v19 = vld [vmem:[#allocation29_spill] sm:$0xff] }
 0x115   :  { %v5161_v12 = vunpack.c.l.bf16 %v5160_v14  ;;  %v1576_v57 = vmul.f32 %v1563_v62, %v1550_v3  ;;  %v5163_v26 = vunpack.c.l.bf16 %v5162_v18  ;;  %v1578_v42 = vmul.f32 %v1563_v62, %v1551_v59  ;;  %v5174_v14 = vld [vmem:[#allocation10_spill] sm:$0xff] }
 0x116   :  { %v1572_v47 = vmul.f32 %v1563_v62, %v5155_v50  ;;  %v1573_v15 = vmul.f32 %v1563_v62, %v5157_v33  ;;  %v1574_v17 = vmul.f32 %v1563_v62, %v5159_v44  ;;  %v5165_v0 = vunpack.c.l.bf16 %v5164_v24  ;;  %v5172_v33 = vld [vmem:[#allocation9_spill] sm:$0xff] }
 0x117   :  { %v1575_v58 = vmul.f32 %v1563_v62, %v5161_v12  ;;  %v1577_v4 = vmul.f32 %v1563_v62, %v5163_v26  ;;  %v1580_v29 = vmul.f32 %v1563_v62, %v1552_v6  ;;  %v5167_v20 = vunpack.c.l.bf16 %v5166_v27 }
 0x118   :  { %v1579_v45 = vmul.f32 %v1563_v62, %v5165_v0  ;;  %v1582_v13 = vmul.f32 %v1563_v62, %v1553_v21  ;;  %v5169_v2 = vunpack.c.l.bf16 %v5168_v7  ;;  %v1584_v51 = vmul.f32 %v1563_v62, %v1554_v61  ;;  %v5176_v21 = vld [vmem:[#allocation13_spill] sm:$0xff]  ;;  %v5178_v0 = vld [vmem:[#allocation14_spill] sm:$0xff] }
 0x119   :  { %v1581_v63 = vmul.f32 %v1563_v62, %v5167_v20  ;;  %v5171_v50 = vunpack.c.l.bf16 %v5170_v19  ;;  %v1586_v3 = vmul.f32 %v1563_v62, %v1555_v43  ;;  %v5173_v35 = vunpack.c.l.bf16 %v5172_v33 }
 0x11a   :  { %v1583_v60 = vmul.f32 %v1563_v62, %v5169_v2  ;;  %v4363_v59 = vmul.f32 %v1563_v62, %v1556_v37  ;;  %v5175_v12 = vunpack.c.l.bf16 %v5174_v14  ;;  %v4369_v18 = vmul.f32 %v1563_v62, %v1557_v48  ;;  %v5180_v37 = vld [vmem:[#allocation16_spill] sm:$0xff] }
 0x11b   :  { %v1585_v38 = vmul.f32 %v1563_v62, %v5171_v50  ;;  %v1587_v44 = vmul.f32 %v1563_v62, %v5173_v35  ;;  %v5177_v26 = vunpack.c.l.bf16 %v5176_v21  ;;  %v4375_v61 = vmul.f32 %v1563_v62, %v1558_v32 }
 0x11c   :  { %v4367_v6 = vmul.f32 %v1563_v62, %v5175_v12  ;;  %v5179_v27 = vunpack.c.l.bf16 %v5178_v0  ;;  %v4381_v20 = vmul.f32 %v1563_v62, %v1559_v22  ;;  %v5181_v7 = vunpack.c.l.bf16 %v5180_v37 }
 0x11d   :  { %v4373_v24 = vmul.f32 %v1563_v62, %v5177_v26  ;;  %v1628_v19 = vrot.slane %v1564_v34, 2  ;;  %v1629_v50 = vrot.slane %v1565_v8, 2  ;;  %v1631_v48 = vrot.slane %v1566_v25, 2 }
 0x11e   :  { %v4379_v43 = vmul.f32 %v1563_v62, %v5179_v27  ;;  %v4385_v2 = vmul.f32 %v1563_v62, %v5181_v7  ;;  %v1632_v33 = vrot.slane %v1567_v23, 2  ;;  %v1634_v35 = vrot.slane %v1568_v54, 2 }
 0x11f   :  { %v1635_v14 = vrot.slane %v1569_v49, 2  ;;  %v1637_v12 = vrot.slane %v1570_v39, 2  ;;  %v1638_v21 = vrot.slane %v1571_v11, 2  ;;  %v1640_v32 = vrot.slane %v1572_v47, 2 }
 0x120   :  { %v1641_v26 = vrot.slane %v1573_v15, 2  ;;  %v1643_v28 = vrot.slane %v1574_v17, 2  ;;  %v1644_v0 = vrot.slane %v1575_v58, 2  ;;  %v1646_v27 = vrot.slane %v1576_v57, 2 }
 0x121   :  { %v1647_v16 = vrot.slane %v1577_v4, 2  ;;  %v1649_v22 = vrot.slane %v1578_v42, 2  ;;  %v1650_v55 = vrot.slane %v1579_v45, 2  ;;  %v1630_v37 = vsel %vm770_vm9, %v1628_v19, %v1629_v50 }
 0x122   :  { %v1633_v62 = vsel %vm770_vm9, %v1631_v48, %v1632_v33  ;;  %v1652_v34 = vrot.slane %v1580_v29, 2  ;;  %v1653_v8 = vrot.slane %v1581_v63, 2  ;;  %v1636_v25 = vsel %vm770_vm9, %v1634_v35, %v1635_v14 }
 0x123   :  { %v1639_v23 = vsel %vm770_vm9, %v1637_v12, %v1638_v21  ;;  %v1655_v54 = vrot.slane %v1582_v13, 2  ;;  %v1656_v49 = vrot.slane %v1583_v60, 2  ;;  %v1642_v39 = vsel %vm770_vm9, %v1640_v32, %v1641_v26 }
 0x124   :  { %v1645_v11 = vsel %vm770_vm9, %v1643_v28, %v1644_v0  ;;  %v1658_v47 = vrot.slane %v1584_v51, 2  ;;  %v1659_v15 = vrot.slane %v1585_v38, 2  ;;  %v1648_v17 = vsel %vm770_vm9, %v1646_v27, %v1647_v16  ;;  %v5182_v27 = vld [vmem:[#allocation26_spill] sm:$0xff] }
 0x125   :  { %v1651_v58 = vsel %vm770_vm9, %v1649_v22, %v1650_v55  ;;  %v1661_v57 = vrot.slane %v1586_v3, 2  ;;  %v1662_v4 = vrot.slane %v1587_v44, 2  ;;  %v1654_v42 = vsel %vm770_vm9, %v1652_v34, %v1653_v8  ;;  %v2427_v55 = vld [vmem:[%s4696_s2] ss:$0 sm:$0xff] }
 0x126   :  { %v1692_v45 = vadd.f32 %v1630_v37, %v4276_v1  ;;  %v1693_v29 = vadd.f32 %v1633_v62, %v4280_v52  ;;  %v1694_v63 = vadd.f32 %v1636_v25, %v4283_v40  ;;  %v1657_v13 = vsel %vm770_vm9, %v1655_v54, %v1656_v49  ;;  %v5183_v34 = vld [vmem:[#allocation11_spill] sm:$0xff] }
 0x127   :  { %v1664_v28 = vrot.slane %v4363_v59, 2  ;;  %v1665_v60 = vrot.slane %v4367_v6, 2  ;;  %v1695_v16 = vadd.f32 %v1639_v23, %v4286_v46  ;;  %v1660_v51 = vsel %vm770_vm9, %v1658_v47, %v1659_v15 }
 0x128   :  { %v1667_v1 = vrot.slane %v4369_v18, 2  ;;  %v1668_v52 = vrot.slane %v4373_v24, 2  ;;  %v1696_v40 = vadd.f32 %v1642_v39, %v4290_v30  ;;  %v1663_v38 = vsel %vm770_vm9, %v1661_v57, %v1662_v4 }
 0x129   :  { %v1670_v3 = vrot.slane %v4375_v61, 2  ;;  %v1671_v44 = vrot.slane %v4379_v43, 2  ;;  %v1697_v46 = vadd.f32 %v1645_v11, %v4293_v53  ;;  %v1698_v59 = vadd.f32 %v1648_v17, %v4296_v36 }
 0x12a   :  { %v4415_v6 = vadd.f32 %v2427_v55, %v1692_v45  ;;  %v4417_v7 = vadd.f32 %v2427_v55, %v1693_v29  ;;  %v4419_v19 = vadd.f32 %v2427_v55, %v1694_v63  ;;  %v1673_v18 = vrot.slane %v4381_v20, 2 }
 0x12b   :  { %v1674_v30 = vrot.slane %v4385_v2, 2  ;;  %v1699_v24 = vadd.f32 %v1651_v58, %v4299_v31  ;;  %v4424_v50 = vadd.f32 %v2427_v55, %v1695_v16  ;;  %v1666_v61 = vsel %vm770_vm9, %v1664_v28, %v1665_v60 }
 0x12c   :  { %v1669_v53 = vsel %vm770_vm9, %v1667_v1, %v1668_v52  ;;  %v1700_v36 = vadd.f32 %v1654_v42, %v4302_v56  ;;  %v4429_v43 = vadd.f32 %v2427_v55, %v1696_v40  ;;  %v1672_v48 = vsel %vm770_vm9, %v1670_v3, %v1671_v44 }
 0x12d   :  { %v1701_v33 = vadd.f32 %v1657_v13, %v4305_v9  ;;  %v1702_v20 = vadd.f32 %v1660_v51, %v4308_v41  ;;  %v4434_v35 = vadd.f32 %v2427_v55, %v1697_v46  ;;  %v4436_v2 = vadd.f32 %v2427_v55, %v1698_v59 }
 0x12e   :  { %v2428_v31 = vmul.f32 -1.442695, %v4415_v6  ;;  %v2429_v14 = vmul.f32 -1.442695, %v4417_v7  ;;  %v2430_v12 = vmul.f32 -1.442695, %v4419_v19  ;;  %v1675_v56 = vsel %vm770_vm9, %v1673_v18, %v1674_v30 }
 0x12f   :  { %v1703_v21 = vadd.f32 %v1663_v38, %v4311_v5  ;;  %v4443_v32 = vadd.f32 %v2427_v55, %v1699_v24  ;;  %v2431_v9 = vmul.f32 -1.442695, %v4424_v50  ;;  %v1704_v41 = vadd.f32 %v1666_v61, %v4314_v10  ;;  %v5184_v10 = vld [vmem:[#allocation12_spill] sm:$0xff] }
 0x130   :  { %v4447_v26 = vadd.f32 %v2427_v55, %v1700_v36  ;;  %2693 = vpow2.f32 %v2428_v31  ;;  %v2432_v0 = vmul.f32 -1.442695, %v4429_v43  ;;  %v1705_v22 = vadd.f32 %v1669_v53, %v5182_v27 }
 0x131   :  { %v4451_v37 = vadd.f32 %v2427_v55, %v1701_v33  ;;  %2695 = vpow2.f32 %v2429_v14  ;;  %v2433_v62 = vmul.f32 -1.442695, %v4434_v35  ;;  %v1706_v5 = vadd.f32 %v1672_v48, %v5183_v34 }
 0x132   :  { %v4455_v8 = vadd.f32 %v2427_v55, %v1702_v20  ;;  %2697 = vpow2.f32 %v2430_v12  ;;  %v2434_v25 = vmul.f32 -1.442695, %v4436_v2  ;;  %v1707_v23 = vadd.f32 %v1675_v56, %v5184_v10 }
 0x133   :  { %v4459_v54 = vadd.f32 %v2427_v55, %v1703_v21  ;;  %2699 = vpow2.f32 %v2431_v9  ;;  %v2435_v49 = vmul.f32 -1.442695, %v4443_v32  ;;  %v4462_v39 = vadd.f32 %v2427_v55, %v1704_v41 }
 0x134   :  { %2701 = vpow2.f32 %v2432_v0  ;;  %v2436_v11 = vmul.f32 -1.442695, %v4447_v26  ;;  %v4465_v47 = vadd.f32 %v2427_v55, %v1705_v22  ;;  %v2437_v15 = vmul.f32 -1.442695, %v4451_v37 }
 0x135   :  { %2703 = vpow2.f32 %v2433_v62  ;;  %v4468_v17 = vadd.f32 %v2427_v55, %v1706_v5  ;;  %v2438_v58 = vmul.f32 -1.442695, %v4455_v8  ;;  %v4471_v57 = vadd.f32 %v2427_v55, %v1707_v23 }
 0x136   :  { %2705 = vpow2.f32 %v2434_v25  ;;  %v2439_v4 = vmul.f32 -1.442695, %v4459_v54  ;;  %v2440_v42 = vmul.f32 -1.442695, %v4462_v39  ;;  %v2441_v45 = vmul.f32 -1.442695, %v4465_v47 }
 0x137   :  { %2707 = vpow2.f32 %v2435_v49  ;;  %v2442_v29 = vmul.f32 -1.442695, %v4468_v17  ;;  %v2443_v63 = vmul.f32 -1.442695, %v4471_v57 }
 0x138   :  { %2709 = vpow2.f32 %v2436_v11 }
 0x139   :  { %2711 = vpow2.f32 %v2437_v15 }
 0x13a   :  { %2713 = vpow2.f32 %v2438_v58 }
 0x13b   :  { %2715 = vpow2.f32 %v2439_v4 }
 0x13c   :  { %2717 = vpow2.f32 %v2440_v42 }
 0x13d   :  { %v2694_v13 = vpop.eup %2693  ;;  %2719 = vpow2.f32 %v2441_v45 }
 0x13e   :  { %v2696_v28 = vpop.eup %2695  ;;  %2721 = vpow2.f32 %v2442_v29  ;;  %v1779_v60 = vadd.f32 1.0, %v2694_v13 }
 0x13f   :  { %v2698_v16 = vpop.eup %2697  ;;  %2723 = vpow2.f32 %v2443_v63  ;;  %v1780_v55 = vadd.f32 1.0, %v2696_v28 }
 0x140   :  { %v2700_v51 = vpop.eup %2699  ;;  %v1781_v1 = vadd.f32 1.0, %v2698_v16  ;;  %2725 = vrcp.f32 %v1779_v60 }
 0x141   :  { %v2702_v52 = vpop.eup %2701  ;;  %v1782_v40 = vadd.f32 1.0, %v2700_v51  ;;  %2727 = vrcp.f32 %v1780_v55 }
 0x142   :  { %v2704_v38 = vpop.eup %2703  ;;  %v1783_v3 = vadd.f32 1.0, %v2702_v52  ;;  %2729 = vrcp.f32 %v1781_v1 }
 0x143   :  { %v2706_v44 = vpop.eup %2705  ;;  %v1784_v46 = vadd.f32 1.0, %v2704_v38  ;;  %2731 = vrcp.f32 %v1782_v40 }
 0x144   :  { %v2708_v59 = vpop.eup %2707  ;;  %v1785_v18 = vadd.f32 1.0, %v2706_v44  ;;  %2733 = vrcp.f32 %v1783_v3 }
 0x145   :  { %v2710_v30 = vpop.eup %2709  ;;  %v1786_v24 = vadd.f32 1.0, %v2708_v59  ;;  %2735 = vrcp.f32 %v1784_v46 }
 0x146   :  { %v2712_v61 = vpop.eup %2711  ;;  %v1787_v53 = vadd.f32 1.0, %v2710_v30  ;;  %2737 = vrcp.f32 %v1785_v18 }
 0x147   :  { %v2714_v36 = vpop.eup %2713  ;;  %v1788_v48 = vadd.f32 1.0, %v2712_v61  ;;  %2739 = vrcp.f32 %v1786_v24 }
 0x148   :  { %v2716_v33 = vpop.eup %2715  ;;  %v1789_v20 = vadd.f32 1.0, %v2714_v36  ;;  %2741 = vrcp.f32 %v1787_v53 }
 0x149   :  { %v2718_v31 = vpop.eup %2717  ;;  %v1790_v14 = vadd.f32 1.0, %v2716_v33  ;;  %2743 = vrcp.f32 %v1788_v48 }
 0x14a   :  { %v2720_v12 = vpop.eup %2719  ;;  %v1791_v56 = vadd.f32 1.0, %v2718_v31  ;;  %2745 = vrcp.f32 %v1789_v20 }
 0x14b   :  { %v2722_v21 = vpop.eup %2721  ;;  %v1792_v9 = vadd.f32 1.0, %v2720_v12  ;;  %2747 = vrcp.f32 %v1790_v14 }
 0x14c   :  { %v2724_v41 = vpop.eup %2723  ;;  %v1793_v0 = vadd.f32 1.0, %v2722_v21  ;;  %2749 = vrcp.f32 %v1791_v56 }
 0x14d   :  { %v2726_v27 = vpop.eup %2725  ;;  %v1794_v22 = vadd.f32 1.0, %v2724_v41  ;;  %2751 = vrcp.f32 %v1792_v9 }
 0x14e   :  { %v2728_v62 = vpop.eup %2727  ;;  %v4479_v34 = vmul.f32 %v2726_v27, %v4415_v6  ;;  %2753 = vrcp.f32 %v1793_v0 }
 0x14f   :  { %v2730_v5 = vpop.eup %2729  ;;  %v4482_v25 = vmul.f32 %v2728_v62, %v4417_v7  ;;  %2755 = vrcp.f32 %v1794_v22 }
 0x150   :  { %v2732_v10 = vpop.eup %2731  ;;  %v4485_v23 = vmul.f32 %v2730_v5, %v4419_v19  ;;  %v5185_v5 = vmov 0.0  }
 0x151   :  { %v2734_v49 = vpop.eup %2733  ;;  %v4488_v11 = vmul.f32 %v2732_v10, %v4424_v50  ;;  %v1894_v15 = vadd.f32 %v4482_v25, %v4479_v34  ;;  %v2677_v10 = vld [vmem:[%s4697_s5 + $0x38] sm:$0xff]  }
 0x152   :  { %v2736_v58 = vpop.eup %2735  ;;  %v4493_v4 = vmul.f32 %v2734_v49, %v4429_v43  ;;  %v2678_v49 = vld [vmem:[%s4697_s5 + $0x30] sm:$0xff]  }
 0x153   :  { %v2738_v6 = vpop.eup %2737  ;;  %v1895_v7 = vadd.f32 %v1894_v15, %v4485_v23  ;;  %v4497_v19 = vmul.f32 %v2736_v58, %v4434_v35  ;;  %v2679_v15 = vld [vmem:[%s4697_s5 + $0x28] sm:$0xff]   ;;  %v2680_v58 = vld [vmem:[%s4697_s5 + $0x20] sm:$0xff]  }
 0x154   :  { %v2740_v42 = vpop.eup %2739  ;;  %v4504_v28 = vmul.f32 %v2738_v6, %v4436_v2  ;;  %v2681_v6 = vld [vmem:[%s4697_s5 + $0x18] sm:$0xff]  }
 0x155   :  { %v2742_v45 = vpop.eup %2741  ;;  %v1896_v29 = vadd.f32 %v1895_v7, %v4488_v11  ;;  %v4514_v51 = vmul.f32 %v2740_v42, %v4443_v32  ;;  %v2682_v7 = vld [vmem:[%s4697_s5 + $0x10] sm:$0xff]   ;;  %v2683_v42 = vld [vmem:[%s4697_s5 + $0x8] sm:$0xff]  }
 0x156   :  { %v2744_v63 = vpop.eup %2743  ;;  %v4501_v50 = vmul.f32 %v2742_v45, %v4447_v26  ;;  %v2684_v45 = vld [vmem:[%s4697_s5] sm:$0xff]  }
 0x157   :  { %v2746_v13 = vpop.eup %2745  ;;  %v4507_v43 = vmul.f32 %v2744_v63, %v4451_v37  ;;  %v1897_v60 = vadd.f32 %v1896_v29, %v4493_v4  ;;  %v2444_v29 = vld [vmem:[%s4698_s4] ss:$0 sm:$0xff] }
 0x158   :  { %v2748_v16 = vpop.eup %2747  ;;  %v4511_v55 = vmul.f32 %v2746_v13, %v4455_v8 }
 0x159   :  { %v2750_v35 = vpop.eup %2749  ;;  %v4517_v26 = vmul.f32 %v2748_v16, %v4459_v54  ;;  %v1898_v1 = vadd.f32 %v1897_v60, %v4497_v19  ;;  %v1907_v2 = vadd.f32 %v4507_v43, %v4501_v50 }
 0x15a   :  { %v2752_v37 = vpop.eup %2751  ;;  %v4523_v52 = vmul.f32 %v2750_v35, %v4462_v39 }
 0x15b   :  { %v1899_v40 = vadd.f32 %v1898_v1, %v4504_v28  ;;  %v1908_v8 = vadd.f32 %v1907_v2, %v4511_v55  ;;  %v2754_v38 = vpop.eup %2753  ;;  %v4528_v32 = vmul.f32 %v2752_v37, %v4465_v47 }
 0x15c   :  { %v2756_v44 = vpop.eup %2755  ;;  %v4533_v46 = vmul.f32 %v2754_v38, %v4468_v17 }
 0x15d   :  { %v1900_v54 = vadd.f32 %v1899_v40, %v4514_v51  ;;  %v1909_v3 = vadd.f32 %v1908_v8, %v4517_v26  ;;  %v4537_v18 = vmul.f32 %v2756_v44, %v4471_v57  ;;  %v2687_v44 = vld [vmem:[%s4699_s7 + $0x28] sm:$0xff]  }
 0x15f   :  { %v1901_v59 = vrot.slane %v1900_v54, 4  ;;  %v1910_v39 = vadd.f32 %v1909_v3, %v4523_v52  ;;  %v2686_v3 = vld [vmem:[%s4699_s7 + $0x30] sm:$0xff]  }
 0x161   :  { %v1902_v30 = vadd.f32 %v1901_v59, %v1900_v54  ;;  %v1911_v24 = vadd.f32 %v1910_v39, %v4528_v32  ;;  %v2685_v54 = vld [vmem:[%s4699_s7 + $0x38] sm:$0xff]   ;;  %v2688_v59 = vld [vmem:[%s4699_s7 + $0x20] sm:$0xff]  }
 0x162   :  { %2633 = vmatprep.subr.bf16.mxu0 %v2685_v54  ;;  %v2689_v39 = vld [vmem:[%s4699_s7 + $0x18] sm:$0xff]  }
 0x163   :  { %v1903_v61 = vrot.slane %v1902_v30, 2  ;;  %v1912_v47 = vadd.f32 %v1911_v24, %v4533_v46  ;;  %2634 = vmatpush3.bf16.msra.mxu0 %v2685_v54  ;;  %v2691_v24 = vld [vmem:[%s4699_s7 + $0x8] sm:$0xff]  }
 0x164   :  { %2635 = vmatprep.subr.bf16.mxu0 %v2686_v3 }
 0x165   :  { %v1904_v53 = vadd.f32 %v1903_v61, %v1902_v30  ;;  %v1913_v36 = vadd.f32 %v1912_v47, %v4537_v18  ;;  %v2690_v30 = vld [vmem:[%s4699_s7 + $0x10] sm:$0xff]   ;;  %v2692_v61 = vld [vmem:[%s4699_s7] sm:$0xff]  }
 0x166   :  { %v2454_v47 = vld [vmem:[%s4700_s6] ss:$0 sm:$0xff] }
 0x167   :  { %v1905_v48 = vrot.slane %v1904_v53, 1  ;;  %v1914_v33 = vrot.slane %v1913_v36, 4  ;;  %2636 = vmatpush3.bf16.msra.mxu0 %v2686_v3 }
 0x168   :  { %2637 = vmatprep.subr.bf16.mxu0 %v2687_v44 }
 0x169   :  { %v1906_v20 = vadd.f32 %v1905_v48, %v1904_v53  ;;  %v1915_v17 = vadd.f32 %v1914_v33, %v1913_v36 }
 0x16b   :  { %v1916_v31 = vrot.slane %v1915_v17, 2  ;;  %v1921_v12 = vmul.f32 0.015625, %v1906_v20  ;;  %2638 = vmatpush3.bf16.msra.mxu0 %v2687_v44 }
 0x16c   :  { %2639 = vmatprep.subr.bf16.mxu0 %v2688_v59 }
 0x16d   :  { %v1917_v14 = vadd.f32 %v1916_v31, %v1915_v17  ;;  %v1923_v57 = vpack.c.bf16 %v1921_v12, %v1921_v12  ;;  %v2768_v12 = vmov 1966171168  }
 0x16f   :  { %v1918_v56 = vrot.slane %v1917_v14, 1  ;;  %v1933_v0 = vunpack.c.l.b16 %v1923_v57  ;;  %2640 = vmatpush3.bf16.msra.mxu0 %v2688_v59  ;;  %v5186_v57 = vld [vmem:[#allocation3_spill] sm:$0xff] }
 0x170   :  { %2641 = vmatprep.subr.bf16.mxu0 %v2689_v39 }
 0x171   :  { %v1919_v21 = vadd.f32 %v1918_v56, %v1917_v14  ;;  %v2137_v56 = vunpack.c.l.s4 %v2768_v12 }
 0x173   :  { %v1922_v9 = vmul.f32 0.015625, %v1919_v21  ;;  %2642 = vmatpush3.bf16.msra.mxu0 %v2689_v39  ;;  %v2138_v21 = vunpack.c.0.s8 %v2137_v56 }
 0x174   :  { %2643 = vmatprep.subr.bf16.mxu0 %v2690_v30 }
 0x175   :  { %v1924_v41 = vpack.c.bf16 %v1922_v9, %v1922_v9  ;;  %v2141_v9 = vsub.s32 %v2138_v21, %v5186_v57 }
 0x177   :  { %v1934_v27 = vunpack.c.l.b16 %v1924_v41  ;;  %2644 = vmatpush3.bf16.msra.mxu0 %v2690_v30 }
 0x178   :  { %2645 = vmatprep.subr.bf16.mxu0 %v2691_v24 }
 0x179   :  { %v1936_v22 = vsel %vm1935_vm10, %v1934_v27, %v1933_v0 }
 0x17a   :  { %v1937_v62 = vpack.c.b16 %v1936_v22, %v1936_v22 }
 0x17b   :  { %2646 = vmatpush3.bf16.msra.mxu0 %v2691_v24 }
 0x17c   :  { %2610 = vmatmul.mubr.bf16.vlgmr.msra.gmra.mxu1 %v1937_v62  ;;  %2647 = vmatprep.subr.bf16.mxu0 %v2692_v61  ;;  %v5187_v62 = vld [vmem:[#allocation4_spill] sm:$0xff] }
 0x17d   :  { %2629 = vmatprep.mubr.msk.bf16.mxu1 %vm2766_vm0, %v5185_v5  ;;  %2614 = vmatpush3.bf16.msra.mxu1 %v2677_v10 }
 0x17e   :  { %2615 = vmatprep.subr.bf16.mxu1 %v5185_v5 }
 0x17f   :  { %2648 = vmatpush3.bf16.msra.mxu0 %v2692_v61 }
 0x181   :  { %2616 = vmatpush3.bf16.msra.mxu1 %v2678_v49 }
 0x182   :  { %2617 = vmatprep.subr.bf16.mxu1 %v5185_v5 }
 0x185   :  { %2618 = vmatpush3.bf16.msra.mxu1 %v2679_v15 }
 0x186   :  { %2619 = vmatprep.subr.bf16.mxu1 %v5185_v5 }
 0x189   :  { %2620 = vmatpush3.bf16.msra.mxu1 %v2680_v58 }
 0x18a   :  { %2621 = vmatprep.subr.bf16.mxu1 %v5185_v5 }
 0x18d   :  { %2622 = vmatpush3.bf16.msra.mxu1 %v2681_v6 }
 0x18e   :  { %2623 = vmatprep.subr.bf16.mxu1 %v5185_v5 }
 0x191   :  { %2624 = vmatpush3.bf16.msra.mxu1 %v2682_v7 }
 0x192   :  { %2625 = vmatprep.subr.bf16.mxu1 %v5185_v5 }
 0x195   :  { %2626 = vmatpush3.bf16.msra.mxu1 %v2683_v42 }
 0x196   :  { %2627 = vmatprep.subr.bf16.mxu1 %v5185_v5 }
 0x199   :  { %2628 = vmatpush3.bf16.msra.mxu1 %v2684_v45 }
 0x23c   :  { %v2021_v63 = vpop.f32.mrf.mxu1 }
 0x23d   :  { %v2022_v13 = vadd.f32 %v2444_v29, %v2021_v63 }
 0x23e   :  { %v2611_v60 = vpop.f32.mrf.mxu1 }
 0x23f   :  { %v2453_v16 = vmul.f32 -1.442695, %v2022_v13 }
 0x240   :  { %v2024_v35 = vpop.f32.mrf.mxu1 }
 0x241   :  { %2757 = vpow2.f32 %v2453_v16 }
 0x242   :  { %v2612_v1 = vpop.f32.mrf.mxu1 }
 0x24e   :  { %v2758_v2 = vpop.eup %2757 }
 0x24f   :  { %v2030_v37 = vadd.f32 1.0, %v2758_v2 }
 0x251   :  { %2759 = vrcp.f32 %v2030_v37 }
 0x25e   :  { %v2760_v40 = vpop.eup %2759 }
 0x25f   :  { %v2033_v8 = vmul.f32 %v2760_v40, %v2022_v13 }
 0x261   :  { %v2034_v38 = vpack.c.bf16 %v2033_v8, %v2033_v8 }
 0x263   :  { %2630 = vmatmul.mubr.bf16.vlgmr.msra.gmra.mxu1 %v2034_v38 }
 0x323   :  { %v2123_v53 = vpop.f32.mrf.mxu1 }
 0x324   :  { %v2124_v36 = vadd.f32 %v2454_v47, %v2123_v53  ;;  %v2547_v47 = vld [vmem:[%s4694_s0 + $0x18] sm:$0xff]  }
 0x325   :  { %v2631_v48 = vpop.f32.mrf.mxu1  ;;  %v2488_v12 = vunpack.c.h.bf16 %v2547_v47 }
 0x326   :  { %v2463_v33 = vmul.f32 -1.442695, %v2124_v36 }
 0x327   :  { %v2126_v20 = vpop.f32.mrf.mxu1 }
 0x328   :  { %2761 = vpow2.f32 %v2463_v33  ;;  %v2546_v20 = vld [vmem:[%s4694_s0 + $0x10] sm:$0xff]  }
 0x329   :  { %v2632_v17 = vpop.f32.mrf.mxu1  ;;  %v2483_v57 = vunpack.c.l.bf16 %v2546_v20 }
 0x335   :  { %v2762_v31 = vpop.eup %2761 }
 0x336   :  { %v2132_v14 = vadd.f32 1.0, %v2762_v31 }
 0x338   :  { %2763 = vrcp.f32 %v2132_v14  ;;  %v2487_v14 = vunpack.c.l.bf16 %v2547_v47 }
 0x345   :  { %v2764_v41 = vpop.eup %2763 }
 0x346   :  { %v2142_v0 = vrot.slane %v2764_v41, %v2141_v9  ;;  %v2484_v41 = vunpack.c.h.bf16 %v2546_v20 }
 0x348   :  { %v2143_v27 = vcombine.high %v2142_v0, %v2142_v0  ;;  %v2150_v22 = vrot.slane %v2142_v0, %v2141_v9 }
 0x34a   :  { %v2161_v5 = vrot.slane %v2150_v22, %v5187_v62  ;;  %v2157_v10 = vrot.slane %v2143_v27, %v2141_v9 }
 0x34c   :  { %v2168_v49 = vmul.f32 %v2161_v5, %v4479_v34  ;;  %v2169_v15 = vmul.f32 %v2161_v5, %v4482_v25  ;;  %v2170_v58 = vmul.f32 %v2161_v5, %v4485_v23  ;;  %v2171_v6 = vmul.f32 %v2161_v5, %v4488_v11 }
 0x34d   :  { %v2172_v7 = vmul.f32 %v2161_v5, %v4493_v4  ;;  %v2173_v42 = vmul.f32 %v2161_v5, %v4497_v19  ;;  %v2165_v63 = vrot.slane %v2157_v10, %v5187_v62  ;;  %v2174_v34 = vmul.f32 %v2161_v5, %v4504_v28  ;;  %v2549_v10 = vld [vmem:[%s4694_s0 + $0x28] sm:$0xff]  }
 0x34e   :  { %v2184_v45 = vpack.c.bf16 %v2169_v15, %v2168_v49  ;;  %v2185_v29 = vpack.c.bf16 %v2171_v6, %v2170_v58  ;;  %v2175_v25 = vmul.f32 %v2161_v5, %v4514_v51 }
 0x34f   :  { %v2186_v13 = vpack.c.bf16 %v2173_v42, %v2172_v7  ;;  %v2176_v23 = vmul.f32 %v2165_v63, %v4501_v50  ;;  %v2177_v11 = vmul.f32 %v2165_v63, %v4507_v43  ;;  %v2178_v19 = vmul.f32 %v2165_v63, %v4511_v55  ;;  %v4627_v55 = vld [vmem:[%s4701_s8] ss:$0 sm:$0xff] }
 0x350   :  { %2649 = vmatprep.mubr.bf16.mxu0 %v2184_v45  ;;  %v2187_v60 = vpack.c.bf16 %v2175_v25, %v2174_v34  ;;  %v2179_v16 = vmul.f32 %v2165_v63, %v4517_v26  ;;  %v2180_v35 = vmul.f32 %v2165_v63, %v4523_v52  ;;  %v2181_v1 = vmul.f32 %v2165_v63, %v4528_v32  ;;  %v2545_v26 = vld [vmem:[%s4694_s0 + $0x8] sm:$0xff]   ;;  %v2474_v32 = vld [vmem:[%s4694_s0] sm:$0xff]  }
 0x351   :  { %2650 = vmatmul.mubr.bf16.vlgmr.msra.gmra.mxu0 %v2185_v29  ;;  %v2188_v4 = vpack.c.bf16 %v2177_v11, %v2176_v23  ;;  %v2182_v50 = vmul.f32 %v2165_v63, %v4533_v46  ;;  %v2183_v43 = vmul.f32 %v2165_v63, %v4537_v18  ;;  %v2479_v18 = vunpack.c.l.bf16 %v2545_v26  ;;  %v2548_v7 = vld [vmem:[%s4694_s0 + $0x20] sm:$0xff]  }
 0x352   :  { %2653 = vmatprep.mubr.bf16.mxu0 %v2186_v13  ;;  %v2189_v2 = vpack.c.bf16 %v2179_v16, %v2178_v19  ;;  %v2190_v28 = vpack.c.bf16 %v2181_v1, %v2180_v35  ;;  %v2480_v40 = vunpack.c.h.bf16 %v2545_v26  ;;  %v2475_v54 = vunpack.c.l.bf16 %v2474_v32  ;;  %v2551_v1 = vld [vmem:[%s4694_s0 + $0x38] sm:$0xff]  }
 0x353   :  { %v2191_v51 = vpack.c.bf16 %v2183_v43, %v2182_v50  ;;  %v2476_v44 = vunpack.c.h.bf16 %v2474_v32  ;;  %v2495_v29 = vunpack.c.l.bf16 %v2549_v10  ;;  %v2496_v63 = vunpack.c.h.bf16 %v2549_v10 }
 0x354   :  { %v2491_v25 = vunpack.c.l.bf16 %v2548_v7  ;;  %v2492_v11 = vunpack.c.h.bf16 %v2548_v7  ;;  %v2504_v32 = vunpack.c.h.bf16 %v2551_v1 }
 0x359   :  { %2654 = vmatmul.mubr.bf16.gmra.mxu0 %v2187_v60 }
 0x35a   :  { %2657 = vmatprep.mubr.bf16.mxu0 %v2188_v4 }
 0x361   :  { %2658 = vmatmul.mubr.bf16.gmra.mxu0 %v2189_v2 }
 0x362   :  { %2661 = vmatprep.mubr.bf16.mxu0 %v2190_v28 }
 0x369   :  { %2662 = vmatmul.mubr.bf16.gmra.mxu0 %v2191_v51  ;;  %v2550_v51 = vld [vmem:[%s4694_s0 + $0x30] sm:$0xff]  }
 0x411   :  { %v2651_v37 = vpop.f32.mrf.mxu0 }
 0x412   :  { %v2289_v46 = vadd.f32 %v2651_v37, %v4627_v55 }
 0x413   :  { %v2280_v52 = vpop.f32.mrf.mxu0 }
 0x414   :  { %v2281_v38 = vadd.f32 %v4627_v55, %v2280_v52  ;;  %v2377_v39 = vadd.f32 %v2479_v18, %v2289_v46  ;;  %v2503_v52 = vunpack.c.l.bf16 %v2551_v1 }
 0x415   :  { %v2652_v8 = vpop.f32.mrf.mxu0 }
 0x416   :  { %v2292_v3 = vadd.f32 %v2652_v8, %v4627_v55  ;;  %v2375_v53 = vadd.f32 %v2475_v54, %v2281_v38  ;;  %v2500_v38 = vunpack.c.h.bf16 %v2550_v51 }
 0x417   :  { %v2283_v59 = vpop.f32.mrf.mxu0 }
 0x418   :  { %v2378_v30 = vadd.f32 %v2480_v40, %v2292_v3  ;;  %v2284_v24 = vadd.f32 %v4627_v55, %v2283_v59  ;;  %v2499_v40 = vunpack.c.l.bf16 %v2550_v51 }
 0x419   :  { %v2655_v61 = vpop.f32.mrf.mxu0 }
 0x41a   :  { %v2513_v36 = vpack.c.bf16 %v2378_v30, %v2377_v39  ;;  %v2376_v48 = vadd.f32 %v2476_v44, %v2284_v24  ;;  %v2305_v31 = vadd.f32 %v2655_v61, %v4627_v55 }
 0x41b   :  { %v2296_v33 = vpop.f32.mrf.mxu0 }
 0x41c   :  { %2552 = vst [vmem:[%s4702_s9 + $0x8] sm:$0xff] %v2513_v36   ;;  %v2508_v17 = vpack.c.bf16 %v2376_v48, %v2375_v53  ;;  %v2297_v21 = vadd.f32 %v4627_v55, %v2296_v33  ;;  %v2381_v27 = vadd.f32 %v2487_v14, %v2305_v31 }
 0x41d   :  { %v2656_v56 = vpop.f32.mrf.mxu0 }
 0x41e   :  { %2509 = vst [vmem:[%s4702_s9] sm:$0xff] %v2508_v17   ;;  %v2308_v9 = vadd.f32 %v2656_v56, %v4627_v55  ;;  %v2379_v49 = vadd.f32 %v2483_v57, %v2297_v21 }
 0x41f   :  { %v2299_v0 = vpop.f32.mrf.mxu0 }
 0x420   :  { %v2382_v22 = vadd.f32 %v2488_v12, %v2308_v9  ;;  %v2300_v62 = vadd.f32 %v4627_v55, %v2299_v0 }
 0x421   :  { %v2659_v5 = vpop.f32.mrf.mxu0 }
 0x422   :  { %v2523_v15 = vpack.c.bf16 %v2382_v22, %v2381_v27  ;;  %v2380_v58 = vadd.f32 %v2484_v41, %v2300_v62  ;;  %v2321_v45 = vadd.f32 %v2659_v5, %v4627_v55 }
 0x423   :  { %v2312_v6 = vpop.f32.mrf.mxu0 }
 0x424   :  { %2554 = vst [vmem:[%s4702_s9 + $0x18] sm:$0xff] %v2523_v15   ;;  %v2518_v42 = vpack.c.bf16 %v2380_v58, %v2379_v49  ;;  %v2313_v34 = vadd.f32 %v4627_v55, %v2312_v6  ;;  %v2385_v4 = vadd.f32 %v2495_v29, %v2321_v45 }
 0x425   :  { %v2660_v13 = vpop.f32.mrf.mxu0 }
 0x426   :  { %2553 = vst [vmem:[%s4702_s9 + $0x10] sm:$0xff] %v2518_v42   ;;  %v2324_v23 = vadd.f32 %v2660_v13, %v4627_v55  ;;  %v2383_v2 = vadd.f32 %v2491_v25, %v2313_v34 }
 0x427   :  { %v2315_v60 = vpop.f32.mrf.mxu0 }
 0x428   :  { %v2386_v19 = vadd.f32 %v2496_v63, %v2324_v23  ;;  %v2316_v16 = vadd.f32 %v4627_v55, %v2315_v60 }
 0x429   :  { %v2663_v35 = vpop.f32.mrf.mxu0 }
 0x42a   :  { %v2533_v28 = vpack.c.bf16 %v2386_v19, %v2385_v4  ;;  %v2384_v50 = vadd.f32 %v2492_v11, %v2316_v16  ;;  %v2337_v26 = vadd.f32 %v2663_v35, %v4627_v55 }
 0x42b   :  { %v2328_v43 = vpop.f32.mrf.mxu0 }
 0x42c   :  { %2556 = vst [vmem:[%s4702_s9 + $0x28] sm:$0xff] %v2533_v28   ;;  %v2528_v37 = vpack.c.bf16 %v2384_v50, %v2383_v2  ;;  %v2329_v18 = vadd.f32 %v4627_v55, %v2328_v43  ;;  %v2389_v3 = vadd.f32 %v2503_v52, %v2337_v26 }
 0x42d   :  { %v2664_v46 = vpop.f32.mrf.mxu0 }
 0x42e   :  { %2555 = vst [vmem:[%s4702_s9 + $0x20] sm:$0xff] %v2528_v37   ;;  %v2340_v8 = vadd.f32 %v2664_v46, %v4627_v55  ;;  %v2387_v39 = vadd.f32 %v2499_v40, %v2329_v18 }
 0x42f   :  { %v2331_v54 = vpop.f32.mrf.mxu0 }
 0x430   :  { %v2390_v44 = vadd.f32 %v2504_v32, %v2340_v8  ;;  %v2332_v59 = vadd.f32 %v4627_v55, %v2331_v54 }
 0x432   :  { %v2543_v30 = vpack.c.bf16 %v2390_v44, %v2389_v3  ;;  %v2388_v24 = vadd.f32 %v2500_v38, %v2332_v59 }
 0x434   :  { %2558 = vst [vmem:[%s4702_s9 + $0x38] sm:$0xff] %v2543_v30   ;;  %v2538_v61 = vpack.c.bf16 %v2388_v24, %v2387_v39 }
 0x436   :  { %2557 = vst [vmem:[%s4702_s9 + $0x30] sm:$0xff] %v2538_v61  }

</bundles_post_ra>
